<compile_context>
chip_gen: v7x
topology: tpu7x:2x2x1
jax: 0.10.0
libtpu: 0.0.40
codegen_flags: <defaults>
</compile_context>

<pallas_src>
import functools

import jax
import jax.numpy as jnp
from jax import lax
from jax.experimental import pallas as pl
from jax.experimental.pallas import tpu as pltpu


# ----------------------------------------------------------------------------
# Kernel 1: fused conv stack (4x Conv1d+bias+ReLU) + LSTM-layer-0 input
# projection, all VMEM-resident.  Activations use the time-major-flattened
# layout: row index = t*Bp + b.  The raw input is zero-padded in time by P
# rows*Bp on each side before the call; intermediate layers re-pad via zeroed
# VMEM scratch rows.  Output: pre-projected layer-0 gates (+ bias) for both
# directions, shape (2, T*Bp, 4H) f32.
# TODO(synk): for long sequences this kernel should be blocked over time with
#             a P-row halo instead of keeping the whole padded slab in VMEM
#             (size against v7x's 64 MiB VMEM, not v5e/v6e's 128 MiB).
# ----------------------------------------------------------------------------
def _make_conv_stack_kernel(T, Bp, K, n_layers):
    P = (K - 1) // 2

    def kernel(x_ref, *refs):
        ws = refs[0:2 * n_layers:2]           # (K, Cin, Cout) bf16 each
        bs = refs[1:2 * n_layers:2]           # (1, Cout) f32 each
        wp_ref = refs[2 * n_layers]           # (C_last, 8H) bf16
        bp_ref = refs[2 * n_layers + 1]       # (1, 8H) f32
        o_ref = refs[2 * n_layers + 2]        # (2, T*Bp, 4H) f32
        scrs = refs[2 * n_layers + 3:]        # padded bf16 activation slabs

        def conv_relu(src_ref, w_ref, b_ref):
            cout = w_ref.shape[-1]
            acc = jnp.zeros((T * Bp, cout), jnp.float32)
            for k in range(K):                # K taps -> K bf16 MXU matmuls
                acc = acc + jnp.dot(src_ref[k * Bp:(k + T) * Bp, :], w_ref[k],
                                    preferred_element_type=jnp.float32)
            return jnp.maximum(acc + b_ref[...], 0.0)

        src = x_ref
        y = None
        for li in range(n_layers):
            y = conv_relu(src, ws[li], bs[li])
            if li < n_layers - 1:
                scr = scrs[li]
                scr[...] = jnp.zeros_like(scr)                    # zero pads
                scr[P * Bp:(P + T) * Bp, :] = y.astype(scr.dtype)
                src = scr

        # Fused LSTM layer-0 input projection for both directions (+ bias).
        g = jnp.dot(y.astype(jnp.bfloat16), wp_ref[...],
                    preferred_element_type=jnp.float32) + bp_ref[...]
        g4 = g.shape[-1] // 2
        o_ref[0] = g[:, :g4]                  # forward-direction gates
        o_ref[1] = g[:, g4:]                  # backward-direction gates

    return kernel


def conv_stack_proj(x_flat, conv_params, wproj, bias_proj, *, T, Bp):
    """x_flat: ((T+2P)*Bp, F) bf16 (zero-padded in time); returns (2, T*Bp, 4H) f32."""
    K = conv_params[0]["w"].shape[0]
    assert all(cp["w"].shape[0] == K for cp in conv_params)
    P = (K - 1) // 2
    n = len(conv_params)
    g8 = wproj.shape[-1]

    operands = [x_flat]
    for cp in conv_params:
        operands += [cp["w"], cp["b"]]
    operands += [wproj, bias_proj]

    scratch = [pltpu.VMEM(((T + 2 * P) * Bp, cp["w"].shape[-1]), jnp.bfloat16)
               for cp in conv_params[:-1]]

    return pl.pallas_call(
        _make_conv_stack_kernel(T, Bp, K, n),
        out_shape=jax.ShapeDtypeStruct((2, T * Bp, g8 // 2), jnp.float32),
        in_specs=[pl.BlockSpec(memory_space=pltpu.MemorySpace.VMEM)] * len(operands),
        out_specs=pl.BlockSpec(memory_space=pltpu.MemorySpace.VMEM),
        scratch_shapes=scratch,
    )(*operands)


# ----------------------------------------------------------------------------
# Kernel 2: LSTM layer-1 input projection (both directions + bias) from the
# bf16 forward/backward halves of the previous layer, blocked over time chunks.
# ----------------------------------------------------------------------------
def _proj_kernel(xf_ref, xb_ref, wp_ref, b_ref, o_ref):
    g = (jnp.dot(xf_ref[...], wp_ref[0], preferred_element_type=jnp.float32)
         + jnp.dot(xb_ref[...], wp_ref[1], preferred_element_type=jnp.float32)
         + b_ref[...])
    g4 = g.shape[-1] // 2
    o_ref[0] = g[:, :g4]
    o_ref[1] = g[:, g4:]


def lstm_input_proj(out_f, out_b, wproj, bias, *, Tc):
    TBp, H = out_f.shape
    g8 = wproj.shape[-1]
    rows = Tc * (TBp // TBp)  # placeholder; real chunk rows computed below
    del rows
    T = TBp // out_f.shape[0] if False else None  # (unused)
    del T
    nc = TBp // (Tc * (TBp // TBp))  # not used; clarity below
    del nc
    # chunk over flattened time-major rows: one chunk = Tc*Bp rows
    # (Bp inferred from caller via Tc*Bp chunk size)
    raise NotImplementedError  # replaced by lstm_input_proj_impl


def lstm_input_proj_impl(out_f, out_b, wproj, bias, *, Tc, Bp):
    TBp, H = out_f.shape
    g8 = wproj.shape[-1]
    chunk = Tc * Bp
    nc = TBp // chunk
    return pl.pallas_call(
        _proj_kernel,
        out_shape=jax.ShapeDtypeStruct((2, TBp, g8 // 2), jnp.float32),
        grid_spec=pltpu.PrefetchScalarGridSpec(
            num_scalar_prefetch=0, grid=(nc,),
            in_specs=[
                pl.BlockSpec((chunk, H), lambda c: (c, 0)),
                pl.BlockSpec((chunk, H), lambda c: (c, 0)),
                pl.BlockSpec((2, H, g8), lambda c: (0, 0, 0)),
                pl.BlockSpec((1, g8), lambda c: (0, 0)),
            ],
            out_specs=pl.BlockSpec((2, chunk, g8 // 2), lambda c: (0, c, 0)),
        ),
        compiler_params=pltpu.CompilerParams(dimension_semantics=("parallel",)),
    )(out_f, out_b, wproj, bias)


# ----------------------------------------------------------------------------
# Kernel 3: bidirectional LSTM recurrence on pre-projected gates.
#   grid = (time chunk,), "arbitrary" (true recurrence).  Both directions are
#   fused in one grid step: forward consumes chunk c, backward consumes chunk
#   nc-1-c (via index_maps); their independent per-step h@W_hh matmuls are
#   interleaved so the two MXU dependency chains hide each other's latency.
#   Per-step row indices are static (Python-unrolled loop).
#   fold_head=False -> outputs per-direction h sequences (bf16).
#   fold_head=True  -> the Linear(2H->1) head is folded into the epilogue and
#                      only (T, Bp) per-direction partial logits are emitted.
# ----------------------------------------------------------------------------
def _make_bilstm_kernel(Tc, Bp, H, fold_head):
    def kernel(*refs):
        if fold_head:
            (gxf_ref, gxb_ref, whh_ref, whd_ref, of_ref, ob_ref,
             hf_s, cf_s, hb_s, cb_s, hcf_s, hcb_s) = refs
        else:
            (gxf_ref, gxb_ref, whh_ref, of_ref, ob_ref,
             hf_s, cf_s, hb_s, cb_s) = refs

        @pl.when(pl.program_id(0) == 0)       # zero initial hidden/cell state
        def _():
            hf_s[...] = jnp.zeros_like(hf_s)
            cf_s[...] = jnp.zeros_like(cf_s)
            hb_s[...] = jnp.zeros_like(hb_s)
            cb_s[...] = jnp.zeros_like(cb_s)

        whh_f = whh_ref[0]                    # (H, 4H) bf16
        whh_b = whh_ref[1]
        gxf = gxf_ref.at[0]                   # (Tc*Bp, 4H) pre-projected gates
        gxb = gxb_ref.at[0]

        hf, cf = hf_s[...], cf_s[...]
        hb, cb = hb_s[...], cb_s[...]

        def gate_math(gates, c_prev):         # gate order [i, f, o, g]
            sig = jax.nn.sigmoid(gates[:, :3 * H])
            g_t = jnp.tanh(gates[:, 3 * H:])
            c_new = sig[:, H:2 * H] * c_prev + sig[:, :H] * g_t
            h_new = sig[:, 2 * H:] * jnp.tanh(c_new)
            return h_new, c_new

        for s in range(Tc):                   # static indices, fully unrolled
            rf = s
            rb = Tc - 1 - s
            gf = jnp.dot(hf.astype(jnp.bfloat16), whh_f,
                         preferred_element_type=jnp.float32) \
                + gxf[rf * Bp:(rf + 1) * Bp, :]
            gb = jnp.dot(hb.astype(jnp.bfloat16), whh_b,
                         preferred_element_type=jnp.float32) \
                + gxb[rb * Bp:(rb + 1) * Bp, :]
            hf, cf = gate_math(gf, cf)
            hb, cb = gate_math(gb, cb)
            if fold_head:
                hcf_s[rf] = hf
                hcb_s[rb] = hb
            else:
                of_ref[rf * Bp:(rf + 1) * Bp, :] = hf.astype(of_ref.dtype)
                ob_ref[rb * Bp:(rb + 1) * Bp, :] = hb.astype(ob_ref.dtype)

        hf_s[...] = hf
        cf_s[...] = cf
        hb_s[...] = hb
        cb_s[...] = cb

        if fold_head:
            # Linear(2H->1) folded: per-direction partial logits for the chunk.
            of_ref[...] = jnp.sum(hcf_s[...] * whd_ref[0], axis=-1)
            ob_ref[...] = jnp.sum(hcb_s[...] * whd_ref[1], axis=-1)

    return kernel


def bilstm_layer(gx, whh, *, Tc, Bp, w_head=None):
    """gx: (2, T*Bp, 4H) f32 pre-projected gates (incl. bias); whh: (2, H, 4H) bf16.

    Without w_head: returns (out_f, out_b), each (T*Bp, H) bf16.
    With w_head (2, 1, H) f32: returns per-direction partial logits (T, Bp) f32.
    """
    _, TBp, G4 = gx.shape
    H = whh.shape[1]
    T = TBp // Bp
    nc = T // Tc
    chunk = Tc * Bp
    fold_head = w_head is not None

    in_specs = [
        pl.BlockSpec((1, chunk, G4), lambda c: (0, c, 0)),            # fwd chunk c
        pl.BlockSpec((1, chunk, G4), lambda c: (1, nc - 1 - c, 0)),   # bwd chunk
        pl.BlockSpec((2, H, G4), lambda c: (0, 0, 0)),
    ]
    operands = [gx, gx, whh]

    if fold_head:
        in_specs.append(pl.BlockSpec((2, 1, H), lambda c: (0, 0, 0)))
        operands.append(w_head)
        out_shape = (jax.ShapeDtypeStruct((T, Bp), jnp.float32),
                     jax.ShapeDtypeStruct((T, Bp), jnp.float32))
        out_specs = (pl.BlockSpec((Tc, Bp), lambda c: (c, 0)),
                     pl.BlockSpec((Tc, Bp), lambda c: (nc - 1 - c, 0)))
    else:
        out_shape = (jax.ShapeDtypeStruct((TBp, H), jnp.bfloat16),
                     jax.ShapeDtypeStruct((TBp, H), jnp.bfloat16))
        out_specs = (pl.BlockSpec((chunk, H), lambda c: (c, 0)),
                     pl.BlockSpec((chunk, H), lambda c: (nc - 1 - c, 0)))

    scratch = [pltpu.VMEM((Bp, H), jnp.float32) for _ in range(4)]
    if fold_head:
        scratch += [pltpu.VMEM((Tc, Bp, H), jnp.float32) for _ in range(2)]

    return pl.pallas_call(
        _make_bilstm_kernel(Tc, Bp, H, fold_head),
        out_shape=out_shape,
        grid_spec=pltpu.PrefetchScalarGridSpec(
            num_scalar_prefetch=0,
            grid=(nc,),
            in_specs=in_specs,
            out_specs=out_specs,
            scratch_shapes=scratch,
        ),
        compiler_params=pltpu.CompilerParams(
            dimension_semantics=("arbitrary",)),
    )(*operands)


# ----------------------------------------------------------------------------
# Parameters (deterministic synthetic, PyTorch-style U(-k, k) ranges).
#   conv:  w (K, Cin, Cout) bf16, b (1, Cout) f32
#   lstm layer 0: wproj (C_conv, 8H) bf16  [cols 0:4H fwd, 4H:8H bwd, gate
#                 order i,f,o,g], whh (2, H, 4H) bf16, bias (1, 8H) f32
#                 (= b_ih + b_hh, fwd||bwd)
#   lstm layer 1: wproj (2, H, 8H) bf16  [part 0 applied to fwd half input,
#                 part 1 to bwd half], whh, bias as above
#   head: w_lin (2, 1, H) f32 per direction, b_lin (1, 1) f32
# ----------------------------------------------------------------------------
def init_params(key, n_features, hidden, f_nums=(16, 32), k_sizes=(9, 9)):
    H = hidden
    params = {"conv": [], "lstm": []}
    conv_cfg = [(n_features, f_nums[0], k_sizes[0]),
                (f_nums[0], f_nums[0], k_sizes[0]),
                (f_nums[0], f_nums[1], k_sizes[1]),
                (f_nums[1], f_nums[1], k_sizes[1])]
    for cin, cout, k in conv_cfg:
        key, kw, kb = jax.random.split(key, 3)
        bound = 1.0 / (cin * k) ** 0.5
        params["conv"].append({
            "w": jax.random.uniform(kw, (k, cin, cout), jnp.float32,
                                    -bound, bound).astype(jnp.bfloat16),
            "b": jax.random.uniform(kb, (1, cout), jnp.float32, -bound, bound),
        })

    bound = 1.0 / H ** 0.5
    layer_in = [f_nums[-1], None]          # layer0: conv feats; layer1: fwd/bwd halves
    for li, fin in enumerate(layer_in):
        key, kp, kh, kb1, kb2 = jax.random.split(key, 5)
        if li == 0:
            wproj = jax.random.uniform(kp, (fin, 8 * H), jnp.float32,
                                       -bound, bound).astype(jnp.bfloat16)
        else:
            wproj = jax.random.uniform(kp, (2, H, 8 * H), jnp.float32,
                                       -bound, bound).astype(jnp.bfloat16)
        whh = jax.random.uniform(kh, (2, H, 4 * H), jnp.float32,
                                 -bound, bound).astype(jnp.bfloat16)
        bias = (jax.random.uniform(kb1, (1, 8 * H), jnp.float32, -bound, bound)
                + jax.random.uniform(kb2, (1, 8 * H), jnp.float32, -bound, bound))
        params["lstm"].append({"wproj": wproj, "whh": whh, "bias": bias})

    key, k4, k5 = jax.random.split(key, 3)
    bl = 1.0 / (2 * H) ** 0.5
    params["w_lin"] = jax.random.uniform(k4, (2, 1, H), jnp.float32, -bl, bl)
    params["b_lin"] = jax.random.uniform(k5, (1, 1), jnp.float32, -bl, bl)
    return params


# ----------------------------------------------------------------------------
# Full forward pass (glue in plain JAX; hot loops inside Pallas kernels).
# ----------------------------------------------------------------------------
@functools.partial(jax.jit, static_argnames=("time_chunk",))
def cnn_blstm_forward(params, x, *, time_chunk=64):
    B, T, F = x.shape
    H = params["lstm"][0]["whh"].shape[1]
    Bp = ((B + 7) // 8) * 8                      # sublane-dense batch padding
    Tc = time_chunk if (T % time_chunk == 0) else T
    # TODO(synk): for long T not divisible by time_chunk, pad T instead of
    #             falling back to Tc=T (full unroll is an instruction-memory
    #             hazard for very long sequences).

    K = params["conv"][0]["w"].shape[0]
    P = (K - 1) // 2

    # Zero-pad batch (to 8) and time (conv halo), time-major-flatten, bf16.
    xb = jnp.pad(x, ((0, Bp - B), (P, P), (0, 0)))
    x_flat = jnp.transpose(xb, (1, 0, 2)).reshape((T + 2 * P) * Bp, F)
    x_flat = x_flat.astype(jnp.bfloat16)

    l0, l1 = params["lstm"]

    # Conv stack + fused layer-0 input projection: (2, T*Bp, 4H) f32.
    gx1 = conv_stack_proj(x_flat, params["conv"], l0["wproj"], l0["bias"],
                          T=T, Bp=Bp)
    # Layer 0 recurrence -> bf16 forward/backward h sequences.
    out1_f, out1_b = bilstm_layer(gx1, l0["whh"], Tc=Tc, Bp=Bp)
    # Layer 1 input projection (both directions + bias).
    gx2 = lstm_input_proj_impl(out1_f, out1_b, l1["wproj"], l1["bias"],
                               Tc=Tc, Bp=Bp)
    # Layer 1 recurrence with the Linear(2H->1) head folded into the epilogue.
    lf, lb = bilstm_layer(gx2, l1["whh"], Tc=Tc, Bp=Bp, w_head=params["w_lin"])

    logits = lf + lb + params["b_lin"][0, 0]     # (T, Bp) tiny elementwise op
    pred = jax.nn.sigmoid(logits)
    return jnp.transpose(pred)[:B]               # (B, T)  (== .squeeze())


# ----------------------------------------------------------------------------
# Pure-JAX reference mirroring the kernel's bf16 storage/operand rounding, so
# the comparison checks structure/indexing with a tight tolerance.
# ----------------------------------------------------------------------------
@jax.jit
def _reference_forward(params, x):
    B, T, _ = x.shape
    H = params["lstm"][0]["whh"].shape[1]
    f32, bf16 = jnp.float32, jnp.bfloat16

    def q(a):                                    # mirror bf16 rounding
        return a.astype(bf16).astype(f32)

    h = q(x)
    for conv in params["conv"]:
        w = conv["w"].astype(f32)
        b = conv["b"]
        K = w.shape[0]
        P = (K - 1) // 2
        hp = jnp.pad(h, ((0, 0), (P, P), (0, 0)))
        y = jnp.zeros((B, T, w.shape[2]), f32)
        for k in range(K):
            y = y + jnp.einsum("btc,cd->btd", hp[:, k:k + T, :], w[k])
        h = q(jnp.maximum(y + b, 0.0))

    def run_dir(gx, whh, reverse):               # gx: (B, T, 4H) incl. bias
        h0 = jnp.zeros((B, H), f32)
        c0 = jnp.zeros_like(h0)

        def step(carry, t):
            hh, cc = carry
            g = jnp.dot(q(hh), whh) + gx[:, t, :]
            i = jax.nn.sigmoid(g[:, :H])
            f = jax.nn.sigmoid(g[:, H:2 * H])
            o = jax.nn.sigmoid(g[:, 2 * H:3 * H])
            gg = jnp.tanh(g[:, 3 * H:])
            cn = f * cc + i * gg
            hn = o * jnp.tanh(cn)
            return (hn, cn), hn

        ts = jnp.arange(T)[::-1] if reverse else jnp.arange(T)
        _, outs = lax.scan(step, (h0, c0), ts)
        if reverse:
            outs = outs[::-1]
        return jnp.transpose(outs, (1, 0, 2))    # (B, T, H)

    l0 = params["lstm"][0]
    wp0 = l0["wproj"].astype(f32)
    gx0 = jnp.einsum("btf,fg->btg", h, wp0) + l0["bias"][0]
    whh0 = l0["whh"].astype(f32)
    of = q(run_dir(gx0[..., :4 * H], whh0[0], False))
    ob = q(run_dir(gx0[..., 4 * H:], whh0[1], True))

    l1 = params["lstm"][1]
    wp1 = l1["wproj"].astype(f32)
    gx1 = (jnp.einsum("bth,hg->btg", of, wp1[0])
           + jnp.einsum("bth,hg->btg", ob, wp1[1]) + l1["bias"][0])
    whh1 = l1["whh"].astype(f32)
    of2 = run_dir(gx1[..., :4 * H], whh1[0], False)
    ob2 = run_dir(gx1[..., 4 * H:], whh1[1], True)

    wlin, blin = params["w_lin"], params["b_lin"]
    logits = (jnp.einsum("bth,h->bt", of2, wlin[0, 0])
              + jnp.einsum("bth,h->bt", ob2, wlin[1, 0]) + blin[0, 0])
    return jax.nn.sigmoid(logits)


if __name__ == "__main__":
    B, T, F, H = 2, 16, 4, 32
    key = jax.random.PRNGKey(0)
    pkey, xkey = jax.random.split(key)
    params = init_params(pkey, n_features=F, hidden=H)
    x = jax.random.normal(xkey, (B, T, F), jnp.float32)

    # time_chunk=8 exercises the chunked (multi-grid-step) recurrence path;
    # for real sequence lengths use 64-256 (subject to VMEM).
    preds = cnn_blstm_forward(params, x, time_chunk=8)
    jax.block_until_ready(preds)
    assert preds.shape == (B, T)
    assert bool(jnp.all(jnp.isfinite(preds)))

    ref = _reference_forward(params, x)
    max_err = float(jnp.max(jnp.abs(preds - ref)))
    assert max_err < 2e-2, f"mismatch vs pure-JAX reference: {max_err}"
    print("KERNEL_OK")
</pallas_src>

<mosaic_0001>
module attributes {stable_mosaic.version = 11 : i64} {
  func.func @kernel(%arg0: memref<192x4xbf16, #tpu.memory_space<vmem>>, %arg1: memref<9x4x16xbf16, #tpu.memory_space<vmem>>, %arg2: memref<1x16xf32, #tpu.memory_space<vmem>>, %arg3: memref<9x16x16xbf16, #tpu.memory_space<vmem>>, %arg4: memref<1x16xf32, #tpu.memory_space<vmem>>, %arg5: memref<9x16x32xbf16, #tpu.memory_space<vmem>>, %arg6: memref<1x32xf32, #tpu.memory_space<vmem>>, %arg7: memref<9x32x32xbf16, #tpu.memory_space<vmem>>, %arg8: memref<1x32xf32, #tpu.memory_space<vmem>>, %arg9: memref<32x256xbf16, #tpu.memory_space<vmem>>, %arg10: memref<1x256xf32, #tpu.memory_space<vmem>>, %arg11: memref<2x128x128xf32, #tpu.memory_space<vmem>>, %arg12: memref<192x16xbf16, #tpu.memory_space<vmem>>, %arg13: memref<192x16xbf16, #tpu.memory_space<vmem>>, %arg14: memref<192x32xbf16, #tpu.memory_space<vmem>>) attributes {dimension_semantics = [], scalar_prefetch = 0 : i64, scratch_operands = 3 : i64, tpu.core_type = #tpu.core_type<tc>} {
    %cst = arith.constant 0.000000e+00 : f32
    %0 = vector.broadcast %cst : f32 to vector<128x16xf32>
    %c0 = arith.constant 0 : index
    %c0_0 = arith.constant 0 : index
    %1 = vector.load %arg0[%c0, %c0_0] : memref<192x4xbf16, #tpu.memory_space<vmem>>, vector<128x4xbf16>
    %c0_1 = arith.constant 0 : index
    %c0_2 = arith.constant 0 : index
    %c0_3 = arith.constant 0 : index
    %2 = vector.load %arg1[%c0_1, %c0_2, %c0_3] : memref<9x4x16xbf16, #tpu.memory_space<vmem>>, vector<1x4x16xbf16>
    %3 = vector.shape_cast %2 : vector<1x4x16xbf16> to vector<4x16xbf16>
    %cst_4 = arith.constant dense<0.000000e+00> : vector<128x16xf32>
    %4 = tpu.matmul %1, %3, %cst_4 {dimension_numbers = #tpu.dot_dimension_numbers<[1], [0], [0], [1], [0, 0, 1, 1], [], []>} : vector<128x4xbf16>, vector<4x16xbf16>, vector<128x16xf32> -> vector<128x16xf32>
    %5 = arith.addf %0, %4 : vector<128x16xf32>
    %c8 = arith.constant 8 : index
    %c0_5 = arith.constant 0 : index
    %6 = vector.load %arg0[%c8, %c0_5] : memref<192x4xbf16, #tpu.memory_space<vmem>>, vector<128x4xbf16>
    %c1 = arith.constant 1 : index
    %c0_6 = arith.constant 0 : index
    %c0_7 = arith.constant 0 : index
    %7 = vector.load %arg1[%c1, %c0_6, %c0_7] : memref<9x4x16xbf16, #tpu.memory_space<vmem>>, vector<1x4x16xbf16>
    %8 = vector.shape_cast %7 : vector<1x4x16xbf16> to vector<4x16xbf16>
    %cst_8 = arith.constant dense<0.000000e+00> : vector<128x16xf32>
    %9 = tpu.matmul %6, %8, %cst_8 {dimension_numbers = #tpu.dot_dimension_numbers<[1], [0], [0], [1], [0, 0, 1, 1], [], []>} : vector<128x4xbf16>, vector<4x16xbf16>, vector<128x16xf32> -> vector<128x16xf32>
    %10 = arith.addf %5, %9 : vector<128x16xf32>
    %c16 = arith.constant 16 : index
    %c0_9 = arith.constant 0 : index
    %11 = vector.load %arg0[%c16, %c0_9] : memref<192x4xbf16, #tpu.memory_space<vmem>>, vector<128x4xbf16>
    %c2 = arith.constant 2 : index
    %c0_10 = arith.constant 0 : index
    %c0_11 = arith.constant 0 : index
    %12 = vector.load %arg1[%c2, %c0_10, %c0_11] : memref<9x4x16xbf16, #tpu.memory_space<vmem>>, vector<1x4x16xbf16>
    %13 = vector.shape_cast %12 : vector<1x4x16xbf16> to vector<4x16xbf16>
    %cst_12 = arith.constant dense<0.000000e+00> : vector<128x16xf32>
    %14 = tpu.matmul %11, %13, %cst_12 {dimension_numbers = #tpu.dot_dimension_numbers<[1], [0], [0], [1], [0, 0, 1, 1], [], []>} : vector<128x4xbf16>, vector<4x16xbf16>, vector<128x16xf32> -> vector<128x16xf32>
    %15 = arith.addf %10, %14 : vector<128x16xf32>
    %c24 = arith.constant 24 : index
    %c0_13 = arith.constant 0 : index
    %16 = vector.load %arg0[%c24, %c0_13] : memref<192x4xbf16, #tpu.memory_space<vmem>>, vector<128x4xbf16>
    %c3 = arith.constant 3 : index
    %c0_14 = arith.constant 0 : index
    %c0_15 = arith.constant 0 : index
    %17 = vector.load %arg1[%c3, %c0_14, %c0_15] : memref<9x4x16xbf16, #tpu.memory_space<vmem>>, vector<1x4x16xbf16>
    %18 = vector.shape_cast %17 : vector<1x4x16xbf16> to vector<4x16xbf16>
    %cst_16 = arith.constant dense<0.000000e+00> : vector<128x16xf32>
    %19 = tpu.matmul %16, %18, %cst_16 {dimension_numbers = #tpu.dot_dimension_numbers<[1], [0], [0], [1], [0, 0, 1, 1], [], []>} : vector<128x4xbf16>, vector<4x16xbf16>, vector<128x16xf32> -> vector<128x16xf32>
    %20 = arith.addf %15, %19 : vector<128x16xf32>
    %c32 = arith.constant 32 : index
    %c0_17 = arith.constant 0 : index
    %21 = vector.load %arg0[%c32, %c0_17] : memref<192x4xbf16, #tpu.memory_space<vmem>>, vector<128x4xbf16>
    %c4 = arith.constant 4 : index
    %c0_18 = arith.constant 0 : index
    %c0_19 = arith.constant 0 : index
    %22 = vector.load %arg1[%c4, %c0_18, %c0_19] : memref<9x4x16xbf16, #tpu.memory_space<vmem>>, vector<1x4x16xbf16>
    %23 = vector.shape_cast %22 : vector<1x4x16xbf16> to vector<4x16xbf16>
    %cst_20 = arith.constant dense<0.000000e+00> : vector<128x16xf32>
    %24 = tpu.matmul %21, %23, %cst_20 {dimension_numbers = #tpu.dot_dimension_numbers<[1], [0], [0], [1], [0, 0, 1, 1], [], []>} : vector<128x4xbf16>, vector<4x16xbf16>, vector<128x16xf32> -> vector<128x16xf32>
    %25 = arith.addf %20, %24 : vector<128x16xf32>
    %c40 = arith.constant 40 : index
    %c0_21 = arith.constant 0 : index
    %26 = vector.load %arg0[%c40, %c0_21] : memref<192x4xbf16, #tpu.memory_space<vmem>>, vector<128x4xbf16>
    %c5 = arith.constant 5 : index
    %c0_22 = arith.constant 0 : index
    %c0_23 = arith.constant 0 : index
    %27 = vector.load %arg1[%c5, %c0_22, %c0_23] : memref<9x4x16xbf16, #tpu.memory_space<vmem>>, vector<1x4x16xbf16>
    %28 = vector.shape_cast %27 : vector<1x4x16xbf16> to vector<4x16xbf16>
    %cst_24 = arith.constant dense<0.000000e+00> : vector<128x16xf32>
    %29 = tpu.matmul %26, %28, %cst_24 {dimension_numbers = #tpu.dot_dimension_numbers<[1], [0], [0], [1], [0, 0, 1, 1], [], []>} : vector<128x4xbf16>, vector<4x16xbf16>, vector<128x16xf32> -> vector<128x16xf32>
    %30 = arith.addf %25, %29 : vector<128x16xf32>
    %c48 = arith.constant 48 : index
    %c0_25 = arith.constant 0 : index
    %31 = vector.load %arg0[%c48, %c0_25] : memref<192x4xbf16, #tpu.memory_space<vmem>>, vector<128x4xbf16>
    %c6 = arith.constant 6 : index
    %c0_26 = arith.constant 0 : index
    %c0_27 = arith.constant 0 : index
    %32 = vector.load %arg1[%c6, %c0_26, %c0_27] : memref<9x4x16xbf16, #tpu.memory_space<vmem>>, vector<1x4x16xbf16>
    %33 = vector.shape_cast %32 : vector<1x4x16xbf16> to vector<4x16xbf16>
    %cst_28 = arith.constant dense<0.000000e+00> : vector<128x16xf32>
    %34 = tpu.matmul %31, %33, %cst_28 {dimension_numbers = #tpu.dot_dimension_numbers<[1], [0], [0], [1], [0, 0, 1, 1], [], []>} : vector<128x4xbf16>, vector<4x16xbf16>, vector<128x16xf32> -> vector<128x16xf32>
    %35 = arith.addf %30, %34 : vector<128x16xf32>
    %c56 = arith.constant 56 : index
    %c0_29 = arith.constant 0 : index
    %36 = vector.load %arg0[%c56, %c0_29] : memref<192x4xbf16, #tpu.memory_space<vmem>>, vector<128x4xbf16>
    %c7 = arith.constant 7 : index
    %c0_30 = arith.constant 0 : index
    %c0_31 = arith.constant 0 : index
    %37 = vector.load %arg1[%c7, %c0_30, %c0_31] : memref<9x4x16xbf16, #tpu.memory_space<vmem>>, vector<1x4x16xbf16>
    %38 = vector.shape_cast %37 : vector<1x4x16xbf16> to vector<4x16xbf16>
    %cst_32 = arith.constant dense<0.000000e+00> : vector<128x16xf32>
    %39 = tpu.matmul %36, %38, %cst_32 {dimension_numbers = #tpu.dot_dimension_numbers<[1], [0], [0], [1], [0, 0, 1, 1], [], []>} : vector<128x4xbf16>, vector<4x16xbf16>, vector<128x16xf32> -> vector<128x16xf32>
    %40 = arith.addf %35, %39 : vector<128x16xf32>
    %c64 = arith.constant 64 : index
    %c0_33 = arith.constant 0 : index
    %41 = vector.load %arg0[%c64, %c0_33] : memref<192x4xbf16, #tpu.memory_space<vmem>>, vector<128x4xbf16>
    %c8_34 = arith.constant 8 : index
    %c0_35 = arith.constant 0 : index
    %c0_36 = arith.constant 0 : index
    %42 = vector.load %arg1[%c8_34, %c0_35, %c0_36] : memref<9x4x16xbf16, #tpu.memory_space<vmem>>, vector<1x4x16xbf16>
    %43 = vector.shape_cast %42 : vector<1x4x16xbf16> to vector<4x16xbf16>
    %cst_37 = arith.constant dense<0.000000e+00> : vector<128x16xf32>
    %44 = tpu.matmul %41, %43, %cst_37 {dimension_numbers = #tpu.dot_dimension_numbers<[1], [0], [0], [1], [0, 0, 1, 1], [], []>} : vector<128x4xbf16>, vector<4x16xbf16>, vector<128x16xf32> -> vector<128x16xf32>
    %45 = arith.addf %40, %44 : vector<128x16xf32>
    %c0_38 = arith.constant 0 : index
    %c0_39 = arith.constant 0 : index
    %46 = vector.load %arg2[%c0_38, %c0_39] : memref<1x16xf32, #tpu.memory_space<vmem>>, vector<1x16xf32>
    %47 = vector.broadcast %46 : vector<1x16xf32> to vector<128x16xf32>
    %48 = arith.addf %45, %47 : vector<128x16xf32>
    %cst_40 = arith.constant 0.000000e+00 : f32
    %49 = vector.broadcast %cst_40 : f32 to vector<128x16xf32>
    %50 = arith.maximumf %48, %49 : vector<128x16xf32>
    %cst_41 = arith.constant 0.000000e+00 : bf16
    %51 = vector.broadcast %cst_41 : bf16 to vector<192x16xbf16>
    %c0_42 = arith.constant 0 : index
    %c0_43 = arith.constant 0 : index
    %52 = vector.load %arg12[%c0_42, %c0_43] : memref<192x16xbf16, #tpu.memory_space<vmem>>, vector<192x16xbf16>
    tpu.vector_store %arg12[%c0_42, %c0_43], %51 {strides = array<i32>} : memref<192x16xbf16, #tpu.memory_space<vmem>>, vector<192x16xbf16>,
    %53 = arith.truncf %50 : vector<128x16xf32> to vector<128x16xbf16>
    %c32_44 = arith.constant 32 : index
    %c0_45 = arith.constant 0 : index
    %54 = vector.load %arg12[%c32_44, %c0_45] : memref<192x16xbf16, #tpu.memory_space<vmem>>, vector<128x16xbf16>
    tpu.vector_store %arg12[%c32_44, %c0_45], %53 {strides = array<i32>} : memref<192x16xbf16, #tpu.memory_space<vmem>>, vector<128x16xbf16>,
    %cst_46 = arith.constant 0.000000e+00 : f32
    %55 = vector.broadcast %cst_46 : f32 to vector<128x16xf32>
    %c0_47 = arith.constant 0 : index
    %c0_48 = arith.constant 0 : index
    %56 = vector.load %arg12[%c0_47, %c0_48] : memref<192x16xbf16, #tpu.memory_space<vmem>>, vector<128x16xbf16>
    %c0_49 = arith.constant 0 : index
    %c0_50 = arith.constant 0 : index
    %c0_51 = arith.constant 0 : index
    %57 = vector.load %arg3[%c0_49, %c0_50, %c0_51] : memref<9x16x16xbf16, #tpu.memory_space<vmem>>, vector<1x16x16xbf16>
    %58 = vector.shape_cast %57 : vector<1x16x16xbf16> to vector<16x16xbf16>
    %cst_52 = arith.constant dense<0.000000e+00> : vector<128x16xf32>
    %59 = tpu.matmul %56, %58, %cst_52 {dimension_numbers = #tpu.dot_dimension_numbers<[1], [0], [0], [1], [0, 0, 1, 1], [], []>} : vector<128x16xbf16>, vector<16x16xbf16>, vector<128x16xf32> -> vector<128x16xf32>
    %60 = arith.addf %55, %59 : vector<128x16xf32>
    %c8_53 = arith.constant 8 : index
    %c0_54 = arith.constant 0 : index
    %61 = vector.load %arg12[%c8_53, %c0_54] : memref<192x16xbf16, #tpu.memory_space<vmem>>, vector<128x16xbf16>
    %c1_55 = arith.constant 1 : index
    %c0_56 = arith.constant 0 : index
    %c0_57 = arith.constant 0 : index
    %62 = vector.load %arg3[%c1_55, %c0_56, %c0_57] : memref<9x16x16xbf16, #tpu.memory_space<vmem>>, vector<1x16x16xbf16>
    %63 = vector.shape_cast %62 : vector<1x16x16xbf16> to vector<16x16xbf16>
    %cst_58 = arith.constant dense<0.000000e+00> : vector<128x16xf32>
    %64 = tpu.matmul %61, %63, %cst_58 {dimension_numbers = #tpu.dot_dimension_numbers<[1], [0], [0], [1], [0, 0, 1, 1], [], []>} : vector<128x16xbf16>, vector<16x16xbf16>, vector<128x16xf32> -> vector<128x16xf32>
    %65 = arith.addf %60, %64 : vector<128x16xf32>
    %c16_59 = arith.constant 16 : index
    %c0_60 = arith.constant 0 : index
    %66 = vector.load %arg12[%c16_59, %c0_60] : memref<192x16xbf16, #tpu.memory_space<vmem>>, vector<128x16xbf16>
    %c2_61 = arith.constant 2 : index
    %c0_62 = arith.constant 0 : index
    %c0_63 = arith.constant 0 : index
    %67 = vector.load %arg3[%c2_61, %c0_62, %c0_63] : memref<9x16x16xbf16, #tpu.memory_space<vmem>>, vector<1x16x16xbf16>
    %68 = vector.shape_cast %67 : vector<1x16x16xbf16> to vector<16x16xbf16>
    %cst_64 = arith.constant dense<0.000000e+00> : vector<128x16xf32>
    %69 = tpu.matmul %66, %68, %cst_64 {dimension_numbers = #tpu.dot_dimension_numbers<[1], [0], [0], [1], [0, 0, 1, 1], [], []>} : vector<128x16xbf16>, vector<16x16xbf16>, vector<128x16xf32> -> vector<128x16xf32>
    %70 = arith.addf %65, %69 : vector<128x16xf32>
    %c24_65 = arith.constant 24 : index
    %c0_66 = arith.constant 0 : index
    %71 = vector.load %arg12[%c24_65, %c0_66] : memref<192x16xbf16, #tpu.memory_space<vmem>>, vector<128x16xbf16>
    %c3_67 = arith.constant 3 : index
    %c0_68 = arith.constant 0 : index
    %c0_69 = arith.constant 0 : index
    %72 = vector.load %arg3[%c3_67, %c0_68, %c0_69] : memref<9x16x16xbf16, #tpu.memory_space<vmem>>, vector<1x16x16xbf16>
    %73 = vector.shape_cast %72 : vector<1x16x16xbf16> to vector<16x16xbf16>
    %cst_70 = arith.constant dense<0.000000e+00> : vector<128x16xf32>
    %74 = tpu.matmul %71, %73, %cst_70 {dimension_numbers = #tpu.dot_dimension_numbers<[1], [0], [0], [1], [0, 0, 1, 1], [], []>} : vector<128x16xbf16>, vector<16x16xbf16>, vector<128x16xf32> -> vector<128x16xf32>
    %75 = arith.addf %70, %74 : vector<128x16xf32>
    %c32_71 = arith.constant 32 : index
    %c0_72 = arith.constant 0 : index
    %76 = vector.load %arg12[%c32_71, %c0_72] : memref<192x16xbf16, #tpu.memory_space<vmem>>, vector<128x16xbf16>
    %c4_73 = arith.constant 4 : index
    %c0_74 = arith.constant 0 : index
    %c0_75 = arith.constant 0 : index
    %77 = vector.load %arg3[%c4_73, %c0_74, %c0_75] : memref<9x16x16xbf16, #tpu.memory_space<vmem>>, vector<1x16x16xbf16>
    %78 = vector.shape_cast %77 : vector<1x16x16xbf16> to vector<16x16xbf16>
    %cst_76 = arith.constant dense<0.000000e+00> : vector<128x16xf32>
    %79 = tpu.matmul %76, %78, %cst_76 {dimension_numbers = #tpu.dot_dimension_numbers<[1], [0], [0], [1], [0, 0, 1, 1], [], []>} : vector<128x16xbf16>, vector<16x16xbf16>, vector<128x16xf32> -> vector<128x16xf32>
    %80 = arith.addf %75, %79 : vector<128x16xf32>
    %c40_77 = arith.constant 40 : index
    %c0_78 = arith.constant 0 : index
    %81 = vector.load %arg12[%c40_77, %c0_78] : memref<192x16xbf16, #tpu.memory_space<vmem>>, vector<128x16xbf16>
    %c5_79 = arith.constant 5 : index
    %c0_80 = arith.constant 0 : index
    %c0_81 = arith.constant 0 : index
    %82 = vector.load %arg3[%c5_79, %c0_80, %c0_81] : memref<9x16x16xbf16, #tpu.memory_space<vmem>>, vector<1x16x16xbf16>
    %83 = vector.shape_cast %82 : vector<1x16x16xbf16> to vector<16x16xbf16>
    %cst_82 = arith.constant dense<0.000000e+00> : vector<128x16xf32>
    %84 = tpu.matmul %81, %83, %cst_82 {dimension_numbers = #tpu.dot_dimension_numbers<[1], [0], [0], [1], [0, 0, 1, 1], [], []>} : vector<128x16xbf16>, vector<16x16xbf16>, vector<128x16xf32> -> vector<128x16xf32>
    %85 = arith.addf %80, %84 : vector<128x16xf32>
    %c48_83 = arith.constant 48 : index
    %c0_84 = arith.constant 0 : index
    %86 = vector.load %arg12[%c48_83, %c0_84] : memref<192x16xbf16, #tpu.memory_space<vmem>>, vector<128x16xbf16>
    %c6_85 = arith.constant 6 : index
    %c0_86 = arith.constant 0 : index
    %c0_87 = arith.constant 0 : index
    %87 = vector.load %arg3[%c6_85, %c0_86, %c0_87] : memref<9x16x16xbf16, #tpu.memory_space<vmem>>, vector<1x16x16xbf16>
    %88 = vector.shape_cast %87 : vector<1x16x16xbf16> to vector<16x16xbf16>
    %cst_88 = arith.constant dense<0.000000e+00> : vector<128x16xf32>
    %89 = tpu.matmul %86, %88, %cst_88 {dimension_numbers = #tpu.dot_dimension_numbers<[1], [0], [0], [1], [0, 0, 1, 1], [], []>} : vector<128x16xbf16>, vector<16x16xbf16>, vector<128x16xf32> -> vector<128x16xf32>
    %90 = arith.addf %85, %89 : vector<128x16xf32>
    %c56_89 = arith.constant 56 : index
    %c0_90 = arith.constant 0 : index
    %91 = vector.load %arg12[%c56_89, %c0_90] : memref<192x16xbf16, #tpu.memory_space<vmem>>, vector<128x16xbf16>
    %c7_91 = arith.constant 7 : index
    %c0_92 = arith.constant 0 : index
    %c0_93 = arith.constant 0 : index
    %92 = vector.load %arg3[%c7_91, %c0_92, %c0_93] : memref<9x16x16xbf16, #tpu.memory_space<vmem>>, vector<1x16x16xbf16>
    %93 = vector.shape_cast %92 : vector<1x16x16xbf16> to vector<16x16xbf16>
    %cst_94 = arith.constant dense<0.000000e+00> : vector<128x16xf32>
    %94 = tpu.matmul %91, %93, %cst_94 {dimension_numbers = #tpu.dot_dimension_numbers<[1], [0], [0], [1], [0, 0, 1, 1], [], []>} : vector<128x16xbf16>, vector<16x16xbf16>, vector<128x16xf32> -> vector<128x16xf32>
    %95 = arith.addf %90, %94 : vector<128x16xf32>
    %c64_95 = arith.constant 64 : index
    %c0_96 = arith.constant 0 : index
    %96 = vector.load %arg12[%c64_95, %c0_96] : memref<192x16xbf16, #tpu.memory_space<vmem>>, vector<128x16xbf16>
    %c8_97 = arith.constant 8 : index
    %c0_98 = arith.constant 0 : index
    %c0_99 = arith.constant 0 : index
    %97 = vector.load %arg3[%c8_97, %c0_98, %c0_99] : memref<9x16x16xbf16, #tpu.memory_space<vmem>>, vector<1x16x16xbf16>
    %98 = vector.shape_cast %97 : vector<1x16x16xbf16> to vector<16x16xbf16>
    %cst_100 = arith.constant dense<0.000000e+00> : vector<128x16xf32>
    %99 = tpu.matmul %96, %98, %cst_100 {dimension_numbers = #tpu.dot_dimension_numbers<[1], [0], [0], [1], [0, 0, 1, 1], [], []>} : vector<128x16xbf16>, vector<16x16xbf16>, vector<128x16xf32> -> vector<128x16xf32>
    %100 = arith.addf %95, %99 : vector<128x16xf32>
    %c0_101 = arith.constant 0 : index
    %c0_102 = arith.constant 0 : index
    %101 = vector.load %arg4[%c0_101, %c0_102] : memref<1x16xf32, #tpu.memory_space<vmem>>, vector<1x16xf32>
    %102 = vector.broadcast %101 : vector<1x16xf32> to vector<128x16xf32>
    %103 = arith.addf %100, %102 : vector<128x16xf32>
    %cst_103 = arith.constant 0.000000e+00 : f32
    %104 = vector.broadcast %cst_103 : f32 to vector<128x16xf32>
    %105 = arith.maximumf %103, %104 : vector<128x16xf32>
    %cst_104 = arith.constant 0.000000e+00 : bf16
    %106 = vector.broadcast %cst_104 : bf16 to vector<192x16xbf16>
    %c0_105 = arith.constant 0 : index
    %c0_106 = arith.constant 0 : index
    %107 = vector.load %arg13[%c0_105, %c0_106] : memref<192x16xbf16, #tpu.memory_space<vmem>>, vector<192x16xbf16>
    tpu.vector_store %arg13[%c0_105, %c0_106], %106 {strides = array<i32>} : memref<192x16xbf16, #tpu.memory_space<vmem>>, vector<192x16xbf16>,
    %108 = arith.truncf %105 : vector<128x16xf32> to vector<128x16xbf16>
    %c32_107 = arith.constant 32 : index
    %c0_108 = arith.constant 0 : index
    %109 = vector.load %arg13[%c32_107, %c0_108] : memref<192x16xbf16, #tpu.memory_space<vmem>>, vector<128x16xbf16>
    tpu.vector_store %arg13[%c32_107, %c0_108], %108 {strides = array<i32>} : memref<192x16xbf16, #tpu.memory_space<vmem>>, vector<128x16xbf16>,
    %cst_109 = arith.constant 0.000000e+00 : f32
    %110 = vector.broadcast %cst_109 : f32 to vector<128x32xf32>
    %c0_110 = arith.constant 0 : index
    %c0_111 = arith.constant 0 : index
    %111 = vector.load %arg13[%c0_110, %c0_111] : memref<192x16xbf16, #tpu.memory_space<vmem>>, vector<128x16xbf16>
    %c0_112 = arith.constant 0 : index
    %c0_113 = arith.constant 0 : index
    %c0_114 = arith.constant 0 : index
    %112 = vector.load %arg5[%c0_112, %c0_113, %c0_114] : memref<9x16x32xbf16, #tpu.memory_space<vmem>>, vector<1x16x32xbf16>
    %113 = vector.shape_cast %112 : vector<1x16x32xbf16> to vector<16x32xbf16>
    %cst_115 = arith.constant dense<0.000000e+00> : vector<128x32xf32>
    %114 = tpu.matmul %111, %113, %cst_115 {dimension_numbers = #tpu.dot_dimension_numbers<[1], [0], [0], [1], [0, 0, 1, 1], [], []>} : vector<128x16xbf16>, vector<16x32xbf16>, vector<128x32xf32> -> vector<128x32xf32>
    %115 = arith.addf %110, %114 : vector<128x32xf32>
    %c8_116 = arith.constant 8 : index
    %c0_117 = arith.constant 0 : index
    %116 = vector.load %arg13[%c8_116, %c0_117] : memref<192x16xbf16, #tpu.memory_space<vmem>>, vector<128x16xbf16>
    %c1_118 = arith.constant 1 : index
    %c0_119 = arith.constant 0 : index
    %c0_120 = arith.constant 0 : index
    %117 = vector.load %arg5[%c1_118, %c0_119, %c0_120] : memref<9x16x32xbf16, #tpu.memory_space<vmem>>, vector<1x16x32xbf16>
    %118 = vector.shape_cast %117 : vector<1x16x32xbf16> to vector<16x32xbf16>
    %cst_121 = arith.constant dense<0.000000e+00> : vector<128x32xf32>
    %119 = tpu.matmul %116, %118, %cst_121 {dimension_numbers = #tpu.dot_dimension_numbers<[1], [0], [0], [1], [0, 0, 1, 1], [], []>} : vector<128x16xbf16>, vector<16x32xbf16>, vector<128x32xf32> -> vector<128x32xf32>
    %120 = arith.addf %115, %119 : vector<128x32xf32>
    %c16_122 = arith.constant 16 : index
    %c0_123 = arith.constant 0 : index
    %121 = vector.load %arg13[%c16_122, %c0_123] : memref<192x16xbf16, #tpu.memory_space<vmem>>, vector<128x16xbf16>
    %c2_124 = arith.constant 2 : index
    %c0_125 = arith.constant 0 : index
    %c0_126 = arith.constant 0 : index
    %122 = vector.load %arg5[%c2_124, %c0_125, %c0_126] : memref<9x16x32xbf16, #tpu.memory_space<vmem>>, vector<1x16x32xbf16>
    %123 = vector.shape_cast %122 : vector<1x16x32xbf16> to vector<16x32xbf16>
    %cst_127 = arith.constant dense<0.000000e+00> : vector<128x32xf32>
    %124 = tpu.matmul %121, %123, %cst_127 {dimension_numbers = #tpu.dot_dimension_numbers<[1], [0], [0], [1], [0, 0, 1, 1], [], []>} : vector<128x16xbf16>, vector<16x32xbf16>, vector<128x32xf32> -> vector<128x32xf32>
    %125 = arith.addf %120, %124 : vector<128x32xf32>
    %c24_128 = arith.constant 24 : index
    %c0_129 = arith.constant 0 : index
    %126 = vector.load %arg13[%c24_128, %c0_129] : memref<192x16xbf16, #tpu.memory_space<vmem>>, vector<128x16xbf16>
    %c3_130 = arith.constant 3 : index
    %c0_131 = arith.constant 0 : index
    %c0_132 = arith.constant 0 : index
    %127 = vector.load %arg5[%c3_130, %c0_131, %c0_132] : memref<9x16x32xbf16, #tpu.memory_space<vmem>>, vector<1x16x32xbf16>
    %128 = vector.shape_cast %127 : vector<1x16x32xbf16> to vector<16x32xbf16>
    %cst_133 = arith.constant dense<0.000000e+00> : vector<128x32xf32>
    %129 = tpu.matmul %126, %128, %cst_133 {dimension_numbers = #tpu.dot_dimension_numbers<[1], [0], [0], [1], [0, 0, 1, 1], [], []>} : vector<128x16xbf16>, vector<16x32xbf16>, vector<128x32xf32> -> vector<128x32xf32>
    %130 = arith.addf %125, %129 : vector<128x32xf32>
    %c32_134 = arith.constant 32 : index
    %c0_135 = arith.constant 0 : index
    %131 = vector.load %arg13[%c32_134, %c0_135] : memref<192x16xbf16, #tpu.memory_space<vmem>>, vector<128x16xbf16>
    %c4_136 = arith.constant 4 : index
    %c0_137 = arith.constant 0 : index
    %c0_138 = arith.constant 0 : index
    %132 = vector.load %arg5[%c4_136, %c0_137, %c0_138] : memref<9x16x32xbf16, #tpu.memory_space<vmem>>, vector<1x16x32xbf16>
    %133 = vector.shape_cast %132 : vector<1x16x32xbf16> to vector<16x32xbf16>
    %cst_139 = arith.constant dense<0.000000e+00> : vector<128x32xf32>
    %134 = tpu.matmul %131, %133, %cst_139 {dimension_numbers = #tpu.dot_dimension_numbers<[1], [0], [0], [1], [0, 0, 1, 1], [], []>} : vector<128x16xbf16>, vector<16x32xbf16>, vector<128x32xf32> -> vector<128x32xf32>
    %135 = arith.addf %130, %134 : vector<128x32xf32>
    %c40_140 = arith.constant 40 : index
    %c0_141 = arith.constant 0 : index
    %136 = vector.load %arg13[%c40_140, %c0_141] : memref<192x16xbf16, #tpu.memory_space<vmem>>, vector<128x16xbf16>
    %c5_142 = arith.constant 5 : index
    %c0_143 = arith.constant 0 : index
    %c0_144 = arith.constant 0 : index
    %137 = vector.load %arg5[%c5_142, %c0_143, %c0_144] : memref<9x16x32xbf16, #tpu.memory_space<vmem>>, vector<1x16x32xbf16>
    %138 = vector.shape_cast %137 : vector<1x16x32xbf16> to vector<16x32xbf16>
    %cst_145 = arith.constant dense<0.000000e+00> : vector<128x32xf32>
    %139 = tpu.matmul %136, %138, %cst_145 {dimension_numbers = #tpu.dot_dimension_numbers<[1], [0], [0], [1], [0, 0, 1, 1], [], []>} : vector<128x16xbf16>, vector<16x32xbf16>, vector<128x32xf32> -> vector<128x32xf32>
    %140 = arith.addf %135, %139 : vector<128x32xf32>
    %c48_146 = arith.constant 48 : index
    %c0_147 = arith.constant 0 : index
    %141 = vector.load %arg13[%c48_146, %c0_147] : memref<192x16xbf16, #tpu.memory_space<vmem>>, vector<128x16xbf16>
    %c6_148 = arith.constant 6 : index
    %c0_149 = arith.constant 0 : index
    %c0_150 = arith.constant 0 : index
    %142 = vector.load %arg5[%c6_148, %c0_149, %c0_150] : memref<9x16x32xbf16, #tpu.memory_space<vmem>>, vector<1x16x32xbf16>
    %143 = vector.shape_cast %142 : vector<1x16x32xbf16> to vector<16x32xbf16>
    %cst_151 = arith.constant dense<0.000000e+00> : vector<128x32xf32>
    %144 = tpu.matmul %141, %143, %cst_151 {dimension_numbers = #tpu.dot_dimension_numbers<[1], [0], [0], [1], [0, 0, 1, 1], [], []>} : vector<128x16xbf16>, vector<16x32xbf16>, vector<128x32xf32> -> vector<128x32xf32>
    %145 = arith.addf %140, %144 : vector<128x32xf32>
    %c56_152 = arith.constant 56 : index
    %c0_153 = arith.constant 0 : index
    %146 = vector.load %arg13[%c56_152, %c0_153] : memref<192x16xbf16, #tpu.memory_space<vmem>>, vector<128x16xbf16>
    %c7_154 = arith.constant 7 : index
    %c0_155 = arith.constant 0 : index
    %c0_156 = arith.constant 0 : index
    %147 = vector.load %arg5[%c7_154, %c0_155, %c0_156] : memref<9x16x32xbf16, #tpu.memory_space<vmem>>, vector<1x16x32xbf16>
    %148 = vector.shape_cast %147 : vector<1x16x32xbf16> to vector<16x32xbf16>
    %cst_157 = arith.constant dense<0.000000e+00> : vector<128x32xf32>
    %149 = tpu.matmul %146, %148, %cst_157 {dimension_numbers = #tpu.dot_dimension_numbers<[1], [0], [0], [1], [0, 0, 1, 1], [], []>} : vector<128x16xbf16>, vector<16x32xbf16>, vector<128x32xf32> -> vector<128x32xf32>
    %150 = arith.addf %145, %149 : vector<128x32xf32>
    %c64_158 = arith.constant 64 : index
    %c0_159 = arith.constant 0 : index
    %151 = vector.load %arg13[%c64_158, %c0_159] : memref<192x16xbf16, #tpu.memory_space<vmem>>, vector<128x16xbf16>
    %c8_160 = arith.constant 8 : index
    %c0_161 = arith.constant 0 : index
    %c0_162 = arith.constant 0 : index
    %152 = vector.load %arg5[%c8_160, %c0_161, %c0_162] : memref<9x16x32xbf16, #tpu.memory_space<vmem>>, vector<1x16x32xbf16>
    %153 = vector.shape_cast %152 : vector<1x16x32xbf16> to vector<16x32xbf16>
    %cst_163 = arith.constant dense<0.000000e+00> : vector<128x32xf32>
    %154 = tpu.matmul %151, %153, %cst_163 {dimension_numbers = #tpu.dot_dimension_numbers<[1], [0], [0], [1], [0, 0, 1, 1], [], []>} : vector<128x16xbf16>, vector<16x32xbf16>, vector<128x32xf32> -> vector<128x32xf32>
    %155 = arith.addf %150, %154 : vector<128x32xf32>
    %c0_164 = arith.constant 0 : index
    %c0_165 = arith.constant 0 : index
    %156 = vector.load %arg6[%c0_164, %c0_165] : memref<1x32xf32, #tpu.memory_space<vmem>>, vector<1x32xf32>
    %157 = vector.broadcast %156 : vector<1x32xf32> to vector<128x32xf32>
    %158 = arith.addf %155, %157 : vector<128x32xf32>
    %cst_166 = arith.constant 0.000000e+00 : f32
    %159 = vector.broadcast %cst_166 : f32 to vector<128x32xf32>
    %160 = arith.maximumf %158, %159 : vector<128x32xf32>
    %cst_167 = arith.constant 0.000000e+00 : bf16
    %161 = vector.broadcast %cst_167 : bf16 to vector<192x32xbf16>
    %c0_168 = arith.constant 0 : index
    %c0_169 = arith.constant 0 : index
    %162 = vector.load %arg14[%c0_168, %c0_169] : memref<192x32xbf16, #tpu.memory_space<vmem>>, vector<192x32xbf16>
    tpu.vector_store %arg14[%c0_168, %c0_169], %161 {strides = array<i32>} : memref<192x32xbf16, #tpu.memory_space<vmem>>, vector<192x32xbf16>,
    %163 = arith.truncf %160 : vector<128x32xf32> to vector<128x32xbf16>
    %c32_170 = arith.constant 32 : index
    %c0_171 = arith.constant 0 : index
    %164 = vector.load %arg14[%c32_170, %c0_171] : memref<192x32xbf16, #tpu.memory_space<vmem>>, vector<128x32xbf16>
    tpu.vector_store %arg14[%c32_170, %c0_171], %163 {strides = array<i32>} : memref<192x32xbf16, #tpu.memory_space<vmem>>, vector<128x32xbf16>,
    %cst_172 = arith.constant 0.000000e+00 : f32
    %165 = vector.broadcast %cst_172 : f32 to vector<128x32xf32>
    %c0_173 = arith.constant 0 : index
    %c0_174 = arith.constant 0 : index
    %166 = vector.load %arg14[%c0_173, %c0_174] : memref<192x32xbf16, #tpu.memory_space<vmem>>, vector<128x32xbf16>
    %c0_175 = arith.constant 0 : index
    %c0_176 = arith.constant 0 : index
    %c0_177 = arith.constant 0 : index
    %167 = vector.load %arg7[%c0_175, %c0_176, %c0_177] : memref<9x32x32xbf16, #tpu.memory_space<vmem>>, vector<1x32x32xbf16>
    %168 = vector.shape_cast %167 : vector<1x32x32xbf16> to vector<32x32xbf16>
    %cst_178 = arith.constant dense<0.000000e+00> : vector<128x32xf32>
    %169 = tpu.matmul %166, %168, %cst_178 {dimension_numbers = #tpu.dot_dimension_numbers<[1], [0], [0], [1], [0, 0, 1, 1], [], []>} : vector<128x32xbf16>, vector<32x32xbf16>, vector<128x32xf32> -> vector<128x32xf32>
    %170 = arith.addf %165, %169 : vector<128x32xf32>
    %c8_179 = arith.constant 8 : index
    %c0_180 = arith.constant 0 : index
    %171 = vector.load %arg14[%c8_179, %c0_180] : memref<192x32xbf16, #tpu.memory_space<vmem>>, vector<128x32xbf16>
    %c1_181 = arith.constant 1 : index
    %c0_182 = arith.constant 0 : index
    %c0_183 = arith.constant 0 : index
    %172 = vector.load %arg7[%c1_181, %c0_182, %c0_183] : memref<9x32x32xbf16, #tpu.memory_space<vmem>>, vector<1x32x32xbf16>
    %173 = vector.shape_cast %172 : vector<1x32x32xbf16> to vector<32x32xbf16>
    %cst_184 = arith.constant dense<0.000000e+00> : vector<128x32xf32>
    %174 = tpu.matmul %171, %173, %cst_184 {dimension_numbers = #tpu.dot_dimension_numbers<[1], [0], [0], [1], [0, 0, 1, 1], [], []>} : vector<128x32xbf16>, vector<32x32xbf16>, vector<128x32xf32> -> vector<128x32xf32>
    %175 = arith.addf %170, %174 : vector<128x32xf32>
    %c16_185 = arith.constant 16 : index
    %c0_186 = arith.constant 0 : index
    %176 = vector.load %arg14[%c16_185, %c0_186] : memref<192x32xbf16, #tpu.memory_space<vmem>>, vector<128x32xbf16>
    %c2_187 = arith.constant 2 : index
    %c0_188 = arith.constant 0 : index
    %c0_189 = arith.constant 0 : index
    %177 = vector.load %arg7[%c2_187, %c0_188, %c0_189] : memref<9x32x32xbf16, #tpu.memory_space<vmem>>, vector<1x32x32xbf16>
    %178 = vector.shape_cast %177 : vector<1x32x32xbf16> to vector<32x32xbf16>
    %cst_190 = arith.constant dense<0.000000e+00> : vector<128x32xf32>
    %179 = tpu.matmul %176, %178, %cst_190 {dimension_numbers = #tpu.dot_dimension_numbers<[1], [0], [0], [1], [0, 0, 1, 1], [], []>} : vector<128x32xbf16>, vector<32x32xbf16>, vector<128x32xf32> -> vector<128x32xf32>
    %180 = arith.addf %175, %179 : vector<128x32xf32>
    %c24_191 = arith.constant 24 : index
    %c0_192 = arith.constant 0 : index
    %181 = vector.load %arg14[%c24_191, %c0_192] : memref<192x32xbf16, #tpu.memory_space<vmem>>, vector<128x32xbf16>
    %c3_193 = arith.constant 3 : index
    %c0_194 = arith.constant 0 : index
    %c0_195 = arith.constant 0 : index
    %182 = vector.load %arg7[%c3_193, %c0_194, %c0_195] : memref<9x32x32xbf16, #tpu.memory_space<vmem>>, vector<1x32x32xbf16>
    %183 = vector.shape_cast %182 : vector<1x32x32xbf16> to vector<32x32xbf16>
    %cst_196 = arith.constant dense<0.000000e+00> : vector<128x32xf32>
    %184 = tpu.matmul %181, %183, %cst_196 {dimension_numbers = #tpu.dot_dimension_numbers<[1], [0], [0], [1], [0, 0, 1, 1], [], []>} : vector<128x32xbf16>, vector<32x32xbf16>, vector<128x32xf32> -> vector<128x32xf32>
    %185 = arith.addf %180, %184 : vector<128x32xf32>
    %c32_197 = arith.constant 32 : index
    %c0_198 = arith.constant 0 : index
    %186 = vector.load %arg14[%c32_197, %c0_198] : memref<192x32xbf16, #tpu.memory_space<vmem>>, vector<128x32xbf16>
    %c4_199 = arith.constant 4 : index
    %c0_200 = arith.constant 0 : index
    %c0_201 = arith.constant 0 : index
    %187 = vector.load %arg7[%c4_199, %c0_200, %c0_201] : memref<9x32x32xbf16, #tpu.memory_space<vmem>>, vector<1x32x32xbf16>
    %188 = vector.shape_cast %187 : vector<1x32x32xbf16> to vector<32x32xbf16>
    %cst_202 = arith.constant dense<0.000000e+00> : vector<128x32xf32>
    %189 = tpu.matmul %186, %188, %cst_202 {dimension_numbers = #tpu.dot_dimension_numbers<[1], [0], [0], [1], [0, 0, 1, 1], [], []>} : vector<128x32xbf16>, vector<32x32xbf16>, vector<128x32xf32> -> vector<128x32xf32>
    %190 = arith.addf %185, %189 : vector<128x32xf32>
    %c40_203 = arith.constant 40 : index
    %c0_204 = arith.constant 0 : index
    %191 = vector.load %arg14[%c40_203, %c0_204] : memref<192x32xbf16, #tpu.memory_space<vmem>>, vector<128x32xbf16>
    %c5_205 = arith.constant 5 : index
    %c0_206 = arith.constant 0 : index
    %c0_207 = arith.constant 0 : index
    %192 = vector.load %arg7[%c5_205, %c0_206, %c0_207] : memref<9x32x32xbf16, #tpu.memory_space<vmem>>, vector<1x32x32xbf16>
    %193 = vector.shape_cast %192 : vector<1x32x32xbf16> to vector<32x32xbf16>
    %cst_208 = arith.constant dense<0.000000e+00> : vector<128x32xf32>
    %194 = tpu.matmul %191, %193, %cst_208 {dimension_numbers = #tpu.dot_dimension_numbers<[1], [0], [0], [1], [0, 0, 1, 1], [], []>} : vector<128x32xbf16>, vector<32x32xbf16>, vector<128x32xf32> -> vector<128x32xf32>
    %195 = arith.addf %190, %194 : vector<128x32xf32>
    %c48_209 = arith.constant 48 : index
    %c0_210 = arith.constant 0 : index
    %196 = vector.load %arg14[%c48_209, %c0_210] : memref<192x32xbf16, #tpu.memory_space<vmem>>, vector<128x32xbf16>
    %c6_211 = arith.constant 6 : index
    %c0_212 = arith.constant 0 : index
    %c0_213 = arith.constant 0 : index
    %197 = vector.load %arg7[%c6_211, %c0_212, %c0_213] : memref<9x32x32xbf16, #tpu.memory_space<vmem>>, vector<1x32x32xbf16>
    %198 = vector.shape_cast %197 : vector<1x32x32xbf16> to vector<32x32xbf16>
    %cst_214 = arith.constant dense<0.000000e+00> : vector<128x32xf32>
    %199 = tpu.matmul %196, %198, %cst_214 {dimension_numbers = #tpu.dot_dimension_numbers<[1], [0], [0], [1], [0, 0, 1, 1], [], []>} : vector<128x32xbf16>, vector<32x32xbf16>, vector<128x32xf32> -> vector<128x32xf32>
    %200 = arith.addf %195, %199 : vector<128x32xf32>
    %c56_215 = arith.constant 56 : index
    %c0_216 = arith.constant 0 : index
    %201 = vector.load %arg14[%c56_215, %c0_216] : memref<192x32xbf16, #tpu.memory_space<vmem>>, vector<128x32xbf16>
    %c7_217 = arith.constant 7 : index
    %c0_218 = arith.constant 0 : index
    %c0_219 = arith.constant 0 : index
    %202 = vector.load %arg7[%c7_217, %c0_218, %c0_219] : memref<9x32x32xbf16, #tpu.memory_space<vmem>>, vector<1x32x32xbf16>
    %203 = vector.shape_cast %202 : vector<1x32x32xbf16> to vector<32x32xbf16>
    %cst_220 = arith.constant dense<0.000000e+00> : vector<128x32xf32>
    %204 = tpu.matmul %201, %203, %cst_220 {dimension_numbers = #tpu.dot_dimension_numbers<[1], [0], [0], [1], [0, 0, 1, 1], [], []>} : vector<128x32xbf16>, vector<32x32xbf16>, vector<128x32xf32> -> vector<128x32xf32>
    %205 = arith.addf %200, %204 : vector<128x32xf32>
    %c64_221 = arith.constant 64 : index
    %c0_222 = arith.constant 0 : index
    %206 = vector.load %arg14[%c64_221, %c0_222] : memref<192x32xbf16, #tpu.memory_space<vmem>>, vector<128x32xbf16>
    %c8_223 = arith.constant 8 : index
    %c0_224 = arith.constant 0 : index
    %c0_225 = arith.constant 0 : index
    %207 = vector.load %arg7[%c8_223, %c0_224, %c0_225] : memref<9x32x32xbf16, #tpu.memory_space<vmem>>, vector<1x32x32xbf16>
    %208 = vector.shape_cast %207 : vector<1x32x32xbf16> to vector<32x32xbf16>
    %cst_226 = arith.constant dense<0.000000e+00> : vector<128x32xf32>
    %209 = tpu.matmul %206, %208, %cst_226 {dimension_numbers = #tpu.dot_dimension_numbers<[1], [0], [0], [1], [0, 0, 1, 1], [], []>} : vector<128x32xbf16>, vector<32x32xbf16>, vector<128x32xf32> -> vector<128x32xf32>
    %210 = arith.addf %205, %209 : vector<128x32xf32>
    %c0_227 = arith.constant 0 : index
    %c0_228 = arith.constant 0 : index
    %211 = vector.load %arg8[%c0_227, %c0_228] : memref<1x32xf32, #tpu.memory_space<vmem>>, vector<1x32xf32>
    %212 = vector.broadcast %211 : vector<1x32xf32> to vector<128x32xf32>
    %213 = arith.addf %210, %212 : vector<128x32xf32>
    %cst_229 = arith.constant 0.000000e+00 : f32
    %214 = vector.broadcast %cst_229 : f32 to vector<128x32xf32>
    %215 = arith.maximumf %213, %214 : vector<128x32xf32>
    %216 = arith.truncf %215 : vector<128x32xf32> to vector<128x32xbf16>
    %c0_230 = arith.constant 0 : index
    %c0_231 = arith.constant 0 : index
    %217 = vector.load %arg9[%c0_230, %c0_231] : memref<32x256xbf16, #tpu.memory_space<vmem>>, vector<32x256xbf16>
    %cst_232 = arith.constant dense<0.000000e+00> : vector<128x256xf32>
    %218 = tpu.matmul %216, %217, %cst_232 {dimension_numbers = #tpu.dot_dimension_numbers<[1], [0], [0], [1], [0, 0, 1, 1], [], []>} : vector<128x32xbf16>, vector<32x256xbf16>, vector<128x256xf32> -> vector<128x256xf32>
    %c0_233 = arith.constant 0 : index
    %c0_234 = arith.constant 0 : index
    %219 = vector.load %arg10[%c0_233, %c0_234] : memref<1x256xf32, #tpu.memory_space<vmem>>, vector<1x256xf32>
    %220 = vector.broadcast %219 : vector<1x256xf32> to vector<128x256xf32>
    %221 = arith.addf %218, %220 : vector<128x256xf32>
    %222 = vector.extract_strided_slice %221 {offsets = [0, 0], sizes = [128, 128], strides = [1, 1]} : vector<128x256xf32> to vector<128x128xf32>
    %c0_235 = arith.constant 0 : index
    %c0_236 = arith.constant 0 : index
    %c0_237 = arith.constant 0 : index
    %223 = vector.load %arg11[%c0_235, %c0_236, %c0_237] : memref<2x128x128xf32, #tpu.memory_space<vmem>>, vector<1x128x128xf32>
    %224 = vector.shape_cast %223 : vector<1x128x128xf32> to vector<128x128xf32>
    %225 = vector.shape_cast %222 : vector<128x128xf32> to vector<1x128x128xf32>
    tpu.vector_store %arg11[%c0_235, %c0_236, %c0_237], %225 {strides = array<i32>} : memref<2x128x128xf32, #tpu.memory_space<vmem>>, vector<1x128x128xf32>,
    %226 = vector.extract_strided_slice %221 {offsets = [0, 128], sizes = [128, 128], strides = [1, 1]} : vector<128x256xf32> to vector<128x128xf32>
    %c1_238 = arith.constant 1 : index
    %c0_239 = arith.constant 0 : index
    %c0_240 = arith.constant 0 : index
    %227 = vector.load %arg11[%c1_238, %c0_239, %c0_240] : memref<2x128x128xf32, #tpu.memory_space<vmem>>, vector<1x128x128xf32>
    %228 = vector.shape_cast %227 : vector<1x128x128xf32> to vector<128x128xf32>
    %229 = vector.shape_cast %226 : vector<128x128xf32> to vector<1x128x128xf32>
    tpu.vector_store %arg11[%c1_238, %c0_239, %c0_240], %229 {strides = array<i32>} : memref<2x128x128xf32, #tpu.memory_space<vmem>>, vector<1x128x128xf32>,
    return
  }
}

module attributes {stable_mosaic.version = 11 : i64} {
  func.func @_proj_kernel(%arg0: i32, %arg1: memref<64x32xbf16, #tpu.memory_space<vmem>>, %arg2: memref<64x32xbf16, #tpu.memory_space<vmem>>, %arg3: memref<2x32x256xbf16, #tpu.memory_space<vmem>>, %arg4: memref<1x256xf32, #tpu.memory_space<vmem>>, %arg5: memref<2x64x128xf32, #tpu.memory_space<vmem>>) attributes {dimension_semantics = [#tpu.dimension_semantics<parallel>], iteration_bounds = array<i64: 2>, scalar_prefetch = 0 : i64, scratch_operands = 0 : i64, tpu.core_type = #tpu.core_type<tc>, window_params = [{transform_indices = @transform_0, window_bounds = array<i64: 64, 32>}, {transform_indices = @transform_1, window_bounds = array<i64: 64, 32>}, {pipeline_mode = #tpu.pipeline_mode<synchronous>, transform_indices = @transform_2, window_bounds = array<i64: 2, 32, 256>}, {pipeline_mode = #tpu.pipeline_mode<synchronous>, transform_indices = @transform_3, window_bounds = array<i64: 1, 256>}, {transform_indices = @transform_4, window_bounds = array<i64: 2, 64, 128>}]} {
    %c0 = arith.constant 0 : index
    %c0_0 = arith.constant 0 : index
    %0 = vector.load %arg1[%c0, %c0_0] : memref<64x32xbf16, #tpu.memory_space<vmem>>, vector<64x32xbf16>
    %c0_1 = arith.constant 0 : index
    %c0_2 = arith.constant 0 : index
    %c0_3 = arith.constant 0 : index
    %1 = vector.load %arg3[%c0_1, %c0_2, %c0_3] : memref<2x32x256xbf16, #tpu.memory_space<vmem>>, vector<1x32x256xbf16>
    %2 = vector.shape_cast %1 : vector<1x32x256xbf16> to vector<32x256xbf16>
    %cst = arith.constant dense<0.000000e+00> : vector<64x256xf32>
    %3 = tpu.matmul %0, %2, %cst {dimension_numbers = #tpu.dot_dimension_numbers<[1], [0], [0], [1], [0, 0, 1, 1], [], []>} : vector<64x32xbf16>, vector<32x256xbf16>, vector<64x256xf32> -> vector<64x256xf32>
    %c0_4 = arith.constant 0 : index
    %c0_5 = arith.constant 0 : index
    %4 = vector.load %arg2[%c0_4, %c0_5] : memref<64x32xbf16, #tpu.memory_space<vmem>>, vector<64x32xbf16>
    %c1 = arith.constant 1 : index
    %c0_6 = arith.constant 0 : index
    %c0_7 = arith.constant 0 : index
    %5 = vector.load %arg3[%c1, %c0_6, %c0_7] : memref<2x32x256xbf16, #tpu.memory_space<vmem>>, vector<1x32x256xbf16>
    %6 = vector.shape_cast %5 : vector<1x32x256xbf16> to vector<32x256xbf16>
    %cst_8 = arith.constant dense<0.000000e+00> : vector<64x256xf32>
    %7 = tpu.matmul %4, %6, %cst_8 {dimension_numbers = #tpu.dot_dimension_numbers<[1], [0], [0], [1], [0, 0, 1, 1], [], []>} : vector<64x32xbf16>, vector<32x256xbf16>, vector<64x256xf32> -> vector<64x256xf32>
    %8 = arith.addf %3, %7 : vector<64x256xf32>
    %c0_9 = arith.constant 0 : index
    %c0_10 = arith.constant 0 : index
    %9 = vector.load %arg4[%c0_9, %c0_10] : memref<1x256xf32, #tpu.memory_space<vmem>>, vector<1x256xf32>
    %10 = vector.broadcast %9 : vector<1x256xf32> to vector<64x256xf32>
    %11 = arith.addf %8, %10 : vector<64x256xf32>
    %12 = vector.extract_strided_slice %11 {offsets = [0, 0], sizes = [64, 128], strides = [1, 1]} : vector<64x256xf32> to vector<64x128xf32>
    %c0_11 = arith.constant 0 : index
    %c0_12 = arith.constant 0 : index
    %c0_13 = arith.constant 0 : index
    %13 = vector.load %arg5[%c0_11, %c0_12, %c0_13] : memref<2x64x128xf32, #tpu.memory_space<vmem>>, vector<1x64x128xf32>
    %14 = vector.shape_cast %13 : vector<1x64x128xf32> to vector<64x128xf32>
    %15 = vector.shape_cast %12 : vector<64x128xf32> to vector<1x64x128xf32>
    tpu.vector_store %arg5[%c0_11, %c0_12, %c0_13], %15 {strides = array<i32>} : memref<2x64x128xf32, #tpu.memory_space<vmem>>, vector<1x64x128xf32>,
    %16 = vector.extract_strided_slice %11 {offsets = [0, 128], sizes = [64, 128], strides = [1, 1]} : vector<64x256xf32> to vector<64x128xf32>
    %c1_14 = arith.constant 1 : index
    %c0_15 = arith.constant 0 : index
    %c0_16 = arith.constant 0 : index
    %17 = vector.load %arg5[%c1_14, %c0_15, %c0_16] : memref<2x64x128xf32, #tpu.memory_space<vmem>>, vector<1x64x128xf32>
    %18 = vector.shape_cast %17 : vector<1x64x128xf32> to vector<64x128xf32>
    %19 = vector.shape_cast %16 : vector<64x128xf32> to vector<1x64x128xf32>
    tpu.vector_store %arg5[%c1_14, %c0_15, %c0_16], %19 {strides = array<i32>} : memref<2x64x128xf32, #tpu.memory_space<vmem>>, vector<1x64x128xf32>,
    return
  }
  func.func @transform_0(%arg0: i32) -> (i32, i32) {
    %c0_i32 = arith.constant 0 : i32
    %c0_i32_0 = arith.constant 0 : i32
    return %arg0, %c0_i32 : i32, i32
  }
  func.func @transform_1(%arg0: i32) -> (i32, i32) {
    %c0_i32 = arith.constant 0 : i32
    %c0_i32_0 = arith.constant 0 : i32
    return %arg0, %c0_i32 : i32, i32
  }
  func.func @transform_2(%arg0: i32) -> (i32, i32, i32) {
    %c0_i32 = arith.constant 0 : i32
    %c0_i32_0 = arith.constant 0 : i32
    %c0_i32_1 = arith.constant 0 : i32
    %c0_i32_2 = arith.constant 0 : i32
    return %c0_i32, %c0_i32_0, %c0_i32_1 : i32, i32, i32
  }
  func.func @transform_3(%arg0: i32) -> (i32, i32) {
    %c0_i32 = arith.constant 0 : i32
    %c0_i32_0 = arith.constant 0 : i32
    %c0_i32_1 = arith.constant 0 : i32
    return %c0_i32, %c0_i32_0 : i32, i32
  }
  func.func @transform_4(%arg0: i32) -> (i32, i32, i32) {
    %c0_i32 = arith.constant 0 : i32
    %c0_i32_0 = arith.constant 0 : i32
    %c0_i32_1 = arith.constant 0 : i32
    return %c0_i32, %arg0, %c0_i32_0 : i32, i32, i32
  }
}

module attributes {stable_mosaic.version = 11 : i64} {
  func.func @kernel(%arg0: i32, %arg1: memref<1x64x128xf32, #tpu.memory_space<vmem>>, %arg2: memref<1x64x128xf32, #tpu.memory_space<vmem>>, %arg3: memref<2x32x128xbf16, #tpu.memory_space<vmem>>, %arg4: memref<64x32xbf16, #tpu.memory_space<vmem>>, %arg5: memref<64x32xbf16, #tpu.memory_space<vmem>>, %arg6: memref<8x32xf32, #tpu.memory_space<vmem>>, %arg7: memref<8x32xf32, #tpu.memory_space<vmem>>, %arg8: memref<8x32xf32, #tpu.memory_space<vmem>>, %arg9: memref<8x32xf32, #tpu.memory_space<vmem>>) attributes {dimension_semantics = [#tpu.dimension_semantics<arbitrary>], iteration_bounds = array<i64: 2>, scalar_prefetch = 0 : i64, scratch_operands = 4 : i64, tpu.core_type = #tpu.core_type<tc>, window_params = [{transform_indices = @transform_0, window_bounds = array<i64: 1, 64, 128>}, {transform_indices = @transform_1, window_bounds = array<i64: 1, 64, 128>}, {pipeline_mode = #tpu.pipeline_mode<synchronous>, transform_indices = @transform_2, window_bounds = array<i64: 2, 32, 128>}, {transform_indices = @transform_3, window_bounds = array<i64: 64, 32>}, {transform_indices = @transform_4, window_bounds = array<i64: 64, 32>}]} {
    %c0_i32 = arith.constant 0 : i32
    %0 = arith.cmpi eq, %arg0, %c0_i32 : i32
    %1 = arith.extui %0 : i1 to i32
    %c0_i32_0 = arith.constant 0 : i32
    %2 = arith.cmpi ne, %1, %c0_i32_0 : i32
    scf.if %2 {
      %cst_157 = arith.constant 0.000000e+00 : f32
      %399 = vector.broadcast %cst_157 : f32 to vector<8x32xf32>
      %c0_158 = arith.constant 0 : index
      %c0_159 = arith.constant 0 : index
      %400 = vector.load %arg6[%c0_158, %c0_159] : memref<8x32xf32, #tpu.memory_space<vmem>>, vector<8x32xf32>
      tpu.vector_store %arg6[%c0_158, %c0_159], %399 {strides = array<i32>} : memref<8x32xf32, #tpu.memory_space<vmem>>, vector<8x32xf32>,
      %cst_160 = arith.constant 0.000000e+00 : f32
      %401 = vector.broadcast %cst_160 : f32 to vector<8x32xf32>
      %c0_161 = arith.constant 0 : index
      %c0_162 = arith.constant 0 : index
      %402 = vector.load %arg7[%c0_161, %c0_162] : memref<8x32xf32, #tpu.memory_space<vmem>>, vector<8x32xf32>
      tpu.vector_store %arg7[%c0_161, %c0_162], %401 {strides = array<i32>} : memref<8x32xf32, #tpu.memory_space<vmem>>, vector<8x32xf32>,
      %cst_163 = arith.constant 0.000000e+00 : f32
      %403 = vector.broadcast %cst_163 : f32 to vector<8x32xf32>
      %c0_164 = arith.constant 0 : index
      %c0_165 = arith.constant 0 : index
      %404 = vector.load %arg8[%c0_164, %c0_165] : memref<8x32xf32, #tpu.memory_space<vmem>>, vector<8x32xf32>
      tpu.vector_store %arg8[%c0_164, %c0_165], %403 {strides = array<i32>} : memref<8x32xf32, #tpu.memory_space<vmem>>, vector<8x32xf32>,
      %cst_166 = arith.constant 0.000000e+00 : f32
      %405 = vector.broadcast %cst_166 : f32 to vector<8x32xf32>
      %c0_167 = arith.constant 0 : index
      %c0_168 = arith.constant 0 : index
      %406 = vector.load %arg9[%c0_167, %c0_168] : memref<8x32xf32, #tpu.memory_space<vmem>>, vector<8x32xf32>
      tpu.vector_store %arg9[%c0_167, %c0_168], %405 {strides = array<i32>} : memref<8x32xf32, #tpu.memory_space<vmem>>, vector<8x32xf32>,
    } else {
    }
    %c0 = arith.constant 0 : index
    %c0_1 = arith.constant 0 : index
    %c0_2 = arith.constant 0 : index
    %3 = vector.load %arg3[%c0, %c0_1, %c0_2] : memref<2x32x128xbf16, #tpu.memory_space<vmem>>, vector<1x32x128xbf16>
    %4 = vector.shape_cast %3 : vector<1x32x128xbf16> to vector<32x128xbf16>
    %c1 = arith.constant 1 : index
    %c0_3 = arith.constant 0 : index
    %c0_4 = arith.constant 0 : index
    %5 = vector.load %arg3[%c1, %c0_3, %c0_4] : memref<2x32x128xbf16, #tpu.memory_space<vmem>>, vector<1x32x128xbf16>
    %6 = vector.shape_cast %5 : vector<1x32x128xbf16> to vector<32x128xbf16>
    %c0_5 = arith.constant 0 : index
    %c0_6 = arith.constant 0 : index
    %7 = vector.load %arg6[%c0_5, %c0_6] : memref<8x32xf32, #tpu.memory_space<vmem>>, vector<8x32xf32>
    %c0_7 = arith.constant 0 : index
    %c0_8 = arith.constant 0 : index
    %8 = vector.load %arg7[%c0_7, %c0_8] : memref<8x32xf32, #tpu.memory_space<vmem>>, vector<8x32xf32>
    %c0_9 = arith.constant 0 : index
    %c0_10 = arith.constant 0 : index
    %9 = vector.load %arg8[%c0_9, %c0_10] : memref<8x32xf32, #tpu.memory_space<vmem>>, vector<8x32xf32>
    %c0_11 = arith.constant 0 : index
    %c0_12 = arith.constant 0 : index
    %10 = vector.load %arg9[%c0_11, %c0_12] : memref<8x32xf32, #tpu.memory_space<vmem>>, vector<8x32xf32>
    %11 = arith.truncf %7 : vector<8x32xf32> to vector<8x32xbf16>
    %cst = arith.constant dense<0.000000e+00> : vector<8x128xf32>
    %12 = tpu.matmul %11, %4, %cst {dimension_numbers = #tpu.dot_dimension_numbers<[1], [0], [0], [1], [0, 0, 1, 1], [], []>} : vector<8x32xbf16>, vector<32x128xbf16>, vector<8x128xf32> -> vector<8x128xf32>
    %c0_i32_13 = arith.constant 0 : i32
    %c0_i32_14 = arith.constant 0 : i32
    %c0_i32_15 = arith.constant 0 : i32
    %13 = tpu.memref_slice %arg1[%c0_i32_13, %c0_i32_14, %c0_i32_15] : memref<1x64x128xf32, #tpu.memory_space<vmem>> -> memref<1x64x128xf32, #tpu.memory_space<vmem>>
    %14 = tpu.memref_squeeze %13 : memref<1x64x128xf32, #tpu.memory_space<vmem>> -> memref<64x128xf32, #tpu.memory_space<vmem>>
    %c0_16 = arith.constant 0 : index
    %c0_17 = arith.constant 0 : index
    %15 = vector.load %14[%c0_16, %c0_17] : memref<64x128xf32, #tpu.memory_space<vmem>>, vector<8x128xf32>
    %16 = arith.addf %12, %15 : vector<8x128xf32>
    %17 = arith.truncf %9 : vector<8x32xf32> to vector<8x32xbf16>
    %cst_18 = arith.constant dense<0.000000e+00> : vector<8x128xf32>
    %18 = tpu.matmul %17, %6, %cst_18 {dimension_numbers = #tpu.dot_dimension_numbers<[1], [0], [0], [1], [0, 0, 1, 1], [], []>} : vector<8x32xbf16>, vector<32x128xbf16>, vector<8x128xf32> -> vector<8x128xf32>
    %c0_i32_19 = arith.constant 0 : i32
    %c0_i32_20 = arith.constant 0 : i32
    %c0_i32_21 = arith.constant 0 : i32
    %19 = tpu.memref_slice %arg2[%c0_i32_19, %c0_i32_20, %c0_i32_21] : memref<1x64x128xf32, #tpu.memory_space<vmem>> -> memref<1x64x128xf32, #tpu.memory_space<vmem>>
    %20 = tpu.memref_squeeze %19 : memref<1x64x128xf32, #tpu.memory_space<vmem>> -> memref<64x128xf32, #tpu.memory_space<vmem>>
    %c56 = arith.constant 56 : index
    %c0_22 = arith.constant 0 : index
    %21 = vector.load %20[%c56, %c0_22] : memref<64x128xf32, #tpu.memory_space<vmem>>, vector<8x128xf32>
    %22 = arith.addf %18, %21 : vector<8x128xf32>
    %23 = vector.extract_strided_slice %16 {offsets = [0, 0], sizes = [8, 96], strides = [1, 1]} : vector<8x128xf32> to vector<8x96xf32>
    %24 = arith.negf %23 : vector<8x96xf32>
    %25 = math.exp %24 : vector<8x96xf32>
    %cst_23 = arith.constant 1.000000e+00 : f32
    %26 = vector.broadcast %cst_23 : f32 to vector<8x96xf32>
    %27 = arith.addf %26, %25 : vector<8x96xf32>
    %28 = arith.divf %26, %27 : vector<8x96xf32>
    %29 = vector.extract_strided_slice %16 {offsets = [0, 96], sizes = [8, 32], strides = [1, 1]} : vector<8x128xf32> to vector<8x32xf32>
    %30 = math.tanh %29 : vector<8x32xf32>
    %31 = vector.extract_strided_slice %28 {offsets = [0, 32], sizes = [8, 32], strides = [1, 1]} : vector<8x96xf32> to vector<8x32xf32>
    %32 = arith.mulf %31, %8 : vector<8x32xf32>
    %33 = vector.extract_strided_slice %28 {offsets = [0, 0], sizes = [8, 32], strides = [1, 1]} : vector<8x96xf32> to vector<8x32xf32>
    %34 = arith.mulf %33, %30 : vector<8x32xf32>
    %35 = arith.addf %32, %34 : vector<8x32xf32>
    %36 = vector.extract_strided_slice %28 {offsets = [0, 64], sizes = [8, 32], strides = [1, 1]} : vector<8x96xf32> to vector<8x32xf32>
    %37 = math.tanh %35 : vector<8x32xf32>
    %38 = arith.mulf %36, %37 : vector<8x32xf32>
    %39 = vector.extract_strided_slice %22 {offsets = [0, 0], sizes = [8, 96], strides = [1, 1]} : vector<8x128xf32> to vector<8x96xf32>
    %40 = arith.negf %39 : vector<8x96xf32>
    %41 = math.exp %40 : vector<8x96xf32>
    %cst_24 = arith.constant 1.000000e+00 : f32
    %42 = vector.broadcast %cst_24 : f32 to vector<8x96xf32>
    %43 = arith.addf %42, %41 : vector<8x96xf32>
    %44 = arith.divf %42, %43 : vector<8x96xf32>
    %45 = vector.extract_strided_slice %22 {offsets = [0, 96], sizes = [8, 32], strides = [1, 1]} : vector<8x128xf32> to vector<8x32xf32>
    %46 = math.tanh %45 : vector<8x32xf32>
    %47 = vector.extract_strided_slice %44 {offsets = [0, 32], sizes = [8, 32], strides = [1, 1]} : vector<8x96xf32> to vector<8x32xf32>
    %48 = arith.mulf %47, %10 : vector<8x32xf32>
    %49 = vector.extract_strided_slice %44 {offsets = [0, 0], sizes = [8, 32], strides = [1, 1]} : vector<8x96xf32> to vector<8x32xf32>
    %50 = arith.mulf %49, %46 : vector<8x32xf32>
    %51 = arith.addf %48, %50 : vector<8x32xf32>
    %52 = vector.extract_strided_slice %44 {offsets = [0, 64], sizes = [8, 32], strides = [1, 1]} : vector<8x96xf32> to vector<8x32xf32>
    %53 = math.tanh %51 : vector<8x32xf32>
    %54 = arith.mulf %52, %53 : vector<8x32xf32>
    %55 = arith.truncf %38 : vector<8x32xf32> to vector<8x32xbf16>
    %c0_25 = arith.constant 0 : index
    %c0_26 = arith.constant 0 : index
    %56 = vector.load %arg4[%c0_25, %c0_26] : memref<64x32xbf16, #tpu.memory_space<vmem>>, vector<8x32xbf16>
    tpu.vector_store %arg4[%c0_25, %c0_26], %55 {strides = array<i32>} : memref<64x32xbf16, #tpu.memory_space<vmem>>, vector<8x32xbf16>,
    %57 = arith.truncf %54 : vector<8x32xf32> to vector<8x32xbf16>
    %c56_27 = arith.constant 56 : index
    %c0_28 = arith.constant 0 : index
    %58 = vector.load %arg5[%c56_27, %c0_28] : memref<64x32xbf16, #tpu.memory_space<vmem>>, vector<8x32xbf16>
    tpu.vector_store %arg5[%c56_27, %c0_28], %57 {strides = array<i32>} : memref<64x32xbf16, #tpu.memory_space<vmem>>, vector<8x32xbf16>,
    %59 = arith.truncf %38 : vector<8x32xf32> to vector<8x32xbf16>
    %cst_29 = arith.constant dense<0.000000e+00> : vector<8x128xf32>
    %60 = tpu.matmul %59, %4, %cst_29 {dimension_numbers = #tpu.dot_dimension_numbers<[1], [0], [0], [1], [0, 0, 1, 1], [], []>} : vector<8x32xbf16>, vector<32x128xbf16>, vector<8x128xf32> -> vector<8x128xf32>
    %c0_i32_30 = arith.constant 0 : i32
    %c0_i32_31 = arith.constant 0 : i32
    %c0_i32_32 = arith.constant 0 : i32
    %61 = tpu.memref_slice %arg1[%c0_i32_30, %c0_i32_31, %c0_i32_32] : memref<1x64x128xf32, #tpu.memory_space<vmem>> -> memref<1x64x128xf32, #tpu.memory_space<vmem>>
    %62 = tpu.memref_squeeze %61 : memref<1x64x128xf32, #tpu.memory_space<vmem>> -> memref<64x128xf32, #tpu.memory_space<vmem>>
    %c8 = arith.constant 8 : index
    %c0_33 = arith.constant 0 : index
    %63 = vector.load %62[%c8, %c0_33] : memref<64x128xf32, #tpu.memory_space<vmem>>, vector<8x128xf32>
    %64 = arith.addf %60, %63 : vector<8x128xf32>
    %65 = arith.truncf %54 : vector<8x32xf32> to vector<8x32xbf16>
    %cst_34 = arith.constant dense<0.000000e+00> : vector<8x128xf32>
    %66 = tpu.matmul %65, %6, %cst_34 {dimension_numbers = #tpu.dot_dimension_numbers<[1], [0], [0], [1], [0, 0, 1, 1], [], []>} : vector<8x32xbf16>, vector<32x128xbf16>, vector<8x128xf32> -> vector<8x128xf32>
    %c0_i32_35 = arith.constant 0 : i32
    %c0_i32_36 = arith.constant 0 : i32
    %c0_i32_37 = arith.constant 0 : i32
    %67 = tpu.memref_slice %arg2[%c0_i32_35, %c0_i32_36, %c0_i32_37] : memref<1x64x128xf32, #tpu.memory_space<vmem>> -> memref<1x64x128xf32, #tpu.memory_space<vmem>>
    %68 = tpu.memref_squeeze %67 : memref<1x64x128xf32, #tpu.memory_space<vmem>> -> memref<64x128xf32, #tpu.memory_space<vmem>>
    %c48 = arith.constant 48 : index
    %c0_38 = arith.constant 0 : index
    %69 = vector.load %68[%c48, %c0_38] : memref<64x128xf32, #tpu.memory_space<vmem>>, vector<8x128xf32>
    %70 = arith.addf %66, %69 : vector<8x128xf32>
    %71 = vector.extract_strided_slice %64 {offsets = [0, 0], sizes = [8, 96], strides = [1, 1]} : vector<8x128xf32> to vector<8x96xf32>
    %72 = arith.negf %71 : vector<8x96xf32>
    %73 = math.exp %72 : vector<8x96xf32>
    %cst_39 = arith.constant 1.000000e+00 : f32
    %74 = vector.broadcast %cst_39 : f32 to vector<8x96xf32>
    %75 = arith.addf %74, %73 : vector<8x96xf32>
    %76 = arith.divf %74, %75 : vector<8x96xf32>
    %77 = vector.extract_strided_slice %64 {offsets = [0, 96], sizes = [8, 32], strides = [1, 1]} : vector<8x128xf32> to vector<8x32xf32>
    %78 = math.tanh %77 : vector<8x32xf32>
    %79 = vector.extract_strided_slice %76 {offsets = [0, 32], sizes = [8, 32], strides = [1, 1]} : vector<8x96xf32> to vector<8x32xf32>
    %80 = arith.mulf %79, %35 : vector<8x32xf32>
    %81 = vector.extract_strided_slice %76 {offsets = [0, 0], sizes = [8, 32], strides = [1, 1]} : vector<8x96xf32> to vector<8x32xf32>
    %82 = arith.mulf %81, %78 : vector<8x32xf32>
    %83 = arith.addf %80, %82 : vector<8x32xf32>
    %84 = vector.extract_strided_slice %76 {offsets = [0, 64], sizes = [8, 32], strides = [1, 1]} : vector<8x96xf32> to vector<8x32xf32>
    %85 = math.tanh %83 : vector<8x32xf32>
    %86 = arith.mulf %84, %85 : vector<8x32xf32>
    %87 = vector.extract_strided_slice %70 {offsets = [0, 0], sizes = [8, 96], strides = [1, 1]} : vector<8x128xf32> to vector<8x96xf32>
    %88 = arith.negf %87 : vector<8x96xf32>
    %89 = math.exp %88 : vector<8x96xf32>
    %cst_40 = arith.constant 1.000000e+00 : f32
    %90 = vector.broadcast %cst_40 : f32 to vector<8x96xf32>
    %91 = arith.addf %90, %89 : vector<8x96xf32>
    %92 = arith.divf %90, %91 : vector<8x96xf32>
    %93 = vector.extract_strided_slice %70 {offsets = [0, 96], sizes = [8, 32], strides = [1, 1]} : vector<8x128xf32> to vector<8x32xf32>
    %94 = math.tanh %93 : vector<8x32xf32>
    %95 = vector.extract_strided_slice %92 {offsets = [0, 32], sizes = [8, 32], strides = [1, 1]} : vector<8x96xf32> to vector<8x32xf32>
    %96 = arith.mulf %95, %51 : vector<8x32xf32>
    %97 = vector.extract_strided_slice %92 {offsets = [0, 0], sizes = [8, 32], strides = [1, 1]} : vector<8x96xf32> to vector<8x32xf32>
    %98 = arith.mulf %97, %94 : vector<8x32xf32>
    %99 = arith.addf %96, %98 : vector<8x32xf32>
    %100 = vector.extract_strided_slice %92 {offsets = [0, 64], sizes = [8, 32], strides = [1, 1]} : vector<8x96xf32> to vector<8x32xf32>
    %101 = math.tanh %99 : vector<8x32xf32>
    %102 = arith.mulf %100, %101 : vector<8x32xf32>
    %103 = arith.truncf %86 : vector<8x32xf32> to vector<8x32xbf16>
    %c8_41 = arith.constant 8 : index
    %c0_42 = arith.constant 0 : index
    %104 = vector.load %arg4[%c8_41, %c0_42] : memref<64x32xbf16, #tpu.memory_space<vmem>>, vector<8x32xbf16>
    tpu.vector_store %arg4[%c8_41, %c0_42], %103 {strides = array<i32>} : memref<64x32xbf16, #tpu.memory_space<vmem>>, vector<8x32xbf16>,
    %105 = arith.truncf %102 : vector<8x32xf32> to vector<8x32xbf16>
    %c48_43 = arith.constant 48 : index
    %c0_44 = arith.constant 0 : index
    %106 = vector.load %arg5[%c48_43, %c0_44] : memref<64x32xbf16, #tpu.memory_space<vmem>>, vector<8x32xbf16>
    tpu.vector_store %arg5[%c48_43, %c0_44], %105 {strides = array<i32>} : memref<64x32xbf16, #tpu.memory_space<vmem>>, vector<8x32xbf16>,
    %107 = arith.truncf %86 : vector<8x32xf32> to vector<8x32xbf16>
    %cst_45 = arith.constant dense<0.000000e+00> : vector<8x128xf32>
    %108 = tpu.matmul %107, %4, %cst_45 {dimension_numbers = #tpu.dot_dimension_numbers<[1], [0], [0], [1], [0, 0, 1, 1], [], []>} : vector<8x32xbf16>, vector<32x128xbf16>, vector<8x128xf32> -> vector<8x128xf32>
    %c0_i32_46 = arith.constant 0 : i32
    %c0_i32_47 = arith.constant 0 : i32
    %c0_i32_48 = arith.constant 0 : i32
    %109 = tpu.memref_slice %arg1[%c0_i32_46, %c0_i32_47, %c0_i32_48] : memref<1x64x128xf32, #tpu.memory_space<vmem>> -> memref<1x64x128xf32, #tpu.memory_space<vmem>>
    %110 = tpu.memref_squeeze %109 : memref<1x64x128xf32, #tpu.memory_space<vmem>> -> memref<64x128xf32, #tpu.memory_space<vmem>>
    %c16 = arith.constant 16 : index
    %c0_49 = arith.constant 0 : index
    %111 = vector.load %110[%c16, %c0_49] : memref<64x128xf32, #tpu.memory_space<vmem>>, vector<8x128xf32>
    %112 = arith.addf %108, %111 : vector<8x128xf32>
    %113 = arith.truncf %102 : vector<8x32xf32> to vector<8x32xbf16>
    %cst_50 = arith.constant dense<0.000000e+00> : vector<8x128xf32>
    %114 = tpu.matmul %113, %6, %cst_50 {dimension_numbers = #tpu.dot_dimension_numbers<[1], [0], [0], [1], [0, 0, 1, 1], [], []>} : vector<8x32xbf16>, vector<32x128xbf16>, vector<8x128xf32> -> vector<8x128xf32>
    %c0_i32_51 = arith.constant 0 : i32
    %c0_i32_52 = arith.constant 0 : i32
    %c0_i32_53 = arith.constant 0 : i32
    %115 = tpu.memref_slice %arg2[%c0_i32_51, %c0_i32_52, %c0_i32_53] : memref<1x64x128xf32, #tpu.memory_space<vmem>> -> memref<1x64x128xf32, #tpu.memory_space<vmem>>
    %116 = tpu.memref_squeeze %115 : memref<1x64x128xf32, #tpu.memory_space<vmem>> -> memref<64x128xf32, #tpu.memory_space<vmem>>
    %c40 = arith.constant 40 : index
    %c0_54 = arith.constant 0 : index
    %117 = vector.load %116[%c40, %c0_54] : memref<64x128xf32, #tpu.memory_space<vmem>>, vector<8x128xf32>
    %118 = arith.addf %114, %117 : vector<8x128xf32>
    %119 = vector.extract_strided_slice %112 {offsets = [0, 0], sizes = [8, 96], strides = [1, 1]} : vector<8x128xf32> to vector<8x96xf32>
    %120 = arith.negf %119 : vector<8x96xf32>
    %121 = math.exp %120 : vector<8x96xf32>
    %cst_55 = arith.constant 1.000000e+00 : f32
    %122 = vector.broadcast %cst_55 : f32 to vector<8x96xf32>
    %123 = arith.addf %122, %121 : vector<8x96xf32>
    %124 = arith.divf %122, %123 : vector<8x96xf32>
    %125 = vector.extract_strided_slice %112 {offsets = [0, 96], sizes = [8, 32], strides = [1, 1]} : vector<8x128xf32> to vector<8x32xf32>
    %126 = math.tanh %125 : vector<8x32xf32>
    %127 = vector.extract_strided_slice %124 {offsets = [0, 32], sizes = [8, 32], strides = [1, 1]} : vector<8x96xf32> to vector<8x32xf32>
    %128 = arith.mulf %127, %83 : vector<8x32xf32>
    %129 = vector.extract_strided_slice %124 {offsets = [0, 0], sizes = [8, 32], strides = [1, 1]} : vector<8x96xf32> to vector<8x32xf32>
    %130 = arith.mulf %129, %126 : vector<8x32xf32>
    %131 = arith.addf %128, %130 : vector<8x32xf32>
    %132 = vector.extract_strided_slice %124 {offsets = [0, 64], sizes = [8, 32], strides = [1, 1]} : vector<8x96xf32> to vector<8x32xf32>
    %133 = math.tanh %131 : vector<8x32xf32>
    %134 = arith.mulf %132, %133 : vector<8x32xf32>
    %135 = vector.extract_strided_slice %118 {offsets = [0, 0], sizes = [8, 96], strides = [1, 1]} : vector<8x128xf32> to vector<8x96xf32>
    %136 = arith.negf %135 : vector<8x96xf32>
    %137 = math.exp %136 : vector<8x96xf32>
    %cst_56 = arith.constant 1.000000e+00 : f32
    %138 = vector.broadcast %cst_56 : f32 to vector<8x96xf32>
    %139 = arith.addf %138, %137 : vector<8x96xf32>
    %140 = arith.divf %138, %139 : vector<8x96xf32>
    %141 = vector.extract_strided_slice %118 {offsets = [0, 96], sizes = [8, 32], strides = [1, 1]} : vector<8x128xf32> to vector<8x32xf32>
    %142 = math.tanh %141 : vector<8x32xf32>
    %143 = vector.extract_strided_slice %140 {offsets = [0, 32], sizes = [8, 32], strides = [1, 1]} : vector<8x96xf32> to vector<8x32xf32>
    %144 = arith.mulf %143, %99 : vector<8x32xf32>
    %145 = vector.extract_strided_slice %140 {offsets = [0, 0], sizes = [8, 32], strides = [1, 1]} : vector<8x96xf32> to vector<8x32xf32>
    %146 = arith.mulf %145, %142 : vector<8x32xf32>
    %147 = arith.addf %144, %146 : vector<8x32xf32>
    %148 = vector.extract_strided_slice %140 {offsets = [0, 64], sizes = [8, 32], strides = [1, 1]} : vector<8x96xf32> to vector<8x32xf32>
    %149 = math.tanh %147 : vector<8x32xf32>
    %150 = arith.mulf %148, %149 : vector<8x32xf32>
    %151 = arith.truncf %134 : vector<8x32xf32> to vector<8x32xbf16>
    %c16_57 = arith.constant 16 : index
    %c0_58 = arith.constant 0 : index
    %152 = vector.load %arg4[%c16_57, %c0_58] : memref<64x32xbf16, #tpu.memory_space<vmem>>, vector<8x32xbf16>
    tpu.vector_store %arg4[%c16_57, %c0_58], %151 {strides = array<i32>} : memref<64x32xbf16, #tpu.memory_space<vmem>>, vector<8x32xbf16>,
    %153 = arith.truncf %150 : vector<8x32xf32> to vector<8x32xbf16>
    %c40_59 = arith.constant 40 : index
    %c0_60 = arith.constant 0 : index
    %154 = vector.load %arg5[%c40_59, %c0_60] : memref<64x32xbf16, #tpu.memory_space<vmem>>, vector<8x32xbf16>
    tpu.vector_store %arg5[%c40_59, %c0_60], %153 {strides = array<i32>} : memref<64x32xbf16, #tpu.memory_space<vmem>>, vector<8x32xbf16>,
    %155 = arith.truncf %134 : vector<8x32xf32> to vector<8x32xbf16>
    %cst_61 = arith.constant dense<0.000000e+00> : vector<8x128xf32>
    %156 = tpu.matmul %155, %4, %cst_61 {dimension_numbers = #tpu.dot_dimension_numbers<[1], [0], [0], [1], [0, 0, 1, 1], [], []>} : vector<8x32xbf16>, vector<32x128xbf16>, vector<8x128xf32> -> vector<8x128xf32>
    %c0_i32_62 = arith.constant 0 : i32
    %c0_i32_63 = arith.constant 0 : i32
    %c0_i32_64 = arith.constant 0 : i32
    %157 = tpu.memref_slice %arg1[%c0_i32_62, %c0_i32_63, %c0_i32_64] : memref<1x64x128xf32, #tpu.memory_space<vmem>> -> memref<1x64x128xf32, #tpu.memory_space<vmem>>
    %158 = tpu.memref_squeeze %157 : memref<1x64x128xf32, #tpu.memory_space<vmem>> -> memref<64x128xf32, #tpu.memory_space<vmem>>
    %c24 = arith.constant 24 : index
    %c0_65 = arith.constant 0 : index
    %159 = vector.load %158[%c24, %c0_65] : memref<64x128xf32, #tpu.memory_space<vmem>>, vector<8x128xf32>
    %160 = arith.addf %156, %159 : vector<8x128xf32>
    %161 = arith.truncf %150 : vector<8x32xf32> to vector<8x32xbf16>
    %cst_66 = arith.constant dense<0.000000e+00> : vector<8x128xf32>
    %162 = tpu.matmul %161, %6, %cst_66 {dimension_numbers = #tpu.dot_dimension_numbers<[1], [0], [0], [1], [0, 0, 1, 1], [], []>} : vector<8x32xbf16>, vector<32x128xbf16>, vector<8x128xf32> -> vector<8x128xf32>
    %c0_i32_67 = arith.constant 0 : i32
    %c0_i32_68 = arith.constant 0 : i32
    %c0_i32_69 = arith.constant 0 : i32
    %163 = tpu.memref_slice %arg2[%c0_i32_67, %c0_i32_68, %c0_i32_69] : memref<1x64x128xf32, #tpu.memory_space<vmem>> -> memref<1x64x128xf32, #tpu.memory_space<vmem>>
    %164 = tpu.memref_squeeze %163 : memref<1x64x128xf32, #tpu.memory_space<vmem>> -> memref<64x128xf32, #tpu.memory_space<vmem>>
    %c32 = arith.constant 32 : index
    %c0_70 = arith.constant 0 : index
    %165 = vector.load %164[%c32, %c0_70] : memref<64x128xf32, #tpu.memory_space<vmem>>, vector<8x128xf32>
    %166 = arith.addf %162, %165 : vector<8x128xf32>
    %167 = vector.extract_strided_slice %160 {offsets = [0, 0], sizes = [8, 96], strides = [1, 1]} : vector<8x128xf32> to vector<8x96xf32>
    %168 = arith.negf %167 : vector<8x96xf32>
    %169 = math.exp %168 : vector<8x96xf32>
    %cst_71 = arith.constant 1.000000e+00 : f32
    %170 = vector.broadcast %cst_71 : f32 to vector<8x96xf32>
    %171 = arith.addf %170, %169 : vector<8x96xf32>
    %172 = arith.divf %170, %171 : vector<8x96xf32>
    %173 = vector.extract_strided_slice %160 {offsets = [0, 96], sizes = [8, 32], strides = [1, 1]} : vector<8x128xf32> to vector<8x32xf32>
    %174 = math.tanh %173 : vector<8x32xf32>
    %175 = vector.extract_strided_slice %172 {offsets = [0, 32], sizes = [8, 32], strides = [1, 1]} : vector<8x96xf32> to vector<8x32xf32>
    %176 = arith.mulf %175, %131 : vector<8x32xf32>
    %177 = vector.extract_strided_slice %172 {offsets = [0, 0], sizes = [8, 32], strides = [1, 1]} : vector<8x96xf32> to vector<8x32xf32>
    %178 = arith.mulf %177, %174 : vector<8x32xf32>
    %179 = arith.addf %176, %178 : vector<8x32xf32>
    %180 = vector.extract_strided_slice %172 {offsets = [0, 64], sizes = [8, 32], strides = [1, 1]} : vector<8x96xf32> to vector<8x32xf32>
    %181 = math.tanh %179 : vector<8x32xf32>
    %182 = arith.mulf %180, %181 : vector<8x32xf32>
    %183 = vector.extract_strided_slice %166 {offsets = [0, 0], sizes = [8, 96], strides = [1, 1]} : vector<8x128xf32> to vector<8x96xf32>
    %184 = arith.negf %183 : vector<8x96xf32>
    %185 = math.exp %184 : vector<8x96xf32>
    %cst_72 = arith.constant 1.000000e+00 : f32
    %186 = vector.broadcast %cst_72 : f32 to vector<8x96xf32>
    %187 = arith.addf %186, %185 : vector<8x96xf32>
    %188 = arith.divf %186, %187 : vector<8x96xf32>
    %189 = vector.extract_strided_slice %166 {offsets = [0, 96], sizes = [8, 32], strides = [1, 1]} : vector<8x128xf32> to vector<8x32xf32>
    %190 = math.tanh %189 : vector<8x32xf32>
    %191 = vector.extract_strided_slice %188 {offsets = [0, 32], sizes = [8, 32], strides = [1, 1]} : vector<8x96xf32> to vector<8x32xf32>
    %192 = arith.mulf %191, %147 : vector<8x32xf32>
    %193 = vector.extract_strided_slice %188 {offsets = [0, 0], sizes = [8, 32], strides = [1, 1]} : vector<8x96xf32> to vector<8x32xf32>
    %194 = arith.mulf %193, %190 : vector<8x32xf32>
    %195 = arith.addf %192, %194 : vector<8x32xf32>
    %196 = vector.extract_strided_slice %188 {offsets = [0, 64], sizes = [8, 32], strides = [1, 1]} : vector<8x96xf32> to vector<8x32xf32>
    %197 = math.tanh %195 : vector<8x32xf32>
    %198 = arith.mulf %196, %197 : vector<8x32xf32>
    %199 = arith.truncf %182 : vector<8x32xf32> to vector<8x32xbf16>
    %c24_73 = arith.constant 24 : index
    %c0_74 = arith.constant 0 : index
    %200 = vector.load %arg4[%c24_73, %c0_74] : memref<64x32xbf16, #tpu.memory_space<vmem>>, vector<8x32xbf16>
    tpu.vector_store %arg4[%c24_73, %c0_74], %199 {strides = array<i32>} : memref<64x32xbf16, #tpu.memory_space<vmem>>, vector<8x32xbf16>,
    %201 = arith.truncf %198 : vector<8x32xf32> to vector<8x32xbf16>
    %c32_75 = arith.constant 32 : index
    %c0_76 = arith.constant 0 : index
    %202 = vector.load %arg5[%c32_75, %c0_76] : memref<64x32xbf16, #tpu.memory_space<vmem>>, vector<8x32xbf16>
    tpu.vector_store %arg5[%c32_75, %c0_76], %201 {strides = array<i32>} : memref<64x32xbf16, #tpu.memory_space<vmem>>, vector<8x32xbf16>,
    %203 = arith.truncf %182 : vector<8x32xf32> to vector<8x32xbf16>
    %cst_77 = arith.constant dense<0.000000e+00> : vector<8x128xf32>
    %204 = tpu.matmul %203, %4, %cst_77 {dimension_numbers = #tpu.dot_dimension_numbers<[1], [0], [0], [1], [0, 0, 1, 1], [], []>} : vector<8x32xbf16>, vector<32x128xbf16>, vector<8x128xf32> -> vector<8x128xf32>
    %c0_i32_78 = arith.constant 0 : i32
    %c0_i32_79 = arith.constant 0 : i32
    %c0_i32_80 = arith.constant 0 : i32
    %205 = tpu.memref_slice %arg1[%c0_i32_78, %c0_i32_79, %c0_i32_80] : memref<1x64x128xf32, #tpu.memory_space<vmem>> -> memref<1x64x128xf32, #tpu.memory_space<vmem>>
    %206 = tpu.memref_squeeze %205 : memref<1x64x128xf32, #tpu.memory_space<vmem>> -> memref<64x128xf32, #tpu.memory_space<vmem>>
    %c32_81 = arith.constant 32 : index
    %c0_82 = arith.constant 0 : index
    %207 = vector.load %206[%c32_81, %c0_82] : memref<64x128xf32, #tpu.memory_space<vmem>>, vector<8x128xf32>
    %208 = arith.addf %204, %207 : vector<8x128xf32>
    %209 = arith.truncf %198 : vector<8x32xf32> to vector<8x32xbf16>
    %cst_83 = arith.constant dense<0.000000e+00> : vector<8x128xf32>
    %210 = tpu.matmul %209, %6, %cst_83 {dimension_numbers = #tpu.dot_dimension_numbers<[1], [0], [0], [1], [0, 0, 1, 1], [], []>} : vector<8x32xbf16>, vector<32x128xbf16>, vector<8x128xf32> -> vector<8x128xf32>
    %c0_i32_84 = arith.constant 0 : i32
    %c0_i32_85 = arith.constant 0 : i32
    %c0_i32_86 = arith.constant 0 : i32
    %211 = tpu.memref_slice %arg2[%c0_i32_84, %c0_i32_85, %c0_i32_86] : memref<1x64x128xf32, #tpu.memory_space<vmem>> -> memref<1x64x128xf32, #tpu.memory_space<vmem>>
    %212 = tpu.memref_squeeze %211 : memref<1x64x128xf32, #tpu.memory_space<vmem>> -> memref<64x128xf32, #tpu.memory_space<vmem>>
    %c24_87 = arith.constant 24 : index
    %c0_88 = arith.constant 0 : index
    %213 = vector.load %212[%c24_87, %c0_88] : memref<64x128xf32, #tpu.memory_space<vmem>>, vector<8x128xf32>
    %214 = arith.addf %210, %213 : vector<8x128xf32>
    %215 = vector.extract_strided_slice %208 {offsets = [0, 0], sizes = [8, 96], strides = [1, 1]} : vector<8x128xf32> to vector<8x96xf32>
    %216 = arith.negf %215 : vector<8x96xf32>
    %217 = math.exp %216 : vector<8x96xf32>
    %cst_89 = arith.constant 1.000000e+00 : f32
    %218 = vector.broadcast %cst_89 : f32 to vector<8x96xf32>
    %219 = arith.addf %218, %217 : vector<8x96xf32>
    %220 = arith.divf %218, %219 : vector<8x96xf32>
    %221 = vector.extract_strided_slice %208 {offsets = [0, 96], sizes = [8, 32], strides = [1, 1]} : vector<8x128xf32> to vector<8x32xf32>
    %222 = math.tanh %221 : vector<8x32xf32>
    %223 = vector.extract_strided_slice %220 {offsets = [0, 32], sizes = [8, 32], strides = [1, 1]} : vector<8x96xf32> to vector<8x32xf32>
    %224 = arith.mulf %223, %179 : vector<8x32xf32>
    %225 = vector.extract_strided_slice %220 {offsets = [0, 0], sizes = [8, 32], strides = [1, 1]} : vector<8x96xf32> to vector<8x32xf32>
    %226 = arith.mulf %225, %222 : vector<8x32xf32>
    %227 = arith.addf %224, %226 : vector<8x32xf32>
    %228 = vector.extract_strided_slice %220 {offsets = [0, 64], sizes = [8, 32], strides = [1, 1]} : vector<8x96xf32> to vector<8x32xf32>
    %229 = math.tanh %227 : vector<8x32xf32>
    %230 = arith.mulf %228, %229 : vector<8x32xf32>
    %231 = vector.extract_strided_slice %214 {offsets = [0, 0], sizes = [8, 96], strides = [1, 1]} : vector<8x128xf32> to vector<8x96xf32>
    %232 = arith.negf %231 : vector<8x96xf32>
    %233 = math.exp %232 : vector<8x96xf32>
    %cst_90 = arith.constant 1.000000e+00 : f32
    %234 = vector.broadcast %cst_90 : f32 to vector<8x96xf32>
    %235 = arith.addf %234, %233 : vector<8x96xf32>
    %236 = arith.divf %234, %235 : vector<8x96xf32>
    %237 = vector.extract_strided_slice %214 {offsets = [0, 96], sizes = [8, 32], strides = [1, 1]} : vector<8x128xf32> to vector<8x32xf32>
    %238 = math.tanh %237 : vector<8x32xf32>
    %239 = vector.extract_strided_slice %236 {offsets = [0, 32], sizes = [8, 32], strides = [1, 1]} : vector<8x96xf32> to vector<8x32xf32>
    %240 = arith.mulf %239, %195 : vector<8x32xf32>
    %241 = vector.extract_strided_slice %236 {offsets = [0, 0], sizes = [8, 32], strides = [1, 1]} : vector<8x96xf32> to vector<8x32xf32>
    %242 = arith.mulf %241, %238 : vector<8x32xf32>
    %243 = arith.addf %240, %242 : vector<8x32xf32>
    %244 = vector.extract_strided_slice %236 {offsets = [0, 64], sizes = [8, 32], strides = [1, 1]} : vector<8x96xf32> to vector<8x32xf32>
    %245 = math.tanh %243 : vector<8x32xf32>
    %246 = arith.mulf %244, %245 : vector<8x32xf32>
    %247 = arith.truncf %230 : vector<8x32xf32> to vector<8x32xbf16>
    %c32_91 = arith.constant 32 : index
    %c0_92 = arith.constant 0 : index
    %248 = vector.load %arg4[%c32_91, %c0_92] : memref<64x32xbf16, #tpu.memory_space<vmem>>, vector<8x32xbf16>
    tpu.vector_store %arg4[%c32_91, %c0_92], %247 {strides = array<i32>} : memref<64x32xbf16, #tpu.memory_space<vmem>>, vector<8x32xbf16>,
    %249 = arith.truncf %246 : vector<8x32xf32> to vector<8x32xbf16>
    %c24_93 = arith.constant 24 : index
    %c0_94 = arith.constant 0 : index
    %250 = vector.load %arg5[%c24_93, %c0_94] : memref<64x32xbf16, #tpu.memory_space<vmem>>, vector<8x32xbf16>
    tpu.vector_store %arg5[%c24_93, %c0_94], %249 {strides = array<i32>} : memref<64x32xbf16, #tpu.memory_space<vmem>>, vector<8x32xbf16>,
    %251 = arith.truncf %230 : vector<8x32xf32> to vector<8x32xbf16>
    %cst_95 = arith.constant dense<0.000000e+00> : vector<8x128xf32>
    %252 = tpu.matmul %251, %4, %cst_95 {dimension_numbers = #tpu.dot_dimension_numbers<[1], [0], [0], [1], [0, 0, 1, 1], [], []>} : vector<8x32xbf16>, vector<32x128xbf16>, vector<8x128xf32> -> vector<8x128xf32>
    %c0_i32_96 = arith.constant 0 : i32
    %c0_i32_97 = arith.constant 0 : i32
    %c0_i32_98 = arith.constant 0 : i32
    %253 = tpu.memref_slice %arg1[%c0_i32_96, %c0_i32_97, %c0_i32_98] : memref<1x64x128xf32, #tpu.memory_space<vmem>> -> memref<1x64x128xf32, #tpu.memory_space<vmem>>
    %254 = tpu.memref_squeeze %253 : memref<1x64x128xf32, #tpu.memory_space<vmem>> -> memref<64x128xf32, #tpu.memory_space<vmem>>
    %c40_99 = arith.constant 40 : index
    %c0_100 = arith.constant 0 : index
    %255 = vector.load %254[%c40_99, %c0_100] : memref<64x128xf32, #tpu.memory_space<vmem>>, vector<8x128xf32>
    %256 = arith.addf %252, %255 : vector<8x128xf32>
    %257 = arith.truncf %246 : vector<8x32xf32> to vector<8x32xbf16>
    %cst_101 = arith.constant dense<0.000000e+00> : vector<8x128xf32>
    %258 = tpu.matmul %257, %6, %cst_101 {dimension_numbers = #tpu.dot_dimension_numbers<[1], [0], [0], [1], [0, 0, 1, 1], [], []>} : vector<8x32xbf16>, vector<32x128xbf16>, vector<8x128xf32> -> vector<8x128xf32>
    %c0_i32_102 = arith.constant 0 : i32
    %c0_i32_103 = arith.constant 0 : i32
    %c0_i32_104 = arith.constant 0 : i32
    %259 = tpu.memref_slice %arg2[%c0_i32_102, %c0_i32_103, %c0_i32_104] : memref<1x64x128xf32, #tpu.memory_space<vmem>> -> memref<1x64x128xf32, #tpu.memory_space<vmem>>
    %260 = tpu.memref_squeeze %259 : memref<1x64x128xf32, #tpu.memory_space<vmem>> -> memref<64x128xf32, #tpu.memory_space<vmem>>
    %c16_105 = arith.constant 16 : index
    %c0_106 = arith.constant 0 : index
    %261 = vector.load %260[%c16_105, %c0_106] : memref<64x128xf32, #tpu.memory_space<vmem>>, vector<8x128xf32>
    %262 = arith.addf %258, %261 : vector<8x128xf32>
    %263 = vector.extract_strided_slice %256 {offsets = [0, 0], sizes = [8, 96], strides = [1, 1]} : vector<8x128xf32> to vector<8x96xf32>
    %264 = arith.negf %263 : vector<8x96xf32>
    %265 = math.exp %264 : vector<8x96xf32>
    %cst_107 = arith.constant 1.000000e+00 : f32
    %266 = vector.broadcast %cst_107 : f32 to vector<8x96xf32>
    %267 = arith.addf %266, %265 : vector<8x96xf32>
    %268 = arith.divf %266, %267 : vector<8x96xf32>
    %269 = vector.extract_strided_slice %256 {offsets = [0, 96], sizes = [8, 32], strides = [1, 1]} : vector<8x128xf32> to vector<8x32xf32>
    %270 = math.tanh %269 : vector<8x32xf32>
    %271 = vector.extract_strided_slice %268 {offsets = [0, 32], sizes = [8, 32], strides = [1, 1]} : vector<8x96xf32> to vector<8x32xf32>
    %272 = arith.mulf %271, %227 : vector<8x32xf32>
    %273 = vector.extract_strided_slice %268 {offsets = [0, 0], sizes = [8, 32], strides = [1, 1]} : vector<8x96xf32> to vector<8x32xf32>
    %274 = arith.mulf %273, %270 : vector<8x32xf32>
    %275 = arith.addf %272, %274 : vector<8x32xf32>
    %276 = vector.extract_strided_slice %268 {offsets = [0, 64], sizes = [8, 32], strides = [1, 1]} : vector<8x96xf32> to vector<8x32xf32>
    %277 = math.tanh %275 : vector<8x32xf32>
    %278 = arith.mulf %276, %277 : vector<8x32xf32>
    %279 = vector.extract_strided_slice %262 {offsets = [0, 0], sizes = [8, 96], strides = [1, 1]} : vector<8x128xf32> to vector<8x96xf32>
    %280 = arith.negf %279 : vector<8x96xf32>
    %281 = math.exp %280 : vector<8x96xf32>
    %cst_108 = arith.constant 1.000000e+00 : f32
    %282 = vector.broadcast %cst_108 : f32 to vector<8x96xf32>
    %283 = arith.addf %282, %281 : vector<8x96xf32>
    %284 = arith.divf %282, %283 : vector<8x96xf32>
    %285 = vector.extract_strided_slice %262 {offsets = [0, 96], sizes = [8, 32], strides = [1, 1]} : vector<8x128xf32> to vector<8x32xf32>
    %286 = math.tanh %285 : vector<8x32xf32>
    %287 = vector.extract_strided_slice %284 {offsets = [0, 32], sizes = [8, 32], strides = [1, 1]} : vector<8x96xf32> to vector<8x32xf32>
    %288 = arith.mulf %287, %243 : vector<8x32xf32>
    %289 = vector.extract_strided_slice %284 {offsets = [0, 0], sizes = [8, 32], strides = [1, 1]} : vector<8x96xf32> to vector<8x32xf32>
    %290 = arith.mulf %289, %286 : vector<8x32xf32>
    %291 = arith.addf %288, %290 : vector<8x32xf32>
    %292 = vector.extract_strided_slice %284 {offsets = [0, 64], sizes = [8, 32], strides = [1, 1]} : vector<8x96xf32> to vector<8x32xf32>
    %293 = math.tanh %291 : vector<8x32xf32>
    %294 = arith.mulf %292, %293 : vector<8x32xf32>
    %295 = arith.truncf %278 : vector<8x32xf32> to vector<8x32xbf16>
    %c40_109 = arith.constant 40 : index
    %c0_110 = arith.constant 0 : index
    %296 = vector.load %arg4[%c40_109, %c0_110] : memref<64x32xbf16, #tpu.memory_space<vmem>>, vector<8x32xbf16>
    tpu.vector_store %arg4[%c40_109, %c0_110], %295 {strides = array<i32>} : memref<64x32xbf16, #tpu.memory_space<vmem>>, vector<8x32xbf16>,
    %297 = arith.truncf %294 : vector<8x32xf32> to vector<8x32xbf16>
    %c16_111 = arith.constant 16 : index
    %c0_112 = arith.constant 0 : index
    %298 = vector.load %arg5[%c16_111, %c0_112] : memref<64x32xbf16, #tpu.memory_space<vmem>>, vector<8x32xbf16>
    tpu.vector_store %arg5[%c16_111, %c0_112], %297 {strides = array<i32>} : memref<64x32xbf16, #tpu.memory_space<vmem>>, vector<8x32xbf16>,
    %299 = arith.truncf %278 : vector<8x32xf32> to vector<8x32xbf16>
    %cst_113 = arith.constant dense<0.000000e+00> : vector<8x128xf32>
    %300 = tpu.matmul %299, %4, %cst_113 {dimension_numbers = #tpu.dot_dimension_numbers<[1], [0], [0], [1], [0, 0, 1, 1], [], []>} : vector<8x32xbf16>, vector<32x128xbf16>, vector<8x128xf32> -> vector<8x128xf32>
    %c0_i32_114 = arith.constant 0 : i32
    %c0_i32_115 = arith.constant 0 : i32
    %c0_i32_116 = arith.constant 0 : i32
    %301 = tpu.memref_slice %arg1[%c0_i32_114, %c0_i32_115, %c0_i32_116] : memref<1x64x128xf32, #tpu.memory_space<vmem>> -> memref<1x64x128xf32, #tpu.memory_space<vmem>>
    %302 = tpu.memref_squeeze %301 : memref<1x64x128xf32, #tpu.memory_space<vmem>> -> memref<64x128xf32, #tpu.memory_space<vmem>>
    %c48_117 = arith.constant 48 : index
    %c0_118 = arith.constant 0 : index
    %303 = vector.load %302[%c48_117, %c0_118] : memref<64x128xf32, #tpu.memory_space<vmem>>, vector<8x128xf32>
    %304 = arith.addf %300, %303 : vector<8x128xf32>
    %305 = arith.truncf %294 : vector<8x32xf32> to vector<8x32xbf16>
    %cst_119 = arith.constant dense<0.000000e+00> : vector<8x128xf32>
    %306 = tpu.matmul %305, %6, %cst_119 {dimension_numbers = #tpu.dot_dimension_numbers<[1], [0], [0], [1], [0, 0, 1, 1], [], []>} : vector<8x32xbf16>, vector<32x128xbf16>, vector<8x128xf32> -> vector<8x128xf32>
    %c0_i32_120 = arith.constant 0 : i32
    %c0_i32_121 = arith.constant 0 : i32
    %c0_i32_122 = arith.constant 0 : i32
    %307 = tpu.memref_slice %arg2[%c0_i32_120, %c0_i32_121, %c0_i32_122] : memref<1x64x128xf32, #tpu.memory_space<vmem>> -> memref<1x64x128xf32, #tpu.memory_space<vmem>>
    %308 = tpu.memref_squeeze %307 : memref<1x64x128xf32, #tpu.memory_space<vmem>> -> memref<64x128xf32, #tpu.memory_space<vmem>>
    %c8_123 = arith.constant 8 : index
    %c0_124 = arith.constant 0 : index
    %309 = vector.load %308[%c8_123, %c0_124] : memref<64x128xf32, #tpu.memory_space<vmem>>, vector<8x128xf32>
    %310 = arith.addf %306, %309 : vector<8x128xf32>
    %311 = vector.extract_strided_slice %304 {offsets = [0, 0], sizes = [8, 96], strides = [1, 1]} : vector<8x128xf32> to vector<8x96xf32>
    %312 = arith.negf %311 : vector<8x96xf32>
    %313 = math.exp %312 : vector<8x96xf32>
    %cst_125 = arith.constant 1.000000e+00 : f32
    %314 = vector.broadcast %cst_125 : f32 to vector<8x96xf32>
    %315 = arith.addf %314, %313 : vector<8x96xf32>
    %316 = arith.divf %314, %315 : vector<8x96xf32>
    %317 = vector.extract_strided_slice %304 {offsets = [0, 96], sizes = [8, 32], strides = [1, 1]} : vector<8x128xf32> to vector<8x32xf32>
    %318 = math.tanh %317 : vector<8x32xf32>
    %319 = vector.extract_strided_slice %316 {offsets = [0, 32], sizes = [8, 32], strides = [1, 1]} : vector<8x96xf32> to vector<8x32xf32>
    %320 = arith.mulf %319, %275 : vector<8x32xf32>
    %321 = vector.extract_strided_slice %316 {offsets = [0, 0], sizes = [8, 32], strides = [1, 1]} : vector<8x96xf32> to vector<8x32xf32>
    %322 = arith.mulf %321, %318 : vector<8x32xf32>
    %323 = arith.addf %320, %322 : vector<8x32xf32>
    %324 = vector.extract_strided_slice %316 {offsets = [0, 64], sizes = [8, 32], strides = [1, 1]} : vector<8x96xf32> to vector<8x32xf32>
    %325 = math.tanh %323 : vector<8x32xf32>
    %326 = arith.mulf %324, %325 : vector<8x32xf32>
    %327 = vector.extract_strided_slice %310 {offsets = [0, 0], sizes = [8, 96], strides = [1, 1]} : vector<8x128xf32> to vector<8x96xf32>
    %328 = arith.negf %327 : vector<8x96xf32>
    %329 = math.exp %328 : vector<8x96xf32>
    %cst_126 = arith.constant 1.000000e+00 : f32
    %330 = vector.broadcast %cst_126 : f32 to vector<8x96xf32>
    %331 = arith.addf %330, %329 : vector<8x96xf32>
    %332 = arith.divf %330, %331 : vector<8x96xf32>
    %333 = vector.extract_strided_slice %310 {offsets = [0, 96], sizes = [8, 32], strides = [1, 1]} : vector<8x128xf32> to vector<8x32xf32>
    %334 = math.tanh %333 : vector<8x32xf32>
    %335 = vector.extract_strided_slice %332 {offsets = [0, 32], sizes = [8, 32], strides = [1, 1]} : vector<8x96xf32> to vector<8x32xf32>
    %336 = arith.mulf %335, %291 : vector<8x32xf32>
    %337 = vector.extract_strided_slice %332 {offsets = [0, 0], sizes = [8, 32], strides = [1, 1]} : vector<8x96xf32> to vector<8x32xf32>
    %338 = arith.mulf %337, %334 : vector<8x32xf32>
    %339 = arith.addf %336, %338 : vector<8x32xf32>
    %340 = vector.extract_strided_slice %332 {offsets = [0, 64], sizes = [8, 32], strides = [1, 1]} : vector<8x96xf32> to vector<8x32xf32>
    %341 = math.tanh %339 : vector<8x32xf32>
    %342 = arith.mulf %340, %341 : vector<8x32xf32>
    %343 = arith.truncf %326 : vector<8x32xf32> to vector<8x32xbf16>
    %c48_127 = arith.constant 48 : index
    %c0_128 = arith.constant 0 : index
    %344 = vector.load %arg4[%c48_127, %c0_128] : memref<64x32xbf16, #tpu.memory_space<vmem>>, vector<8x32xbf16>
    tpu.vector_store %arg4[%c48_127, %c0_128], %343 {strides = array<i32>} : memref<64x32xbf16, #tpu.memory_space<vmem>>, vector<8x32xbf16>,
    %345 = arith.truncf %342 : vector<8x32xf32> to vector<8x32xbf16>
    %c8_129 = arith.constant 8 : index
    %c0_130 = arith.constant 0 : index
    %346 = vector.load %arg5[%c8_129, %c0_130] : memref<64x32xbf16, #tpu.memory_space<vmem>>, vector<8x32xbf16>
    tpu.vector_store %arg5[%c8_129, %c0_130], %345 {strides = array<i32>} : memref<64x32xbf16, #tpu.memory_space<vmem>>, vector<8x32xbf16>,
    %347 = arith.truncf %326 : vector<8x32xf32> to vector<8x32xbf16>
    %cst_131 = arith.constant dense<0.000000e+00> : vector<8x128xf32>
    %348 = tpu.matmul %347, %4, %cst_131 {dimension_numbers = #tpu.dot_dimension_numbers<[1], [0], [0], [1], [0, 0, 1, 1], [], []>} : vector<8x32xbf16>, vector<32x128xbf16>, vector<8x128xf32> -> vector<8x128xf32>
    %c0_i32_132 = arith.constant 0 : i32
    %c0_i32_133 = arith.constant 0 : i32
    %c0_i32_134 = arith.constant 0 : i32
    %349 = tpu.memref_slice %arg1[%c0_i32_132, %c0_i32_133, %c0_i32_134] : memref<1x64x128xf32, #tpu.memory_space<vmem>> -> memref<1x64x128xf32, #tpu.memory_space<vmem>>
    %350 = tpu.memref_squeeze %349 : memref<1x64x128xf32, #tpu.memory_space<vmem>> -> memref<64x128xf32, #tpu.memory_space<vmem>>
    %c56_135 = arith.constant 56 : index
    %c0_136 = arith.constant 0 : index
    %351 = vector.load %350[%c56_135, %c0_136] : memref<64x128xf32, #tpu.memory_space<vmem>>, vector<8x128xf32>
    %352 = arith.addf %348, %351 : vector<8x128xf32>
    %353 = arith.truncf %342 : vector<8x32xf32> to vector<8x32xbf16>
    %cst_137 = arith.constant dense<0.000000e+00> : vector<8x128xf32>
    %354 = tpu.matmul %353, %6, %cst_137 {dimension_numbers = #tpu.dot_dimension_numbers<[1], [0], [0], [1], [0, 0, 1, 1], [], []>} : vector<8x32xbf16>, vector<32x128xbf16>, vector<8x128xf32> -> vector<8x128xf32>
    %c0_i32_138 = arith.constant 0 : i32
    %c0_i32_139 = arith.constant 0 : i32
    %c0_i32_140 = arith.constant 0 : i32
    %355 = tpu.memref_slice %arg2[%c0_i32_138, %c0_i32_139, %c0_i32_140] : memref<1x64x128xf32, #tpu.memory_space<vmem>> -> memref<1x64x128xf32, #tpu.memory_space<vmem>>
    %356 = tpu.memref_squeeze %355 : memref<1x64x128xf32, #tpu.memory_space<vmem>> -> memref<64x128xf32, #tpu.memory_space<vmem>>
    %c0_141 = arith.constant 0 : index
    %c0_142 = arith.constant 0 : index
    %357 = vector.load %356[%c0_141, %c0_142] : memref<64x128xf32, #tpu.memory_space<vmem>>, vector<8x128xf32>
    %358 = arith.addf %354, %357 : vector<8x128xf32>
    %359 = vector.extract_strided_slice %352 {offsets = [0, 0], sizes = [8, 96], strides = [1, 1]} : vector<8x128xf32> to vector<8x96xf32>
    %360 = arith.negf %359 : vector<8x96xf32>
    %361 = math.exp %360 : vector<8x96xf32>
    %cst_143 = arith.constant 1.000000e+00 : f32
    %362 = vector.broadcast %cst_143 : f32 to vector<8x96xf32>
    %363 = arith.addf %362, %361 : vector<8x96xf32>
    %364 = arith.divf %362, %363 : vector<8x96xf32>
    %365 = vector.extract_strided_slice %352 {offsets = [0, 96], sizes = [8, 32], strides = [1, 1]} : vector<8x128xf32> to vector<8x32xf32>
    %366 = math.tanh %365 : vector<8x32xf32>
    %367 = vector.extract_strided_slice %364 {offsets = [0, 32], sizes = [8, 32], strides = [1, 1]} : vector<8x96xf32> to vector<8x32xf32>
    %368 = arith.mulf %367, %323 : vector<8x32xf32>
    %369 = vector.extract_strided_slice %364 {offsets = [0, 0], sizes = [8, 32], strides = [1, 1]} : vector<8x96xf32> to vector<8x32xf32>
    %370 = arith.mulf %369, %366 : vector<8x32xf32>
    %371 = arith.addf %368, %370 : vector<8x32xf32>
    %372 = vector.extract_strided_slice %364 {offsets = [0, 64], sizes = [8, 32], strides = [1, 1]} : vector<8x96xf32> to vector<8x32xf32>
    %373 = math.tanh %371 : vector<8x32xf32>
    %374 = arith.mulf %372, %373 : vector<8x32xf32>
    %375 = vector.extract_strided_slice %358 {offsets = [0, 0], sizes = [8, 96], strides = [1, 1]} : vector<8x128xf32> to vector<8x96xf32>
    %376 = arith.negf %375 : vector<8x96xf32>
    %377 = math.exp %376 : vector<8x96xf32>
    %cst_144 = arith.constant 1.000000e+00 : f32
    %378 = vector.broadcast %cst_144 : f32 to vector<8x96xf32>
    %379 = arith.addf %378, %377 : vector<8x96xf32>
    %380 = arith.divf %378, %379 : vector<8x96xf32>
    %381 = vector.extract_strided_slice %358 {offsets = [0, 96], sizes = [8, 32], strides = [1, 1]} : vector<8x128xf32> to vector<8x32xf32>
    %382 = math.tanh %381 : vector<8x32xf32>
    %383 = vector.extract_strided_slice %380 {offsets = [0, 32], sizes = [8, 32], strides = [1, 1]} : vector<8x96xf32> to vector<8x32xf32>
    %384 = arith.mulf %383, %339 : vector<8x32xf32>
    %385 = vector.extract_strided_slice %380 {offsets = [0, 0], sizes = [8, 32], strides = [1, 1]} : vector<8x96xf32> to vector<8x32xf32>
    %386 = arith.mulf %385, %382 : vector<8x32xf32>
    %387 = arith.addf %384, %386 : vector<8x32xf32>
    %388 = vector.extract_strided_slice %380 {offsets = [0, 64], sizes = [8, 32], strides = [1, 1]} : vector<8x96xf32> to vector<8x32xf32>
    %389 = math.tanh %387 : vector<8x32xf32>
    %390 = arith.mulf %388, %389 : vector<8x32xf32>
    %391 = arith.truncf %374 : vector<8x32xf32> to vector<8x32xbf16>
    %c56_145 = arith.constant 56 : index
    %c0_146 = arith.constant 0 : index
    %392 = vector.load %arg4[%c56_145, %c0_146] : memref<64x32xbf16, #tpu.memory_space<vmem>>, vector<8x32xbf16>
    tpu.vector_store %arg4[%c56_145, %c0_146], %391 {strides = array<i32>} : memref<64x32xbf16, #tpu.memory_space<vmem>>, vector<8x32xbf16>,
    %393 = arith.truncf %390 : vector<8x32xf32> to vector<8x32xbf16>
    %c0_147 = arith.constant 0 : index
    %c0_148 = arith.constant 0 : index
    %394 = vector.load %arg5[%c0_147, %c0_148] : memref<64x32xbf16, #tpu.memory_space<vmem>>, vector<8x32xbf16>
    tpu.vector_store %arg5[%c0_147, %c0_148], %393 {strides = array<i32>} : memref<64x32xbf16, #tpu.memory_space<vmem>>, vector<8x32xbf16>,
    %c0_149 = arith.constant 0 : index
    %c0_150 = arith.constant 0 : index
    %395 = vector.load %arg6[%c0_149, %c0_150] : memref<8x32xf32, #tpu.memory_space<vmem>>, vector<8x32xf32>
    tpu.vector_store %arg6[%c0_149, %c0_150], %374 {strides = array<i32>} : memref<8x32xf32, #tpu.memory_space<vmem>>, vector<8x32xf32>,
    %c0_151 = arith.constant 0 : index
    %c0_152 = arith.constant 0 : index
    %396 = vector.load %arg7[%c0_151, %c0_152] : memref<8x32xf32, #tpu.memory_space<vmem>>, vector<8x32xf32>
    tpu.vector_store %arg7[%c0_151, %c0_152], %371 {strides = array<i32>} : memref<8x32xf32, #tpu.memory_space<vmem>>, vector<8x32xf32>,
    %c0_153 = arith.constant 0 : index
    %c0_154 = arith.constant 0 : index
    %397 = vector.load %arg8[%c0_153, %c0_154] : memref<8x32xf32, #tpu.memory_space<vmem>>, vector<8x32xf32>
    tpu.vector_store %arg8[%c0_153, %c0_154], %390 {strides = array<i32>} : memref<8x32xf32, #tpu.memory_space<vmem>>, vector<8x32xf32>,
    %c0_155 = arith.constant 0 : index
    %c0_156 = arith.constant 0 : index
    %398 = vector.load %arg9[%c0_155, %c0_156] : memref<8x32xf32, #tpu.memory_space<vmem>>, vector<8x32xf32>
    tpu.vector_store %arg9[%c0_155, %c0_156], %387 {strides = array<i32>} : memref<8x32xf32, #tpu.memory_space<vmem>>, vector<8x32xf32>,
    return
  }
  func.func @transform_0(%arg0: i32) -> (i32, i32, i32) {
    %c0_i32 = arith.constant 0 : i32
    %c0_i32_0 = arith.constant 0 : i32
    %c0_i32_1 = arith.constant 0 : i32
    return %c0_i32, %arg0, %c0_i32_0 : i32, i32, i32
  }
  func.func @transform_1(%arg0: i32) -> (i32, i32, i32) {
    %c1_i32 = arith.constant 1 : i32
    %0 = arith.subi %c1_i32, %arg0 : i32
    %c1_i32_0 = arith.constant 1 : i32
    %c0_i32 = arith.constant 0 : i32
    %c0_i32_1 = arith.constant 0 : i32
    return %c1_i32_0, %0, %c0_i32 : i32, i32, i32
  }
  func.func @transform_2(%arg0: i32) -> (i32, i32, i32) {
    %c0_i32 = arith.constant 0 : i32
    %c0_i32_0 = arith.constant 0 : i32
    %c0_i32_1 = arith.constant 0 : i32
    %c0_i32_2 = arith.constant 0 : i32
    return %c0_i32, %c0_i32_0, %c0_i32_1 : i32, i32, i32
  }
  func.func @transform_3(%arg0: i32) -> (i32, i32) {
    %c0_i32 = arith.constant 0 : i32
    %c0_i32_0 = arith.constant 0 : i32
    return %arg0, %c0_i32 : i32, i32
  }
  func.func @transform_4(%arg0: i32) -> (i32, i32) {
    %c1_i32 = arith.constant 1 : i32
    %0 = arith.subi %c1_i32, %arg0 : i32
    %c0_i32 = arith.constant 0 : i32
    %c0_i32_0 = arith.constant 0 : i32
    return %0, %c0_i32 : i32, i32
  }
}

module attributes {stable_mosaic.version = 11 : i64} {
  func.func @kernel(%arg0: i32, %arg1: memref<1x64x128xf32, #tpu.memory_space<vmem>>, %arg2: memref<1x64x128xf32, #tpu.memory_space<vmem>>, %arg3: memref<2x32x128xbf16, #tpu.memory_space<vmem>>, %arg4: memref<2x1x32xf32, #tpu.memory_space<vmem>>, %arg5: memref<8x8xf32, #tpu.memory_space<vmem>>, %arg6: memref<8x8xf32, #tpu.memory_space<vmem>>, %arg7: memref<8x32xf32, #tpu.memory_space<vmem>>, %arg8: memref<8x32xf32, #tpu.memory_space<vmem>>, %arg9: memref<8x32xf32, #tpu.memory_space<vmem>>, %arg10: memref<8x32xf32, #tpu.memory_space<vmem>>, %arg11: memref<8x8x32xf32, #tpu.memory_space<vmem>>, %arg12: memref<8x8x32xf32, #tpu.memory_space<vmem>>) attributes {dimension_semantics = [#tpu.dimension_semantics<arbitrary>], iteration_bounds = array<i64: 2>, scalar_prefetch = 0 : i64, scratch_operands = 6 : i64, tpu.core_type = #tpu.core_type<tc>, window_params = [{transform_indices = @transform_0, window_bounds = array<i64: 1, 64, 128>}, {transform_indices = @transform_1, window_bounds = array<i64: 1, 64, 128>}, {pipeline_mode = #tpu.pipeline_mode<synchronous>, transform_indices = @transform_2, window_bounds = array<i64: 2, 32, 128>}, {pipeline_mode = #tpu.pipeline_mode<synchronous>, transform_indices = @transform_3, window_bounds = array<i64: 2, 1, 32>}, {transform_indices = @transform_4, window_bounds = array<i64: 8, 8>}, {transform_indices = @transform_5, window_bounds = array<i64: 8, 8>}]} {
    %c0_i32 = arith.constant 0 : i32
    %0 = arith.cmpi eq, %arg0, %c0_i32 : i32
    %1 = arith.extui %0 : i1 to i32
    %c0_i32_0 = arith.constant 0 : i32
    %2 = arith.cmpi ne, %1, %c0_i32_0 : i32
    scf.if %2 {
      %cst_185 = arith.constant 0.000000e+00 : f32
      %431 = vector.broadcast %cst_185 : f32 to vector<8x32xf32>
      %c0_186 = arith.constant 0 : index
      %c0_187 = arith.constant 0 : index
      %432 = vector.load %arg7[%c0_186, %c0_187] : memref<8x32xf32, #tpu.memory_space<vmem>>, vector<8x32xf32>
      tpu.vector_store %arg7[%c0_186, %c0_187], %431 {strides = array<i32>} : memref<8x32xf32, #tpu.memory_space<vmem>>, vector<8x32xf32>,
      %cst_188 = arith.constant 0.000000e+00 : f32
      %433 = vector.broadcast %cst_188 : f32 to vector<8x32xf32>
      %c0_189 = arith.constant 0 : index
      %c0_190 = arith.constant 0 : index
      %434 = vector.load %arg8[%c0_189, %c0_190] : memref<8x32xf32, #tpu.memory_space<vmem>>, vector<8x32xf32>
      tpu.vector_store %arg8[%c0_189, %c0_190], %433 {strides = array<i32>} : memref<8x32xf32, #tpu.memory_space<vmem>>, vector<8x32xf32>,
      %cst_191 = arith.constant 0.000000e+00 : f32
      %435 = vector.broadcast %cst_191 : f32 to vector<8x32xf32>
      %c0_192 = arith.constant 0 : index
      %c0_193 = arith.constant 0 : index
      %436 = vector.load %arg9[%c0_192, %c0_193] : memref<8x32xf32, #tpu.memory_space<vmem>>, vector<8x32xf32>
      tpu.vector_store %arg9[%c0_192, %c0_193], %435 {strides = array<i32>} : memref<8x32xf32, #tpu.memory_space<vmem>>, vector<8x32xf32>,
      %cst_194 = arith.constant 0.000000e+00 : f32
      %437 = vector.broadcast %cst_194 : f32 to vector<8x32xf32>
      %c0_195 = arith.constant 0 : index
      %c0_196 = arith.constant 0 : index
      %438 = vector.load %arg10[%c0_195, %c0_196] : memref<8x32xf32, #tpu.memory_space<vmem>>, vector<8x32xf32>
      tpu.vector_store %arg10[%c0_195, %c0_196], %437 {strides = array<i32>} : memref<8x32xf32, #tpu.memory_space<vmem>>, vector<8x32xf32>,
    } else {
    }
    %c0 = arith.constant 0 : index
    %c0_1 = arith.constant 0 : index
    %c0_2 = arith.constant 0 : index
    %3 = vector.load %arg3[%c0, %c0_1, %c0_2] : memref<2x32x128xbf16, #tpu.memory_space<vmem>>, vector<1x32x128xbf16>
    %4 = vector.shape_cast %3 : vector<1x32x128xbf16> to vector<32x128xbf16>
    %c1 = arith.constant 1 : index
    %c0_3 = arith.constant 0 : index
    %c0_4 = arith.constant 0 : index
    %5 = vector.load %arg3[%c1, %c0_3, %c0_4] : memref<2x32x128xbf16, #tpu.memory_space<vmem>>, vector<1x32x128xbf16>
    %6 = vector.shape_cast %5 : vector<1x32x128xbf16> to vector<32x128xbf16>
    %c0_5 = arith.constant 0 : index
    %c0_6 = arith.constant 0 : index
    %7 = vector.load %arg7[%c0_5, %c0_6] : memref<8x32xf32, #tpu.memory_space<vmem>>, vector<8x32xf32>
    %c0_7 = arith.constant 0 : index
    %c0_8 = arith.constant 0 : index
    %8 = vector.load %arg8[%c0_7, %c0_8] : memref<8x32xf32, #tpu.memory_space<vmem>>, vector<8x32xf32>
    %c0_9 = arith.constant 0 : index
    %c0_10 = arith.constant 0 : index
    %9 = vector.load %arg9[%c0_9, %c0_10] : memref<8x32xf32, #tpu.memory_space<vmem>>, vector<8x32xf32>
    %c0_11 = arith.constant 0 : index
    %c0_12 = arith.constant 0 : index
    %10 = vector.load %arg10[%c0_11, %c0_12] : memref<8x32xf32, #tpu.memory_space<vmem>>, vector<8x32xf32>
    %11 = arith.truncf %7 : vector<8x32xf32> to vector<8x32xbf16>
    %cst = arith.constant dense<0.000000e+00> : vector<8x128xf32>
    %12 = tpu.matmul %11, %4, %cst {dimension_numbers = #tpu.dot_dimension_numbers<[1], [0], [0], [1], [0, 0, 1, 1], [], []>} : vector<8x32xbf16>, vector<32x128xbf16>, vector<8x128xf32> -> vector<8x128xf32>
    %c0_i32_13 = arith.constant 0 : i32
    %c0_i32_14 = arith.constant 0 : i32
    %c0_i32_15 = arith.constant 0 : i32
    %13 = tpu.memref_slice %arg1[%c0_i32_13, %c0_i32_14, %c0_i32_15] : memref<1x64x128xf32, #tpu.memory_space<vmem>> -> memref<1x64x128xf32, #tpu.memory_space<vmem>>
    %14 = tpu.memref_squeeze %13 : memref<1x64x128xf32, #tpu.memory_space<vmem>> -> memref<64x128xf32, #tpu.memory_space<vmem>>
    %c0_16 = arith.constant 0 : index
    %c0_17 = arith.constant 0 : index
    %15 = vector.load %14[%c0_16, %c0_17] : memref<64x128xf32, #tpu.memory_space<vmem>>, vector<8x128xf32>
    %16 = arith.addf %12, %15 : vector<8x128xf32>
    %17 = arith.truncf %9 : vector<8x32xf32> to vector<8x32xbf16>
    %cst_18 = arith.constant dense<0.000000e+00> : vector<8x128xf32>
    %18 = tpu.matmul %17, %6, %cst_18 {dimension_numbers = #tpu.dot_dimension_numbers<[1], [0], [0], [1], [0, 0, 1, 1], [], []>} : vector<8x32xbf16>, vector<32x128xbf16>, vector<8x128xf32> -> vector<8x128xf32>
    %c0_i32_19 = arith.constant 0 : i32
    %c0_i32_20 = arith.constant 0 : i32
    %c0_i32_21 = arith.constant 0 : i32
    %19 = tpu.memref_slice %arg2[%c0_i32_19, %c0_i32_20, %c0_i32_21] : memref<1x64x128xf32, #tpu.memory_space<vmem>> -> memref<1x64x128xf32, #tpu.memory_space<vmem>>
    %20 = tpu.memref_squeeze %19 : memref<1x64x128xf32, #tpu.memory_space<vmem>> -> memref<64x128xf32, #tpu.memory_space<vmem>>
    %c56 = arith.constant 56 : index
    %c0_22 = arith.constant 0 : index
    %21 = vector.load %20[%c56, %c0_22] : memref<64x128xf32, #tpu.memory_space<vmem>>, vector<8x128xf32>
    %22 = arith.addf %18, %21 : vector<8x128xf32>
    %23 = vector.extract_strided_slice %16 {offsets = [0, 0], sizes = [8, 96], strides = [1, 1]} : vector<8x128xf32> to vector<8x96xf32>
    %24 = arith.negf %23 : vector<8x96xf32>
    %25 = math.exp %24 : vector<8x96xf32>
    %cst_23 = arith.constant 1.000000e+00 : f32
    %26 = vector.broadcast %cst_23 : f32 to vector<8x96xf32>
    %27 = arith.addf %26, %25 : vector<8x96xf32>
    %28 = arith.divf %26, %27 : vector<8x96xf32>
    %29 = vector.extract_strided_slice %16 {offsets = [0, 96], sizes = [8, 32], strides = [1, 1]} : vector<8x128xf32> to vector<8x32xf32>
    %30 = math.tanh %29 : vector<8x32xf32>
    %31 = vector.extract_strided_slice %28 {offsets = [0, 32], sizes = [8, 32], strides = [1, 1]} : vector<8x96xf32> to vector<8x32xf32>
    %32 = arith.mulf %31, %8 : vector<8x32xf32>
    %33 = vector.extract_strided_slice %28 {offsets = [0, 0], sizes = [8, 32], strides = [1, 1]} : vector<8x96xf32> to vector<8x32xf32>
    %34 = arith.mulf %33, %30 : vector<8x32xf32>
    %35 = arith.addf %32, %34 : vector<8x32xf32>
    %36 = vector.extract_strided_slice %28 {offsets = [0, 64], sizes = [8, 32], strides = [1, 1]} : vector<8x96xf32> to vector<8x32xf32>
    %37 = math.tanh %35 : vector<8x32xf32>
    %38 = arith.mulf %36, %37 : vector<8x32xf32>
    %39 = vector.extract_strided_slice %22 {offsets = [0, 0], sizes = [8, 96], strides = [1, 1]} : vector<8x128xf32> to vector<8x96xf32>
    %40 = arith.negf %39 : vector<8x96xf32>
    %41 = math.exp %40 : vector<8x96xf32>
    %cst_24 = arith.constant 1.000000e+00 : f32
    %42 = vector.broadcast %cst_24 : f32 to vector<8x96xf32>
    %43 = arith.addf %42, %41 : vector<8x96xf32>
    %44 = arith.divf %42, %43 : vector<8x96xf32>
    %45 = vector.extract_strided_slice %22 {offsets = [0, 96], sizes = [8, 32], strides = [1, 1]} : vector<8x128xf32> to vector<8x32xf32>
    %46 = math.tanh %45 : vector<8x32xf32>
    %47 = vector.extract_strided_slice %44 {offsets = [0, 32], sizes = [8, 32], strides = [1, 1]} : vector<8x96xf32> to vector<8x32xf32>
    %48 = arith.mulf %47, %10 : vector<8x32xf32>
    %49 = vector.extract_strided_slice %44 {offsets = [0, 0], sizes = [8, 32], strides = [1, 1]} : vector<8x96xf32> to vector<8x32xf32>
    %50 = arith.mulf %49, %46 : vector<8x32xf32>
    %51 = arith.addf %48, %50 : vector<8x32xf32>
    %52 = vector.extract_strided_slice %44 {offsets = [0, 64], sizes = [8, 32], strides = [1, 1]} : vector<8x96xf32> to vector<8x32xf32>
    %53 = math.tanh %51 : vector<8x32xf32>
    %54 = arith.mulf %52, %53 : vector<8x32xf32>
    %c0_25 = arith.constant 0 : index
    %c0_26 = arith.constant 0 : index
    %c0_27 = arith.constant 0 : index
    %55 = vector.load %arg11[%c0_25, %c0_26, %c0_27] : memref<8x8x32xf32, #tpu.memory_space<vmem>>, vector<1x8x32xf32>
    %56 = vector.shape_cast %55 : vector<1x8x32xf32> to vector<8x32xf32>
    %57 = vector.shape_cast %38 : vector<8x32xf32> to vector<1x8x32xf32>
    tpu.vector_store %arg11[%c0_25, %c0_26, %c0_27], %57 {strides = array<i32>} : memref<8x8x32xf32, #tpu.memory_space<vmem>>, vector<1x8x32xf32>,
    %c7 = arith.constant 7 : index
    %c0_28 = arith.constant 0 : index
    %c0_29 = arith.constant 0 : index
    %58 = vector.load %arg12[%c7, %c0_28, %c0_29] : memref<8x8x32xf32, #tpu.memory_space<vmem>>, vector<1x8x32xf32>
    %59 = vector.shape_cast %58 : vector<1x8x32xf32> to vector<8x32xf32>
    %60 = vector.shape_cast %54 : vector<8x32xf32> to vector<1x8x32xf32>
    tpu.vector_store %arg12[%c7, %c0_28, %c0_29], %60 {strides = array<i32>} : memref<8x8x32xf32, #tpu.memory_space<vmem>>, vector<1x8x32xf32>,
    %61 = arith.truncf %38 : vector<8x32xf32> to vector<8x32xbf16>
    %cst_30 = arith.constant dense<0.000000e+00> : vector<8x128xf32>
    %62 = tpu.matmul %61, %4, %cst_30 {dimension_numbers = #tpu.dot_dimension_numbers<[1], [0], [0], [1], [0, 0, 1, 1], [], []>} : vector<8x32xbf16>, vector<32x128xbf16>, vector<8x128xf32> -> vector<8x128xf32>
    %c0_i32_31 = arith.constant 0 : i32
    %c0_i32_32 = arith.constant 0 : i32
    %c0_i32_33 = arith.constant 0 : i32
    %63 = tpu.memref_slice %arg1[%c0_i32_31, %c0_i32_32, %c0_i32_33] : memref<1x64x128xf32, #tpu.memory_space<vmem>> -> memref<1x64x128xf32, #tpu.memory_space<vmem>>
    %64 = tpu.memref_squeeze %63 : memref<1x64x128xf32, #tpu.memory_space<vmem>> -> memref<64x128xf32, #tpu.memory_space<vmem>>
    %c8 = arith.constant 8 : index
    %c0_34 = arith.constant 0 : index
    %65 = vector.load %64[%c8, %c0_34] : memref<64x128xf32, #tpu.memory_space<vmem>>, vector<8x128xf32>
    %66 = arith.addf %62, %65 : vector<8x128xf32>
    %67 = arith.truncf %54 : vector<8x32xf32> to vector<8x32xbf16>
    %cst_35 = arith.constant dense<0.000000e+00> : vector<8x128xf32>
    %68 = tpu.matmul %67, %6, %cst_35 {dimension_numbers = #tpu.dot_dimension_numbers<[1], [0], [0], [1], [0, 0, 1, 1], [], []>} : vector<8x32xbf16>, vector<32x128xbf16>, vector<8x128xf32> -> vector<8x128xf32>
    %c0_i32_36 = arith.constant 0 : i32
    %c0_i32_37 = arith.constant 0 : i32
    %c0_i32_38 = arith.constant 0 : i32
    %69 = tpu.memref_slice %arg2[%c0_i32_36, %c0_i32_37, %c0_i32_38] : memref<1x64x128xf32, #tpu.memory_space<vmem>> -> memref<1x64x128xf32, #tpu.memory_space<vmem>>
    %70 = tpu.memref_squeeze %69 : memref<1x64x128xf32, #tpu.memory_space<vmem>> -> memref<64x128xf32, #tpu.memory_space<vmem>>
    %c48 = arith.constant 48 : index
    %c0_39 = arith.constant 0 : index
    %71 = vector.load %70[%c48, %c0_39] : memref<64x128xf32, #tpu.memory_space<vmem>>, vector<8x128xf32>
    %72 = arith.addf %68, %71 : vector<8x128xf32>
    %73 = vector.extract_strided_slice %66 {offsets = [0, 0], sizes = [8, 96], strides = [1, 1]} : vector<8x128xf32> to vector<8x96xf32>
    %74 = arith.negf %73 : vector<8x96xf32>
    %75 = math.exp %74 : vector<8x96xf32>
    %cst_40 = arith.constant 1.000000e+00 : f32
    %76 = vector.broadcast %cst_40 : f32 to vector<8x96xf32>
    %77 = arith.addf %76, %75 : vector<8x96xf32>
    %78 = arith.divf %76, %77 : vector<8x96xf32>
    %79 = vector.extract_strided_slice %66 {offsets = [0, 96], sizes = [8, 32], strides = [1, 1]} : vector<8x128xf32> to vector<8x32xf32>
    %80 = math.tanh %79 : vector<8x32xf32>
    %81 = vector.extract_strided_slice %78 {offsets = [0, 32], sizes = [8, 32], strides = [1, 1]} : vector<8x96xf32> to vector<8x32xf32>
    %82 = arith.mulf %81, %35 : vector<8x32xf32>
    %83 = vector.extract_strided_slice %78 {offsets = [0, 0], sizes = [8, 32], strides = [1, 1]} : vector<8x96xf32> to vector<8x32xf32>
    %84 = arith.mulf %83, %80 : vector<8x32xf32>
    %85 = arith.addf %82, %84 : vector<8x32xf32>
    %86 = vector.extract_strided_slice %78 {offsets = [0, 64], sizes = [8, 32], strides = [1, 1]} : vector<8x96xf32> to vector<8x32xf32>
    %87 = math.tanh %85 : vector<8x32xf32>
    %88 = arith.mulf %86, %87 : vector<8x32xf32>
    %89 = vector.extract_strided_slice %72 {offsets = [0, 0], sizes = [8, 96], strides = [1, 1]} : vector<8x128xf32> to vector<8x96xf32>
    %90 = arith.negf %89 : vector<8x96xf32>
    %91 = math.exp %90 : vector<8x96xf32>
    %cst_41 = arith.constant 1.000000e+00 : f32
    %92 = vector.broadcast %cst_41 : f32 to vector<8x96xf32>
    %93 = arith.addf %92, %91 : vector<8x96xf32>
    %94 = arith.divf %92, %93 : vector<8x96xf32>
    %95 = vector.extract_strided_slice %72 {offsets = [0, 96], sizes = [8, 32], strides = [1, 1]} : vector<8x128xf32> to vector<8x32xf32>
    %96 = math.tanh %95 : vector<8x32xf32>
    %97 = vector.extract_strided_slice %94 {offsets = [0, 32], sizes = [8, 32], strides = [1, 1]} : vector<8x96xf32> to vector<8x32xf32>
    %98 = arith.mulf %97, %51 : vector<8x32xf32>
    %99 = vector.extract_strided_slice %94 {offsets = [0, 0], sizes = [8, 32], strides = [1, 1]} : vector<8x96xf32> to vector<8x32xf32>
    %100 = arith.mulf %99, %96 : vector<8x32xf32>
    %101 = arith.addf %98, %100 : vector<8x32xf32>
    %102 = vector.extract_strided_slice %94 {offsets = [0, 64], sizes = [8, 32], strides = [1, 1]} : vector<8x96xf32> to vector<8x32xf32>
    %103 = math.tanh %101 : vector<8x32xf32>
    %104 = arith.mulf %102, %103 : vector<8x32xf32>
    %c1_42 = arith.constant 1 : index
    %c0_43 = arith.constant 0 : index
    %c0_44 = arith.constant 0 : index
    %105 = vector.load %arg11[%c1_42, %c0_43, %c0_44] : memref<8x8x32xf32, #tpu.memory_space<vmem>>, vector<1x8x32xf32>
    %106 = vector.shape_cast %105 : vector<1x8x32xf32> to vector<8x32xf32>
    %107 = vector.shape_cast %88 : vector<8x32xf32> to vector<1x8x32xf32>
    tpu.vector_store %arg11[%c1_42, %c0_43, %c0_44], %107 {strides = array<i32>} : memref<8x8x32xf32, #tpu.memory_space<vmem>>, vector<1x8x32xf32>,
    %c6 = arith.constant 6 : index
    %c0_45 = arith.constant 0 : index
    %c0_46 = arith.constant 0 : index
    %108 = vector.load %arg12[%c6, %c0_45, %c0_46] : memref<8x8x32xf32, #tpu.memory_space<vmem>>, vector<1x8x32xf32>
    %109 = vector.shape_cast %108 : vector<1x8x32xf32> to vector<8x32xf32>
    %110 = vector.shape_cast %104 : vector<8x32xf32> to vector<1x8x32xf32>
    tpu.vector_store %arg12[%c6, %c0_45, %c0_46], %110 {strides = array<i32>} : memref<8x8x32xf32, #tpu.memory_space<vmem>>, vector<1x8x32xf32>,
    %111 = arith.truncf %88 : vector<8x32xf32> to vector<8x32xbf16>
    %cst_47 = arith.constant dense<0.000000e+00> : vector<8x128xf32>
    %112 = tpu.matmul %111, %4, %cst_47 {dimension_numbers = #tpu.dot_dimension_numbers<[1], [0], [0], [1], [0, 0, 1, 1], [], []>} : vector<8x32xbf16>, vector<32x128xbf16>, vector<8x128xf32> -> vector<8x128xf32>
    %c0_i32_48 = arith.constant 0 : i32
    %c0_i32_49 = arith.constant 0 : i32
    %c0_i32_50 = arith.constant 0 : i32
    %113 = tpu.memref_slice %arg1[%c0_i32_48, %c0_i32_49, %c0_i32_50] : memref<1x64x128xf32, #tpu.memory_space<vmem>> -> memref<1x64x128xf32, #tpu.memory_space<vmem>>
    %114 = tpu.memref_squeeze %113 : memref<1x64x128xf32, #tpu.memory_space<vmem>> -> memref<64x128xf32, #tpu.memory_space<vmem>>
    %c16 = arith.constant 16 : index
    %c0_51 = arith.constant 0 : index
    %115 = vector.load %114[%c16, %c0_51] : memref<64x128xf32, #tpu.memory_space<vmem>>, vector<8x128xf32>
    %116 = arith.addf %112, %115 : vector<8x128xf32>
    %117 = arith.truncf %104 : vector<8x32xf32> to vector<8x32xbf16>
    %cst_52 = arith.constant dense<0.000000e+00> : vector<8x128xf32>
    %118 = tpu.matmul %117, %6, %cst_52 {dimension_numbers = #tpu.dot_dimension_numbers<[1], [0], [0], [1], [0, 0, 1, 1], [], []>} : vector<8x32xbf16>, vector<32x128xbf16>, vector<8x128xf32> -> vector<8x128xf32>
    %c0_i32_53 = arith.constant 0 : i32
    %c0_i32_54 = arith.constant 0 : i32
    %c0_i32_55 = arith.constant 0 : i32
    %119 = tpu.memref_slice %arg2[%c0_i32_53, %c0_i32_54, %c0_i32_55] : memref<1x64x128xf32, #tpu.memory_space<vmem>> -> memref<1x64x128xf32, #tpu.memory_space<vmem>>
    %120 = tpu.memref_squeeze %119 : memref<1x64x128xf32, #tpu.memory_space<vmem>> -> memref<64x128xf32, #tpu.memory_space<vmem>>
    %c40 = arith.constant 40 : index
    %c0_56 = arith.constant 0 : index
    %121 = vector.load %120[%c40, %c0_56] : memref<64x128xf32, #tpu.memory_space<vmem>>, vector<8x128xf32>
    %122 = arith.addf %118, %121 : vector<8x128xf32>
    %123 = vector.extract_strided_slice %116 {offsets = [0, 0], sizes = [8, 96], strides = [1, 1]} : vector<8x128xf32> to vector<8x96xf32>
    %124 = arith.negf %123 : vector<8x96xf32>
    %125 = math.exp %124 : vector<8x96xf32>
    %cst_57 = arith.constant 1.000000e+00 : f32
    %126 = vector.broadcast %cst_57 : f32 to vector<8x96xf32>
    %127 = arith.addf %126, %125 : vector<8x96xf32>
    %128 = arith.divf %126, %127 : vector<8x96xf32>
    %129 = vector.extract_strided_slice %116 {offsets = [0, 96], sizes = [8, 32], strides = [1, 1]} : vector<8x128xf32> to vector<8x32xf32>
    %130 = math.tanh %129 : vector<8x32xf32>
    %131 = vector.extract_strided_slice %128 {offsets = [0, 32], sizes = [8, 32], strides = [1, 1]} : vector<8x96xf32> to vector<8x32xf32>
    %132 = arith.mulf %131, %85 : vector<8x32xf32>
    %133 = vector.extract_strided_slice %128 {offsets = [0, 0], sizes = [8, 32], strides = [1, 1]} : vector<8x96xf32> to vector<8x32xf32>
    %134 = arith.mulf %133, %130 : vector<8x32xf32>
    %135 = arith.addf %132, %134 : vector<8x32xf32>
    %136 = vector.extract_strided_slice %128 {offsets = [0, 64], sizes = [8, 32], strides = [1, 1]} : vector<8x96xf32> to vector<8x32xf32>
    %137 = math.tanh %135 : vector<8x32xf32>
    %138 = arith.mulf %136, %137 : vector<8x32xf32>
    %139 = vector.extract_strided_slice %122 {offsets = [0, 0], sizes = [8, 96], strides = [1, 1]} : vector<8x128xf32> to vector<8x96xf32>
    %140 = arith.negf %139 : vector<8x96xf32>
    %141 = math.exp %140 : vector<8x96xf32>
    %cst_58 = arith.constant 1.000000e+00 : f32
    %142 = vector.broadcast %cst_58 : f32 to vector<8x96xf32>
    %143 = arith.addf %142, %141 : vector<8x96xf32>
    %144 = arith.divf %142, %143 : vector<8x96xf32>
    %145 = vector.extract_strided_slice %122 {offsets = [0, 96], sizes = [8, 32], strides = [1, 1]} : vector<8x128xf32> to vector<8x32xf32>
    %146 = math.tanh %145 : vector<8x32xf32>
    %147 = vector.extract_strided_slice %144 {offsets = [0, 32], sizes = [8, 32], strides = [1, 1]} : vector<8x96xf32> to vector<8x32xf32>
    %148 = arith.mulf %147, %101 : vector<8x32xf32>
    %149 = vector.extract_strided_slice %144 {offsets = [0, 0], sizes = [8, 32], strides = [1, 1]} : vector<8x96xf32> to vector<8x32xf32>
    %150 = arith.mulf %149, %146 : vector<8x32xf32>
    %151 = arith.addf %148, %150 : vector<8x32xf32>
    %152 = vector.extract_strided_slice %144 {offsets = [0, 64], sizes = [8, 32], strides = [1, 1]} : vector<8x96xf32> to vector<8x32xf32>
    %153 = math.tanh %151 : vector<8x32xf32>
    %154 = arith.mulf %152, %153 : vector<8x32xf32>
    %c2 = arith.constant 2 : index
    %c0_59 = arith.constant 0 : index
    %c0_60 = arith.constant 0 : index
    %155 = vector.load %arg11[%c2, %c0_59, %c0_60] : memref<8x8x32xf32, #tpu.memory_space<vmem>>, vector<1x8x32xf32>
    %156 = vector.shape_cast %155 : vector<1x8x32xf32> to vector<8x32xf32>
    %157 = vector.shape_cast %138 : vector<8x32xf32> to vector<1x8x32xf32>
    tpu.vector_store %arg11[%c2, %c0_59, %c0_60], %157 {strides = array<i32>} : memref<8x8x32xf32, #tpu.memory_space<vmem>>, vector<1x8x32xf32>,
    %c5 = arith.constant 5 : index
    %c0_61 = arith.constant 0 : index
    %c0_62 = arith.constant 0 : index
    %158 = vector.load %arg12[%c5, %c0_61, %c0_62] : memref<8x8x32xf32, #tpu.memory_space<vmem>>, vector<1x8x32xf32>
    %159 = vector.shape_cast %158 : vector<1x8x32xf32> to vector<8x32xf32>
    %160 = vector.shape_cast %154 : vector<8x32xf32> to vector<1x8x32xf32>
    tpu.vector_store %arg12[%c5, %c0_61, %c0_62], %160 {strides = array<i32>} : memref<8x8x32xf32, #tpu.memory_space<vmem>>, vector<1x8x32xf32>,
    %161 = arith.truncf %138 : vector<8x32xf32> to vector<8x32xbf16>
    %cst_63 = arith.constant dense<0.000000e+00> : vector<8x128xf32>
    %162 = tpu.matmul %161, %4, %cst_63 {dimension_numbers = #tpu.dot_dimension_numbers<[1], [0], [0], [1], [0, 0, 1, 1], [], []>} : vector<8x32xbf16>, vector<32x128xbf16>, vector<8x128xf32> -> vector<8x128xf32>
    %c0_i32_64 = arith.constant 0 : i32
    %c0_i32_65 = arith.constant 0 : i32
    %c0_i32_66 = arith.constant 0 : i32
    %163 = tpu.memref_slice %arg1[%c0_i32_64, %c0_i32_65, %c0_i32_66] : memref<1x64x128xf32, #tpu.memory_space<vmem>> -> memref<1x64x128xf32, #tpu.memory_space<vmem>>
    %164 = tpu.memref_squeeze %163 : memref<1x64x128xf32, #tpu.memory_space<vmem>> -> memref<64x128xf32, #tpu.memory_space<vmem>>
    %c24 = arith.constant 24 : index
    %c0_67 = arith.constant 0 : index
    %165 = vector.load %164[%c24, %c0_67] : memref<64x128xf32, #tpu.memory_space<vmem>>, vector<8x128xf32>
    %166 = arith.addf %162, %165 : vector<8x128xf32>
    %167 = arith.truncf %154 : vector<8x32xf32> to vector<8x32xbf16>
    %cst_68 = arith.constant dense<0.000000e+00> : vector<8x128xf32>
    %168 = tpu.matmul %167, %6, %cst_68 {dimension_numbers = #tpu.dot_dimension_numbers<[1], [0], [0], [1], [0, 0, 1, 1], [], []>} : vector<8x32xbf16>, vector<32x128xbf16>, vector<8x128xf32> -> vector<8x128xf32>
    %c0_i32_69 = arith.constant 0 : i32
    %c0_i32_70 = arith.constant 0 : i32
    %c0_i32_71 = arith.constant 0 : i32
    %169 = tpu.memref_slice %arg2[%c0_i32_69, %c0_i32_70, %c0_i32_71] : memref<1x64x128xf32, #tpu.memory_space<vmem>> -> memref<1x64x128xf32, #tpu.memory_space<vmem>>
    %170 = tpu.memref_squeeze %169 : memref<1x64x128xf32, #tpu.memory_space<vmem>> -> memref<64x128xf32, #tpu.memory_space<vmem>>
    %c32 = arith.constant 32 : index
    %c0_72 = arith.constant 0 : index
    %171 = vector.load %170[%c32, %c0_72] : memref<64x128xf32, #tpu.memory_space<vmem>>, vector<8x128xf32>
    %172 = arith.addf %168, %171 : vector<8x128xf32>
    %173 = vector.extract_strided_slice %166 {offsets = [0, 0], sizes = [8, 96], strides = [1, 1]} : vector<8x128xf32> to vector<8x96xf32>
    %174 = arith.negf %173 : vector<8x96xf32>
    %175 = math.exp %174 : vector<8x96xf32>
    %cst_73 = arith.constant 1.000000e+00 : f32
    %176 = vector.broadcast %cst_73 : f32 to vector<8x96xf32>
    %177 = arith.addf %176, %175 : vector<8x96xf32>
    %178 = arith.divf %176, %177 : vector<8x96xf32>
    %179 = vector.extract_strided_slice %166 {offsets = [0, 96], sizes = [8, 32], strides = [1, 1]} : vector<8x128xf32> to vector<8x32xf32>
    %180 = math.tanh %179 : vector<8x32xf32>
    %181 = vector.extract_strided_slice %178 {offsets = [0, 32], sizes = [8, 32], strides = [1, 1]} : vector<8x96xf32> to vector<8x32xf32>
    %182 = arith.mulf %181, %135 : vector<8x32xf32>
    %183 = vector.extract_strided_slice %178 {offsets = [0, 0], sizes = [8, 32], strides = [1, 1]} : vector<8x96xf32> to vector<8x32xf32>
    %184 = arith.mulf %183, %180 : vector<8x32xf32>
    %185 = arith.addf %182, %184 : vector<8x32xf32>
    %186 = vector.extract_strided_slice %178 {offsets = [0, 64], sizes = [8, 32], strides = [1, 1]} : vector<8x96xf32> to vector<8x32xf32>
    %187 = math.tanh %185 : vector<8x32xf32>
    %188 = arith.mulf %186, %187 : vector<8x32xf32>
    %189 = vector.extract_strided_slice %172 {offsets = [0, 0], sizes = [8, 96], strides = [1, 1]} : vector<8x128xf32> to vector<8x96xf32>
    %190 = arith.negf %189 : vector<8x96xf32>
    %191 = math.exp %190 : vector<8x96xf32>
    %cst_74 = arith.constant 1.000000e+00 : f32
    %192 = vector.broadcast %cst_74 : f32 to vector<8x96xf32>
    %193 = arith.addf %192, %191 : vector<8x96xf32>
    %194 = arith.divf %192, %193 : vector<8x96xf32>
    %195 = vector.extract_strided_slice %172 {offsets = [0, 96], sizes = [8, 32], strides = [1, 1]} : vector<8x128xf32> to vector<8x32xf32>
    %196 = math.tanh %195 : vector<8x32xf32>
    %197 = vector.extract_strided_slice %194 {offsets = [0, 32], sizes = [8, 32], strides = [1, 1]} : vector<8x96xf32> to vector<8x32xf32>
    %198 = arith.mulf %197, %151 : vector<8x32xf32>
    %199 = vector.extract_strided_slice %194 {offsets = [0, 0], sizes = [8, 32], strides = [1, 1]} : vector<8x96xf32> to vector<8x32xf32>
    %200 = arith.mulf %199, %196 : vector<8x32xf32>
    %201 = arith.addf %198, %200 : vector<8x32xf32>
    %202 = vector.extract_strided_slice %194 {offsets = [0, 64], sizes = [8, 32], strides = [1, 1]} : vector<8x96xf32> to vector<8x32xf32>
    %203 = math.tanh %201 : vector<8x32xf32>
    %204 = arith.mulf %202, %203 : vector<8x32xf32>
    %c3 = arith.constant 3 : index
    %c0_75 = arith.constant 0 : index
    %c0_76 = arith.constant 0 : index
    %205 = vector.load %arg11[%c3, %c0_75, %c0_76] : memref<8x8x32xf32, #tpu.memory_space<vmem>>, vector<1x8x32xf32>
    %206 = vector.shape_cast %205 : vector<1x8x32xf32> to vector<8x32xf32>
    %207 = vector.shape_cast %188 : vector<8x32xf32> to vector<1x8x32xf32>
    tpu.vector_store %arg11[%c3, %c0_75, %c0_76], %207 {strides = array<i32>} : memref<8x8x32xf32, #tpu.memory_space<vmem>>, vector<1x8x32xf32>,
    %c4 = arith.constant 4 : index
    %c0_77 = arith.constant 0 : index
    %c0_78 = arith.constant 0 : index
    %208 = vector.load %arg12[%c4, %c0_77, %c0_78] : memref<8x8x32xf32, #tpu.memory_space<vmem>>, vector<1x8x32xf32>
    %209 = vector.shape_cast %208 : vector<1x8x32xf32> to vector<8x32xf32>
    %210 = vector.shape_cast %204 : vector<8x32xf32> to vector<1x8x32xf32>
    tpu.vector_store %arg12[%c4, %c0_77, %c0_78], %210 {strides = array<i32>} : memref<8x8x32xf32, #tpu.memory_space<vmem>>, vector<1x8x32xf32>,
    %211 = arith.truncf %188 : vector<8x32xf32> to vector<8x32xbf16>
    %cst_79 = arith.constant dense<0.000000e+00> : vector<8x128xf32>
    %212 = tpu.matmul %211, %4, %cst_79 {dimension_numbers = #tpu.dot_dimension_numbers<[1], [0], [0], [1], [0, 0, 1, 1], [], []>} : vector<8x32xbf16>, vector<32x128xbf16>, vector<8x128xf32> -> vector<8x128xf32>
    %c0_i32_80 = arith.constant 0 : i32
    %c0_i32_81 = arith.constant 0 : i32
    %c0_i32_82 = arith.constant 0 : i32
    %213 = tpu.memref_slice %arg1[%c0_i32_80, %c0_i32_81, %c0_i32_82] : memref<1x64x128xf32, #tpu.memory_space<vmem>> -> memref<1x64x128xf32, #tpu.memory_space<vmem>>
    %214 = tpu.memref_squeeze %213 : memref<1x64x128xf32, #tpu.memory_space<vmem>> -> memref<64x128xf32, #tpu.memory_space<vmem>>
    %c32_83 = arith.constant 32 : index
    %c0_84 = arith.constant 0 : index
    %215 = vector.load %214[%c32_83, %c0_84] : memref<64x128xf32, #tpu.memory_space<vmem>>, vector<8x128xf32>
    %216 = arith.addf %212, %215 : vector<8x128xf32>
    %217 = arith.truncf %204 : vector<8x32xf32> to vector<8x32xbf16>
    %cst_85 = arith.constant dense<0.000000e+00> : vector<8x128xf32>
    %218 = tpu.matmul %217, %6, %cst_85 {dimension_numbers = #tpu.dot_dimension_numbers<[1], [0], [0], [1], [0, 0, 1, 1], [], []>} : vector<8x32xbf16>, vector<32x128xbf16>, vector<8x128xf32> -> vector<8x128xf32>
    %c0_i32_86 = arith.constant 0 : i32
    %c0_i32_87 = arith.constant 0 : i32
    %c0_i32_88 = arith.constant 0 : i32
    %219 = tpu.memref_slice %arg2[%c0_i32_86, %c0_i32_87, %c0_i32_88] : memref<1x64x128xf32, #tpu.memory_space<vmem>> -> memref<1x64x128xf32, #tpu.memory_space<vmem>>
    %220 = tpu.memref_squeeze %219 : memref<1x64x128xf32, #tpu.memory_space<vmem>> -> memref<64x128xf32, #tpu.memory_space<vmem>>
    %c24_89 = arith.constant 24 : index
    %c0_90 = arith.constant 0 : index
    %221 = vector.load %220[%c24_89, %c0_90] : memref<64x128xf32, #tpu.memory_space<vmem>>, vector<8x128xf32>
    %222 = arith.addf %218, %221 : vector<8x128xf32>
    %223 = vector.extract_strided_slice %216 {offsets = [0, 0], sizes = [8, 96], strides = [1, 1]} : vector<8x128xf32> to vector<8x96xf32>
    %224 = arith.negf %223 : vector<8x96xf32>
    %225 = math.exp %224 : vector<8x96xf32>
    %cst_91 = arith.constant 1.000000e+00 : f32
    %226 = vector.broadcast %cst_91 : f32 to vector<8x96xf32>
    %227 = arith.addf %226, %225 : vector<8x96xf32>
    %228 = arith.divf %226, %227 : vector<8x96xf32>
    %229 = vector.extract_strided_slice %216 {offsets = [0, 96], sizes = [8, 32], strides = [1, 1]} : vector<8x128xf32> to vector<8x32xf32>
    %230 = math.tanh %229 : vector<8x32xf32>
    %231 = vector.extract_strided_slice %228 {offsets = [0, 32], sizes = [8, 32], strides = [1, 1]} : vector<8x96xf32> to vector<8x32xf32>
    %232 = arith.mulf %231, %185 : vector<8x32xf32>
    %233 = vector.extract_strided_slice %228 {offsets = [0, 0], sizes = [8, 32], strides = [1, 1]} : vector<8x96xf32> to vector<8x32xf32>
    %234 = arith.mulf %233, %230 : vector<8x32xf32>
    %235 = arith.addf %232, %234 : vector<8x32xf32>
    %236 = vector.extract_strided_slice %228 {offsets = [0, 64], sizes = [8, 32], strides = [1, 1]} : vector<8x96xf32> to vector<8x32xf32>
    %237 = math.tanh %235 : vector<8x32xf32>
    %238 = arith.mulf %236, %237 : vector<8x32xf32>
    %239 = vector.extract_strided_slice %222 {offsets = [0, 0], sizes = [8, 96], strides = [1, 1]} : vector<8x128xf32> to vector<8x96xf32>
    %240 = arith.negf %239 : vector<8x96xf32>
    %241 = math.exp %240 : vector<8x96xf32>
    %cst_92 = arith.constant 1.000000e+00 : f32
    %242 = vector.broadcast %cst_92 : f32 to vector<8x96xf32>
    %243 = arith.addf %242, %241 : vector<8x96xf32>
    %244 = arith.divf %242, %243 : vector<8x96xf32>
    %245 = vector.extract_strided_slice %222 {offsets = [0, 96], sizes = [8, 32], strides = [1, 1]} : vector<8x128xf32> to vector<8x32xf32>
    %246 = math.tanh %245 : vector<8x32xf32>
    %247 = vector.extract_strided_slice %244 {offsets = [0, 32], sizes = [8, 32], strides = [1, 1]} : vector<8x96xf32> to vector<8x32xf32>
    %248 = arith.mulf %247, %201 : vector<8x32xf32>
    %249 = vector.extract_strided_slice %244 {offsets = [0, 0], sizes = [8, 32], strides = [1, 1]} : vector<8x96xf32> to vector<8x32xf32>
    %250 = arith.mulf %249, %246 : vector<8x32xf32>
    %251 = arith.addf %248, %250 : vector<8x32xf32>
    %252 = vector.extract_strided_slice %244 {offsets = [0, 64], sizes = [8, 32], strides = [1, 1]} : vector<8x96xf32> to vector<8x32xf32>
    %253 = math.tanh %251 : vector<8x32xf32>
    %254 = arith.mulf %252, %253 : vector<8x32xf32>
    %c4_93 = arith.constant 4 : index
    %c0_94 = arith.constant 0 : index
    %c0_95 = arith.constant 0 : index
    %255 = vector.load %arg11[%c4_93, %c0_94, %c0_95] : memref<8x8x32xf32, #tpu.memory_space<vmem>>, vector<1x8x32xf32>
    %256 = vector.shape_cast %255 : vector<1x8x32xf32> to vector<8x32xf32>
    %257 = vector.shape_cast %238 : vector<8x32xf32> to vector<1x8x32xf32>
    tpu.vector_store %arg11[%c4_93, %c0_94, %c0_95], %257 {strides = array<i32>} : memref<8x8x32xf32, #tpu.memory_space<vmem>>, vector<1x8x32xf32>,
    %c3_96 = arith.constant 3 : index
    %c0_97 = arith.constant 0 : index
    %c0_98 = arith.constant 0 : index
    %258 = vector.load %arg12[%c3_96, %c0_97, %c0_98] : memref<8x8x32xf32, #tpu.memory_space<vmem>>, vector<1x8x32xf32>
    %259 = vector.shape_cast %258 : vector<1x8x32xf32> to vector<8x32xf32>
    %260 = vector.shape_cast %254 : vector<8x32xf32> to vector<1x8x32xf32>
    tpu.vector_store %arg12[%c3_96, %c0_97, %c0_98], %260 {strides = array<i32>} : memref<8x8x32xf32, #tpu.memory_space<vmem>>, vector<1x8x32xf32>,
    %261 = arith.truncf %238 : vector<8x32xf32> to vector<8x32xbf16>
    %cst_99 = arith.constant dense<0.000000e+00> : vector<8x128xf32>
    %262 = tpu.matmul %261, %4, %cst_99 {dimension_numbers = #tpu.dot_dimension_numbers<[1], [0], [0], [1], [0, 0, 1, 1], [], []>} : vector<8x32xbf16>, vector<32x128xbf16>, vector<8x128xf32> -> vector<8x128xf32>
    %c0_i32_100 = arith.constant 0 : i32
    %c0_i32_101 = arith.constant 0 : i32
    %c0_i32_102 = arith.constant 0 : i32
    %263 = tpu.memref_slice %arg1[%c0_i32_100, %c0_i32_101, %c0_i32_102] : memref<1x64x128xf32, #tpu.memory_space<vmem>> -> memref<1x64x128xf32, #tpu.memory_space<vmem>>
    %264 = tpu.memref_squeeze %263 : memref<1x64x128xf32, #tpu.memory_space<vmem>> -> memref<64x128xf32, #tpu.memory_space<vmem>>
    %c40_103 = arith.constant 40 : index
    %c0_104 = arith.constant 0 : index
    %265 = vector.load %264[%c40_103, %c0_104] : memref<64x128xf32, #tpu.memory_space<vmem>>, vector<8x128xf32>
    %266 = arith.addf %262, %265 : vector<8x128xf32>
    %267 = arith.truncf %254 : vector<8x32xf32> to vector<8x32xbf16>
    %cst_105 = arith.constant dense<0.000000e+00> : vector<8x128xf32>
    %268 = tpu.matmul %267, %6, %cst_105 {dimension_numbers = #tpu.dot_dimension_numbers<[1], [0], [0], [1], [0, 0, 1, 1], [], []>} : vector<8x32xbf16>, vector<32x128xbf16>, vector<8x128xf32> -> vector<8x128xf32>
    %c0_i32_106 = arith.constant 0 : i32
    %c0_i32_107 = arith.constant 0 : i32
    %c0_i32_108 = arith.constant 0 : i32
    %269 = tpu.memref_slice %arg2[%c0_i32_106, %c0_i32_107, %c0_i32_108] : memref<1x64x128xf32, #tpu.memory_space<vmem>> -> memref<1x64x128xf32, #tpu.memory_space<vmem>>
    %270 = tpu.memref_squeeze %269 : memref<1x64x128xf32, #tpu.memory_space<vmem>> -> memref<64x128xf32, #tpu.memory_space<vmem>>
    %c16_109 = arith.constant 16 : index
    %c0_110 = arith.constant 0 : index
    %271 = vector.load %270[%c16_109, %c0_110] : memref<64x128xf32, #tpu.memory_space<vmem>>, vector<8x128xf32>
    %272 = arith.addf %268, %271 : vector<8x128xf32>
    %273 = vector.extract_strided_slice %266 {offsets = [0, 0], sizes = [8, 96], strides = [1, 1]} : vector<8x128xf32> to vector<8x96xf32>
    %274 = arith.negf %273 : vector<8x96xf32>
    %275 = math.exp %274 : vector<8x96xf32>
    %cst_111 = arith.constant 1.000000e+00 : f32
    %276 = vector.broadcast %cst_111 : f32 to vector<8x96xf32>
    %277 = arith.addf %276, %275 : vector<8x96xf32>
    %278 = arith.divf %276, %277 : vector<8x96xf32>
    %279 = vector.extract_strided_slice %266 {offsets = [0, 96], sizes = [8, 32], strides = [1, 1]} : vector<8x128xf32> to vector<8x32xf32>
    %280 = math.tanh %279 : vector<8x32xf32>
    %281 = vector.extract_strided_slice %278 {offsets = [0, 32], sizes = [8, 32], strides = [1, 1]} : vector<8x96xf32> to vector<8x32xf32>
    %282 = arith.mulf %281, %235 : vector<8x32xf32>
    %283 = vector.extract_strided_slice %278 {offsets = [0, 0], sizes = [8, 32], strides = [1, 1]} : vector<8x96xf32> to vector<8x32xf32>
    %284 = arith.mulf %283, %280 : vector<8x32xf32>
    %285 = arith.addf %282, %284 : vector<8x32xf32>
    %286 = vector.extract_strided_slice %278 {offsets = [0, 64], sizes = [8, 32], strides = [1, 1]} : vector<8x96xf32> to vector<8x32xf32>
    %287 = math.tanh %285 : vector<8x32xf32>
    %288 = arith.mulf %286, %287 : vector<8x32xf32>
    %289 = vector.extract_strided_slice %272 {offsets = [0, 0], sizes = [8, 96], strides = [1, 1]} : vector<8x128xf32> to vector<8x96xf32>
    %290 = arith.negf %289 : vector<8x96xf32>
    %291 = math.exp %290 : vector<8x96xf32>
    %cst_112 = arith.constant 1.000000e+00 : f32
    %292 = vector.broadcast %cst_112 : f32 to vector<8x96xf32>
    %293 = arith.addf %292, %291 : vector<8x96xf32>
    %294 = arith.divf %292, %293 : vector<8x96xf32>
    %295 = vector.extract_strided_slice %272 {offsets = [0, 96], sizes = [8, 32], strides = [1, 1]} : vector<8x128xf32> to vector<8x32xf32>
    %296 = math.tanh %295 : vector<8x32xf32>
    %297 = vector.extract_strided_slice %294 {offsets = [0, 32], sizes = [8, 32], strides = [1, 1]} : vector<8x96xf32> to vector<8x32xf32>
    %298 = arith.mulf %297, %251 : vector<8x32xf32>
    %299 = vector.extract_strided_slice %294 {offsets = [0, 0], sizes = [8, 32], strides = [1, 1]} : vector<8x96xf32> to vector<8x32xf32>
    %300 = arith.mulf %299, %296 : vector<8x32xf32>
    %301 = arith.addf %298, %300 : vector<8x32xf32>
    %302 = vector.extract_strided_slice %294 {offsets = [0, 64], sizes = [8, 32], strides = [1, 1]} : vector<8x96xf32> to vector<8x32xf32>
    %303 = math.tanh %301 : vector<8x32xf32>
    %304 = arith.mulf %302, %303 : vector<8x32xf32>
    %c5_113 = arith.constant 5 : index
    %c0_114 = arith.constant 0 : index
    %c0_115 = arith.constant 0 : index
    %305 = vector.load %arg11[%c5_113, %c0_114, %c0_115] : memref<8x8x32xf32, #tpu.memory_space<vmem>>, vector<1x8x32xf32>
    %306 = vector.shape_cast %305 : vector<1x8x32xf32> to vector<8x32xf32>
    %307 = vector.shape_cast %288 : vector<8x32xf32> to vector<1x8x32xf32>
    tpu.vector_store %arg11[%c5_113, %c0_114, %c0_115], %307 {strides = array<i32>} : memref<8x8x32xf32, #tpu.memory_space<vmem>>, vector<1x8x32xf32>,
    %c2_116 = arith.constant 2 : index
    %c0_117 = arith.constant 0 : index
    %c0_118 = arith.constant 0 : index
    %308 = vector.load %arg12[%c2_116, %c0_117, %c0_118] : memref<8x8x32xf32, #tpu.memory_space<vmem>>, vector<1x8x32xf32>
    %309 = vector.shape_cast %308 : vector<1x8x32xf32> to vector<8x32xf32>
    %310 = vector.shape_cast %304 : vector<8x32xf32> to vector<1x8x32xf32>
    tpu.vector_store %arg12[%c2_116, %c0_117, %c0_118], %310 {strides = array<i32>} : memref<8x8x32xf32, #tpu.memory_space<vmem>>, vector<1x8x32xf32>,
    %311 = arith.truncf %288 : vector<8x32xf32> to vector<8x32xbf16>
    %cst_119 = arith.constant dense<0.000000e+00> : vector<8x128xf32>
    %312 = tpu.matmul %311, %4, %cst_119 {dimension_numbers = #tpu.dot_dimension_numbers<[1], [0], [0], [1], [0, 0, 1, 1], [], []>} : vector<8x32xbf16>, vector<32x128xbf16>, vector<8x128xf32> -> vector<8x128xf32>
    %c0_i32_120 = arith.constant 0 : i32
    %c0_i32_121 = arith.constant 0 : i32
    %c0_i32_122 = arith.constant 0 : i32
    %313 = tpu.memref_slice %arg1[%c0_i32_120, %c0_i32_121, %c0_i32_122] : memref<1x64x128xf32, #tpu.memory_space<vmem>> -> memref<1x64x128xf32, #tpu.memory_space<vmem>>
    %314 = tpu.memref_squeeze %313 : memref<1x64x128xf32, #tpu.memory_space<vmem>> -> memref<64x128xf32, #tpu.memory_space<vmem>>
    %c48_123 = arith.constant 48 : index
    %c0_124 = arith.constant 0 : index
    %315 = vector.load %314[%c48_123, %c0_124] : memref<64x128xf32, #tpu.memory_space<vmem>>, vector<8x128xf32>
    %316 = arith.addf %312, %315 : vector<8x128xf32>
    %317 = arith.truncf %304 : vector<8x32xf32> to vector<8x32xbf16>
    %cst_125 = arith.constant dense<0.000000e+00> : vector<8x128xf32>
    %318 = tpu.matmul %317, %6, %cst_125 {dimension_numbers = #tpu.dot_dimension_numbers<[1], [0], [0], [1], [0, 0, 1, 1], [], []>} : vector<8x32xbf16>, vector<32x128xbf16>, vector<8x128xf32> -> vector<8x128xf32>
    %c0_i32_126 = arith.constant 0 : i32
    %c0_i32_127 = arith.constant 0 : i32
    %c0_i32_128 = arith.constant 0 : i32
    %319 = tpu.memref_slice %arg2[%c0_i32_126, %c0_i32_127, %c0_i32_128] : memref<1x64x128xf32, #tpu.memory_space<vmem>> -> memref<1x64x128xf32, #tpu.memory_space<vmem>>
    %320 = tpu.memref_squeeze %319 : memref<1x64x128xf32, #tpu.memory_space<vmem>> -> memref<64x128xf32, #tpu.memory_space<vmem>>
    %c8_129 = arith.constant 8 : index
    %c0_130 = arith.constant 0 : index
    %321 = vector.load %320[%c8_129, %c0_130] : memref<64x128xf32, #tpu.memory_space<vmem>>, vector<8x128xf32>
    %322 = arith.addf %318, %321 : vector<8x128xf32>
    %323 = vector.extract_strided_slice %316 {offsets = [0, 0], sizes = [8, 96], strides = [1, 1]} : vector<8x128xf32> to vector<8x96xf32>
    %324 = arith.negf %323 : vector<8x96xf32>
    %325 = math.exp %324 : vector<8x96xf32>
    %cst_131 = arith.constant 1.000000e+00 : f32
    %326 = vector.broadcast %cst_131 : f32 to vector<8x96xf32>
    %327 = arith.addf %326, %325 : vector<8x96xf32>
    %328 = arith.divf %326, %327 : vector<8x96xf32>
    %329 = vector.extract_strided_slice %316 {offsets = [0, 96], sizes = [8, 32], strides = [1, 1]} : vector<8x128xf32> to vector<8x32xf32>
    %330 = math.tanh %329 : vector<8x32xf32>
    %331 = vector.extract_strided_slice %328 {offsets = [0, 32], sizes = [8, 32], strides = [1, 1]} : vector<8x96xf32> to vector<8x32xf32>
    %332 = arith.mulf %331, %285 : vector<8x32xf32>
    %333 = vector.extract_strided_slice %328 {offsets = [0, 0], sizes = [8, 32], strides = [1, 1]} : vector<8x96xf32> to vector<8x32xf32>
    %334 = arith.mulf %333, %330 : vector<8x32xf32>
    %335 = arith.addf %332, %334 : vector<8x32xf32>
    %336 = vector.extract_strided_slice %328 {offsets = [0, 64], sizes = [8, 32], strides = [1, 1]} : vector<8x96xf32> to vector<8x32xf32>
    %337 = math.tanh %335 : vector<8x32xf32>
    %338 = arith.mulf %336, %337 : vector<8x32xf32>
    %339 = vector.extract_strided_slice %322 {offsets = [0, 0], sizes = [8, 96], strides = [1, 1]} : vector<8x128xf32> to vector<8x96xf32>
    %340 = arith.negf %339 : vector<8x96xf32>
    %341 = math.exp %340 : vector<8x96xf32>
    %cst_132 = arith.constant 1.000000e+00 : f32
    %342 = vector.broadcast %cst_132 : f32 to vector<8x96xf32>
    %343 = arith.addf %342, %341 : vector<8x96xf32>
    %344 = arith.divf %342, %343 : vector<8x96xf32>
    %345 = vector.extract_strided_slice %322 {offsets = [0, 96], sizes = [8, 32], strides = [1, 1]} : vector<8x128xf32> to vector<8x32xf32>
    %346 = math.tanh %345 : vector<8x32xf32>
    %347 = vector.extract_strided_slice %344 {offsets = [0, 32], sizes = [8, 32], strides = [1, 1]} : vector<8x96xf32> to vector<8x32xf32>
    %348 = arith.mulf %347, %301 : vector<8x32xf32>
    %349 = vector.extract_strided_slice %344 {offsets = [0, 0], sizes = [8, 32], strides = [1, 1]} : vector<8x96xf32> to vector<8x32xf32>
    %350 = arith.mulf %349, %346 : vector<8x32xf32>
    %351 = arith.addf %348, %350 : vector<8x32xf32>
    %352 = vector.extract_strided_slice %344 {offsets = [0, 64], sizes = [8, 32], strides = [1, 1]} : vector<8x96xf32> to vector<8x32xf32>
    %353 = math.tanh %351 : vector<8x32xf32>
    %354 = arith.mulf %352, %353 : vector<8x32xf32>
    %c6_133 = arith.constant 6 : index
    %c0_134 = arith.constant 0 : index
    %c0_135 = arith.constant 0 : index
    %355 = vector.load %arg11[%c6_133, %c0_134, %c0_135] : memref<8x8x32xf32, #tpu.memory_space<vmem>>, vector<1x8x32xf32>
    %356 = vector.shape_cast %355 : vector<1x8x32xf32> to vector<8x32xf32>
    %357 = vector.shape_cast %338 : vector<8x32xf32> to vector<1x8x32xf32>
    tpu.vector_store %arg11[%c6_133, %c0_134, %c0_135], %357 {strides = array<i32>} : memref<8x8x32xf32, #tpu.memory_space<vmem>>, vector<1x8x32xf32>,
    %c1_136 = arith.constant 1 : index
    %c0_137 = arith.constant 0 : index
    %c0_138 = arith.constant 0 : index
    %358 = vector.load %arg12[%c1_136, %c0_137, %c0_138] : memref<8x8x32xf32, #tpu.memory_space<vmem>>, vector<1x8x32xf32>
    %359 = vector.shape_cast %358 : vector<1x8x32xf32> to vector<8x32xf32>
    %360 = vector.shape_cast %354 : vector<8x32xf32> to vector<1x8x32xf32>
    tpu.vector_store %arg12[%c1_136, %c0_137, %c0_138], %360 {strides = array<i32>} : memref<8x8x32xf32, #tpu.memory_space<vmem>>, vector<1x8x32xf32>,
    %361 = arith.truncf %338 : vector<8x32xf32> to vector<8x32xbf16>
    %cst_139 = arith.constant dense<0.000000e+00> : vector<8x128xf32>
    %362 = tpu.matmul %361, %4, %cst_139 {dimension_numbers = #tpu.dot_dimension_numbers<[1], [0], [0], [1], [0, 0, 1, 1], [], []>} : vector<8x32xbf16>, vector<32x128xbf16>, vector<8x128xf32> -> vector<8x128xf32>
    %c0_i32_140 = arith.constant 0 : i32
    %c0_i32_141 = arith.constant 0 : i32
    %c0_i32_142 = arith.constant 0 : i32
    %363 = tpu.memref_slice %arg1[%c0_i32_140, %c0_i32_141, %c0_i32_142] : memref<1x64x128xf32, #tpu.memory_space<vmem>> -> memref<1x64x128xf32, #tpu.memory_space<vmem>>
    %364 = tpu.memref_squeeze %363 : memref<1x64x128xf32, #tpu.memory_space<vmem>> -> memref<64x128xf32, #tpu.memory_space<vmem>>
    %c56_143 = arith.constant 56 : index
    %c0_144 = arith.constant 0 : index
    %365 = vector.load %364[%c56_143, %c0_144] : memref<64x128xf32, #tpu.memory_space<vmem>>, vector<8x128xf32>
    %366 = arith.addf %362, %365 : vector<8x128xf32>
    %367 = arith.truncf %354 : vector<8x32xf32> to vector<8x32xbf16>
    %cst_145 = arith.constant dense<0.000000e+00> : vector<8x128xf32>
    %368 = tpu.matmul %367, %6, %cst_145 {dimension_numbers = #tpu.dot_dimension_numbers<[1], [0], [0], [1], [0, 0, 1, 1], [], []>} : vector<8x32xbf16>, vector<32x128xbf16>, vector<8x128xf32> -> vector<8x128xf32>
    %c0_i32_146 = arith.constant 0 : i32
    %c0_i32_147 = arith.constant 0 : i32
    %c0_i32_148 = arith.constant 0 : i32
    %369 = tpu.memref_slice %arg2[%c0_i32_146, %c0_i32_147, %c0_i32_148] : memref<1x64x128xf32, #tpu.memory_space<vmem>> -> memref<1x64x128xf32, #tpu.memory_space<vmem>>
    %370 = tpu.memref_squeeze %369 : memref<1x64x128xf32, #tpu.memory_space<vmem>> -> memref<64x128xf32, #tpu.memory_space<vmem>>
    %c0_149 = arith.constant 0 : index
    %c0_150 = arith.constant 0 : index
    %371 = vector.load %370[%c0_149, %c0_150] : memref<64x128xf32, #tpu.memory_space<vmem>>, vector<8x128xf32>
    %372 = arith.addf %368, %371 : vector<8x128xf32>
    %373 = vector.extract_strided_slice %366 {offsets = [0, 0], sizes = [8, 96], strides = [1, 1]} : vector<8x128xf32> to vector<8x96xf32>
    %374 = arith.negf %373 : vector<8x96xf32>
    %375 = math.exp %374 : vector<8x96xf32>
    %cst_151 = arith.constant 1.000000e+00 : f32
    %376 = vector.broadcast %cst_151 : f32 to vector<8x96xf32>
    %377 = arith.addf %376, %375 : vector<8x96xf32>
    %378 = arith.divf %376, %377 : vector<8x96xf32>
    %379 = vector.extract_strided_slice %366 {offsets = [0, 96], sizes = [8, 32], strides = [1, 1]} : vector<8x128xf32> to vector<8x32xf32>
    %380 = math.tanh %379 : vector<8x32xf32>
    %381 = vector.extract_strided_slice %378 {offsets = [0, 32], sizes = [8, 32], strides = [1, 1]} : vector<8x96xf32> to vector<8x32xf32>
    %382 = arith.mulf %381, %335 : vector<8x32xf32>
    %383 = vector.extract_strided_slice %378 {offsets = [0, 0], sizes = [8, 32], strides = [1, 1]} : vector<8x96xf32> to vector<8x32xf32>
    %384 = arith.mulf %383, %380 : vector<8x32xf32>
    %385 = arith.addf %382, %384 : vector<8x32xf32>
    %386 = vector.extract_strided_slice %378 {offsets = [0, 64], sizes = [8, 32], strides = [1, 1]} : vector<8x96xf32> to vector<8x32xf32>
    %387 = math.tanh %385 : vector<8x32xf32>
    %388 = arith.mulf %386, %387 : vector<8x32xf32>
    %389 = vector.extract_strided_slice %372 {offsets = [0, 0], sizes = [8, 96], strides = [1, 1]} : vector<8x128xf32> to vector<8x96xf32>
    %390 = arith.negf %389 : vector<8x96xf32>
    %391 = math.exp %390 : vector<8x96xf32>
    %cst_152 = arith.constant 1.000000e+00 : f32
    %392 = vector.broadcast %cst_152 : f32 to vector<8x96xf32>
    %393 = arith.addf %392, %391 : vector<8x96xf32>
    %394 = arith.divf %392, %393 : vector<8x96xf32>
    %395 = vector.extract_strided_slice %372 {offsets = [0, 96], sizes = [8, 32], strides = [1, 1]} : vector<8x128xf32> to vector<8x32xf32>
    %396 = math.tanh %395 : vector<8x32xf32>
    %397 = vector.extract_strided_slice %394 {offsets = [0, 32], sizes = [8, 32], strides = [1, 1]} : vector<8x96xf32> to vector<8x32xf32>
    %398 = arith.mulf %397, %351 : vector<8x32xf32>
    %399 = vector.extract_strided_slice %394 {offsets = [0, 0], sizes = [8, 32], strides = [1, 1]} : vector<8x96xf32> to vector<8x32xf32>
    %400 = arith.mulf %399, %396 : vector<8x32xf32>
    %401 = arith.addf %398, %400 : vector<8x32xf32>
    %402 = vector.extract_strided_slice %394 {offsets = [0, 64], sizes = [8, 32], strides = [1, 1]} : vector<8x96xf32> to vector<8x32xf32>
    %403 = math.tanh %401 : vector<8x32xf32>
    %404 = arith.mulf %402, %403 : vector<8x32xf32>
    %c7_153 = arith.constant 7 : index
    %c0_154 = arith.constant 0 : index
    %c0_155 = arith.constant 0 : index
    %405 = vector.load %arg11[%c7_153, %c0_154, %c0_155] : memref<8x8x32xf32, #tpu.memory_space<vmem>>, vector<1x8x32xf32>
    %406 = vector.shape_cast %405 : vector<1x8x32xf32> to vector<8x32xf32>
    %407 = vector.shape_cast %388 : vector<8x32xf32> to vector<1x8x32xf32>
    tpu.vector_store %arg11[%c7_153, %c0_154, %c0_155], %407 {strides = array<i32>} : memref<8x8x32xf32, #tpu.memory_space<vmem>>, vector<1x8x32xf32>,
    %c0_156 = arith.constant 0 : index
    %c0_157 = arith.constant 0 : index
    %c0_158 = arith.constant 0 : index
    %408 = vector.load %arg12[%c0_156, %c0_157, %c0_158] : memref<8x8x32xf32, #tpu.memory_space<vmem>>, vector<1x8x32xf32>
    %409 = vector.shape_cast %408 : vector<1x8x32xf32> to vector<8x32xf32>
    %410 = vector.shape_cast %404 : vector<8x32xf32> to vector<1x8x32xf32>
    tpu.vector_store %arg12[%c0_156, %c0_157, %c0_158], %410 {strides = array<i32>} : memref<8x8x32xf32, #tpu.memory_space<vmem>>, vector<1x8x32xf32>,
    %c0_159 = arith.constant 0 : index
    %c0_160 = arith.constant 0 : index
    %411 = vector.load %arg7[%c0_159, %c0_160] : memref<8x32xf32, #tpu.memory_space<vmem>>, vector<8x32xf32>
    tpu.vector_store %arg7[%c0_159, %c0_160], %388 {strides = array<i32>} : memref<8x32xf32, #tpu.memory_space<vmem>>, vector<8x32xf32>,
    %c0_161 = arith.constant 0 : index
    %c0_162 = arith.constant 0 : index
    %412 = vector.load %arg8[%c0_161, %c0_162] : memref<8x32xf32, #tpu.memory_space<vmem>>, vector<8x32xf32>
    tpu.vector_store %arg8[%c0_161, %c0_162], %385 {strides = array<i32>} : memref<8x32xf32, #tpu.memory_space<vmem>>, vector<8x32xf32>,
    %c0_163 = arith.constant 0 : index
    %c0_164 = arith.constant 0 : index
    %413 = vector.load %arg9[%c0_163, %c0_164] : memref<8x32xf32, #tpu.memory_space<vmem>>, vector<8x32xf32>
    tpu.vector_store %arg9[%c0_163, %c0_164], %404 {strides = array<i32>} : memref<8x32xf32, #tpu.memory_space<vmem>>, vector<8x32xf32>,
    %c0_165 = arith.constant 0 : index
    %c0_166 = arith.constant 0 : index
    %414 = vector.load %arg10[%c0_165, %c0_166] : memref<8x32xf32, #tpu.memory_space<vmem>>, vector<8x32xf32>
    tpu.vector_store %arg10[%c0_165, %c0_166], %401 {strides = array<i32>} : memref<8x32xf32, #tpu.memory_space<vmem>>, vector<8x32xf32>,
    %c0_167 = arith.constant 0 : index
    %c0_168 = arith.constant 0 : index
    %c0_169 = arith.constant 0 : index
    %415 = vector.load %arg11[%c0_167, %c0_168, %c0_169] : memref<8x8x32xf32, #tpu.memory_space<vmem>>, vector<8x8x32xf32>
    %c0_170 = arith.constant 0 : index
    %c0_171 = arith.constant 0 : index
    %c0_172 = arith.constant 0 : index
    %416 = vector.load %arg4[%c0_170, %c0_171, %c0_172] : memref<2x1x32xf32, #tpu.memory_space<vmem>>, vector<1x1x32xf32>
    %417 = vector.shape_cast %416 : vector<1x1x32xf32> to vector<1x32xf32>
    %418 = vector.shape_cast %417 : vector<1x32xf32> to vector<1x1x32xf32>
    %419 = vector.broadcast %418 : vector<1x1x32xf32> to vector<8x8x32xf32>
    %420 = arith.mulf %415, %419 : vector<8x8x32xf32>
    %cst_173 = arith.constant dense<0.000000e+00> : vector<8x8xf32>
    %421 = vector.multi_reduction <add>, %420, %cst_173 [2] : vector<8x8x32xf32> to vector<8x8xf32>
    %c0_174 = arith.constant 0 : index
    %c0_175 = arith.constant 0 : index
    %422 = vector.load %arg5[%c0_174, %c0_175] : memref<8x8xf32, #tpu.memory_space<vmem>>, vector<8x8xf32>
    tpu.vector_store %arg5[%c0_174, %c0_175], %421 {strides = array<i32>} : memref<8x8xf32, #tpu.memory_space<vmem>>, vector<8x8xf32>,
    %c0_176 = arith.constant 0 : index
    %c0_177 = arith.constant 0 : index
    %c0_178 = arith.constant 0 : index
    %423 = vector.load %arg12[%c0_176, %c0_177, %c0_178] : memref<8x8x32xf32, #tpu.memory_space<vmem>>, vector<8x8x32xf32>
    %c1_179 = arith.constant 1 : index
    %c0_180 = arith.constant 0 : index
    %c0_181 = arith.constant 0 : index
    %424 = vector.load %arg4[%c1_179, %c0_180, %c0_181] : memref<2x1x32xf32, #tpu.memory_space<vmem>>, vector<1x1x32xf32>
    %425 = vector.shape_cast %424 : vector<1x1x32xf32> to vector<1x32xf32>
    %426 = vector.shape_cast %425 : vector<1x32xf32> to vector<1x1x32xf32>
    %427 = vector.broadcast %426 : vector<1x1x32xf32> to vector<8x8x32xf32>
    %428 = arith.mulf %423, %427 : vector<8x8x32xf32>
    %cst_182 = arith.constant dense<0.000000e+00> : vector<8x8xf32>
    %429 = vector.multi_reduction <add>, %428, %cst_182 [2] : vector<8x8x32xf32> to vector<8x8xf32>
    %c0_183 = arith.constant 0 : index
    %c0_184 = arith.constant 0 : index
    %430 = vector.load %arg6[%c0_183, %c0_184] : memref<8x8xf32, #tpu.memory_space<vmem>>, vector<8x8xf32>
    tpu.vector_store %arg6[%c0_183, %c0_184], %429 {strides = array<i32>} : memref<8x8xf32, #tpu.memory_space<vmem>>, vector<8x8xf32>,
    return
  }
  func.func @transform_0(%arg0: i32) -> (i32, i32, i32) {
    %c0_i32 = arith.constant 0 : i32
    %c0_i32_0 = arith.constant 0 : i32
    %c0_i32_1 = arith.constant 0 : i32
    return %c0_i32, %arg0, %c0_i32_0 : i32, i32, i32
  }
  func.func @transform_1(%arg0: i32) -> (i32, i32, i32) {
    %c1_i32 = arith.constant 1 : i32
    %0 = arith.subi %c1_i32, %arg0 : i32
    %c1_i32_0 = arith.constant 1 : i32
    %c0_i32 = arith.constant 0 : i32
    %c0_i32_1 = arith.constant 0 : i32
    return %c1_i32_0, %0, %c0_i32 : i32, i32, i32
  }
  func.func @transform_2(%arg0: i32) -> (i32, i32, i32) {
    %c0_i32 = arith.constant 0 : i32
    %c0_i32_0 = arith.constant 0 : i32
    %c0_i32_1 = arith.constant 0 : i32
    %c0_i32_2 = arith.constant 0 : i32
    return %c0_i32, %c0_i32_0, %c0_i32_1 : i32, i32, i32
  }
  func.func @transform_3(%arg0: i32) -> (i32, i32, i32) {
    %c0_i32 = arith.constant 0 : i32
    %c0_i32_0 = arith.constant 0 : i32
    %c0_i32_1 = arith.constant 0 : i32
    %c0_i32_2 = arith.constant 0 : i32
    return %c0_i32, %c0_i32_0, %c0_i32_1 : i32, i32, i32
  }
  func.func @transform_4(%arg0: i32) -> (i32, i32) {
    %c0_i32 = arith.constant 0 : i32
    %c0_i32_0 = arith.constant 0 : i32
    return %arg0, %c0_i32 : i32, i32
  }
  func.func @transform_5(%arg0: i32) -> (i32, i32) {
    %c1_i32 = arith.constant 1 : i32
    %0 = arith.subi %c1_i32, %arg0 : i32
    %c0_i32 = arith.constant 0 : i32
    %c0_i32_0 = arith.constant 0 : i32
    return %0, %c0_i32 : i32, i32
  }
}

</mosaic_0001>

<bundles_post_ra>
// kernel: cnn_blstm_forward.6
= control target key start
LH: loop header
LB: loop body
LE: loop exit
PB: predicated region body
PF: predicated region fallthrough
CT: control target
= control target key end

     0   :  { %s866_s15 = smov 0   ;;  %s868_s16 = smov 0   ;;  %s1008_s0 = inlined_call_operand.vmem [shape: bf16[128,32], index: 0, kind: input, shape index: {}]   ;;  %s1009_s1 = inlined_call_operand.vmem [shape: bf16[128,32], index: 1, kind: input, shape index: {}]   ;;  %s1010_s2 = inlined_call_operand.vmem [shape: bf16[2,32,256], index: 2, kind: input, shape index: {}]   ;;  %s1011_s3 = inlined_call_operand.vmem [shape: f32[1,256], index: 3, kind: input, shape index: {}]   ;;  %s1012_s4 = inlined_call_operand.vmem [shape: f32[2,128,128], index: 4, kind: output, shape index: {}]  }
   0x1   :  { %s870_s17 = smov 0  }
   0x2 LB: > { %s879_s18 = sadd.s32 4294967295, %s838_s17   ;;  %s881_s19 = sadd.s32 1, %s838_s17   ;;  %s838_s17 = sphi %s870_s17, %s1016_s17   ;;  %s834_s16 = sphi %s868_s16, %s1015_s16   ;;  %s830_s15 = sphi %s866_s15, %s1014_s15  }
   0x3   : > { %s112_s20 = ssub.s32 %s838_s17, %s881_s19  ;;  %s115_s21 = sadd.s32 1, %s834_s16 }
   0x4   : > { %p113_p0 = scmp.eq.s32.totalorder %s112_s20, 0  ;;  %p125_p1 = scmp.ne.s32.totalorder %s834_s16, %s830_s15 }
   0x5   : > { %p126_p2 = scmp.eq.s32.totalorder %s879_s18, 1  ;;  %p707_p3 = scmp.ge.s32.totalorder %s838_s17, 1 }
   0x6   : > { %s889_s22 = scalar_select %p113_p0, %s834_s16, %s115_s21  }
   0x7   : > { %p891_p4 = por %p126_p2, %p125_p1  ;;  %p174_p5 = scmp.lt.s32.totalorder %s838_s17, 3 }
   0x9   : > { %p175_p6 = pnand %p707_p3, %p174_p5 }
   0xa   : > { %v796_v0 = vld [vmem:[%s1010_s2 + $0x24] ss:$8 sps:$4 sm:$0xff] (!%p175_p6)   ;;  %s709_s26 = sshll.u32 (!%p175_p6), %s879_s18, 3  ;;  %v840_v2 = vmov (!%p175_p6), 0   ;;  %v800_v3 = vld [vmem:[%s1010_s2 + $0x20] ss:$8 sps:$4 sm:$0xff] (!%p175_p6)   ;;  %v496_v17 = vlaneseq (!%p175_p6) }
   0xb   : > { %178 = sbr.rel (%p175_p6) target bundleno = 275 (0x113), region = 36  ;;  %v798_v1 = vld [vmem:[%s1010_s2 + $0x4] ss:$8 sps:$4 sm:$0xff] (!%p175_p6)   ;;  %328 = vmatprep.mubr.bf16.mxu1 (!%p175_p6), %v840_v2  ;;  %453 = vmatprep.mubr.bf16.mxu0 (!%p175_p6), %v840_v2  ;;  %p205_p7 = scmp.lt.s32.totalorder (!%p175_p6), %s709_s26, 15  ;;  %v801_v4 = vld [vmem:[%s1010_s2] ss:$8 sps:$4 sm:$0xff] (!%p175_p6)  }
   0xc   : > { %296 = vmatprep.subr.bf16.mxu1 (!%p175_p6), %v796_v0  ;;  %421 = vmatprep.subr.bf16.mxu0 (!%p175_p6), %v798_v1  ;;  %v802_v5 = vld [vmem:[%s1010_s2 + $0x34] ss:$8 sps:$4 sm:$0xff] (!%p175_p6)   ;;  %v806_v7 = vld [vmem:[%s1010_s2 + $0x30] ss:$8 sps:$4 sm:$0xff] (!%p175_p6)   ;;  %vm283_vm0 = vcmask (!%p175_p6), 261120   ;;  %v497_v18 = vshrl.u32 (!%p175_p6), %v496_v17, 7 }
   0xd   : > { %297 = vmatpush1.bf16.msra.mxu1 (!%p175_p6), %v800_v3  ;;  %422 = vmatpush1.bf16.msra.mxu0 (!%p175_p6), %v801_v4  ;;  %v804_v6 = vld [vmem:[%s1010_s2 + $0x14] ss:$8 sps:$4 sm:$0xff] (!%p175_p6)   ;;  %v807_v8 = vld [vmem:[%s1010_s2 + $0x10] ss:$8 sps:$4 sm:$0xff] (!%p175_p6)   ;;  %v494_v20 = vld [vmem:[%s1011_s3] sm:$0x3] (!%p175_p6) }
   0xe   : > { %298 = vmatprep.subr.bf16.mxu1 (!%p175_p6), %v802_v5  ;;  %423 = vmatprep.subr.bf16.mxu0 (!%p175_p6), %v804_v6  ;;  %v498_v19 = vsub.s32 (!%p175_p6), 0, %v497_v18  ;;  %v502_v21 = vsub.s32 (!%p175_p6), 1, %v497_v18 }
  0x10   : > { %v938_v22 = vrot.slane (!%p175_p6), %v494_v20, %v498_v19  ;;  %v940_v25 = vrot.slane (!%p175_p6), %v494_v20, %v502_v21 }
  0x11   : > { %299 = vmatpush1.bf16.msra.mxu1 (!%p175_p6), %v806_v7  ;;  %424 = vmatpush1.bf16.msra.mxu0 (!%p175_p6), %v807_v8 }
  0x12   : > { %s1018_s26 = smov (!%p205_p7, %s709_s26), 15  ;;  %s754_s6 = sshll.u32 (%p891_p4), %s879_s18, 6 }
  0x13   : > { %s710_s17 = sshll.u32 %s1018_s26, 2  ;;  %s201_s26 = sand.u32 1, %s830_s15  }
  0x14   : > { %s214_s24 = scalar_lea.vmem %s1009_s1, %s710_s17  ;;  %s208_s28 = scalar_lea.vmem %s1008_s0, %s710_s17 }
  0x15   : > { %v808_v9 = vld [vmem:[%s214_s24] sm:$0xff]   ;;  %v810_v11 = vld [vmem:[%s214_s24 + $0x8] sm:$0xff]   ;;  %v812_v13 = vld [vmem:[%s214_s24 + $0x10] sm:$0xff]   ;;  %s708_s5 = sshll.u32 %s201_s26, 7  ;;  %s548_s9 = scalar_lea.vmem (%p891_p4), %s1012_s4, %s754_s6 }
  0x16   : > { %v809_v10 = vld [vmem:[%s208_s28] sm:$0xff]   ;;  %725 = vmatmul.mubr.msk.bf16.vlgmr.msra.gmra.mrb[0].mxu1 %vm283_vm0, %v808_v9  ;;  %v811_v12 = vld [vmem:[%s208_s28 + $0x8] sm:$0xff]   ;;  %v813_v14 = vld [vmem:[%s208_s28 + $0x10] sm:$0xff]   ;;  %s944_s15 = scalar_lea.vmem [#allocation2], %s708_s5 }
  0x17   : > { %737 = vmatmul.mubr.msk.bf16.vlgmr.msra.gmra.mrb[0].mxu0 %vm283_vm0, %v809_v10  ;;  %338 = vmatprep.mubr.bf16.mxu1 %v840_v2  ;;  %v814_v15 = vld [vmem:[%s214_s24 + $0x18] sm:$0xff]  }
  0x18   : > { %463 = vmatprep.mubr.bf16.mxu0 %v840_v2  ;;  %v815_v16 = vld [vmem:[%s208_s28 + $0x18] sm:$0xff]  }
  0x1e   : > { %726 = vmatmul.mubr.msk.bf16.gmra.mrb[4].mxu1 %vm283_vm0, %v810_v11 }
  0x1f   : > { %738 = vmatmul.mubr.msk.bf16.gmra.mrb[4].mxu0 %vm283_vm0, %v811_v12  ;;  %348 = vmatprep.mubr.bf16.mxu1 %v840_v2 }
  0x20   : > { %473 = vmatprep.mubr.bf16.mxu0 %v840_v2 }
  0x26   : > { %727 = vmatmul.mubr.msk.bf16.gmra.mrb[8].mxu1 %vm283_vm0, %v812_v13 }
  0x27   : > { %739 = vmatmul.mubr.msk.bf16.gmra.mrb[8].mxu0 %vm283_vm0, %v813_v14  ;;  %358 = vmatprep.mubr.bf16.mxu1 %v840_v2 }
  0x28   : > { %483 = vmatprep.mubr.bf16.mxu0 %v840_v2 }
  0x2e   : > { %728 = vmatmul.mubr.msk.bf16.gmra.mrb[12].mxu1 %vm283_vm0, %v814_v15 }
  0x2f   : > { %740 = vmatmul.mubr.msk.bf16.gmra.mrb[12].mxu0 %vm283_vm0, %v815_v16 }
  0xe9   : > { %v330_v23 = vpop.f32.mrb[0].mxu1 }
  0xea   : > { %v455_v24 = vpop.f32.mrb[0].mxu0  ;;  %v332_v27 = vpop.f32.mrb[1].mxu1 }
  0xeb   : > { %v456_v26 = vadd.f32 %v455_v24, %v330_v23  ;;  %v457_v28 = vpop.f32.mrb[1].mxu0  ;;  %v334_v30 = vpop.f32.mrb[2].mxu1 }
  0xec   : > { %v458_v29 = vadd.f32 %v457_v28, %v332_v27  ;;  %v459_v31 = vpop.f32.mrb[2].mxu0  ;;  %v336_v34 = vpop.f32.mrb[3].mxu1 }
  0xed   : > { %v506_v32 = vadd.f32 %v938_v22, %v456_v26  ;;  %v460_v33 = vadd.f32 %v459_v31, %v334_v30  ;;  %v461_v35 = vpop.f32.mrb[3].mxu0 }
  0xee   : > { %v507_v36 = vadd.f32 %v940_v25, %v458_v29  ;;  %v462_v37 = vadd.f32 %v461_v35, %v336_v34 }
  0xef   : > { %522 = vst [vmem:[%s944_s15] sm:$0xff] %v506_v32  ;;  %v508_v38 = vadd.f32 %v938_v22, %v460_v33 }
  0xf0   : > { %741 = vst [vmem:[%s944_s15 + $0x40] sm:$0xff] %v507_v36  ;;  %v509_v39 = vadd.f32 %v940_v25, %v462_v37 }
  0xf1   : > { %523 = vst [vmem:[%s944_s15 + $0x8] sm:$0xff] %v508_v38  ;;  %v340_v40 = vpop.f32.mrb[4].mxu1 }
  0xf2   : > { %742 = vst [vmem:[%s944_s15 + $0x48] sm:$0xff] %v509_v39  ;;  %v465_v41 = vpop.f32.mrb[4].mxu0  ;;  %v342_v43 = vpop.f32.mrb[5].mxu1 }
  0xf3   : > { %v466_v42 = vadd.f32 %v465_v41, %v340_v40  ;;  %v467_v44 = vpop.f32.mrb[5].mxu0  ;;  %v344_v46 = vpop.f32.mrb[6].mxu1 }
  0xf4   : > { %v468_v45 = vadd.f32 %v467_v44, %v342_v43  ;;  %v469_v47 = vpop.f32.mrb[6].mxu0  ;;  %v346_v50 = vpop.f32.mrb[7].mxu1 }
  0xf5   : > { %v510_v48 = vadd.f32 %v938_v22, %v466_v42  ;;  %v470_v49 = vadd.f32 %v469_v47, %v344_v46  ;;  %v471_v51 = vpop.f32.mrb[7].mxu0 }
  0xf6   : > { %v511_v52 = vadd.f32 %v940_v25, %v468_v45  ;;  %v472_v53 = vadd.f32 %v471_v51, %v346_v50 }
  0xf7   : > { %524 = vst [vmem:[%s944_s15 + $0x10] sm:$0xff] %v510_v48  ;;  %v512_v54 = vadd.f32 %v938_v22, %v470_v49  ;;  %v622_v32 = vld [vmem:[%s944_s15 + $0x40] sm:$0xff] (%p891_p4) }
  0xf8   : > { %743 = vst [vmem:[%s944_s15 + $0x50] sm:$0xff] %v511_v52  ;;  %v513_v55 = vadd.f32 %v940_v25, %v472_v53  ;;  %v608_v26 = vld [vmem:[%s944_s15 + $0x8] sm:$0xff] (%p891_p4)  ;;  %623 = vst [vmem:[%s548_s9 + $0x80] sm:$0xff] (%p891_p4), %v622_v32 }
  0xf9   : > { %525 = vst [vmem:[%s944_s15 + $0x18] sm:$0xff] %v512_v54  ;;  %v350_v56 = vpop.f32.mrb[8].mxu1  ;;  %609 = vst [vmem:[%s548_s9 + $0x8] sm:$0xff] (%p891_p4), %v608_v26  ;;  %v624_v33 = vld [vmem:[%s944_s15 + $0x48] sm:$0xff] (%p891_p4) }
  0xfa   : > { %744 = vst [vmem:[%s944_s15 + $0x58] sm:$0xff] %v513_v55  ;;  %v475_v57 = vpop.f32.mrb[8].mxu0  ;;  %v352_v59 = vpop.f32.mrb[9].mxu1  ;;  %625 = vst [vmem:[%s548_s9 + $0x88] sm:$0xff] (%p891_p4), %v624_v33 }
  0xfb   : > { %v476_v58 = vadd.f32 %v475_v57, %v350_v56  ;;  %v477_v60 = vpop.f32.mrb[9].mxu0  ;;  %v354_v62 = vpop.f32.mrb[10].mxu1 }
  0xfc   : > { %v478_v61 = vadd.f32 %v477_v60, %v352_v59  ;;  %v479_v63 = vpop.f32.mrb[10].mxu0  ;;  %v356_v2 = vpop.f32.mrb[11].mxu1 }
  0xfd   : > { %v514_v0 = vadd.f32 %v938_v22, %v476_v58  ;;  %v480_v1 = vadd.f32 %v479_v63, %v354_v62  ;;  %v481_v3 = vpop.f32.mrb[11].mxu0 }
  0xfe   : > { %v515_v4 = vadd.f32 %v940_v25, %v478_v61  ;;  %v482_v5 = vadd.f32 %v481_v3, %v356_v2  ;;  %v610_v27 = vld [vmem:[%s944_s15 + $0x10] sm:$0xff] (%p891_p4) }
  0xff   : > { %526 = vst [vmem:[%s944_s15 + $0x20] sm:$0xff] %v514_v0  ;;  %v516_v6 = vadd.f32 %v938_v22, %v480_v1  ;;  %611 = vst [vmem:[%s548_s9 + $0x10] sm:$0xff] (%p891_p4), %v610_v27  ;;  %v626_v34 = vld [vmem:[%s944_s15 + $0x50] sm:$0xff] (%p891_p4) }
 0x100   : > { %745 = vst [vmem:[%s944_s15 + $0x60] sm:$0xff] %v515_v4  ;;  %v517_v7 = vadd.f32 %v940_v25, %v482_v5  ;;  %627 = vst [vmem:[%s548_s9 + $0x90] sm:$0xff] (%p891_p4), %v626_v34 }
 0x101   : > { %527 = vst [vmem:[%s944_s15 + $0x28] sm:$0xff] %v516_v6  ;;  %v360_v8 = vpop.f32.mrb[12].mxu1  ;;  %v628_v35 = vld [vmem:[%s944_s15 + $0x58] sm:$0xff] (%p891_p4) }
 0x102   : > { %746 = vst [vmem:[%s944_s15 + $0x68] sm:$0xff] %v517_v7  ;;  %v485_v9 = vpop.f32.mrb[12].mxu0  ;;  %v362_v11 = vpop.f32.mrb[13].mxu1  ;;  %629 = vst [vmem:[%s548_s9 + $0x98] sm:$0xff] (%p891_p4), %v628_v35 }
 0x103   : > { %v486_v10 = vadd.f32 %v485_v9, %v360_v8  ;;  %v487_v12 = vpop.f32.mrb[13].mxu0  ;;  %v364_v14 = vpop.f32.mrb[14].mxu1 }
 0x104   : > { %v488_v13 = vadd.f32 %v487_v12, %v362_v11  ;;  %v489_v15 = vpop.f32.mrb[14].mxu0  ;;  %v366_v18 = vpop.f32.mrb[15].mxu1  ;;  %545 = sbr.rel (!%p891_p4) target bundleno = 275 (0x113), region = 40 }
 0x105   : > { %v518_v16 = vadd.f32 %v938_v22, %v486_v10  ;;  %v490_v17 = vadd.f32 %v489_v15, %v364_v14  ;;  %v491_v19 = vpop.f32.mrb[15].mxu0 }
 0x106   : > { %v519_v20 = vadd.f32 %v940_v25, %v488_v13  ;;  %v492_v21 = vadd.f32 %v491_v19, %v366_v18  ;;  %v614_v28 = vld [vmem:[%s944_s15 + $0x20] sm:$0xff] (%p891_p4) }
 0x107   : > { %528 = vst [vmem:[%s944_s15 + $0x30] sm:$0xff] %v518_v16  ;;  %v520_v23 = vadd.f32 %v938_v22, %v490_v17  ;;  %v606_v22 = vld [vmem:[%s944_s15] sm:$0xff] (%p891_p4)  ;;  %615 = vst [vmem:[%s548_s9 + $0x20] sm:$0xff] (%p891_p4), %v614_v28 }
 0x108   : > { %747 = vst [vmem:[%s944_s15 + $0x70] sm:$0xff] %v519_v20  ;;  %v521_v24 = vadd.f32 %v940_v25, %v492_v21  ;;  %v612_v25 = vld [vmem:[%s944_s15 + $0x18] sm:$0xff] (%p891_p4)  ;;  %v616_v29 = vld [vmem:[%s944_s15 + $0x28] sm:$0xff] (%p891_p4)  ;;  %607 = vst [vmem:[%s548_s9] sm:$0xff] (%p891_p4), %v606_v22 }
 0x109   : > { %529 = vst [vmem:[%s944_s15 + $0x38] sm:$0xff] %v520_v23  ;;  %613 = vst [vmem:[%s548_s9 + $0x18] sm:$0xff] (%p891_p4), %v612_v25  ;;  %v630_v36 = vld [vmem:[%s944_s15 + $0x60] sm:$0xff] (%p891_p4)  ;;  %v632_v37 = vld [vmem:[%s944_s15 + $0x68] sm:$0xff] (%p891_p4) }
 0x10a   : > { %748 = vst [vmem:[%s944_s15 + $0x78] sm:$0xff] %v521_v24  ;;  %617 = vst [vmem:[%s548_s9 + $0x28] sm:$0xff] (%p891_p4), %v616_v29 }
 0x10b   : > { %631 = vst [vmem:[%s548_s9 + $0xa0] sm:$0xff] %v630_v36  ;;  %633 = vst [vmem:[%s548_s9 + $0xa8] sm:$0xff] %v632_v37 }
 0x10e   : > { %v618_v30 = vld [vmem:[%s944_s15 + $0x30] sm:$0xff] }
 0x10f   : > { %619 = vst [vmem:[%s548_s9 + $0x30] sm:$0xff] %v618_v30  ;;  %v634_v38 = vld [vmem:[%s944_s15 + $0x70] sm:$0xff] }
 0x110   : > { %v620_v31 = vld [vmem:[%s944_s15 + $0x38] sm:$0xff]  ;;  %635 = vst [vmem:[%s548_s9 + $0xb0] sm:$0xff] %v634_v38 }
 0x111   : > { %621 = vst [vmem:[%s548_s9 + $0x38] sm:$0xff] %v620_v31  ;;  %v636_v39 = vld [vmem:[%s944_s15 + $0x78] sm:$0xff] }
 0x112   : > { %637 = vst [vmem:[%s548_s9 + $0xb8] sm:$0xff] %v636_v39 }
 0x113 PF: > { %p11_p8 = scmp.ge.s32.totalorder %s881_s19, 4   ;;  %s1014_s15 = smov %s834_s16 }
 0x114   : > { %s1015_s16 = smov %s889_s22  ;;  %s1016_s17 = smov %s881_s19 }
 0x115   :  { %13 = sbr.rel (!%p11_p8) target bundleno = 2 (0x2), region = 109 }

// kernel: cnn_blstm_forward.5
= control target key start
LH: loop header
LB: loop body
LE: loop exit
PB: predicated region body
PF: predicated region fallthrough
CT: control target
= control target key end

     0   :  { %s2140_s15 = smov 0   ;;  %s2541_s0 = inlined_call_operand.vmem [shape: f32[2,128,128], index: 0, kind: input, shape index: {}, may-alias: {0,1}]   ;;  %s2542_s1 = inlined_call_operand.vmem [shape: f32[2,128,128], index: 1, kind: input, shape index: {}, may-alias: {0,1}]   ;;  %s2543_s2 = inlined_call_operand.vmem [shape: bf16[2,32,128], index: 2, kind: input, shape index: {}]   ;;  %s2544_s3 = inlined_call_operand.vmem [shape: bf16[128,32], index: 3, kind: output, shape index: {0}]   ;;  %s2545_s4 = inlined_call_operand.vmem [shape: bf16[128,32], index: 4, kind: output, shape index: {1}]  }
   0x1 LB: > { %s1683_s16 = sadd.s32 4294967295, %s2107_s15   ;;  %p1687_p0 = scmp.ge.s32.totalorder %s2107_s15, 1  ;;  %s2107_s15 = sphi %s2140_s15, %s15_s15  }
   0x2   : > { %p184_p1 = scmp.lt.s32.totalorder %s2107_s15, 3 }
   0x4   : > { %p185_p2 = pnand %p1687_p0, %p184_p1 }
   0x5   : > { %s1688_s17 = sshll.u32 (!%p185_p2), %s1683_s16, 3  ;;  %s229_s18 = ssub.s32 (!%p185_p2), 1, %s1683_s16 }
   0x6   : > { %188 = sbr.rel (%p185_p2) target bundleno = 5674 (0x162a), region = 32  ;;  %p224_p3 = scmp.lt.s32.totalorder (!%p185_p2), %s1688_s17, 15 }
   0x7   : > { %s1690_s19 = sshll.u32 (!%p185_p2), %s229_s18, 3  ;;  %p1696_p5 = scmp.ne.s32.totalorder (!%p185_p2), %s1683_s16, 0 }
   0x8   : > { %p231_p4 = scmp.lt.s32.totalorder (!%p185_p2), %s1690_s19, 15 }
   0xd   : > { %s2547_s17 = smov (!%p224_p3, %s1688_s17), 15  ;;  %s2549_s19 = smov (!%p231_p4, %s1690_s19), 15 }
   0xe   : > { %s1689_s20 = sshll.u32 %s2547_s17, 3  ;;  %s1693_s21 = sshll.u32 %s2547_s17, 2  ;;  %vm257_vm0 = vcmask (!%p1696_p5), 261120   ;;  %v2109_v0 = vmov (!%p1696_p5), 0.0  }
   0xf   : > { %s2151_s24 = scalar_lea.vmem %s2541_s0, %s1689_s20  ;;  %s1691_s25 = sshll.u32 %s2549_s19, 3  ;;  %258 = vst.msk [vmem:[#allocation2] sm:$0xff] (!%p1696_p5), %vm257_vm0, %v2109_v0  ;;  %259 = vst.msk [vmem:[#allocation3] sm:$0xff] (!%p1696_p5), %vm257_vm0, %v2109_v0 }
  0x10   : > { %s2156_s28 = scalar_lea.vmem %s2542_s1, %s1691_s25  ;;  %s2161_s5 = scalar_lea.vmem %s2544_s3, %s1693_s21  ;;  %260 = vst.msk [vmem:[#allocation4] sm:$0xff] (!%p1696_p5), %vm257_vm0, %v2109_v0  ;;  %261 = vst.msk [vmem:[#allocation5] sm:$0xff] (!%p1696_p5), %vm257_vm0, %v2109_v0 }
  0x11   : > { %s1695_s6 = sshll.u32 %s2549_s19, 2  ;;  %256 = sbr.rel (%p1696_p5) target bundleno = 24 (0x18), region = 36 }
  0x12   : > { %s2166_s9 = scalar_lea.vmem %s2545_s4, %s1695_s6 }
  0x18 PF: > { %v2171_v1 = vld [vmem:[%s2543_s2] sm:$0xff]   ;;  %v2110_v2 = vmov 0.0   ;;  %v2178_v3 = vld [vmem:[%s2543_s2 + $0x10] sm:$0xff]   ;;  %v2184_v4 = vld [vmem:[%s2543_s2 + $0x8] sm:$0xff]   ;;  %vm2111_vm1 = vmmov 0   ;;  %s2112_s19 = smov 32  }
  0x19   : > { %1827 = vmatprep.subr.bf16.mxu0 %v2110_v2  ;;  %1835 = vmatprep.subr.bf16.mxu1 %v2110_v2  ;;  %v2193_v5 = vld [vmem:[%s2543_s2 + $0x18] sm:$0xff]   ;;  %v271_v6 = vld [vmem:[#allocation2] sm:$0xff]  ;;  %v273_v7 = vld [vmem:[#allocation4] sm:$0xff]  ;;  %vm289_vm2 = vcmask 261120   ;;  %s2113_s20 = smov 64   ;;  %s2114_s21 = smov 96  }
  0x1a   : > { %1828 = vmatpush3.bf16.msra.mxu0 %v2171_v1  ;;  %1831 = vmatprep.mubr.msk.bf16.mxu0 %vm2111_vm1, %v2110_v2  ;;  %v272_v8 = vld [vmem:[#allocation3] sm:$0xff]  ;;  %v275_v9 = vpack.c.bf16 %v271_v6, %v271_v6  ;;  %v333_v10 = vpack.c.bf16 %v273_v7, %v273_v7  ;;  %v274_v11 = vld [vmem:[#allocation5] sm:$0xff]  ;;  %v276_v12 = vld [vmem:[%s2151_s24] sm:$0xff]  ;;  %vm453_vm3 = vcmask 257024  }
  0x1b   : > { %1836 = vmatpush3.bf16.msra.mxu1 %v2178_v3  ;;  %1829 = vmatprep.subr.bf16.mxu0 %v2110_v2  ;;  %v1704_v13 = vld [vmem:[%s2156_s28 + $0xb8] sm:$0xff]  ;;  %v463_v56 = vld [vmem:[%s2151_s24 + $0x8] sm:$0xff]  ;;  %v1713_v61 = vld [vmem:[%s2156_s28 + $0xb0] sm:$0xff] }
  0x1c   : > { %1837 = vmatprep.subr.bf16.mxu1 %v2110_v2  ;;  %1839 = vmatprep.mubr.msk.bf16.mxu1 %vm2111_vm1, %v2110_v2 }
  0x1d   : > { %398 = vrot.lane.b32.xlu1 %v272_v8, %s2112_s19 }
  0x1e   : > { %1830 = vmatpush3.bf16.msra.mxu0 %v2184_v4 }
  0x1f   : > { %1838 = vmatpush3.bf16.msra.mxu1 %v2193_v5  ;;  %1843 = vmatprep.subr.bf16.mxu0 %v2110_v2 }
  0x20   : > { %1851 = vmatprep.subr.bf16.mxu1 %v2110_v2 }
  0x21   : > { %1832 = vmatmul.mubr.msk.bf16.vlgmr.msra.gmra.mrb[0].mxu0 %vm289_vm2, %v275_v9  ;;  %426 = vrot.lane.b32.xlu1 %v274_v11, %s2112_s19 }
  0x22   : > { %1840 = vmatmul.mubr.msk.bf16.vlgmr.msra.gmra.mrb[0].mxu1 %vm289_vm2, %v333_v10  ;;  %1844 = vmatpush3.bf16.msra.mxu0 %v2171_v1 }
  0x23   : > { %1845 = vmatprep.subr.bf16.mxu0 %v2110_v2  ;;  %1852 = vmatpush3.bf16.msra.mxu1 %v2178_v3 }
  0x24   : > { %1847 = vmatprep.mubr.msk.bf16.mxu0 %vm2111_vm1, %v2110_v2  ;;  %1853 = vmatprep.subr.bf16.mxu1 %v2110_v2 }
  0x25   : > { %1855 = vmatprep.mubr.msk.bf16.mxu1 %vm2111_vm1, %v2110_v2 }
  0x26   : > { %1846 = vmatpush3.bf16.msra.mxu0 %v2184_v4 }
  0x27   : > { %1854 = vmatpush3.bf16.msra.mxu1 %v2193_v5  ;;  %1859 = vmatprep.subr.bf16.mxu0 %v2110_v2 }
  0x28   : > { %1867 = vmatprep.subr.bf16.mxu1 %v2110_v2 }
  0x8f   : > { %v399_v38 = vpop.permute.xlu1 %398 }
  0x93   : > { %v427_v40 = vpop.permute.xlu1 %426 }
  0xf4   : > { %v327_v14 = vpop.f32.mrb[0].mxu0 }
  0xf5   : > { %v328_v15 = vadd.f32 %v327_v14, %v276_v12  ;;  %v1833_v16 = vpop.f32.mrb[1].mxu0  ;;  %v384_v17 = vpop.f32.mrb[0].mxu1 }
  0xf6   : > { %v385_v18 = vadd.f32 %v1704_v13, %v384_v17  ;;  %v330_v19 = vpop.f32.mrb[2].mxu0  ;;  %v1841_v20 = vpop.f32.mrb[1].mxu1 }
  0xf7   : > { %1973 = vtanh.f32 %v328_v15  ;;  %v1834_v21 = vpop.f32.mrb[3].mxu0  ;;  %v387_v22 = vpop.f32.mrb[2].mxu1  ;;  %v1708_v26 = vmul.f32 -1.442695, %v328_v15 }
  0xf8   : > { %v1842_v23 = vpop.f32.mrb[3].mxu1  ;;  %1975 = vtanh.f32 %v385_v18  ;;  %v1709_v27 = vmul.f32 -1.442695, %v385_v18 }
  0xf9   : > { %1977 = vpow2.f32 %v1708_v26 }
  0xfa   : > { %1979 = vpow2.f32 %v1709_v27 }
 0x101   : > { %v1974_v24 = vpop.eup %1973 }
 0x102   : > { %403 = vrot.lane.b32.xlu0 %v1974_v24, %s2112_s19  ;;  %v1976_v25 = vpop.eup %1975 }
 0x103   : > { %v1978_v28 = vpop.eup %1977 }
 0x104   : > { %v393_v29 = vadd.f32 1.0, %v1978_v28  ;;  %v1980_v30 = vpop.eup %1979 }
 0x105   : > { %v421_v31 = vadd.f32 1.0, %v1980_v30 }
 0x106   : > { %431 = vrot.lane.b32.xlu0 %v1976_v25, %s2112_s19  ;;  %1981 = vrcp.f32 %v393_v29 }
 0x107   : > { %1983 = vrcp.f32 %v421_v31 }
 0x110   : > { %v1982_v32 = vpop.eup %1981 }
 0x111   : > { %v1984_v35 = vpop.eup %1983  ;;  %v401_v39 = vmul.f32 %v1982_v32, %v399_v38 }
 0x112   : > { %v429_v43 = vmul.f32 %v1984_v35, %v427_v40 }
 0x174   : > { %v404_v33 = vpop.permute.xlu0 %403 }
 0x175   : > { %v406_v34 = vmul.f32 %v1982_v32, %v404_v33 }
 0x177   : > { %408 = vrot.lane.b32.xlu0 %v406_v34, %s2112_s19 }
 0x178   : > { %v432_v36 = vpop.permute.xlu0 %431 }
 0x179   : > { %v434_v37 = vmul.f32 %v1984_v35, %v432_v36 }
 0x17b   : > { %436 = vrot.lane.b32.xlu1 %v434_v37, %s2112_s19 }
 0x1e9   : > { %v409_v41 = vpop.permute.xlu0 %408 }
 0x1ea   : > { %v2224_v42 = vadd.f32 %v409_v41, %v401_v39  ;;  %v619_v39 = vld [vmem:[%s2151_s24 + $0x10] sm:$0xff] }
 0x1ec   : > { %1985 = vtanh.f32 %v2224_v42 }
 0x1ed   : > { %v437_v44 = vpop.permute.xlu1 %436 }
 0x1ee   : > { %v2227_v45 = vadd.f32 %v437_v44, %v429_v43  ;;  %v1720_v44 = vld [vmem:[%s2156_s28 + $0xa8] sm:$0xff] }
 0x1f0   : > { %1987 = vtanh.f32 %v2227_v45 }
 0x1f6   : > { %v1986_v46 = vpop.eup %1985 }
 0x1f7   : > { %414 = vrot.lane.b32.xlu0 %v1986_v46, %s2112_s19 }
 0x1fa   : > { %v1988_v47 = vpop.eup %1987 }
 0x1fb   : > { %442 = vrot.lane.b32.xlu1 %v1988_v47, %s2112_s19 }
 0x269   : > { %v415_v48 = vpop.permute.xlu0 %414 }
 0x26a   : > { %v417_v49 = vmul.f32 %v1982_v32, %v415_v48 }
 0x26c   : > { %v2232_v50 = vpack.c.bf16 %v417_v49, %v417_v49 }
 0x26d   : > { %v443_v51 = vpop.permute.xlu1 %442 }
 0x26e   : > { %v445_v52 = vmul.f32 %v1984_v35, %v443_v51  ;;  %464 = vrot.lane.b32.xlu0 %v2232_v50, %s2113_s20 }
 0x270   : > { %v2236_v53 = vpack.c.bf16 %v445_v52, %v445_v52 }
 0x272   : > { %510 = vrot.lane.b32.xlu1 %v2236_v53, %s2113_s20 }
 0x2e0   : > { %v465_v54 = vpop.permute.xlu0 %464 }
 0x2e1   : > { %1848 = vmatmul.mubr.msk.bf16.vlgmr.msra.gmra.mrb[4].mxu0 %vm289_vm2, %v465_v54 }
 0x2e2   : > { %1860 = vmatpush3.bf16.msra.mxu0 %v2171_v1  ;;  %1863 = vmatprep.mubr.msk.bf16.mxu0 %vm2111_vm1, %v2110_v2 }
 0x2e3   : > { %1861 = vmatprep.subr.bf16.mxu0 %v2110_v2 }
 0x2e4   : > { %v511_v55 = vpop.permute.xlu1 %510 }
 0x2e5   : > { %1856 = vmatmul.mubr.msk.bf16.vlgmr.msra.gmra.mrb[4].mxu1 %vm289_vm2, %v511_v55 }
 0x2e6   : > { %1868 = vmatpush3.bf16.msra.mxu1 %v2178_v3  ;;  %1862 = vmatpush3.bf16.msra.mxu0 %v2184_v4 }
 0x2e7   : > { %1869 = vmatprep.subr.bf16.mxu1 %v2110_v2  ;;  %1871 = vmatprep.mubr.msk.bf16.mxu1 %vm2111_vm1, %v2110_v2 }
 0x2e8   : > { %1875 = vmatprep.subr.bf16.mxu0 %v2110_v2 }
 0x2ea   : > { %1870 = vmatpush3.bf16.msra.mxu1 %v2193_v5 }
 0x2eb   : > { %1883 = vmatprep.subr.bf16.mxu1 %v2110_v2 }
 0x3b4   : > { %v503_v57 = vpop.f32.mrb[4].mxu0 }
 0x3b5   : > { %v504_v58 = vadd.f32 %v503_v57, %v463_v56  ;;  %v1849_v59 = vpop.f32.mrb[5].mxu0 }
 0x3b6   : > { %v506_v60 = vpop.f32.mrb[6].mxu0 }
 0x3b7   : > { %1989 = vtanh.f32 %v504_v58  ;;  %v1850_v62 = vpop.f32.mrb[7].mxu0  ;;  %v1715_v11 = vmul.f32 -1.442695, %v504_v58 }
 0x3b8   : > { %v549_v63 = vpop.f32.mrb[4].mxu1 }
 0x3b9   : > { %v550_v0 = vadd.f32 %v1713_v61, %v549_v63  ;;  %v1857_v6 = vpop.f32.mrb[5].mxu1 }
 0x3ba   : > { %v552_v7 = vpop.f32.mrb[6].mxu1 }
 0x3bb   : > { %1991 = vtanh.f32 %v550_v0  ;;  %v1858_v8 = vpop.f32.mrb[7].mxu1  ;;  %v1716_v12 = vmul.f32 -1.442695, %v550_v0 }
 0x3bc   : > { %1993 = vpow2.f32 %v1715_v11 }
 0x3bd   : > { %1995 = vpow2.f32 %v1716_v12 }
 0x3c1   : > { %v1990_v9 = vpop.eup %1989 }
 0x3c2   : > { %564 = vrot.lane.b32.xlu0 %v1990_v9, %s2112_s19 }
 0x3c5   : > { %v1992_v10 = vpop.eup %1991 }
 0x3c6   : > { %588 = vrot.lane.b32.xlu1 %v1992_v10, %s2112_s19  ;;  %v1994_v13 = vpop.eup %1993 }
 0x3c7   : > { %v558_v14 = vadd.f32 1.0, %v1994_v13  ;;  %v1996_v15 = vpop.eup %1995 }
 0x3c8   : > { %v582_v16 = vadd.f32 1.0, %v1996_v15 }
 0x3c9   : > { %1997 = vrcp.f32 %v558_v14 }
 0x3ca   : > { %1999 = vrcp.f32 %v582_v16 }
 0x3d3   : > { %v1998_v17 = vpop.eup %1997 }
 0x3d4   : > { %v2000_v20 = vpop.eup %1999  ;;  %v562_v23 = vmul.f32 %v1998_v17, %v2224_v42 }
 0x3d5   : > { %v586_v26 = vmul.f32 %v2000_v20, %v2227_v45 }
 0x434   : > { %v565_v18 = vpop.permute.xlu0 %564 }
 0x435   : > { %v567_v19 = vmul.f32 %v1998_v17, %v565_v18 }
 0x437   : > { %569 = vrot.lane.b32.xlu0 %v567_v19, %s2112_s19 }
 0x438   : > { %v589_v21 = vpop.permute.xlu1 %588 }
 0x439   : > { %v591_v22 = vmul.f32 %v2000_v20, %v589_v21 }
 0x43b   : > { %593 = vrot.lane.b32.xlu1 %v591_v22, %s2112_s19 }
 0x4a9   : > { %v570_v24 = vpop.permute.xlu0 %569 }
 0x4aa   : > { %v2261_v25 = vadd.f32 %v570_v24, %v562_v23  ;;  %v775_v24 = vld [vmem:[%s2151_s24 + $0x18] sm:$0xff] }
 0x4ac   : > { %2001 = vtanh.f32 %v2261_v25 }
 0x4ad   : > { %v594_v27 = vpop.permute.xlu1 %593 }
 0x4ae   : > { %v2265_v28 = vadd.f32 %v594_v27, %v586_v26 }
 0x4b0   : > { %2003 = vtanh.f32 %v2265_v28 }
 0x4b6   : > { %v2002_v29 = vpop.eup %2001 }
 0x4b7   : > { %575 = vrot.lane.b32.xlu0 %v2002_v29, %s2112_s19  ;;  %v1727_v29 = vld [vmem:[%s2156_s28 + $0xa0] sm:$0xff] }
 0x4ba   : > { %v2004_v30 = vpop.eup %2003 }
 0x4bb   : > { %599 = vrot.lane.b32.xlu1 %v2004_v30, %s2112_s19 }
 0x529   : > { %v576_v31 = vpop.permute.xlu0 %575 }
 0x52a   : > { %v578_v32 = vmul.f32 %v1998_v17, %v576_v31 }
 0x52c   : > { %v2270_v33 = vpack.c.bf16 %v578_v32, %v578_v32 }
 0x52d   : > { %v600_v34 = vpop.permute.xlu1 %599 }
 0x52e   : > { %v602_v35 = vmul.f32 %v2000_v20, %v600_v34  ;;  %620 = vrot.lane.b32.xlu0 %v2270_v33, %s2113_s20 }
 0x530   : > { %v2274_v36 = vpack.c.bf16 %v602_v35, %v602_v35 }
 0x532   : > { %666 = vrot.lane.b32.xlu1 %v2274_v36, %s2113_s20 }
 0x5a0   : > { %v621_v37 = vpop.permute.xlu0 %620 }
 0x5a1   : > { %1864 = vmatmul.mubr.msk.bf16.vlgmr.msra.gmra.mrb[8].mxu0 %vm289_vm2, %v621_v37 }
 0x5a2   : > { %1876 = vmatpush3.bf16.msra.mxu0 %v2171_v1  ;;  %1879 = vmatprep.mubr.msk.bf16.mxu0 %vm2111_vm1, %v2110_v2 }
 0x5a3   : > { %1877 = vmatprep.subr.bf16.mxu0 %v2110_v2 }
 0x5a4   : > { %v667_v38 = vpop.permute.xlu1 %666 }
 0x5a5   : > { %1872 = vmatmul.mubr.msk.bf16.vlgmr.msra.gmra.mrb[8].mxu1 %vm289_vm2, %v667_v38 }
 0x5a6   : > { %1884 = vmatpush3.bf16.msra.mxu1 %v2178_v3  ;;  %1878 = vmatpush3.bf16.msra.mxu0 %v2184_v4 }
 0x5a7   : > { %1885 = vmatprep.subr.bf16.mxu1 %v2110_v2  ;;  %1887 = vmatprep.mubr.msk.bf16.mxu1 %vm2111_vm1, %v2110_v2 }
 0x5a8   : > { %1891 = vmatprep.subr.bf16.mxu0 %v2110_v2 }
 0x5aa   : > { %1886 = vmatpush3.bf16.msra.mxu1 %v2193_v5 }
 0x5ab   : > { %1899 = vmatprep.subr.bf16.mxu1 %v2110_v2 }
 0x674   : > { %v659_v40 = vpop.f32.mrb[8].mxu0 }
 0x675   : > { %v660_v41 = vadd.f32 %v659_v40, %v619_v39  ;;  %v1865_v42 = vpop.f32.mrb[9].mxu0 }
 0x676   : > { %v662_v43 = vpop.f32.mrb[10].mxu0 }
 0x677   : > { %2005 = vtanh.f32 %v660_v41  ;;  %v1866_v45 = vpop.f32.mrb[11].mxu0  ;;  %v1722_v55 = vmul.f32 -1.442695, %v660_v41 }
 0x678   : > { %v705_v46 = vpop.f32.mrb[8].mxu1 }
 0x679   : > { %v706_v47 = vadd.f32 %v1720_v44, %v705_v46  ;;  %v1873_v48 = vpop.f32.mrb[9].mxu1 }
 0x67a   : > { %v708_v49 = vpop.f32.mrb[10].mxu1 }
 0x67b   : > { %2007 = vtanh.f32 %v706_v47  ;;  %v1874_v51 = vpop.f32.mrb[11].mxu1  ;;  %v1723_v56 = vmul.f32 -1.442695, %v706_v47 }
 0x67c   : > { %2009 = vpow2.f32 %v1722_v55 }
 0x67d   : > { %2011 = vpow2.f32 %v1723_v56 }
 0x681   : > { %v2006_v52 = vpop.eup %2005 }
 0x682   : > { %720 = vrot.lane.b32.xlu0 %v2006_v52, %s2112_s19 }
 0x685   : > { %v2008_v54 = vpop.eup %2007 }
 0x686   : > { %744 = vrot.lane.b32.xlu1 %v2008_v54, %s2112_s19  ;;  %v2010_v57 = vpop.eup %2009 }
 0x687   : > { %v714_v58 = vadd.f32 1.0, %v2010_v57  ;;  %v2012_v59 = vpop.eup %2011 }
 0x688   : > { %v738_v60 = vadd.f32 1.0, %v2012_v59 }
 0x689   : > { %2013 = vrcp.f32 %v714_v58 }
 0x68a   : > { %2015 = vrcp.f32 %v738_v60 }
 0x693   : > { %v2014_v61 = vpop.eup %2013 }
 0x694   : > { %v2016_v0 = vpop.eup %2015  ;;  %v718_v8 = vmul.f32 %v2014_v61, %v2261_v25 }
 0x695   : > { %v742_v11 = vmul.f32 %v2016_v0, %v2265_v28 }
 0x6f4   : > { %v721_v62 = vpop.permute.xlu0 %720 }
 0x6f5   : > { %v723_v63 = vmul.f32 %v2014_v61, %v721_v62 }
 0x6f7   : > { %725 = vrot.lane.b32.xlu0 %v723_v63, %s2112_s19 }
 0x6f8   : > { %v745_v6 = vpop.permute.xlu1 %744 }
 0x6f9   : > { %v747_v7 = vmul.f32 %v2016_v0, %v745_v6 }
 0x6fb   : > { %749 = vrot.lane.b32.xlu1 %v747_v7, %s2112_s19 }
 0x769   : > { %v726_v9 = vpop.permute.xlu0 %725 }
 0x76a   : > { %v2299_v10 = vadd.f32 %v726_v9, %v718_v8 }
 0x76c   : > { %2017 = vtanh.f32 %v2299_v10 }
 0x76d   : > { %v750_v12 = vpop.permute.xlu1 %749 }
 0x76e   : > { %v2303_v13 = vadd.f32 %v750_v12, %v742_v11  ;;  %v931_v11 = vld [vmem:[%s2151_s24 + $0x20] sm:$0xff] }
 0x770   : > { %2019 = vtanh.f32 %v2303_v13 }
 0x776   : > { %v2018_v14 = vpop.eup %2017 }
 0x777   : > { %731 = vrot.lane.b32.xlu0 %v2018_v14, %s2112_s19 }
 0x77a   : > { %v2020_v15 = vpop.eup %2019 }
 0x77b   : > { %755 = vrot.lane.b32.xlu1 %v2020_v15, %s2112_s19 }
 0x7e9   : > { %v732_v16 = vpop.permute.xlu0 %731 }
 0x7ea   : > { %v734_v17 = vmul.f32 %v2014_v61, %v732_v16  ;;  %v1734_v16 = vld [vmem:[%s2156_s28 + $0x98] sm:$0xff] }
 0x7ec   : > { %v2308_v18 = vpack.c.bf16 %v734_v17, %v734_v17 }
 0x7ed   : > { %v756_v19 = vpop.permute.xlu1 %755 }
 0x7ee   : > { %v758_v20 = vmul.f32 %v2016_v0, %v756_v19  ;;  %776 = vrot.lane.b32.xlu0 %v2308_v18, %s2113_s20 }
 0x7f0   : > { %v2312_v21 = vpack.c.bf16 %v758_v20, %v758_v20 }
 0x7f2   : > { %822 = vrot.lane.b32.xlu1 %v2312_v21, %s2113_s20 }
 0x860   : > { %v777_v22 = vpop.permute.xlu0 %776 }
 0x861   : > { %1880 = vmatmul.mubr.msk.bf16.vlgmr.msra.gmra.mrb[12].mxu0 %vm289_vm2, %v777_v22 }
 0x862   : > { %1892 = vmatpush3.bf16.msra.mxu0 %v2171_v1  ;;  %1895 = vmatprep.mubr.msk.bf16.mxu0 %vm2111_vm1, %v2110_v2 }
 0x863   : > { %1893 = vmatprep.subr.bf16.mxu0 %v2110_v2 }
 0x864   : > { %v823_v23 = vpop.permute.xlu1 %822 }
 0x865   : > { %1888 = vmatmul.mubr.msk.bf16.vlgmr.msra.gmra.mrb[12].mxu1 %vm289_vm2, %v823_v23 }
 0x866   : > { %1900 = vmatpush3.bf16.msra.mxu1 %v2178_v3  ;;  %1894 = vmatpush3.bf16.msra.mxu0 %v2184_v4 }
 0x867   : > { %1901 = vmatprep.subr.bf16.mxu1 %v2110_v2  ;;  %1903 = vmatprep.mubr.msk.bf16.mxu1 %vm2111_vm1, %v2110_v2 }
 0x868   : > { %1907 = vmatprep.subr.bf16.mxu0 %v2110_v2 }
 0x86a   : > { %1902 = vmatpush3.bf16.msra.mxu1 %v2193_v5 }
 0x86b   : > { %1915 = vmatprep.subr.bf16.mxu1 %v2110_v2 }
 0x934   : > { %v815_v25 = vpop.f32.mrb[12].mxu0 }
 0x935   : > { %v816_v26 = vadd.f32 %v815_v25, %v775_v24  ;;  %v1881_v27 = vpop.f32.mrb[13].mxu0 }
 0x936   : > { %v818_v28 = vpop.f32.mrb[14].mxu0 }
 0x937   : > { %2021 = vtanh.f32 %v816_v26  ;;  %v1882_v30 = vpop.f32.mrb[15].mxu0  ;;  %v1729_v40 = vmul.f32 -1.442695, %v816_v26 }
 0x938   : > { %v861_v31 = vpop.f32.mrb[12].mxu1 }
 0x939   : > { %v862_v32 = vadd.f32 %v1727_v29, %v861_v31  ;;  %v1889_v34 = vpop.f32.mrb[13].mxu1 }
 0x93a   : > { %v864_v35 = vpop.f32.mrb[14].mxu1 }
 0x93b   : > { %2023 = vtanh.f32 %v862_v32  ;;  %v1890_v37 = vpop.f32.mrb[15].mxu1  ;;  %v1730_v41 = vmul.f32 -1.442695, %v862_v32 }
 0x93c   : > { %2025 = vpow2.f32 %v1729_v40 }
 0x93d   : > { %2027 = vpow2.f32 %v1730_v41 }
 0x941   : > { %v2022_v38 = vpop.eup %2021 }
 0x942   : > { %876 = vrot.lane.b32.xlu0 %v2022_v38, %s2112_s19 }
 0x945   : > { %v2024_v39 = vpop.eup %2023 }
 0x946   : > { %900 = vrot.lane.b32.xlu1 %v2024_v39, %s2112_s19  ;;  %v2026_v42 = vpop.eup %2025 }
 0x947   : > { %v870_v43 = vadd.f32 1.0, %v2026_v42  ;;  %v2028_v44 = vpop.eup %2027 }
 0x948   : > { %v894_v45 = vadd.f32 1.0, %v2028_v44 }
 0x949   : > { %2029 = vrcp.f32 %v870_v43 }
 0x94a   : > { %2031 = vrcp.f32 %v894_v45 }
 0x953   : > { %v2030_v46 = vpop.eup %2029 }
 0x954   : > { %v2032_v49 = vpop.eup %2031  ;;  %v874_v54 = vmul.f32 %v2030_v46, %v2299_v10 }
 0x955   : > { %v898_v57 = vmul.f32 %v2032_v49, %v2303_v13 }
 0x9b4   : > { %v877_v47 = vpop.permute.xlu0 %876 }
 0x9b5   : > { %v879_v48 = vmul.f32 %v2030_v46, %v877_v47 }
 0x9b7   : > { %881 = vrot.lane.b32.xlu0 %v879_v48, %s2112_s19 }
 0x9b8   : > { %v901_v51 = vpop.permute.xlu1 %900 }
 0x9b9   : > { %v903_v52 = vmul.f32 %v2032_v49, %v901_v51 }
 0x9bb   : > { %905 = vrot.lane.b32.xlu1 %v903_v52, %s2112_s19 }
 0xa29   : > { %v882_v55 = vpop.permute.xlu0 %881 }
 0xa2a   : > { %v2337_v56 = vadd.f32 %v882_v55, %v874_v54 }
 0xa2c   : > { %2033 = vtanh.f32 %v2337_v56 }
 0xa2d   : > { %v906_v58 = vpop.permute.xlu1 %905 }
 0xa2e   : > { %v2341_v59 = vadd.f32 %v906_v58, %v898_v57 }
 0xa30   : > { %2035 = vtanh.f32 %v2341_v59 }
 0xa36   : > { %v2034_v60 = vpop.eup %2033 }
 0xa37   : > { %887 = vrot.lane.b32.xlu0 %v2034_v60, %s2112_s19 }
 0xa3a   : > { %v2036_v61 = vpop.eup %2035 }
 0xa3b   : > { %911 = vrot.lane.b32.xlu1 %v2036_v61, %s2112_s19 }
 0xaa9   : > { %v888_v62 = vpop.permute.xlu0 %887 }
 0xaaa   : > { %v890_v63 = vmul.f32 %v2030_v46, %v888_v62 }
 0xaac   : > { %v2346_v0 = vpack.c.bf16 %v890_v63, %v890_v63 }
 0xaad   : > { %v912_v6 = vpop.permute.xlu1 %911 }
 0xaae   : > { %v914_v7 = vmul.f32 %v2032_v49, %v912_v6  ;;  %932 = vrot.lane.b32.xlu0 %v2346_v0, %s2113_s20  ;;  %v1741_v6 = vld [vmem:[%s2156_s28 + $0x90] sm:$0xff] }
 0xab0   : > { %v2350_v8 = vpack.c.bf16 %v914_v7, %v914_v7 }
 0xab2   : > { %978 = vrot.lane.b32.xlu1 %v2350_v8, %s2113_s20 }
 0xb20   : > { %v933_v9 = vpop.permute.xlu0 %932 }
 0xb21   : > { %1896 = vmatmul.mubr.msk.bf16.vlgmr.msra.gmra.mrb[16].mxu0 %vm289_vm2, %v933_v9 }
 0xb22   : > { %1908 = vmatpush3.bf16.msra.mxu0 %v2171_v1  ;;  %1911 = vmatprep.mubr.msk.bf16.mxu0 %vm2111_vm1, %v2110_v2 }
 0xb23   : > { %1909 = vmatprep.subr.bf16.mxu0 %v2110_v2 }
 0xb24   : > { %v979_v10 = vpop.permute.xlu1 %978 }
 0xb25   : > { %1904 = vmatmul.mubr.msk.bf16.vlgmr.msra.gmra.mrb[16].mxu1 %vm289_vm2, %v979_v10 }
 0xb26   : > { %1916 = vmatpush3.bf16.msra.mxu1 %v2178_v3  ;;  %1910 = vmatpush3.bf16.msra.mxu0 %v2184_v4 }
 0xb27   : > { %1917 = vmatprep.subr.bf16.mxu1 %v2110_v2  ;;  %1919 = vmatprep.mubr.msk.bf16.mxu1 %vm2111_vm1, %v2110_v2 }
 0xb28   : > { %1923 = vmatprep.subr.bf16.mxu0 %v2110_v2 }
 0xb2a   : > { %1918 = vmatpush3.bf16.msra.mxu1 %v2193_v5 }
 0xb2b   : > { %1931 = vmatprep.subr.bf16.mxu1 %v2110_v2 }
 0xbf4   : > { %v971_v12 = vpop.f32.mrb[16].mxu0 }
 0xbf5   : > { %v972_v13 = vadd.f32 %v971_v12, %v931_v11  ;;  %v1897_v14 = vpop.f32.mrb[17].mxu0 }
 0xbf6   : > { %v974_v15 = vpop.f32.mrb[18].mxu0 }
 0xbf7   : > { %2037 = vtanh.f32 %v972_v13  ;;  %v1898_v17 = vpop.f32.mrb[19].mxu0  ;;  %v1736_v27 = vmul.f32 -1.442695, %v972_v13 }
 0xbf8   : > { %v1017_v19 = vpop.f32.mrb[16].mxu1 }
 0xbf9   : > { %v1018_v20 = vadd.f32 %v1734_v16, %v1017_v19  ;;  %v1905_v22 = vpop.f32.mrb[17].mxu1 }
 0xbfa   : > { %v1020_v23 = vpop.f32.mrb[18].mxu1 }
 0xbfb   : > { %2039 = vtanh.f32 %v1018_v20  ;;  %v1906_v24 = vpop.f32.mrb[19].mxu1  ;;  %v1737_v28 = vmul.f32 -1.442695, %v1018_v20 }
 0xbfc   : > { %2041 = vpow2.f32 %v1736_v27 }
 0xbfd   : > { %2043 = vpow2.f32 %v1737_v28 }
 0xc01   : > { %v2038_v25 = vpop.eup %2037 }
 0xc02   : > { %1032 = vrot.lane.b32.xlu0 %v2038_v25, %s2112_s19 }
 0xc05   : > { %v2040_v26 = vpop.eup %2039 }
 0xc06   : > { %1056 = vrot.lane.b32.xlu1 %v2040_v26, %s2112_s19  ;;  %v2042_v29 = vpop.eup %2041 }
 0xc07   : > { %v1026_v30 = vadd.f32 1.0, %v2042_v29  ;;  %v2044_v31 = vpop.eup %2043 }
 0xc08   : > { %v1050_v32 = vadd.f32 1.0, %v2044_v31 }
 0xc09   : > { %2045 = vrcp.f32 %v1026_v30 }
 0xc0a   : > { %2047 = vrcp.f32 %v1050_v32 }
 0xc13   : > { %v2046_v34 = vpop.eup %2045 }
 0xc14   : > { %v2048_v38 = vpop.eup %2047  ;;  %v1030_v41 = vmul.f32 %v2046_v34, %v2337_v56 }
 0xc15   : > { %v1054_v44 = vmul.f32 %v2048_v38, %v2341_v59  ;;  %v1087_v59 = vld [vmem:[%s2151_s24 + $0x28] sm:$0xff] }
 0xc74   : > { %v1033_v35 = vpop.permute.xlu0 %1032 }
 0xc75   : > { %v1035_v37 = vmul.f32 %v2046_v34, %v1033_v35 }
 0xc77   : > { %1037 = vrot.lane.b32.xlu0 %v1035_v37, %s2112_s19 }
 0xc78   : > { %v1057_v39 = vpop.permute.xlu1 %1056 }
 0xc79   : > { %v1059_v40 = vmul.f32 %v2048_v38, %v1057_v39 }
 0xc7b   : > { %1061 = vrot.lane.b32.xlu1 %v1059_v40, %s2112_s19 }
 0xce9   : > { %v1038_v42 = vpop.permute.xlu0 %1037 }
 0xcea   : > { %v2375_v43 = vadd.f32 %v1038_v42, %v1030_v41 }
 0xcec   : > { %2049 = vtanh.f32 %v2375_v43 }
 0xced   : > { %v1062_v45 = vpop.permute.xlu1 %1061 }
 0xcee   : > { %v2379_v46 = vadd.f32 %v1062_v45, %v1054_v44 }
 0xcf0   : > { %2051 = vtanh.f32 %v2379_v46 }
 0xcf6   : > { %v2050_v47 = vpop.eup %2049 }
 0xcf7   : > { %1043 = vrot.lane.b32.xlu0 %v2050_v47, %s2112_s19 }
 0xcfa   : > { %v2052_v48 = vpop.eup %2051 }
 0xcfb   : > { %1067 = vrot.lane.b32.xlu1 %v2052_v48, %s2112_s19 }
 0xd69   : > { %v1044_v49 = vpop.permute.xlu0 %1043 }
 0xd6a   : > { %v1046_v51 = vmul.f32 %v2046_v34, %v1044_v49 }
 0xd6c   : > { %v2384_v52 = vpack.c.bf16 %v1046_v51, %v1046_v51 }
 0xd6d   : > { %v1068_v54 = vpop.permute.xlu1 %1067 }
 0xd6e   : > { %v1070_v55 = vmul.f32 %v2048_v38, %v1068_v54  ;;  %1088 = vrot.lane.b32.xlu0 %v2384_v52, %s2113_s20 }
 0xd70   : > { %v2388_v56 = vpack.c.bf16 %v1070_v55, %v1070_v55  ;;  %v1748_v55 = vld [vmem:[%s2156_s28 + $0x88] sm:$0xff] }
 0xd72   : > { %1134 = vrot.lane.b32.xlu1 %v2388_v56, %s2113_s20 }
 0xde0   : > { %v1089_v57 = vpop.permute.xlu0 %1088 }
 0xde1   : > { %1912 = vmatmul.mubr.msk.bf16.vlgmr.msra.gmra.mrb[20].mxu0 %vm289_vm2, %v1089_v57 }
 0xde2   : > { %1924 = vmatpush3.bf16.msra.mxu0 %v2171_v1  ;;  %1927 = vmatprep.mubr.msk.bf16.mxu0 %vm2111_vm1, %v2110_v2 }
 0xde3   : > { %1925 = vmatprep.subr.bf16.mxu0 %v2110_v2 }
 0xde4   : > { %v1135_v58 = vpop.permute.xlu1 %1134 }
 0xde5   : > { %1920 = vmatmul.mubr.msk.bf16.vlgmr.msra.gmra.mrb[20].mxu1 %vm289_vm2, %v1135_v58 }
 0xde6   : > { %1932 = vmatpush3.bf16.msra.mxu1 %v2178_v3  ;;  %1926 = vmatpush3.bf16.msra.mxu0 %v2184_v4 }
 0xde7   : > { %1933 = vmatprep.subr.bf16.mxu1 %v2110_v2  ;;  %1935 = vmatprep.mubr.msk.bf16.mxu1 %vm2111_vm1, %v2110_v2 }
 0xde8   : > { %1939 = vmatprep.subr.bf16.mxu0 %v2110_v2 }
 0xdea   : > { %1934 = vmatpush3.bf16.msra.mxu1 %v2193_v5 }
 0xdeb   : > { %1947 = vmatprep.subr.bf16.mxu1 %v2110_v2 }
 0xeb4   : > { %v1127_v60 = vpop.f32.mrb[20].mxu0 }
 0xeb5   : > { %v1128_v61 = vadd.f32 %v1127_v60, %v1087_v59  ;;  %v1913_v62 = vpop.f32.mrb[21].mxu0 }
 0xeb6   : > { %v1130_v63 = vpop.f32.mrb[22].mxu0 }
 0xeb7   : > { %2053 = vtanh.f32 %v1128_v61  ;;  %v1914_v7 = vpop.f32.mrb[23].mxu0  ;;  %v1743_v16 = vmul.f32 -1.442695, %v1128_v61 }
 0xeb8   : > { %v1173_v9 = vpop.f32.mrb[20].mxu1 }
 0xeb9   : > { %v1174_v10 = vadd.f32 %v1741_v6, %v1173_v9  ;;  %v1921_v11 = vpop.f32.mrb[21].mxu1 }
 0xeba   : > { %v1176_v12 = vpop.f32.mrb[22].mxu1 }
 0xebb   : > { %2055 = vtanh.f32 %v1174_v10  ;;  %v1922_v13 = vpop.f32.mrb[23].mxu1  ;;  %v1744_v17 = vmul.f32 -1.442695, %v1174_v10 }
 0xebc   : > { %2057 = vpow2.f32 %v1743_v16 }
 0xebd   : > { %2059 = vpow2.f32 %v1744_v17 }
 0xec1   : > { %v2054_v14 = vpop.eup %2053 }
 0xec2   : > { %1188 = vrot.lane.b32.xlu0 %v2054_v14, %s2112_s19 }
 0xec5   : > { %v2056_v15 = vpop.eup %2055 }
 0xec6   : > { %1212 = vrot.lane.b32.xlu1 %v2056_v15, %s2112_s19  ;;  %v2058_v19 = vpop.eup %2057 }
 0xec7   : > { %v1182_v20 = vadd.f32 1.0, %v2058_v19  ;;  %v2060_v22 = vpop.eup %2059 }
 0xec8   : > { %v1206_v23 = vadd.f32 1.0, %v2060_v22 }
 0xec9   : > { %2061 = vrcp.f32 %v1182_v20 }
 0xeca   : > { %2063 = vrcp.f32 %v1206_v23 }
 0xed3   : > { %v2062_v24 = vpop.eup %2061 }
 0xed4   : > { %v2064_v27 = vpop.eup %2063  ;;  %v1186_v30 = vmul.f32 %v2062_v24, %v2375_v43 }
 0xed5   : > { %v1210_v34 = vmul.f32 %v2064_v27, %v2379_v46 }
 0xf34   : > { %v1189_v25 = vpop.permute.xlu0 %1188 }
 0xf35   : > { %v1191_v26 = vmul.f32 %v2062_v24, %v1189_v25 }
 0xf37   : > { %1193 = vrot.lane.b32.xlu0 %v1191_v26, %s2112_s19 }
 0xf38   : > { %v1213_v28 = vpop.permute.xlu1 %1212 }
 0xf39   : > { %v1215_v29 = vmul.f32 %v2064_v27, %v1213_v28 }
 0xf3b   : > { %1217 = vrot.lane.b32.xlu1 %v1215_v29, %s2112_s19 }
 0xfa9   : > { %v1194_v31 = vpop.permute.xlu0 %1193 }
 0xfaa   : > { %v2413_v32 = vadd.f32 %v1194_v31, %v1186_v30 }
 0xfac   : > { %2065 = vtanh.f32 %v2413_v32 }
 0xfad   : > { %v1218_v35 = vpop.permute.xlu1 %1217 }
 0xfae   : > { %v2417_v37 = vadd.f32 %v1218_v35, %v1210_v34  ;;  %v1399_v35 = vld [vmem:[%s2151_s24 + $0x38] sm:$0xff] }
 0xfb0   : > { %2067 = vtanh.f32 %v2417_v37 }
 0xfb6   : > { %v2066_v38 = vpop.eup %2065 }
 0xfb7   : > { %1199 = vrot.lane.b32.xlu0 %v2066_v38, %s2112_s19 }
 0xfba   : > { %v2068_v39 = vpop.eup %2067 }
 0xfbb   : > { %1223 = vrot.lane.b32.xlu1 %v2068_v39, %s2112_s19 }
0x1029   : > { %v1200_v40 = vpop.permute.xlu0 %1199 }
0x102a   : > { %v1202_v41 = vmul.f32 %v2062_v24, %v1200_v40 }
0x102c   : > { %v2422_v42 = vpack.c.bf16 %v1202_v41, %v1202_v41  ;;  %v1755_v41 = vld [vmem:[%s2156_s28 + $0x80] sm:$0xff] }
0x102d   : > { %v1224_v43 = vpop.permute.xlu1 %1223 }
0x102e   : > { %v1226_v44 = vmul.f32 %v2064_v27, %v1224_v43  ;;  %1244 = vrot.lane.b32.xlu0 %v2422_v42, %s2113_s20 }
0x1030   : > { %v2426_v45 = vpack.c.bf16 %v1226_v44, %v1226_v44 }
0x1032   : > { %1290 = vrot.lane.b32.xlu1 %v2426_v45, %s2113_s20 }
0x10a0   : > { %v1245_v46 = vpop.permute.xlu0 %1244 }
0x10a1   : > { %1928 = vmatmul.mubr.msk.bf16.vlgmr.msra.gmra.mrb[24].mxu0 %vm289_vm2, %v1245_v46 }
0x10a2   : > { %1940 = vmatpush3.bf16.msra.mxu0 %v2171_v1  ;;  %1943 = vmatprep.mubr.msk.bf16.mxu0 %vm2111_vm1, %v2110_v2  ;;  %v1243_v1 = vld [vmem:[%s2151_s24 + $0x30] sm:$0xff] }
0x10a3   : > { %1941 = vmatprep.subr.bf16.mxu0 %v2110_v2 }
0x10a4   : > { %v1291_v47 = vpop.permute.xlu1 %1290 }
0x10a5   : > { %1936 = vmatmul.mubr.msk.bf16.vlgmr.msra.gmra.mrb[24].mxu1 %vm289_vm2, %v1291_v47 }
0x10a6   : > { %1948 = vmatpush3.bf16.msra.mxu1 %v2178_v3  ;;  %1942 = vmatpush3.bf16.msra.mxu0 %v2184_v4 }
0x10a7   : > { %1949 = vmatprep.subr.bf16.mxu1 %v2110_v2  ;;  %1951 = vmatprep.mubr.msk.bf16.mxu1 %vm2111_vm1, %v2110_v2 }
0x10aa   : > { %1950 = vmatpush3.bf16.msra.mxu1 %v2193_v5 }
0x1174   : > { %v1283_v48 = vpop.f32.mrb[24].mxu0 }
0x1175   : > { %v1284_v49 = vadd.f32 %v1283_v48, %v1243_v1  ;;  %v1929_v51 = vpop.f32.mrb[25].mxu0 }
0x1176   : > { %v1286_v54 = vpop.f32.mrb[26].mxu0 }
0x1177   : > { %2069 = vtanh.f32 %v1284_v49  ;;  %v1930_v57 = vpop.f32.mrb[27].mxu0  ;;  %v1750_v5 = vmul.f32 -1.442695, %v1284_v49 }
0x1178   : > { %v1329_v58 = vpop.f32.mrb[24].mxu1 }
0x1179   : > { %v1330_v59 = vadd.f32 %v1748_v55, %v1329_v58  ;;  %v1937_v3 = vpop.f32.mrb[25].mxu1 }
0x117a   : > { %v1332_v60 = vpop.f32.mrb[26].mxu1 }
0x117b   : > { %2071 = vtanh.f32 %v1330_v59  ;;  %v1938_v4 = vpop.f32.mrb[27].mxu1  ;;  %v1751_v62 = vmul.f32 -1.442695, %v1330_v59 }
0x117c   : > { %2073 = vpow2.f32 %v1750_v5 }
0x117d   : > { %2075 = vpow2.f32 %v1751_v62 }
0x1181   : > { %v2070_v61 = vpop.eup %2069 }
0x1182   : > { %1344 = vrot.lane.b32.xlu0 %v2070_v61, %s2112_s19 }
0x1185   : > { %v2072_v2 = vpop.eup %2071 }
0x1186   : > { %1368 = vrot.lane.b32.xlu1 %v2072_v2, %s2112_s19  ;;  %v2074_v63 = vpop.eup %2073 }
0x1187   : > { %v1338_v6 = vadd.f32 1.0, %v2074_v63  ;;  %v2076_v7 = vpop.eup %2075 }
0x1188   : > { %v1362_v9 = vadd.f32 1.0, %v2076_v7 }
0x1189   : > { %2077 = vrcp.f32 %v1338_v6 }
0x118a   : > { %2079 = vrcp.f32 %v1362_v9 }
0x1193   : > { %v2078_v10 = vpop.eup %2077 }
0x1194   : > { %v2080_v13 = vpop.eup %2079  ;;  %v1342_v16 = vmul.f32 %v2078_v10, %v2413_v32 }
0x1195   : > { %v1366_v20 = vmul.f32 %v2080_v13, %v2417_v37 }
0x11f4   : > { %v1345_v11 = vpop.permute.xlu0 %1344 }
0x11f5   : > { %v1347_v12 = vmul.f32 %v2078_v10, %v1345_v11 }
0x11f7   : > { %1349 = vrot.lane.b32.xlu0 %v1347_v12, %s2112_s19 }
0x11f8   : > { %v1369_v14 = vpop.permute.xlu1 %1368 }
0x11f9   : > { %v1371_v15 = vmul.f32 %v2080_v13, %v1369_v14 }
0x11fb   : > { %1373 = vrot.lane.b32.xlu1 %v1371_v15, %s2112_s19 }
0x1269   : > { %v1350_v17 = vpop.permute.xlu0 %1349 }
0x126a   : > { %v1352_v19 = vadd.f32 %v1350_v17, %v1342_v16 }
0x126c   : > { %2081 = vtanh.f32 %v1352_v19 }
0x126d   : > { %v1374_v22 = vpop.permute.xlu1 %1373 }
0x126e   : > { %v1376_v23 = vadd.f32 %v1374_v22, %v1366_v20 }
0x1270   : > { %2083 = vtanh.f32 %v1376_v23 }
0x1276   : > { %v2082_v24 = vpop.eup %2081 }
0x1277   : > { %1355 = vrot.lane.b32.xlu0 %v2082_v24, %s2112_s19 }
0x127a   : > { %v2084_v25 = vpop.eup %2083 }
0x127b   : > { %1379 = vrot.lane.b32.xlu1 %v2084_v25, %s2112_s19 }
0x12e9   : > { %v1356_v26 = vpop.permute.xlu0 %1355 }
0x12ea   : > { %v1358_v27 = vmul.f32 %v2078_v10, %v1356_v26 }
0x12ec   : > { %v2452_v28 = vpack.c.bf16 %v1358_v27, %v1358_v27 }
0x12ed   : > { %v1380_v29 = vpop.permute.xlu1 %1379 }
0x12ee   : > { %v1382_v30 = vmul.f32 %v2080_v13, %v1380_v29  ;;  %1400 = vrot.lane.b32.xlu0 %v2452_v28, %s2113_s20 }
0x12f0   : > { %v2456_v31 = vpack.c.bf16 %v1382_v30, %v1382_v30 }
0x12f2   : > { %1446 = vrot.lane.b32.xlu1 %v2456_v31, %s2113_s20 }
0x1360   : > { %v1401_v32 = vpop.permute.xlu0 %1400 }
0x1361   : > { %1944 = vmatmul.mubr.msk.bf16.vlgmr.msra.gmra.mrb[28].mxu0 %vm289_vm2, %v1401_v32 }
0x1364   : > { %v1447_v34 = vpop.permute.xlu1 %1446 }
0x1365   : > { %1952 = vmatmul.mubr.msk.bf16.vlgmr.msra.gmra.mrb[28].mxu1 %vm289_vm2, %v1447_v34 }
0x1434   : > { %v1439_v37 = vpop.f32.mrb[28].mxu0 }
0x1435   : > { %v1440_v38 = vadd.f32 %v1439_v37, %v1399_v35  ;;  %v1945_v39 = vpop.f32.mrb[29].mxu0 }
0x1436   : > { %v1442_v40 = vpop.f32.mrb[30].mxu0 }
0x1437   : > { %2085 = vtanh.f32 %v1440_v38  ;;  %v1946_v43 = vpop.f32.mrb[31].mxu0  ;;  %v1757_v54 = vmul.f32 -1.442695, %v1440_v38 }
0x1438   : > { %v1485_v44 = vpop.f32.mrb[28].mxu1 }
0x1439   : > { %v1486_v46 = vadd.f32 %v1755_v41, %v1485_v44  ;;  %v1953_v47 = vpop.f32.mrb[29].mxu1 }
0x143a   : > { %v1488_v1 = vpop.f32.mrb[30].mxu1 }
0x143b   : > { %2087 = vtanh.f32 %v1486_v46  ;;  %v1954_v48 = vpop.f32.mrb[31].mxu1  ;;  %v1758_v55 = vmul.f32 -1.442695, %v1486_v46 }
0x143c   : > { %2089 = vpow2.f32 %v1757_v54 }
0x143d   : > { %2091 = vpow2.f32 %v1758_v55 }
0x1441   : > { %v2086_v49 = vpop.eup %2085 }
0x1442   : > { %1500 = vrot.lane.b32.xlu0 %v2086_v49, %s2112_s19 }
0x1445   : > { %v2088_v51 = vpop.eup %2087 }
0x1446   : > { %1524 = vrot.lane.b32.xlu1 %v2088_v51, %s2112_s19  ;;  %v2090_v57 = vpop.eup %2089 }
0x1447   : > { %v1494_v58 = vadd.f32 1.0, %v2090_v57  ;;  %v2092_v59 = vpop.eup %2091 }
0x1448   : > { %v1518_v3 = vadd.f32 1.0, %v2092_v59 }
0x1449   : > { %2093 = vrcp.f32 %v1494_v58 }
0x144a   : > { %2095 = vrcp.f32 %v1518_v3 }
0x1453   : > { %v2094_v60 = vpop.eup %2093 }
0x1454   : > { %v2096_v2 = vpop.eup %2095  ;;  %v1498_v63 = vmul.f32 %v2094_v60, %v1352_v19 }
0x1455   : > { %v1522_v9 = vmul.f32 %v2096_v2, %v1376_v23 }
0x14b4   : > { %v1501_v4 = vpop.permute.xlu0 %1500 }
0x14b5   : > { %v1503_v61 = vmul.f32 %v2094_v60, %v1501_v4 }
0x14b7   : > { %1505 = vrot.lane.b32.xlu0 %v1503_v61, %s2112_s19 }
0x14b8   : > { %v1525_v5 = vpop.permute.xlu1 %1524 }
0x14b9   : > { %v1527_v62 = vmul.f32 %v2096_v2, %v1525_v5 }
0x14bb   : > { %1529 = vrot.lane.b32.xlu1 %v1527_v62, %s2112_s19 }
0x1529   : > { %v1506_v6 = vpop.permute.xlu0 %1505 }
0x152a   : > { %v1508_v7 = vadd.f32 %v1506_v6, %v1498_v63 }
0x152c   : > { %2097 = vtanh.f32 %v1508_v7 }
0x152d   : > { %v1530_v10 = vpop.permute.xlu1 %1529 }
0x152e   : > { %v1532_v11 = vadd.f32 %v1530_v10, %v1522_v9 }
0x1530   : > { %2099 = vtanh.f32 %v1532_v11 }
0x1536   : > { %v2098_v12 = vpop.eup %2097 }
0x1537   : > { %1511 = vrot.lane.b32.xlu0 %v2098_v12, %s2112_s19 }
0x153a   : > { %v2100_v13 = vpop.eup %2099 }
0x153b   : > { %1535 = vrot.lane.b32.xlu1 %v2100_v13, %s2112_s19  ;;  %450 = vrot.lane.b32.xlu0 %v2232_v50, %s2113_s20 }
0x153f   : > { %459 = vrot.lane.b32.xlu1 %v2236_v53, %s2113_s20  ;;  %607 = vrot.lane.b32.xlu0 %v2270_v33, %s2113_s20 }
0x1543   : > { %615 = vrot.lane.b32.xlu1 %v2274_v36, %s2113_s20  ;;  %763 = vrot.lane.b32.xlu0 %v2308_v18, %s2113_s20 }
0x1547   : > { %771 = vrot.lane.b32.xlu1 %v2312_v21, %s2113_s20  ;;  %919 = vrot.lane.b32.xlu0 %v2346_v0, %s2113_s20 }
0x154b   : > { %927 = vrot.lane.b32.xlu1 %v2350_v8, %s2113_s20  ;;  %1075 = vrot.lane.b32.xlu0 %v2384_v52, %s2113_s20 }
0x154f   : > { %1083 = vrot.lane.b32.xlu1 %v2388_v56, %s2113_s20  ;;  %1231 = vrot.lane.b32.xlu0 %v2422_v42, %s2113_s20 }
0x1553   : > { %1239 = vrot.lane.b32.xlu1 %v2426_v45, %s2113_s20  ;;  %1387 = vrot.lane.b32.xlu0 %v2452_v28, %s2113_s20 }
0x1557   : > { %1395 = vrot.lane.b32.xlu1 %v2456_v31, %s2113_s20 }
0x155b   : > { %1561 = vrot.lane.b32.xlu1 %v1508_v7, %s2114_s21 }
0x15a9   : > { %v1512_v50 = vpop.permute.xlu0 %1511 }
0x15aa   : > { %v1514_v53 = vmul.f32 %v2094_v60, %v1512_v50 }
0x15ac   : > { %1556 = vrot.lane.b32.xlu0 %v1514_v53, %s2113_s20  ;;  %v1777_v18 = vpack.c.bf16 %v1514_v53, %v1514_v53 }
0x15ad   : > { %v1536_v33 = vpop.permute.xlu1 %1535  ;;  %v451_v36 = vpop.permute.xlu0 %450 }
0x15ae   : > { %v1538_v21 = vmul.f32 %v2096_v2, %v1536_v33  ;;  %454 = vst.msk [vmem:[%s2161_s5] sm:$0xf] %vm453_vm3, %v451_v36 }
0x15b0   : > { %v1778_v0 = vpack.c.bf16 %v1538_v21, %v1538_v21  ;;  %1543 = vrot.lane.b32.xlu0 %v1777_v18, %s2113_s20 }
0x15b1   : > { %v460_v8 = vpop.permute.xlu1 %459  ;;  %v608_v52 = vpop.permute.xlu0 %607 }
0x15b2   : > { %462 = vst.msk [vmem:[%s2166_s9 + $0x1c] sm:$0xf] %vm453_vm3, %v460_v8  ;;  %610 = vst.msk [vmem:[%s2161_s5 + $0x4] sm:$0xf] %vm453_vm3, %v608_v52  ;;  %1551 = vrot.lane.b32.xlu1 %v1778_v0, %s2113_s20 }
0x15b4   : > { %1566 = vrot.lane.b32.xlu0 %v1538_v21, %s2113_s20 }
0x15b5   : > { %v616_v56 = vpop.permute.xlu1 %615  ;;  %v764_v42 = vpop.permute.xlu0 %763 }
0x15b6   : > { %618 = vst.msk [vmem:[%s2166_s9 + $0x18] sm:$0xf] %vm453_vm3, %v616_v56  ;;  %766 = vst.msk [vmem:[%s2161_s5 + $0x8] sm:$0xf] %vm453_vm3, %v764_v42  ;;  %1571 = vrot.lane.b32.xlu1 %v1532_v11, %s2114_s21 }
0x15b9   : > { %v772_v45 = vpop.permute.xlu1 %771  ;;  %v920_v14 = vpop.permute.xlu0 %919 }
0x15ba   : > { %774 = vst.msk [vmem:[%s2166_s9 + $0x14] sm:$0xf] %vm453_vm3, %v772_v45  ;;  %922 = vst.msk [vmem:[%s2161_s5 + $0xc] sm:$0xf] %vm453_vm3, %v920_v14 }
0x15bd   : > { %v928_v15 = vpop.permute.xlu1 %927  ;;  %v1076_v16 = vpop.permute.xlu0 %1075 }
0x15be   : > { %930 = vst.msk [vmem:[%s2166_s9 + $0x10] sm:$0xf] %vm453_vm3, %v928_v15  ;;  %1078 = vst.msk [vmem:[%s2161_s5 + $0x10] sm:$0xf] %vm453_vm3, %v1076_v16 }
0x15c1   : > { %v1084_v17 = vpop.permute.xlu1 %1083  ;;  %v1232_v19 = vpop.permute.xlu0 %1231 }
0x15c2   : > { %1086 = vst.msk [vmem:[%s2166_s9 + $0xc] sm:$0xf] %vm453_vm3, %v1084_v17  ;;  %1234 = vst.msk [vmem:[%s2161_s5 + $0x14] sm:$0xf] %vm453_vm3, %v1232_v19 }
0x15c5   : > { %v1240_v20 = vpop.permute.xlu1 %1239  ;;  %v1388_v22 = vpop.permute.xlu0 %1387 }
0x15c6   : > { %1242 = vst.msk [vmem:[%s2166_s9 + $0x8] sm:$0xf] %vm453_vm3, %v1240_v20  ;;  %1390 = vst.msk [vmem:[%s2161_s5 + $0x18] sm:$0xf] %vm453_vm3, %v1388_v22 }
0x15c9   : > { %v1396_v23 = vpop.permute.xlu1 %1395 }
0x15ca   : > { %1398 = vst.msk [vmem:[%s2166_s9 + $0x4] sm:$0xf] %vm453_vm3, %v1396_v23 }
0x15cd   : > { %v1562_v24 = vpop.permute.xlu1 %1561 }
0x15ce   : > { %1564 = vst.msk [vmem:[#allocation3] sm:$0xff] %vm289_vm2, %v1562_v24 }
0x161e   : > { %v1557_v25 = vpop.permute.xlu0 %1556 }
0x161f   : > { %1559 = vst.msk [vmem:[#allocation2] sm:$0xff] %vm289_vm2, %v1557_v25 }
0x1622   : > { %v1544_v26 = vpop.permute.xlu0 %1543 }
0x1623   : > { %1546 = vst.msk [vmem:[%s2161_s5 + $0x1c] sm:$0xf] %vm453_vm3, %v1544_v26 }
0x1624   : > { %v1552_v27 = vpop.permute.xlu1 %1551 }
0x1625   : > { %1554 = vst.msk [vmem:[%s2166_s9] sm:$0xf] %vm453_vm3, %v1552_v27 }
0x1626   : > { %v1567_v28 = vpop.permute.xlu0 %1566 }
0x1627   : > { %1569 = vst.msk [vmem:[#allocation4] sm:$0xff] %vm289_vm2, %v1567_v28 }
0x1628   : > { %v1572_v29 = vpop.permute.xlu1 %1571 }
0x1629   : > { %1574 = vst.msk [vmem:[#allocation5] sm:$0xff] %vm289_vm2, %v1572_v29 }
0x162a PF: > { %s15_s15 = sadd.s32 1, %s2107_s15  }
0x162b   : > { %p12_p6 = scmp.ge.s32.totalorder %s15_s15, 4  }
0x162d   :  { %14 = sbr.rel (!%p12_p6) target bundleno = 1 (0x1), region = 82 }

// kernel: cnn_blstm_forward.7
= control target key start
LH: loop header
LB: loop body
LE: loop exit
PB: predicated region body
PF: predicated region fallthrough
CT: control target
= control target key end

     0   :  { %s2317_s18 = smov 0   ;;  %s2775_s0 = inlined_call_operand.vmem [shape: f32[2,128,128], index: 0, kind: input, shape index: {}, may-alias: {0,1}]   ;;  %s2776_s1 = inlined_call_operand.vmem [shape: f32[2,128,128], index: 1, kind: input, shape index: {}, may-alias: {0,1}]   ;;  %s2777_s2 = inlined_call_operand.vmem [shape: bf16[2,32,128], index: 2, kind: input, shape index: {}]   ;;  %s2778_s3 = inlined_call_operand.vmem [shape: f32[2,1,32], index: 3, kind: input, shape index: {}]   ;;  %s2779_s4 = inlined_call_operand.vmem [shape: f32[16,8], index: 4, kind: output, shape index: {0}]   ;;  %s2780_s5 = inlined_call_operand.vmem [shape: f32[16,8], index: 5, kind: output, shape index: {1}]  }
   0x1 LB: > { %s1886_s19 = sadd.s32 4294967295, %s2279_s18   ;;  %p1890_p0 = scmp.ge.s32.totalorder %s2279_s18, 1  ;;  %s2279_s18 = sphi %s2317_s18, %s16_s18  }
   0x2   : > { %p209_p1 = scmp.lt.s32.totalorder %s2279_s18, 3 }
   0x4   : > { %p210_p2 = pnand %p1890_p0, %p209_p1 }
   0x5   : > { %s1891_s20 = sshll.u32 (!%p210_p2), %s1886_s19, 3  ;;  %s254_s21 = ssub.s32 (!%p210_p2), 1, %s1886_s19 }
   0x6   : > { %213 = sbr.rel (%p210_p2) target bundleno = 5829 (0x16c5), region = 36  ;;  %p249_p3 = scmp.lt.s32.totalorder (!%p210_p2), %s1891_s20, 15 }
   0x7   : > { %s1893_s22 = sshll.u32 (!%p210_p2), %s254_s21, 3  ;;  %p263_p5 = scmp.lt.s32.totalorder (!%p210_p2), %s1886_s19, 1 }
   0x8   : > { %p256_p4 = scmp.lt.s32.totalorder (!%p210_p2), %s1893_s22, 15  ;;  %p268_p6 = scmp.lt.s32.totalorder (!%p210_p2), %s254_s21, 1 }
   0x9   : > { %p1897_p7 = scmp.ne.s32.totalorder (!%p210_p2), %s1886_s19, 0 }
   0xd   : > { %s2782_s20 = smov (!%p249_p3, %s1891_s20), 15  ;;  %s2784_s22 = smov (!%p256_p4, %s1893_s22), 15 }
   0xe   : > { %s1892_s23 = sshll.u32 %s2782_s20, 3  ;;  %s1894_s27 = sshll.u32 %s2784_s22, 3  ;;  %vm278_vm0 = vcmask (!%p1897_p7), 261120   ;;  %v2281_v0 = vmov (!%p1897_p7), 0.0  }
   0xf   : > { %s2328_s26 = scalar_lea.vmem %s2775_s0, %s1892_s23  ;;  %s2333_s30 = scalar_lea.vmem %s2776_s1, %s1894_s27  ;;  %279 = vst.msk [vmem:[#allocation2] sm:$0xff] (!%p1897_p7), %vm278_vm0, %v2281_v0  ;;  %280 = vst.msk [vmem:[#allocation3] sm:$0xff] (!%p1897_p7), %vm278_vm0, %v2281_v0 }
  0x10   : > { %s264_s6 = scalar_select %p263_p5, %s1886_s19, 1 }
  0x11   : > { %s2786_s21 = smov (!%p268_p6, %s254_s21), 1  ;;  %277 = sbr.rel (%p1897_p7) target bundleno = 24 (0x18), region = 40 }
  0x12   : > { %s1895_s7 = sshll.u32 %s264_s6, 3  ;;  %s1896_s11 = sshll.u32 %s2786_s21, 3  ;;  %281 = vst.msk [vmem:[#allocation4] sm:$0xff] (!%p1897_p7), %vm278_vm0, %v2281_v0  ;;  %282 = vst.msk [vmem:[#allocation5] sm:$0xff] (!%p1897_p7), %vm278_vm0, %v2281_v0 }
  0x13   : > { %s2338_s10 = scalar_lea.vmem %s2779_s4, %s1895_s7  ;;  %s2343_s14 = scalar_lea.vmem %s2780_s5, %s1896_s11 }
  0x18 PF: > { %v2348_v1 = vld [vmem:[%s2777_s2 + $0x10] sm:$0xff]   ;;  %v2282_v2 = vmov 0.0   ;;  %v2355_v3 = vld [vmem:[%s2777_s2] sm:$0xff]   ;;  %v2361_v4 = vld [vmem:[%s2777_s2 + $0x18] sm:$0xff]   ;;  %vm2283_vm1 = vmmov 0   ;;  %s2284_s24 = smov 32  }
  0x19   : > { %2007 = vmatprep.subr.bf16.mxu1 %v2282_v2  ;;  %1999 = vmatprep.subr.bf16.mxu0 %v2282_v2  ;;  %v294_v5 = vld [vmem:[#allocation4] sm:$0xff]  ;;  %v2371_v6 = vld [vmem:[%s2777_s2 + $0x8] sm:$0xff]   ;;  %v292_v7 = vld [vmem:[#allocation2] sm:$0xff]  ;;  %vm310_vm2 = vcmask 261120   ;;  %s2285_s25 = smov 64   ;;  %vm1670_vm3 = vcmask 1041409  }
  0x1a   : > { %2008 = vmatpush3.bf16.msra.mxu1 %v2348_v1  ;;  %2011 = vmatprep.mubr.msk.bf16.mxu1 %vm2283_vm1, %v2282_v2  ;;  %v295_v8 = vld [vmem:[#allocation5] sm:$0xff]  ;;  %v354_v9 = vpack.c.bf16 %v294_v5, %v294_v5  ;;  %v296_v10 = vpack.c.bf16 %v292_v7, %v292_v7  ;;  %v297_v12 = vld [vmem:[%s2328_s26] sm:$0xff]  ;;  %v293_v25 = vld [vmem:[#allocation3] sm:$0xff]  ;;  %vm1672_vm4 = vcmask 1042434   ;;  %vm1674_vm5 = vcmask 1043459  }
  0x1b   : > { %2009 = vmatprep.subr.bf16.mxu1 %v2282_v2  ;;  %2000 = vmatpush3.bf16.msra.mxu0 %v2355_v3  ;;  %v1905_v11 = vld [vmem:[%s2333_s30 + $0xb8] sm:$0xff]  ;;  %v1912_v56 = vld [vmem:[%s2333_s30 + $0xb0] sm:$0xff]  ;;  %v479_v61 = vld [vmem:[%s2328_s26 + $0x8] sm:$0xff]  ;;  %vm1676_vm6 = vcmask 1044484   ;;  %vm1678_vm7 = vcmask 1045509   ;;  %vm1680_vm8 = vcmask 1046534  }
  0x1c   : > { %2001 = vmatprep.subr.bf16.mxu0 %v2282_v2  ;;  %2003 = vmatprep.mubr.msk.bf16.mxu0 %vm2283_vm1, %v2282_v2  ;;  %vm1682_vm9 = vcmask 1047559   ;;  %vm1685_vm10 = vcmask 64512  }
  0x1d   : > { %447 = vrot.lane.b32.xlu1 %v295_v8, %s2284_s24 }
  0x1e   : > { %2010 = vmatpush3.bf16.msra.mxu1 %v2361_v4 }
  0x1f   : > { %2002 = vmatpush3.bf16.msra.mxu0 %v2371_v6  ;;  %2023 = vmatprep.subr.bf16.mxu1 %v2282_v2 }
  0x20   : > { %2015 = vmatprep.subr.bf16.mxu0 %v2282_v2 }
  0x21   : > { %2012 = vmatmul.mubr.msk.bf16.vlgmr.msra.gmra.mrb[0].mxu1 %vm310_vm2, %v354_v9 }
  0x22   : > { %2004 = vmatmul.mubr.msk.bf16.vlgmr.msra.gmra.mrb[0].mxu0 %vm310_vm2, %v296_v10  ;;  %2024 = vmatpush3.bf16.msra.mxu1 %v2348_v1 }
  0x23   : > { %2025 = vmatprep.subr.bf16.mxu1 %v2282_v2  ;;  %2016 = vmatpush3.bf16.msra.mxu0 %v2355_v3 }
  0x24   : > { %2027 = vmatprep.mubr.msk.bf16.mxu1 %vm2283_vm1, %v2282_v2  ;;  %2017 = vmatprep.subr.bf16.mxu0 %v2282_v2 }
  0x25   : > { %2019 = vmatprep.mubr.msk.bf16.mxu0 %vm2283_vm1, %v2282_v2 }
  0x26   : > { %2026 = vmatpush3.bf16.msra.mxu1 %v2361_v4 }
  0x27   : > { %2018 = vmatpush3.bf16.msra.mxu0 %v2371_v6  ;;  %2039 = vmatprep.subr.bf16.mxu1 %v2282_v2 }
  0x28   : > { %2031 = vmatprep.subr.bf16.mxu0 %v2282_v2 }
  0x8f   : > { %v448_v38 = vpop.permute.xlu1 %447 }
  0xf4   : > { %v405_v13 = vpop.f32.mrb[0].mxu1 }
  0xf5   : > { %v406_v14 = vadd.f32 %v1905_v11, %v405_v13  ;;  %v2013_v15 = vpop.f32.mrb[1].mxu1  ;;  %v348_v16 = vpop.f32.mrb[0].mxu0 }
  0xf6   : > { %v408_v17 = vpop.f32.mrb[2].mxu1  ;;  %v349_v18 = vadd.f32 %v348_v16, %v297_v12  ;;  %v2005_v19 = vpop.f32.mrb[1].mxu0 }
  0xf7   : > { %2145 = vtanh.f32 %v406_v14  ;;  %v2014_v20 = vpop.f32.mrb[3].mxu1  ;;  %v351_v21 = vpop.f32.mrb[2].mxu0  ;;  %v1910_v26 = vmul.f32 -1.442695, %v406_v14 }
  0xf8   : > { %v2006_v22 = vpop.f32.mrb[3].mxu0  ;;  %2147 = vtanh.f32 %v349_v18  ;;  %v1909_v27 = vmul.f32 -1.442695, %v349_v18 }
  0xf9   : > { %2149 = vpow2.f32 %v1910_v26 }
  0xfa   : > { %2151 = vpow2.f32 %v1909_v27 }
 0x101   : > { %v2146_v23 = vpop.eup %2145 }
 0x102   : > { %452 = vrot.lane.b32.xlu0 %v2146_v23, %s2284_s24  ;;  %v2148_v24 = vpop.eup %2147 }
 0x103   : > { %v2150_v28 = vpop.eup %2149 }
 0x104   : > { %v442_v29 = vadd.f32 1.0, %v2150_v28  ;;  %v2152_v30 = vpop.eup %2151 }
 0x105   : > { %v414_v31 = vadd.f32 1.0, %v2152_v30 }
 0x106   : > { %424 = vrot.lane.b32.xlu0 %v2148_v24, %s2284_s24  ;;  %2153 = vrcp.f32 %v442_v29 }
 0x107   : > { %2155 = vrcp.f32 %v414_v31 }
 0x10a   : > { %419 = vrot.lane.b32.xlu0 %v293_v25, %s2284_s24 }
 0x110   : > { %v2154_v32 = vpop.eup %2153 }
 0x111   : > { %v2156_v35 = vpop.eup %2155  ;;  %v450_v39 = vmul.f32 %v2154_v32, %v448_v38 }
 0x174   : > { %v453_v33 = vpop.permute.xlu0 %452 }
 0x175   : > { %v455_v34 = vmul.f32 %v2154_v32, %v453_v33 }
 0x177   : > { %457 = vrot.lane.b32.xlu1 %v455_v34, %s2284_s24 }
 0x178   : > { %v425_v36 = vpop.permute.xlu0 %424 }
 0x179   : > { %v427_v37 = vmul.f32 %v2156_v35, %v425_v36 }
 0x17b   : > { %429 = vrot.lane.b32.xlu1 %v427_v37, %s2284_s24 }
 0x17c   : > { %v420_v40 = vpop.permute.xlu0 %419 }
 0x17d   : > { %v422_v43 = vmul.f32 %v2156_v35, %v420_v40 }
 0x1e9   : > { %v458_v41 = vpop.permute.xlu1 %457 }
 0x1ea   : > { %v2401_v42 = vadd.f32 %v458_v41, %v450_v39  ;;  %v1917_v39 = vld [vmem:[%s2333_s30 + $0xa8] sm:$0xff] }
 0x1ec   : > { %2157 = vtanh.f32 %v2401_v42 }
 0x1ed   : > { %v430_v44 = vpop.permute.xlu1 %429 }
 0x1ee   : > { %v2404_v45 = vadd.f32 %v430_v44, %v422_v43  ;;  %v635_v44 = vld [vmem:[%s2328_s26 + $0x10] sm:$0xff] }
 0x1f0   : > { %2159 = vtanh.f32 %v2404_v45 }
 0x1f6   : > { %v2158_v46 = vpop.eup %2157 }
 0x1f7   : > { %463 = vrot.lane.b32.xlu0 %v2158_v46, %s2284_s24 }
 0x1fa   : > { %v2160_v47 = vpop.eup %2159 }
 0x1fb   : > { %435 = vrot.lane.b32.xlu1 %v2160_v47, %s2284_s24 }
 0x269   : > { %v464_v48 = vpop.permute.xlu0 %463 }
 0x26a   : > { %v2409_v49 = vmul.f32 %v2154_v32, %v464_v48 }
 0x26c   : > { %v526_v50 = vpack.c.bf16 %v2409_v49, %v2409_v49 }
 0x26d   : > { %v436_v51 = vpop.permute.xlu1 %435 }
 0x26e   : > { %v2413_v52 = vmul.f32 %v2156_v35, %v436_v51  ;;  %529 = vrot.lane.b32.xlu0 %v526_v50, %s2285_s25 }
 0x270   : > { %v478_v53 = vpack.c.bf16 %v2413_v52, %v2413_v52 }
 0x272   : > { %481 = vrot.lane.b32.xlu1 %v478_v53, %s2285_s25 }
 0x2e0   : > { %v530_v54 = vpop.permute.xlu0 %529 }
 0x2e1   : > { %2028 = vmatmul.mubr.msk.bf16.vlgmr.msra.gmra.mrb[4].mxu1 %vm310_vm2, %v530_v54 }
 0x2e2   : > { %2040 = vmatpush3.bf16.msra.mxu1 %v2348_v1  ;;  %2043 = vmatprep.mubr.msk.bf16.mxu1 %vm2283_vm1, %v2282_v2 }
 0x2e3   : > { %2041 = vmatprep.subr.bf16.mxu1 %v2282_v2 }
 0x2e4   : > { %v482_v55 = vpop.permute.xlu1 %481 }
 0x2e5   : > { %2020 = vmatmul.mubr.msk.bf16.vlgmr.msra.gmra.mrb[4].mxu0 %vm310_vm2, %v482_v55 }
 0x2e6   : > { %2042 = vmatpush3.bf16.msra.mxu1 %v2361_v4  ;;  %2032 = vmatpush3.bf16.msra.mxu0 %v2355_v3 }
 0x2e7   : > { %2033 = vmatprep.subr.bf16.mxu0 %v2282_v2  ;;  %2035 = vmatprep.mubr.msk.bf16.mxu0 %vm2283_vm1, %v2282_v2 }
 0x2e8   : > { %2055 = vmatprep.subr.bf16.mxu1 %v2282_v2 }
 0x2ea   : > { %2034 = vmatpush3.bf16.msra.mxu0 %v2371_v6 }
 0x2eb   : > { %2047 = vmatprep.subr.bf16.mxu0 %v2282_v2 }
 0x3b4   : > { %v568_v57 = vpop.f32.mrb[4].mxu1 }
 0x3b5   : > { %v569_v58 = vadd.f32 %v1912_v56, %v568_v57  ;;  %v2029_v59 = vpop.f32.mrb[5].mxu1 }
 0x3b6   : > { %v571_v60 = vpop.f32.mrb[6].mxu1 }
 0x3b7   : > { %2161 = vtanh.f32 %v569_v58  ;;  %v2030_v62 = vpop.f32.mrb[7].mxu1  ;;  %v1915_v11 = vmul.f32 -1.442695, %v569_v58 }
 0x3b8   : > { %v520_v63 = vpop.f32.mrb[4].mxu0 }
 0x3b9   : > { %v521_v0 = vadd.f32 %v520_v63, %v479_v61  ;;  %v2021_v5 = vpop.f32.mrb[5].mxu0 }
 0x3ba   : > { %v523_v7 = vpop.f32.mrb[6].mxu0 }
 0x3bb   : > { %2163 = vtanh.f32 %v521_v0  ;;  %v2022_v8 = vpop.f32.mrb[7].mxu0  ;;  %v1914_v12 = vmul.f32 -1.442695, %v521_v0 }
 0x3bc   : > { %2165 = vpow2.f32 %v1915_v11 }
 0x3bd   : > { %2167 = vpow2.f32 %v1914_v12 }
 0x3c1   : > { %v2162_v9 = vpop.eup %2161 }
 0x3c2   : > { %607 = vrot.lane.b32.xlu0 %v2162_v9, %s2284_s24 }
 0x3c5   : > { %v2164_v10 = vpop.eup %2163 }
 0x3c6   : > { %583 = vrot.lane.b32.xlu1 %v2164_v10, %s2284_s24  ;;  %v2166_v13 = vpop.eup %2165 }
 0x3c7   : > { %v601_v14 = vadd.f32 1.0, %v2166_v13  ;;  %v2168_v15 = vpop.eup %2167 }
 0x3c8   : > { %v577_v16 = vadd.f32 1.0, %v2168_v15 }
 0x3c9   : > { %2169 = vrcp.f32 %v601_v14 }
 0x3ca   : > { %2171 = vrcp.f32 %v577_v16 }
 0x3d3   : > { %v2170_v17 = vpop.eup %2169 }
 0x3d4   : > { %v2172_v20 = vpop.eup %2171  ;;  %v605_v23 = vmul.f32 %v2170_v17, %v2401_v42 }
 0x3d5   : > { %v581_v26 = vmul.f32 %v2172_v20, %v2404_v45 }
 0x434   : > { %v608_v18 = vpop.permute.xlu0 %607 }
 0x435   : > { %v610_v19 = vmul.f32 %v2170_v17, %v608_v18 }
 0x437   : > { %612 = vrot.lane.b32.xlu0 %v610_v19, %s2284_s24 }
 0x438   : > { %v584_v21 = vpop.permute.xlu1 %583 }
 0x439   : > { %v586_v22 = vmul.f32 %v2172_v20, %v584_v21 }
 0x43b   : > { %588 = vrot.lane.b32.xlu1 %v586_v22, %s2284_s24 }
 0x4a9   : > { %v613_v24 = vpop.permute.xlu0 %612 }
 0x4aa   : > { %v2440_v25 = vadd.f32 %v613_v24, %v605_v23  ;;  %v1922_v24 = vld [vmem:[%s2333_s30 + $0xa0] sm:$0xff] }
 0x4ac   : > { %2173 = vtanh.f32 %v2440_v25 }
 0x4ad   : > { %v589_v27 = vpop.permute.xlu1 %588 }
 0x4ae   : > { %v2444_v28 = vadd.f32 %v589_v27, %v581_v26 }
 0x4b0   : > { %2175 = vtanh.f32 %v2444_v28 }
 0x4b6   : > { %v2174_v29 = vpop.eup %2173 }
 0x4b7   : > { %618 = vrot.lane.b32.xlu0 %v2174_v29, %s2284_s24  ;;  %v791_v29 = vld [vmem:[%s2328_s26 + $0x18] sm:$0xff] }
 0x4ba   : > { %v2176_v30 = vpop.eup %2175 }
 0x4bb   : > { %594 = vrot.lane.b32.xlu1 %v2176_v30, %s2284_s24 }
 0x529   : > { %v619_v31 = vpop.permute.xlu0 %618 }
 0x52a   : > { %v2449_v32 = vmul.f32 %v2170_v17, %v619_v31 }
 0x52c   : > { %v682_v33 = vpack.c.bf16 %v2449_v32, %v2449_v32 }
 0x52d   : > { %v595_v34 = vpop.permute.xlu1 %594 }
 0x52e   : > { %v2453_v35 = vmul.f32 %v2172_v20, %v595_v34  ;;  %685 = vrot.lane.b32.xlu0 %v682_v33, %s2285_s25 }
 0x530   : > { %v634_v36 = vpack.c.bf16 %v2453_v35, %v2453_v35 }
 0x532   : > { %637 = vrot.lane.b32.xlu1 %v634_v36, %s2285_s25 }
 0x5a0   : > { %v686_v37 = vpop.permute.xlu0 %685 }
 0x5a1   : > { %2044 = vmatmul.mubr.msk.bf16.vlgmr.msra.gmra.mrb[8].mxu1 %vm310_vm2, %v686_v37 }
 0x5a2   : > { %2056 = vmatpush3.bf16.msra.mxu1 %v2348_v1  ;;  %2059 = vmatprep.mubr.msk.bf16.mxu1 %vm2283_vm1, %v2282_v2 }
 0x5a3   : > { %2057 = vmatprep.subr.bf16.mxu1 %v2282_v2 }
 0x5a4   : > { %v638_v38 = vpop.permute.xlu1 %637 }
 0x5a5   : > { %2036 = vmatmul.mubr.msk.bf16.vlgmr.msra.gmra.mrb[8].mxu0 %vm310_vm2, %v638_v38 }
 0x5a6   : > { %2058 = vmatpush3.bf16.msra.mxu1 %v2361_v4  ;;  %2048 = vmatpush3.bf16.msra.mxu0 %v2355_v3 }
 0x5a7   : > { %2049 = vmatprep.subr.bf16.mxu0 %v2282_v2  ;;  %2051 = vmatprep.mubr.msk.bf16.mxu0 %vm2283_vm1, %v2282_v2 }
 0x5a8   : > { %2071 = vmatprep.subr.bf16.mxu1 %v2282_v2 }
 0x5aa   : > { %2050 = vmatpush3.bf16.msra.mxu0 %v2371_v6 }
 0x5ab   : > { %2063 = vmatprep.subr.bf16.mxu0 %v2282_v2 }
 0x674   : > { %v724_v40 = vpop.f32.mrb[8].mxu1 }
 0x675   : > { %v725_v41 = vadd.f32 %v1917_v39, %v724_v40  ;;  %v2045_v42 = vpop.f32.mrb[9].mxu1 }
 0x676   : > { %v727_v43 = vpop.f32.mrb[10].mxu1 }
 0x677   : > { %2177 = vtanh.f32 %v725_v41  ;;  %v2046_v45 = vpop.f32.mrb[11].mxu1  ;;  %v1920_v55 = vmul.f32 -1.442695, %v725_v41 }
 0x678   : > { %v676_v46 = vpop.f32.mrb[8].mxu0 }
 0x679   : > { %v677_v47 = vadd.f32 %v676_v46, %v635_v44  ;;  %v2037_v48 = vpop.f32.mrb[9].mxu0 }
 0x67a   : > { %v679_v50 = vpop.f32.mrb[10].mxu0 }
 0x67b   : > { %2179 = vtanh.f32 %v677_v47  ;;  %v2038_v51 = vpop.f32.mrb[11].mxu0  ;;  %v1919_v56 = vmul.f32 -1.442695, %v677_v47 }
 0x67c   : > { %2181 = vpow2.f32 %v1920_v55 }
 0x67d   : > { %2183 = vpow2.f32 %v1919_v56 }
 0x681   : > { %v2178_v53 = vpop.eup %2177 }
 0x682   : > { %763 = vrot.lane.b32.xlu0 %v2178_v53, %s2284_s24 }
 0x685   : > { %v2180_v54 = vpop.eup %2179 }
 0x686   : > { %739 = vrot.lane.b32.xlu1 %v2180_v54, %s2284_s24  ;;  %v2182_v57 = vpop.eup %2181 }
 0x687   : > { %v757_v58 = vadd.f32 1.0, %v2182_v57  ;;  %v2184_v59 = vpop.eup %2183 }
 0x688   : > { %v733_v60 = vadd.f32 1.0, %v2184_v59 }
 0x689   : > { %2185 = vrcp.f32 %v757_v58 }
 0x68a   : > { %2187 = vrcp.f32 %v733_v60 }
 0x693   : > { %v2186_v61 = vpop.eup %2185 }
 0x694   : > { %v2188_v0 = vpop.eup %2187  ;;  %v761_v8 = vmul.f32 %v2186_v61, %v2440_v25 }
 0x695   : > { %v737_v11 = vmul.f32 %v2188_v0, %v2444_v28 }
 0x6f4   : > { %v764_v62 = vpop.permute.xlu0 %763 }
 0x6f5   : > { %v766_v63 = vmul.f32 %v2186_v61, %v764_v62 }
 0x6f7   : > { %768 = vrot.lane.b32.xlu0 %v766_v63, %s2284_s24 }
 0x6f8   : > { %v740_v5 = vpop.permute.xlu1 %739 }
 0x6f9   : > { %v742_v7 = vmul.f32 %v2188_v0, %v740_v5 }
 0x6fb   : > { %744 = vrot.lane.b32.xlu1 %v742_v7, %s2284_s24 }
 0x769   : > { %v769_v9 = vpop.permute.xlu0 %768 }
 0x76a   : > { %v2480_v10 = vadd.f32 %v769_v9, %v761_v8 }
 0x76c   : > { %2189 = vtanh.f32 %v2480_v10 }
 0x76d   : > { %v745_v12 = vpop.permute.xlu1 %744 }
 0x76e   : > { %v2484_v13 = vadd.f32 %v745_v12, %v737_v11  ;;  %v1927_v11 = vld [vmem:[%s2333_s30 + $0x98] sm:$0xff] }
 0x770   : > { %2191 = vtanh.f32 %v2484_v13 }
 0x776   : > { %v2190_v14 = vpop.eup %2189 }
 0x777   : > { %774 = vrot.lane.b32.xlu0 %v2190_v14, %s2284_s24 }
 0x77a   : > { %v2192_v15 = vpop.eup %2191 }
 0x77b   : > { %750 = vrot.lane.b32.xlu1 %v2192_v15, %s2284_s24 }
 0x7e9   : > { %v775_v16 = vpop.permute.xlu0 %774 }
 0x7ea   : > { %v2489_v17 = vmul.f32 %v2186_v61, %v775_v16  ;;  %v947_v16 = vld [vmem:[%s2328_s26 + $0x20] sm:$0xff] }
 0x7ec   : > { %v838_v18 = vpack.c.bf16 %v2489_v17, %v2489_v17 }
 0x7ed   : > { %v751_v19 = vpop.permute.xlu1 %750 }
 0x7ee   : > { %v2493_v20 = vmul.f32 %v2188_v0, %v751_v19  ;;  %841 = vrot.lane.b32.xlu0 %v838_v18, %s2285_s25 }
 0x7f0   : > { %v790_v21 = vpack.c.bf16 %v2493_v20, %v2493_v20 }
 0x7f2   : > { %793 = vrot.lane.b32.xlu1 %v790_v21, %s2285_s25 }
 0x860   : > { %v842_v22 = vpop.permute.xlu0 %841 }
 0x861   : > { %2060 = vmatmul.mubr.msk.bf16.vlgmr.msra.gmra.mrb[12].mxu1 %vm310_vm2, %v842_v22 }
 0x862   : > { %2072 = vmatpush3.bf16.msra.mxu1 %v2348_v1  ;;  %2075 = vmatprep.mubr.msk.bf16.mxu1 %vm2283_vm1, %v2282_v2 }
 0x863   : > { %2073 = vmatprep.subr.bf16.mxu1 %v2282_v2 }
 0x864   : > { %v794_v23 = vpop.permute.xlu1 %793 }
 0x865   : > { %2052 = vmatmul.mubr.msk.bf16.vlgmr.msra.gmra.mrb[12].mxu0 %vm310_vm2, %v794_v23 }
 0x866   : > { %2074 = vmatpush3.bf16.msra.mxu1 %v2361_v4  ;;  %2064 = vmatpush3.bf16.msra.mxu0 %v2355_v3 }
 0x867   : > { %2065 = vmatprep.subr.bf16.mxu0 %v2282_v2  ;;  %2067 = vmatprep.mubr.msk.bf16.mxu0 %vm2283_vm1, %v2282_v2 }
 0x868   : > { %2087 = vmatprep.subr.bf16.mxu1 %v2282_v2 }
 0x86a   : > { %2066 = vmatpush3.bf16.msra.mxu0 %v2371_v6 }
 0x86b   : > { %2079 = vmatprep.subr.bf16.mxu0 %v2282_v2 }
 0x934   : > { %v880_v25 = vpop.f32.mrb[12].mxu1 }
 0x935   : > { %v881_v26 = vadd.f32 %v1922_v24, %v880_v25  ;;  %v2061_v27 = vpop.f32.mrb[13].mxu1 }
 0x936   : > { %v883_v28 = vpop.f32.mrb[14].mxu1 }
 0x937   : > { %2193 = vtanh.f32 %v881_v26  ;;  %v2062_v30 = vpop.f32.mrb[15].mxu1  ;;  %v1925_v40 = vmul.f32 -1.442695, %v881_v26 }
 0x938   : > { %v832_v31 = vpop.f32.mrb[12].mxu0 }
 0x939   : > { %v833_v33 = vadd.f32 %v832_v31, %v791_v29  ;;  %v2053_v34 = vpop.f32.mrb[13].mxu0 }
 0x93a   : > { %v835_v36 = vpop.f32.mrb[14].mxu0 }
 0x93b   : > { %2195 = vtanh.f32 %v833_v33  ;;  %v2054_v37 = vpop.f32.mrb[15].mxu0  ;;  %v1924_v41 = vmul.f32 -1.442695, %v833_v33 }
 0x93c   : > { %2197 = vpow2.f32 %v1925_v40 }
 0x93d   : > { %2199 = vpow2.f32 %v1924_v41 }
 0x941   : > { %v2194_v38 = vpop.eup %2193 }
 0x942   : > { %919 = vrot.lane.b32.xlu0 %v2194_v38, %s2284_s24 }
 0x945   : > { %v2196_v39 = vpop.eup %2195 }
 0x946   : > { %895 = vrot.lane.b32.xlu1 %v2196_v39, %s2284_s24  ;;  %v2198_v42 = vpop.eup %2197 }
 0x947   : > { %v913_v43 = vadd.f32 1.0, %v2198_v42  ;;  %v2200_v44 = vpop.eup %2199 }
 0x948   : > { %v889_v45 = vadd.f32 1.0, %v2200_v44 }
 0x949   : > { %2201 = vrcp.f32 %v913_v43 }
 0x94a   : > { %2203 = vrcp.f32 %v889_v45 }
 0x953   : > { %v2202_v46 = vpop.eup %2201 }
 0x954   : > { %v2204_v50 = vpop.eup %2203  ;;  %v917_v54 = vmul.f32 %v2202_v46, %v2480_v10 }
 0x955   : > { %v893_v57 = vmul.f32 %v2204_v50, %v2484_v13 }
 0x9b4   : > { %v920_v47 = vpop.permute.xlu0 %919 }
 0x9b5   : > { %v922_v48 = vmul.f32 %v2202_v46, %v920_v47 }
 0x9b7   : > { %924 = vrot.lane.b32.xlu0 %v922_v48, %s2284_s24 }
 0x9b8   : > { %v896_v51 = vpop.permute.xlu1 %895 }
 0x9b9   : > { %v898_v53 = vmul.f32 %v2204_v50, %v896_v51 }
 0x9bb   : > { %900 = vrot.lane.b32.xlu1 %v898_v53, %s2284_s24 }
 0xa29   : > { %v925_v55 = vpop.permute.xlu0 %924 }
 0xa2a   : > { %v2520_v56 = vadd.f32 %v925_v55, %v917_v54 }
 0xa2c   : > { %2205 = vtanh.f32 %v2520_v56 }
 0xa2d   : > { %v901_v58 = vpop.permute.xlu1 %900 }
 0xa2e   : > { %v2524_v59 = vadd.f32 %v901_v58, %v893_v57 }
 0xa30   : > { %2207 = vtanh.f32 %v2524_v59 }
 0xa36   : > { %v2206_v60 = vpop.eup %2205 }
 0xa37   : > { %930 = vrot.lane.b32.xlu0 %v2206_v60, %s2284_s24 }
 0xa3a   : > { %v2208_v61 = vpop.eup %2207 }
 0xa3b   : > { %906 = vrot.lane.b32.xlu1 %v2208_v61, %s2284_s24 }
 0xaa9   : > { %v931_v62 = vpop.permute.xlu0 %930 }
 0xaaa   : > { %v2529_v63 = vmul.f32 %v2202_v46, %v931_v62 }
 0xaac   : > { %v994_v0 = vpack.c.bf16 %v2529_v63, %v2529_v63 }
 0xaad   : > { %v907_v5 = vpop.permute.xlu1 %906 }
 0xaae   : > { %v2533_v7 = vmul.f32 %v2204_v50, %v907_v5  ;;  %997 = vrot.lane.b32.xlu0 %v994_v0, %s2285_s25  ;;  %v1103_v5 = vld [vmem:[%s2328_s26 + $0x28] sm:$0xff] }
 0xab0   : > { %v946_v8 = vpack.c.bf16 %v2533_v7, %v2533_v7 }
 0xab2   : > { %949 = vrot.lane.b32.xlu1 %v946_v8, %s2285_s25 }
 0xb20   : > { %v998_v9 = vpop.permute.xlu0 %997 }
 0xb21   : > { %2076 = vmatmul.mubr.msk.bf16.vlgmr.msra.gmra.mrb[16].mxu1 %vm310_vm2, %v998_v9 }
 0xb22   : > { %2088 = vmatpush3.bf16.msra.mxu1 %v2348_v1  ;;  %2091 = vmatprep.mubr.msk.bf16.mxu1 %vm2283_vm1, %v2282_v2 }
 0xb23   : > { %2089 = vmatprep.subr.bf16.mxu1 %v2282_v2 }
 0xb24   : > { %v950_v10 = vpop.permute.xlu1 %949 }
 0xb25   : > { %2068 = vmatmul.mubr.msk.bf16.vlgmr.msra.gmra.mrb[16].mxu0 %vm310_vm2, %v950_v10 }
 0xb26   : > { %2090 = vmatpush3.bf16.msra.mxu1 %v2361_v4  ;;  %2080 = vmatpush3.bf16.msra.mxu0 %v2355_v3 }
 0xb27   : > { %2081 = vmatprep.subr.bf16.mxu0 %v2282_v2  ;;  %2083 = vmatprep.mubr.msk.bf16.mxu0 %vm2283_vm1, %v2282_v2 }
 0xb28   : > { %2103 = vmatprep.subr.bf16.mxu1 %v2282_v2 }
 0xb2a   : > { %2082 = vmatpush3.bf16.msra.mxu0 %v2371_v6 }
 0xb2b   : > { %2095 = vmatprep.subr.bf16.mxu0 %v2282_v2 }
 0xbf4   : > { %v1036_v12 = vpop.f32.mrb[16].mxu1 }
 0xbf5   : > { %v1037_v13 = vadd.f32 %v1927_v11, %v1036_v12  ;;  %v2077_v14 = vpop.f32.mrb[17].mxu1 }
 0xbf6   : > { %v1039_v15 = vpop.f32.mrb[18].mxu1 }
 0xbf7   : > { %2209 = vtanh.f32 %v1037_v13  ;;  %v2078_v18 = vpop.f32.mrb[19].mxu1  ;;  %v1930_v27 = vmul.f32 -1.442695, %v1037_v13 }
 0xbf8   : > { %v988_v19 = vpop.f32.mrb[16].mxu0 }
 0xbf9   : > { %v989_v21 = vadd.f32 %v988_v19, %v947_v16  ;;  %v2069_v22 = vpop.f32.mrb[17].mxu0 }
 0xbfa   : > { %v991_v23 = vpop.f32.mrb[18].mxu0 }
 0xbfb   : > { %2211 = vtanh.f32 %v989_v21  ;;  %v2070_v24 = vpop.f32.mrb[19].mxu0  ;;  %v1929_v28 = vmul.f32 -1.442695, %v989_v21 }
 0xbfc   : > { %2213 = vpow2.f32 %v1930_v27 }
 0xbfd   : > { %2215 = vpow2.f32 %v1929_v28 }
 0xc01   : > { %v2210_v25 = vpop.eup %2209 }
 0xc02   : > { %1075 = vrot.lane.b32.xlu0 %v2210_v25, %s2284_s24 }
 0xc05   : > { %v2212_v26 = vpop.eup %2211 }
 0xc06   : > { %1051 = vrot.lane.b32.xlu1 %v2212_v26, %s2284_s24  ;;  %v2214_v29 = vpop.eup %2213 }
 0xc07   : > { %v1069_v30 = vadd.f32 1.0, %v2214_v29  ;;  %v2216_v31 = vpop.eup %2215 }
 0xc08   : > { %v1045_v33 = vadd.f32 1.0, %v2216_v31 }
 0xc09   : > { %2217 = vrcp.f32 %v1069_v30 }
 0xc0a   : > { %2219 = vrcp.f32 %v1045_v33 }
 0xc13   : > { %v2218_v34 = vpop.eup %2217 }
 0xc14   : > { %v2220_v38 = vpop.eup %2219  ;;  %v1073_v41 = vmul.f32 %v2218_v34, %v2520_v56 }
 0xc15   : > { %v1049_v44 = vmul.f32 %v2220_v38, %v2524_v59  ;;  %v1932_v59 = vld [vmem:[%s2333_s30 + $0x90] sm:$0xff] }
 0xc74   : > { %v1076_v36 = vpop.permute.xlu0 %1075 }
 0xc75   : > { %v1078_v37 = vmul.f32 %v2218_v34, %v1076_v36 }
 0xc77   : > { %1080 = vrot.lane.b32.xlu0 %v1078_v37, %s2284_s24 }
 0xc78   : > { %v1052_v39 = vpop.permute.xlu1 %1051 }
 0xc79   : > { %v1054_v40 = vmul.f32 %v2220_v38, %v1052_v39 }
 0xc7b   : > { %1056 = vrot.lane.b32.xlu1 %v1054_v40, %s2284_s24 }
 0xce9   : > { %v1081_v42 = vpop.permute.xlu0 %1080 }
 0xcea   : > { %v2560_v43 = vadd.f32 %v1081_v42, %v1073_v41 }
 0xcec   : > { %2221 = vtanh.f32 %v2560_v43 }
 0xced   : > { %v1057_v45 = vpop.permute.xlu1 %1056 }
 0xcee   : > { %v2564_v46 = vadd.f32 %v1057_v45, %v1049_v44 }
 0xcf0   : > { %2223 = vtanh.f32 %v2564_v46 }
 0xcf6   : > { %v2222_v47 = vpop.eup %2221 }
 0xcf7   : > { %1086 = vrot.lane.b32.xlu0 %v2222_v47, %s2284_s24 }
 0xcfa   : > { %v2224_v48 = vpop.eup %2223 }
 0xcfb   : > { %1062 = vrot.lane.b32.xlu1 %v2224_v48, %s2284_s24 }
 0xd69   : > { %v1087_v50 = vpop.permute.xlu0 %1086 }
 0xd6a   : > { %v2569_v51 = vmul.f32 %v2218_v34, %v1087_v50 }
 0xd6c   : > { %v1150_v53 = vpack.c.bf16 %v2569_v51, %v2569_v51 }
 0xd6d   : > { %v1063_v54 = vpop.permute.xlu1 %1062 }
 0xd6e   : > { %v2573_v55 = vmul.f32 %v2220_v38, %v1063_v54  ;;  %1153 = vrot.lane.b32.xlu0 %v1150_v53, %s2285_s25 }
 0xd70   : > { %v1102_v56 = vpack.c.bf16 %v2573_v55, %v2573_v55 }
 0xd72   : > { %1105 = vrot.lane.b32.xlu1 %v1102_v56, %s2285_s25  ;;  %v1259_v56 = vld [vmem:[%s2328_s26 + $0x30] sm:$0xff] }
 0xde0   : > { %v1154_v57 = vpop.permute.xlu0 %1153 }
 0xde1   : > { %2092 = vmatmul.mubr.msk.bf16.vlgmr.msra.gmra.mrb[20].mxu1 %vm310_vm2, %v1154_v57 }
 0xde2   : > { %2104 = vmatpush3.bf16.msra.mxu1 %v2348_v1  ;;  %2107 = vmatprep.mubr.msk.bf16.mxu1 %vm2283_vm1, %v2282_v2 }
 0xde3   : > { %2105 = vmatprep.subr.bf16.mxu1 %v2282_v2 }
 0xde4   : > { %v1106_v58 = vpop.permute.xlu1 %1105 }
 0xde5   : > { %2084 = vmatmul.mubr.msk.bf16.vlgmr.msra.gmra.mrb[20].mxu0 %vm310_vm2, %v1106_v58 }
 0xde6   : > { %2106 = vmatpush3.bf16.msra.mxu1 %v2361_v4  ;;  %2096 = vmatpush3.bf16.msra.mxu0 %v2355_v3 }
 0xde7   : > { %2097 = vmatprep.subr.bf16.mxu0 %v2282_v2  ;;  %2099 = vmatprep.mubr.msk.bf16.mxu0 %vm2283_vm1, %v2282_v2 }
 0xde8   : > { %2119 = vmatprep.subr.bf16.mxu1 %v2282_v2 }
 0xdea   : > { %2098 = vmatpush3.bf16.msra.mxu0 %v2371_v6 }
 0xdeb   : > { %2111 = vmatprep.subr.bf16.mxu0 %v2282_v2 }
 0xeb4   : > { %v1192_v60 = vpop.f32.mrb[20].mxu1 }
 0xeb5   : > { %v1193_v61 = vadd.f32 %v1932_v59, %v1192_v60  ;;  %v2093_v62 = vpop.f32.mrb[21].mxu1 }
 0xeb6   : > { %v1195_v0 = vpop.f32.mrb[22].mxu1 }
 0xeb7   : > { %2225 = vtanh.f32 %v1193_v61  ;;  %v2094_v8 = vpop.f32.mrb[23].mxu1  ;;  %v1935_v16 = vmul.f32 -1.442695, %v1193_v61 }
 0xeb8   : > { %v1144_v9 = vpop.f32.mrb[20].mxu0 }
 0xeb9   : > { %v1145_v10 = vadd.f32 %v1144_v9, %v1103_v5  ;;  %v2085_v11 = vpop.f32.mrb[21].mxu0 }
 0xeba   : > { %v1147_v12 = vpop.f32.mrb[22].mxu0 }
 0xebb   : > { %2227 = vtanh.f32 %v1145_v10  ;;  %v2086_v13 = vpop.f32.mrb[23].mxu0  ;;  %v1934_v18 = vmul.f32 -1.442695, %v1145_v10 }
 0xebc   : > { %2229 = vpow2.f32 %v1935_v16 }
 0xebd   : > { %2231 = vpow2.f32 %v1934_v18 }
 0xec1   : > { %v2226_v14 = vpop.eup %2225 }
 0xec2   : > { %1231 = vrot.lane.b32.xlu0 %v2226_v14, %s2284_s24 }
 0xec5   : > { %v2228_v15 = vpop.eup %2227 }
 0xec6   : > { %1207 = vrot.lane.b32.xlu1 %v2228_v15, %s2284_s24  ;;  %v2230_v19 = vpop.eup %2229 }
 0xec7   : > { %v1225_v21 = vadd.f32 1.0, %v2230_v19  ;;  %v2232_v22 = vpop.eup %2231 }
 0xec8   : > { %v1201_v23 = vadd.f32 1.0, %v2232_v22 }
 0xec9   : > { %2233 = vrcp.f32 %v1225_v21 }
 0xeca   : > { %2235 = vrcp.f32 %v1201_v23 }
 0xed3   : > { %v2234_v24 = vpop.eup %2233 }
 0xed4   : > { %v2236_v27 = vpop.eup %2235  ;;  %v1229_v30 = vmul.f32 %v2234_v24, %v2560_v43 }
 0xed5   : > { %v1205_v34 = vmul.f32 %v2236_v27, %v2564_v46 }
 0xf34   : > { %v1232_v25 = vpop.permute.xlu0 %1231 }
 0xf35   : > { %v1234_v26 = vmul.f32 %v2234_v24, %v1232_v25 }
 0xf37   : > { %1236 = vrot.lane.b32.xlu0 %v1234_v26, %s2284_s24 }
 0xf38   : > { %v1208_v28 = vpop.permute.xlu1 %1207 }
 0xf39   : > { %v1210_v29 = vmul.f32 %v2236_v27, %v1208_v28 }
 0xf3b   : > { %1212 = vrot.lane.b32.xlu1 %v1210_v29, %s2284_s24 }
 0xfa9   : > { %v1237_v31 = vpop.permute.xlu0 %1236 }
 0xfaa   : > { %v2600_v33 = vadd.f32 %v1237_v31, %v1229_v30 }
 0xfac   : > { %2237 = vtanh.f32 %v2600_v33 }
 0xfad   : > { %v1213_v36 = vpop.permute.xlu1 %1212 }
 0xfae   : > { %v2604_v37 = vadd.f32 %v1213_v36, %v1205_v34  ;;  %v1942_v36 = vld [vmem:[%s2333_s30 + $0x80] sm:$0xff] }
 0xfb0   : > { %2239 = vtanh.f32 %v2604_v37 }
 0xfb6   : > { %v2238_v38 = vpop.eup %2237 }
 0xfb7   : > { %1242 = vrot.lane.b32.xlu0 %v2238_v38, %s2284_s24 }
 0xfba   : > { %v2240_v39 = vpop.eup %2239 }
 0xfbb   : > { %1218 = vrot.lane.b32.xlu1 %v2240_v39, %s2284_s24 }
0x1029   : > { %v1243_v40 = vpop.permute.xlu0 %1242 }
0x102a   : > { %v2609_v41 = vmul.f32 %v2234_v24, %v1243_v40 }
0x102c   : > { %v1306_v42 = vpack.c.bf16 %v2609_v41, %v2609_v41 }
0x102d   : > { %v1219_v43 = vpop.permute.xlu1 %1218 }
0x102e   : > { %v2613_v44 = vmul.f32 %v2236_v27, %v1219_v43  ;;  %1309 = vrot.lane.b32.xlu0 %v1306_v42, %s2285_s25  ;;  %v1415_v42 = vld [vmem:[%s2328_s26 + $0x38] sm:$0xff] }
0x1030   : > { %v1258_v45 = vpack.c.bf16 %v2613_v44, %v2613_v44 }
0x1032   : > { %1261 = vrot.lane.b32.xlu1 %v1258_v45, %s2285_s25 }
0x10a0   : > { %v1310_v46 = vpop.permute.xlu0 %1309 }
0x10a1   : > { %2108 = vmatmul.mubr.msk.bf16.vlgmr.msra.gmra.mrb[24].mxu1 %vm310_vm2, %v1310_v46 }
0x10a2   : > { %2120 = vmatpush3.bf16.msra.mxu1 %v2348_v1  ;;  %2123 = vmatprep.mubr.msk.bf16.mxu1 %vm2283_vm1, %v2282_v2  ;;  %v1937_v1 = vld [vmem:[%s2333_s30 + $0x88] sm:$0xff]  ;;  %s2286_s30 = smov 96  }
0x10a3   : > { %2121 = vmatprep.subr.bf16.mxu1 %v2282_v2 }
0x10a4   : > { %v1262_v47 = vpop.permute.xlu1 %1261 }
0x10a5   : > { %2100 = vmatmul.mubr.msk.bf16.vlgmr.msra.gmra.mrb[24].mxu0 %vm310_vm2, %v1262_v47 }
0x10a6   : > { %2122 = vmatpush3.bf16.msra.mxu1 %v2361_v4  ;;  %2112 = vmatpush3.bf16.msra.mxu0 %v2355_v3 }
0x10a7   : > { %2113 = vmatprep.subr.bf16.mxu0 %v2282_v2  ;;  %2115 = vmatprep.mubr.msk.bf16.mxu0 %vm2283_vm1, %v2282_v2 }
0x10aa   : > { %2114 = vmatpush3.bf16.msra.mxu0 %v2371_v6 }
0x1174   : > { %v1348_v48 = vpop.f32.mrb[24].mxu1 }
0x1175   : > { %v1349_v50 = vadd.f32 %v1937_v1, %v1348_v48  ;;  %v2109_v53 = vpop.f32.mrb[25].mxu1 }
0x1176   : > { %v1351_v54 = vpop.f32.mrb[26].mxu1 }
0x1177   : > { %2241 = vtanh.f32 %v1349_v50  ;;  %v2110_v57 = vpop.f32.mrb[27].mxu1  ;;  %v1940_v6 = vmul.f32 -1.442695, %v1349_v50 }
0x1178   : > { %v1300_v58 = vpop.f32.mrb[24].mxu0 }
0x1179   : > { %v1301_v59 = vadd.f32 %v1300_v58, %v1259_v56  ;;  %v2101_v4 = vpop.f32.mrb[25].mxu0 }
0x117a   : > { %v1303_v60 = vpop.f32.mrb[26].mxu0 }
0x117b   : > { %2243 = vtanh.f32 %v1301_v59  ;;  %v2102_v3 = vpop.f32.mrb[27].mxu0  ;;  %v1939_v62 = vmul.f32 -1.442695, %v1301_v59 }
0x117c   : > { %2245 = vpow2.f32 %v1940_v6 }
0x117d   : > { %2247 = vpow2.f32 %v1939_v62 }
0x1181   : > { %v2242_v61 = vpop.eup %2241 }
0x1182   : > { %1387 = vrot.lane.b32.xlu0 %v2242_v61, %s2284_s24 }
0x1185   : > { %v2244_v2 = vpop.eup %2243 }
0x1186   : > { %1363 = vrot.lane.b32.xlu1 %v2244_v2, %s2284_s24  ;;  %v2246_v0 = vpop.eup %2245 }
0x1187   : > { %v1381_v5 = vadd.f32 1.0, %v2246_v0  ;;  %v2248_v8 = vpop.eup %2247 }
0x1188   : > { %v1357_v9 = vadd.f32 1.0, %v2248_v8 }
0x1189   : > { %2249 = vrcp.f32 %v1381_v5 }
0x118a   : > { %2251 = vrcp.f32 %v1357_v9 }
0x1193   : > { %v2250_v10 = vpop.eup %2249 }
0x1194   : > { %v2252_v13 = vpop.eup %2251  ;;  %v1385_v16 = vmul.f32 %v2250_v10, %v2600_v33 }
0x1195   : > { %v1361_v21 = vmul.f32 %v2252_v13, %v2604_v37 }
0x11f4   : > { %v1388_v11 = vpop.permute.xlu0 %1387 }
0x11f5   : > { %v1390_v12 = vmul.f32 %v2250_v10, %v1388_v11 }
0x11f7   : > { %1392 = vrot.lane.b32.xlu0 %v1390_v12, %s2284_s24 }
0x11f8   : > { %v1364_v14 = vpop.permute.xlu1 %1363 }
0x11f9   : > { %v1366_v15 = vmul.f32 %v2252_v13, %v1364_v14  ;;  %v2706_v14 = vld [vmem:[%s2778_s3 + $0x1] ss:$0 sm:$0xff] }
0x11fb   : > { %1368 = vrot.lane.b32.xlu1 %v1366_v15, %s2284_s24 }
0x1269   : > { %v1393_v18 = vpop.permute.xlu0 %1392 }
0x126a   : > { %v1395_v19 = vadd.f32 %v1393_v18, %v1385_v16 }
0x126c   : > { %2253 = vtanh.f32 %v1395_v19 }
0x126d   : > { %v1369_v22 = vpop.permute.xlu1 %1368 }
0x126e   : > { %v1371_v23 = vadd.f32 %v1369_v22, %v1361_v21 }
0x1270   : > { %2255 = vtanh.f32 %v1371_v23 }
0x1276   : > { %v2254_v24 = vpop.eup %2253 }
0x1277   : > { %1398 = vrot.lane.b32.xlu0 %v2254_v24, %s2284_s24 }
0x127a   : > { %v2256_v25 = vpop.eup %2255 }
0x127b   : > { %1374 = vrot.lane.b32.xlu1 %v2256_v25, %s2284_s24 }
0x12e9   : > { %v1399_v26 = vpop.permute.xlu0 %1398 }
0x12ea   : > { %v1401_v27 = vmul.f32 %v2250_v10, %v1399_v26 }
0x12ec   : > { %v1462_v28 = vpack.c.bf16 %v1401_v27, %v1401_v27 }
0x12ed   : > { %v1375_v29 = vpop.permute.xlu1 %1374 }
0x12ee   : > { %v2641_v30 = vmul.f32 %v2252_v13, %v1375_v29  ;;  %1465 = vrot.lane.b32.xlu0 %v1462_v28, %s2285_s25 }
0x12f0   : > { %v1414_v31 = vpack.c.bf16 %v2641_v30, %v2641_v30 }
0x12f2   : > { %1417 = vrot.lane.b32.xlu1 %v1414_v31, %s2285_s25 }
0x1360   : > { %v1466_v33 = vpop.permute.xlu0 %1465 }
0x1361   : > { %2124 = vmatmul.mubr.msk.bf16.vlgmr.msra.gmra.mrb[28].mxu1 %vm310_vm2, %v1466_v33 }
0x1364   : > { %v1418_v34 = vpop.permute.xlu1 %1417 }
0x1365   : > { %2116 = vmatmul.mubr.msk.bf16.vlgmr.msra.gmra.mrb[28].mxu0 %vm310_vm2, %v1418_v34 }
0x1434   : > { %v1504_v37 = vpop.f32.mrb[28].mxu1 }
0x1435   : > { %v1505_v38 = vadd.f32 %v1942_v36, %v1504_v37  ;;  %v2125_v39 = vpop.f32.mrb[29].mxu1 }
0x1436   : > { %v1507_v40 = vpop.f32.mrb[30].mxu1 }
0x1437   : > { %2257 = vtanh.f32 %v1505_v38  ;;  %v2126_v43 = vpop.f32.mrb[31].mxu1  ;;  %v1945_v54 = vmul.f32 -1.442695, %v1505_v38 }
0x1438   : > { %v1456_v45 = vpop.f32.mrb[28].mxu0 }
0x1439   : > { %v1457_v46 = vadd.f32 %v1456_v45, %v1415_v42  ;;  %v2117_v47 = vpop.f32.mrb[29].mxu0 }
0x143a   : > { %v1459_v1 = vpop.f32.mrb[30].mxu0 }
0x143b   : > { %2259 = vtanh.f32 %v1457_v46  ;;  %v2118_v48 = vpop.f32.mrb[31].mxu0  ;;  %v1944_v56 = vmul.f32 -1.442695, %v1457_v46 }
0x143c   : > { %2261 = vpow2.f32 %v1945_v54 }
0x143d   : > { %2263 = vpow2.f32 %v1944_v56 }
0x1441   : > { %v2258_v50 = vpop.eup %2257 }
0x1442   : > { %1543 = vrot.lane.b32.xlu0 %v2258_v50, %s2284_s24 }
0x1445   : > { %v2260_v53 = vpop.eup %2259 }
0x1446   : > { %1519 = vrot.lane.b32.xlu1 %v2260_v53, %s2284_s24  ;;  %v2262_v57 = vpop.eup %2261 }
0x1447   : > { %v1537_v58 = vadd.f32 1.0, %v2262_v57  ;;  %v2264_v59 = vpop.eup %2263 }
0x1448   : > { %v1513_v4 = vadd.f32 1.0, %v2264_v59 }
0x1449   : > { %2265 = vrcp.f32 %v1537_v58 }
0x144a   : > { %2267 = vrcp.f32 %v1513_v4 }
0x1453   : > { %v2266_v60 = vpop.eup %2265 }
0x1454   : > { %v2268_v2 = vpop.eup %2267  ;;  %v1541_v0 = vmul.f32 %v2266_v60, %v1395_v19 }
0x1455   : > { %v1517_v9 = vmul.f32 %v2268_v2, %v1371_v23 }
0x14b4   : > { %v1544_v3 = vpop.permute.xlu0 %1543 }
0x14b5   : > { %v1546_v61 = vmul.f32 %v2266_v60, %v1544_v3 }
0x14b7   : > { %1548 = vrot.lane.b32.xlu0 %v1546_v61, %s2284_s24 }
0x14b8   : > { %v1520_v6 = vpop.permute.xlu1 %1519 }
0x14b9   : > { %v1522_v62 = vmul.f32 %v2268_v2, %v1520_v6 }
0x14bb   : > { %1524 = vrot.lane.b32.xlu1 %v1522_v62, %s2284_s24 }
0x1529   : > { %v1549_v5 = vpop.permute.xlu0 %1548 }
0x152a   : > { %v2655_v8 = vadd.f32 %v1549_v5, %v1541_v0 }
0x152c   : > { %2269 = vtanh.f32 %v2655_v8 }
0x152d   : > { %v1525_v10 = vpop.permute.xlu1 %1524 }
0x152e   : > { %v2658_v11 = vadd.f32 %v1525_v10, %v1517_v9 }
0x1530   : > { %2271 = vtanh.f32 %v2658_v11 }
0x1536   : > { %v2270_v12 = vpop.eup %2269 }
0x1537   : > { %1554 = vrot.lane.b32.xlu0 %v2270_v12, %s2284_s24 }
0x153a   : > { %v2272_v13 = vpop.eup %2271 }
0x153b   : > { %468 = vrot.lane.b32.xlu0 %v2413_v52, %s2285_s25  ;;  %1530 = vrot.lane.b32.xlu1 %v2272_v13, %s2284_s24 }
0x153f   : > { %1409 = vrot.lane.b32.xlu0 %v1401_v27, %s2285_s25  ;;  %623 = vrot.lane.b32.xlu1 %v2453_v35, %s2285_s25 }
0x1543   : > { %779 = vrot.lane.b32.xlu0 %v2493_v20, %s2285_s25  ;;  %1253 = vrot.lane.b32.xlu1 %v2609_v41, %s2285_s25 }
0x1547   : > { %935 = vrot.lane.b32.xlu0 %v2533_v7, %s2285_s25  ;;  %1097 = vrot.lane.b32.xlu1 %v2569_v51, %s2285_s25 }
0x154b   : > { %941 = vrot.lane.b32.xlu0 %v2529_v63, %s2285_s25  ;;  %1091 = vrot.lane.b32.xlu1 %v2573_v55, %s2285_s25 }
0x154f   : > { %785 = vrot.lane.b32.xlu0 %v2489_v17, %s2285_s25  ;;  %1247 = vrot.lane.b32.xlu1 %v2613_v44, %s2285_s25 }
0x1553   : > { %629 = vrot.lane.b32.xlu0 %v2449_v32, %s2285_s25 }
0x1557   : > { %473 = vrot.lane.b32.xlu0 %v2409_v49, %s2285_s25  ;;  %v2697_v49 = vld [vmem:[%s2778_s3] ss:$0 sm:$0xff] }
0x15a9   : > { %v1555_v52 = vpop.permute.xlu0 %1554 }
0x15aa   : > { %v1557_v35 = vmul.f32 %v2266_v60, %v1555_v52 }
0x15ac   : > { %1565 = vrot.lane.b32.xlu1 %v1557_v35, %s2285_s25 }
0x15ad   : > { %v469_v20 = vpop.permute.xlu0 %468  ;;  %v1531_v63 = vpop.permute.xlu1 %1530 }
0x15ae   : > { %471 = vst.msk [vmem:[#allocation6] sm:$0xff] %vm310_vm2, %v469_v20  ;;  %v1533_v51 = vmul.f32 %v2268_v2, %v1531_v63 }
0x15b0   : > { %1403 = vrot.lane.b32.xlu1 %v2641_v30, %s2285_s25 }
0x15b1   : > { %v1410_v17 = vpop.permute.xlu0 %1409  ;;  %v624_v7 = vpop.permute.xlu1 %623 }
0x15b2   : > { %1413 = vst.msk [vmem:[#allocation7 + $0x8] sm:$0xff] %vm310_vm2, %v1410_v17  ;;  %627 = vst.msk [vmem:[#allocation6 + $0x8] sm:$0xff] %vm310_vm2, %v624_v7 }
0x15b4   : > { %1559 = vrot.lane.b32.xlu1 %v1533_v51, %s2285_s25 }
0x15b5   : > { %v780_v32 = vpop.permute.xlu0 %779  ;;  %v1254_v55 = vpop.permute.xlu1 %1253  ;;  %v1581_v41 = vld [vmem:[#allocation6] sm:$0xff] }
0x15b6   : > { %783 = vst.msk [vmem:[#allocation6 + $0x10] sm:$0xff] %vm310_vm2, %v780_v32  ;;  %1257 = vst.msk [vmem:[#allocation7 + $0x10] sm:$0xff] %vm310_vm2, %v1254_v55  ;;  %v1596_v44 = vmul.f32 %v2697_v49, %v1581_v41 }
0x15b8   : > { %v1604_v15 = vsel %vm310_vm2, %v1596_v44, 0.0 }
0x15b9   : > { %1605 = vadd.xlane.f32.xlu0 %v1604_v15  ;;  %v936_v16 = vpop.permute.xlu0 %935  ;;  %v1098_v18 = vpop.permute.xlu1 %1097  ;;  %v1688_v19 = vld [vmem:[#allocation7 + $0x8] sm:$0xff] }
0x15ba   : > { %939 = vst.msk [vmem:[#allocation6 + $0x18] sm:$0xff] %vm310_vm2, %v936_v16  ;;  %1101 = vst.msk [vmem:[#allocation7 + $0x18] sm:$0xff] %vm310_vm2, %v1098_v18  ;;  %v1704_v21 = vmul.f32 %v2706_v14, %v1688_v19  ;;  %v1582_v1 = vld [vmem:[#allocation6 + $0x8] sm:$0xff] }
0x15bb   : > { %v1597_v53 = vmul.f32 %v2697_v49, %v1582_v1 }
0x15bc   : > { %v1714_v22 = vsel %vm310_vm2, %v1704_v21, 0.0 }
0x15bd   : > { %1715 = vadd.xlane.f32.xlu0 %v1714_v22  ;;  %v942_v23 = vpop.permute.xlu0 %941  ;;  %v1092_v24 = vpop.permute.xlu1 %1091  ;;  %v1689_v25 = vld [vmem:[#allocation7 + $0x10] sm:$0xff]  ;;  %v1607_v57 = vsel %vm310_vm2, %v1597_v53, 0.0 }
0x15be   : > { %945 = vst.msk [vmem:[#allocation7 + $0x20] sm:$0xff] %vm310_vm2, %v942_v23  ;;  %1095 = vst.msk [vmem:[#allocation6 + $0x20] sm:$0xff] %vm310_vm2, %v1092_v24  ;;  %v1705_v26 = vmul.f32 %v2706_v14, %v1689_v25  ;;  %v1583_v56 = vld [vmem:[#allocation6 + $0x10] sm:$0xff]  ;;  %v1636_v23 = vlaneseq }
0x15bf   : > { %v1598_v58 = vmul.f32 %v2697_v49, %v1583_v56 }
0x15c0   : > { %v1717_v27 = vsel %vm310_vm2, %v1705_v26, 0.0  ;;  %v1637_v24 = vand.u32 127, %v1636_v23  ;;  %v1639_v25 = vshrl.u32 %v1636_v23, 7 }
0x15c1   : > { %v786_v28 = vpop.permute.xlu0 %785  ;;  %1718 = vadd.xlane.f32.xlu0 %v1717_v27  ;;  %v1248_v29 = vpop.permute.xlu1 %1247  ;;  %v1690_v30 = vld [vmem:[#allocation7 + $0x18] sm:$0xff]  ;;  %v1610_v4 = vsel %vm310_vm2, %v1598_v58, 0.0 }
0x15c2   : > { %789 = vst.msk [vmem:[#allocation7 + $0x28] sm:$0xff] %vm310_vm2, %v786_v28  ;;  %1251 = vst.msk [vmem:[#allocation6 + $0x28] sm:$0xff] %vm310_vm2, %v1248_v29  ;;  %v1706_v31 = vmul.f32 %v2706_v14, %v1690_v30  ;;  %v1584_v59 = vld [vmem:[#allocation6 + $0x18] sm:$0xff]  ;;  %v1640_v27 = vsub.s32 %v1637_v24, %v1639_v25 }
0x15c3   : > { %v1599_v60 = vmul.f32 %v2697_v49, %v1584_v59 }
0x15c4   : > { %v1720_v33 = vsel %vm310_vm2, %v1706_v31, 0.0 }
0x15c5   : > { %v630_v34 = vpop.permute.xlu0 %629  ;;  %1721 = vadd.xlane.f32.xlu0 %v1720_v33  ;;  %v1691_v36 = vld [vmem:[#allocation7 + $0x20] sm:$0xff]  ;;  %v1613_v61 = vsel %vm310_vm2, %v1599_v60, 0.0 }
0x15c6   : > { %633 = vst.msk [vmem:[#allocation7 + $0x30] sm:$0xff] %vm310_vm2, %v630_v34  ;;  %v1707_v37 = vmul.f32 %v2706_v14, %v1691_v36  ;;  %v1585_v3 = vld [vmem:[#allocation6 + $0x20] sm:$0xff] }
0x15c7   : > { %v1600_v2 = vmul.f32 %v2697_v49, %v1585_v3 }
0x15c8   : > { %v1723_v38 = vsel %vm310_vm2, %v1707_v37, 0.0 }
0x15c9   : > { %v474_v39 = vpop.permute.xlu0 %473  ;;  %1724 = vadd.xlane.f32.xlu0 %v1723_v38  ;;  %v1692_v40 = vld [vmem:[#allocation7 + $0x28] sm:$0xff]  ;;  %v1616_v62 = vsel %vm310_vm2, %v1600_v2, 0.0 }
0x15ca   : > { %477 = vst.msk [vmem:[#allocation7 + $0x38] sm:$0xff] %vm310_vm2, %v474_v39  ;;  %v1708_v42 = vmul.f32 %v2706_v14, %v1692_v40  ;;  %v1586_v6 = vld [vmem:[#allocation6 + $0x28] sm:$0xff] }
0x15cb   : > { %v1601_v0 = vmul.f32 %v2697_v49, %v1586_v6 }
0x15cc   : > { %v1726_v43 = vsel %vm310_vm2, %v1708_v42, 0.0 }
0x15cd   : > { %1727 = vadd.xlane.f32.xlu0 %v1726_v43  ;;  %v1693_v45 = vld [vmem:[#allocation7 + $0x30] sm:$0xff]  ;;  %v1619_v5 = vsel %vm310_vm2, %v1601_v0, 0.0 }
0x15ce   : > { %v1709_v46 = vmul.f32 %v2706_v14, %v1693_v45 }
0x15d0   : > { %v1729_v47 = vsel %vm310_vm2, %v1709_v46, 0.0 }
0x15d1   : > { %1730 = vadd.xlane.f32.xlu0 %v1729_v47  ;;  %v1694_v48 = vld [vmem:[#allocation7 + $0x38] sm:$0xff] }
0x15d2   : > { %v1710_v50 = vmul.f32 %v2706_v14, %v1694_v48 }
0x15d4   : > { %v1732_v54 = vsel %vm310_vm2, %v1710_v50, 0.0 }
0x15d5   : > { %1733 = vadd.xlane.f32.xlu0 %v1732_v54 }
0x15d8   : > { %1608 = vadd.xlane.f32.xlu1 %v1607_v57 }
0x15dc   : > { %1611 = vadd.xlane.f32.xlu1 %v1610_v4 }
0x15e0   : > { %1614 = vadd.xlane.f32.xlu1 %v1613_v61 }
0x15e4   : > { %1617 = vadd.xlane.f32.xlu1 %v1616_v62 }
0x15e8   : > { %1620 = vadd.xlane.f32.xlu1 %v1619_v5 }
0x161e   : > { %v1566_v9 = vpop.permute.xlu1 %1565 }
0x161f   : > { %1568 = vst.msk [vmem:[#allocation7] sm:$0xff] %vm310_vm2, %v1566_v9  ;;  %1575 = vst.msk [vmem:[#allocation4] sm:$0xff] %vm310_vm2, %v1566_v9 }
0x1622   : > { %v1404_v10 = vpop.permute.xlu1 %1403 }
0x1623   : > { %1407 = vst.msk [vmem:[#allocation6 + $0x30] sm:$0xff] %vm310_vm2, %v1404_v10 }
0x1626   : > { %v1560_v12 = vpop.permute.xlu1 %1559  ;;  %v1687_v13 = vld [vmem:[#allocation7] sm:$0xff] }
0x1627   : > { %1563 = vst.msk [vmem:[#allocation6 + $0x38] sm:$0xff] %vm310_vm2, %v1560_v12  ;;  %1569 = vst.msk [vmem:[#allocation2] sm:$0xff] %vm310_vm2, %v1560_v12  ;;  %v1703_v52 = vmul.f32 %v2706_v14, %v1687_v13 }
0x1629   : > { %v1711_v35 = vsel %vm310_vm2, %v1703_v52, 0.0 }
0x162a   : > { %1712 = vadd.xlane.f32.xlu0 %v1711_v35  ;;  %v1587_v20 = vld [vmem:[#allocation6 + $0x30] sm:$0xff] }
0x162b   : > { %v1602_v63 = vmul.f32 %v2697_v49, %v1587_v20 }
0x162d   : > { %v1622_v17 = vsel %vm310_vm2, %v1602_v63, 0.0 }
0x162e   : > { %1623 = vadd.xlane.f32.xlu1 %v1622_v17  ;;  %v1588_v7 = vld [vmem:[#allocation6 + $0x38] sm:$0xff] }
0x162f   : > { %v1603_v51 = vmul.f32 %v2697_v49, %v1588_v7 }
0x1631   : > { %v1625_v32 = vsel %vm310_vm2, %v1603_v51, 0.0 }
0x1632   : > { %1626 = vadd.xlane.f32.xlu1 %v1625_v32 }
0x1640   : > { %1577 = vrot.lane.b32.xlu0 %v2655_v8, %s2286_s30 }
0x1643   : > { %1571 = vrot.lane.b32.xlu1 %v2658_v11, %s2286_s30 }
0x1646   : > { %v1606_v55 = vpop.xlane.xlu0 %1605 }
0x1647   : > { %v1641_v34 = vrot.slane %v1606_v55, %v1640_v27 }
0x164a   : > { %v1716_v41 = vpop.xlane.xlu0 %1715 }
0x164b   : > { %v1750_v28 = vrot.slane %v1716_v41, %v1640_v27 }
0x164e   : > { %v1719_v44 = vpop.xlane.xlu0 %1718 }
0x164f   : > { %v1754_v31 = vrot.slane %v1719_v44, %v1640_v27 }
0x1652   : > { %v1722_v14 = vpop.xlane.xlu0 %1721 }
0x1653   : > { %v1758_v36 = vrot.slane %v1722_v14, %v1640_v27 }
0x1656   : > { %v1725_v16 = vpop.xlane.xlu0 %1724 }
0x1657   : > { %v1762_v39 = vrot.slane %v1725_v16, %v1640_v27 }
0x165a   : > { %v1728_v19 = vpop.xlane.xlu0 %1727 }
0x165b   : > { %v1766_v46 = vrot.slane %v1728_v19, %v1640_v27 }
0x165e   : > { %v1731_v22 = vpop.xlane.xlu0 %1730 }
0x165f   : > { %v1770_v50 = vrot.slane %v1731_v22, %v1640_v27 }
0x1662   : > { %v1734_v26 = vpop.xlane.xlu0 %1733 }
0x1663   : > { %v1774_v57 = vrot.slane %v1734_v26, %v1640_v27 }
0x1665   : > { %v1609_v15 = vpop.xlane.xlu1 %1608 }
0x1666   : > { %v1645_v29 = vrot.slane %v1609_v15, %v1640_v27 }
0x1668   : > { %v1671_v47 = vsel %vm1670_vm3, %v1645_v29, %v1641_v34 }
0x1669   : > { %v1612_v18 = vpop.xlane.xlu1 %1611 }
0x166a   : > { %v1649_v33 = vrot.slane %v1612_v18, %v1640_v27 }
0x166c   : > { %v1673_v53 = vsel %vm1672_vm4, %v1649_v33, %v1671_v47 }
0x166d   : > { %v1615_v21 = vpop.xlane.xlu1 %1614 }
0x166e   : > { %v1653_v37 = vrot.slane %v1615_v21, %v1640_v27 }
0x1670   : > { %v1675_v58 = vsel %vm1674_vm5, %v1653_v37, %v1673_v53 }
0x1671   : > { %v1618_v49 = vpop.xlane.xlu1 %1617 }
0x1672   : > { %v1657_v40 = vrot.slane %v1618_v49, %v1640_v27 }
0x1674   : > { %v1677_v4 = vsel %vm1676_vm6, %v1657_v40, %v1675_v58 }
0x1675   : > { %v1621_v8 = vpop.xlane.xlu1 %1620 }
0x1676   : > { %v1661_v1 = vrot.slane %v1621_v8, %v1640_v27 }
0x1678   : > { %v1679_v61 = vsel %vm1678_vm7, %v1661_v1, %v1677_v4 }
0x16b7   : > { %v1713_v11 = vpop.xlane.xlu0 %1712 }
0x16b8   : > { %v1746_v30 = vrot.slane %v1713_v11, %v1640_v27 }
0x16ba   : > { %v1775_v38 = vsel %vm1670_vm3, %v1750_v28, %v1746_v30 }
0x16bb   : > { %v1776_v42 = vsel %vm1672_vm4, %v1754_v31, %v1775_v38  ;;  %v1578_v43 = vpop.permute.xlu0 %1577  ;;  %v1624_v45 = vpop.xlane.xlu1 %1623 }
0x16bc   : > { %v1777_v48 = vsel %vm1674_vm5, %v1758_v36, %v1776_v42  ;;  %1580 = vst.msk [vmem:[#allocation5] sm:$0xff] %vm310_vm2, %v1578_v43  ;;  %v1665_v56 = vrot.slane %v1624_v45, %v1640_v27 }
0x16bd   : > { %v1778_v54 = vsel %vm1676_vm6, %v1762_v39, %v1777_v48 }
0x16be   : > { %v1779_v59 = vsel %vm1678_vm7, %v1766_v46, %v1778_v54  ;;  %v1681_v62 = vsel %vm1680_vm8, %v1665_v56, %v1679_v61 }
0x16bf   : > { %v1780_v60 = vsel %vm1680_vm8, %v1770_v50, %v1779_v59  ;;  %v1627_v3 = vpop.xlane.xlu1 %1626 }
0x16c0   : > { %v1781_v2 = vsel %vm1682_vm9, %v1774_v57, %v1780_v60  ;;  %v1669_v6 = vrot.slane %v1627_v3, %v1640_v27 }
0x16c1   : > { %1783 = vst.msk [vmem:[%s2343_s14] sm:$0xff] %vm1685_vm10, %v1781_v2 }
0x16c2   : > { %v1683_v0 = vsel %vm1682_vm9, %v1669_v6, %v1681_v62 }
0x16c3   : > { %1686 = vst.msk [vmem:[%s2338_s10] sm:$0xff] %vm1685_vm10, %v1683_v0  ;;  %v1572_v5 = vpop.permute.xlu1 %1571 }
0x16c4   : > { %1574 = vst.msk [vmem:[#allocation3] sm:$0xff] %vm310_vm2, %v1572_v5 }
0x16c5 PF: > { %s16_s18 = sadd.s32 1, %s2279_s18  }
0x16c6   : > { %p13_p8 = scmp.ge.s32.totalorder %s16_s18, 4  }
0x16c8   :  { %15 = sbr.rel (!%p13_p8) target bundleno = 1 (0x1), region = 101 }

// kernel: cnn_blstm_forward.4
= control target key start
LH: loop header
LB: loop body
LE: loop exit
PB: predicated region body
PF: predicated region fallthrough
CT: control target
= control target key end

     0   :  { %16 = vsyncpa [#allocation6], 0  ;;  %s10197_s0 = inlined_call_operand.vmem [shape: bf16[192,4], index: 0, kind: input, shape index: {}]   ;;  %s10198_s1 = inlined_call_operand.vmem [shape: bf16[9,4,16], index: 1, kind: input, shape index: {}]   ;;  %s10199_s2 = inlined_call_operand.vmem [shape: f32[1,16], index: 2, kind: input, shape index: {}]   ;;  %s10200_s3 = inlined_call_operand.hbm [shape: bf16[9,16,16], index: 3, kind: input, shape index: {}]   ;;  %s10201_s4 = inlined_call_operand.vmem [shape: f32[1,16], index: 4, kind: input, shape index: {}]   ;;  %s10202_s5 = inlined_call_operand.hbm [shape: bf16[9,16,32], index: 5, kind: input, shape index: {}]   ;;  %s10203_s6 = inlined_call_operand.vmem [shape: f32[1,32], index: 6, kind: input, shape index: {}]   ;;  %s10204_s7 = inlined_call_operand.vmem [shape: bf16[9,32,32], index: 7, kind: input, shape index: {}]   ;;  %s10205_s8 = inlined_call_operand.vmem [shape: f32[1,32], index: 8, kind: input, shape index: {}]   ;;  %s10206_s9 = inlined_call_operand.hbm [shape: bf16[32,256], index: 9, kind: input, shape index: {}]   ;;  %s10207_s10 = inlined_call_operand.vmem [shape: f32[1,256], index: 10, kind: input, shape index: {}]   ;;  %s10208_s11 = inlined_call_operand.vmem [shape: f32[2,128,128], index: 11, kind: output, shape index: {}]  }
   0x1   :  { %17 = vsyncpa [#allocation8], 0  ;;  %s8716_s17 = smov [#allocation7]   ;;  %s8717_s19 = smov [#allocation5]  }
   0x2   :  { %s43_s18 = sshll.u32 %s8716_s17, 4  ;;  %s29_s20 = sshll.u32 %s8717_s19, 4  ;;  %s44_s18 = int_to_ptr.vmem [resolvable:$true] %s43_s18  ;;  %s8784_s20 = int_to_ptr.vmem [resolvable:$true] %s29_s20 }
   0x3   :  { %s8646_s23 = scalar_lea.hbm %s10202_s5, 1152 }
   0x4   :  { %p8647_p0 = scmp.ne.s32.totalorder %s10202_s5, %s8646_s23  ;;  %p8650_p1 = scmp.lt.u32.totalorder %s8646_s23, %s10202_s5 }
   0x6   :  { %p8652_p2 = pnand %p8650_p1, %p8647_p0 }
   0x8   :  { %8655 = shalt.err (!%p8652_p2)
}
   0x9   :  { %s8656_s28 = scalar_lea.vmem %s44_s18, 1152  ;;  %p8661_p4 = scmp.lt.s32.totalorder %s44_s18, %s44_s18 }
   0xa   :  { %p8657_p3 = scmp.ne.s32.totalorder %s44_s18, %s8656_s28  ;;  %p8662_p5 = scmp.lt.s32.totalorder %s8656_s28, %s8656_s28 }
   0xc   :  { %p8663_p6 = por %p8662_p5, %p8661_p4 }
   0xe   :  { %p8664_p7 = pnand %p8663_p6, %p8657_p3 }
  0x10   :  { %8667 = shalt.err (!%p8664_p7)
}
  0x11   :  { %s8718_s29 = smov 64   ;;  %s8719_s30 = smov 4  }
  0x12   :  { %49 = dma.hbm_to_vmem [thread:$0]  %s10202_s5, 1152, %s44_s18, [#allocation8], %s8718_s29, %s8718_s29, %s8719_s30  }
  0x13   :  { %s8668_s16 = scalar_lea.hbm %s10200_s3, 1152 }
  0x14   :  { %p8669_p8 = scmp.ne.s32.totalorder %s10200_s3, %s8668_s16  ;;  %p8672_p9 = scmp.lt.u32.totalorder %s8668_s16, %s10200_s3 }
  0x16   :  { %p8674_p10 = pnand %p8672_p9, %p8669_p8 }
  0x18   :  { %8677 = shalt.err (!%p8674_p10)
}
  0x19   :  { %s8678_s23 = scalar_lea.vmem %s8784_s20, 1152  ;;  %p8683_p12 = scmp.lt.s32.totalorder %s8784_s20, %s8784_s20 }
  0x1a   :  { %p8679_p11 = scmp.ne.s32.totalorder %s8784_s20, %s8678_s23  ;;  %p8684_p13 = scmp.lt.s32.totalorder %s8678_s23, %s8678_s23 }
  0x1c   :  { %p8685_p0 = por %p8684_p13, %p8683_p12 }
  0x1e   :  { %p8686_p1 = pnand %p8685_p0, %p8679_p11 }
  0x20   :  { %8689 = shalt.err (!%p8686_p1)
}
  0x21   :  { %35 = dma.hbm_to_vmem [thread:$0]  %s10200_s3, 1152, %s8784_s20, [#allocation6], %s8718_s29, %s8718_s29, %s8719_s30  }
  0x22   :  { %s8720_s24 = smov [#allocation9]   ;;  %s8690_s28 = scalar_lea.hbm %s10206_s9, 512 }
  0x23   :  { %s61_s25 = sshll.u32 %s8720_s24, 4  ;;  %p8691_p2 = scmp.ne.s32.totalorder %s10206_s9, %s8690_s28  ;;  %s62_s25 = int_to_ptr.vmem [resolvable:$true] %s61_s25 }
  0x24   :  { %p8694_p3 = scmp.lt.u32.totalorder %s8690_s28, %s10206_s9 }
  0x26   :  { %p8696_p4 = pnand %p8694_p3, %p8691_p2 }
  0x28   :  { %8699 = shalt.err (!%p8696_p4)
}
  0x29   :  { %s8700_s16 = scalar_lea.vmem %s62_s25, 512  ;;  %p8705_p6 = scmp.lt.s32.totalorder %s62_s25, %s62_s25 }
  0x2a   :  { %p8701_p5 = scmp.ne.s32.totalorder %s62_s25, %s8700_s16  ;;  %p8706_p7 = scmp.lt.s32.totalorder %s8700_s16, %s8700_s16 }
  0x2c   :  { %p8707_p8 = por %p8706_p7, %p8705_p6 }
  0x2e   :  { %p8708_p9 = pnand %p8707_p8, %p8701_p5 }
  0x30   :  { %8711 = shalt.err (!%p8708_p9)
}
  0x31   :  { %s8721_s3 = smov 128   ;;  %s8722_s20 = smov 8  }
  0x32   :  { %67 = dma.hbm_to_vmem [thread:$0]  %s10206_s9, 512, %s62_s25, [#allocation8], %s8721_s3, %s8721_s3, %s8722_s20  }
  0x33   :  { %8712 = dma.done.wait [#allocation6], 1152  }
  0x34   :  { %8713 = vsyncadd [#allocation6], 4294966144 }
  0x35   :  { %8714 = dma.done.wait [#allocation8], 1664  }
  0x36   :  { %8715 = vsyncadd [#allocation8], 4294965632  ;;  %vm165_vm0 = vcmask 1041408   ;;  %vm140_vm1 = vcmask 31744   ;;  %v96_v0 = vld [vmem:[%s10198_s1] sm:$0x3] }
  0x37   :  { %v80_v1 = vld [vmem:[%s10197_s0] sm:$0xf]  ;;  %v8836_v2 = vld [vmem:[%s10197_s0 + $0x4] sm:$0xf]  ;;  %8516 = vmatprep.subr.msk.bf16.mxu0 %vm165_vm0, %v96_v0  ;;  %v301_v3 = vsel %vm165_vm0, %v96_v0, 0  ;;  %v8540_v29 = vld [vmem:[%s10197_s0 + $0x8] sm:$0xff]  }
  0x38   :  { %v6553_v4 = vcombine.low %v80_v1, %v8836_v2  ;;  %v8844_v5 = vld [vmem:[%s10197_s0 + $0x8] sm:$0xf]  ;;  %v8849_v6 = vld [vmem:[%s10197_s0 + $0xc] sm:$0xf]  ;;  %7356 = vmatpush3.bf16.msra.mxu0 %v301_v3  ;;  %v6569_v8 = vld [vmem:[%s10198_s1 + $0x4] sm:$0x3] }
  0x39   :  { %v6554_v7 = vcombine.low %v8844_v5, %v8849_v6  ;;  %v8859_v9 = vld [vmem:[%s10197_s0 + $0x10] sm:$0xf]  ;;  %v8864_v10 = vld [vmem:[%s10197_s0 + $0x14] sm:$0xf]  ;;  %8517 = vmatprep.subr.msk.bf16.mxu0 %vm165_vm0, %v6569_v8  ;;  %v483_v11 = vsel %vm165_vm0, %v6569_v8, 0  ;;  %v8542_v31 = vld [vmem:[%s10197_s0 + $0x18] sm:$0xff]   ;;  %v6537_v51 = vcombine.low %v8836_v2, %v8844_v5 }
  0x3a   :  { %7357 = vmatprep.mubr.msk.bf16.mxu0 %vm140_vm1, %v6553_v4  ;;  %v6555_v12 = vcombine.low %v8859_v9, %v8864_v10  ;;  %v8875_v13 = vld [vmem:[%s10197_s0 + $0x18] sm:$0xf]  ;;  %v8880_v14 = vld [vmem:[%s10197_s0 + $0x1c] sm:$0xf]  ;;  %v8886_v15 = vld [vmem:[%s10197_s0 + $0x20] sm:$0xf]  ;;  %v6538_v53 = vcombine.low %v8849_v6, %v8859_v9 }
  0x3b   :  { %7358 = vmatmul.mubr.msk.bf16.vlgmr.msra.gmra.mrb[0].mxu0 %vm140_vm1, %v6554_v7  ;;  %v8891_v16 = vld [vmem:[%s10197_s0 + $0x24] sm:$0xf]  ;;  %v6556_v18 = vcombine.low %v8875_v13, %v8880_v14  ;;  %v8904_v20 = vld [vmem:[%s10197_s0 + $0x28] sm:$0xf]  ;;  %v8910_v21 = vld [vmem:[%s10197_s0 + $0x2c] sm:$0xf]  ;;  %7339 = vmatprep.mubr.msk.bf16.mxu1 %vm140_vm1, %v6537_v51  ;;  %v6539_v58 = vcombine.low %v8864_v10, %v8875_v13  ;;  %v6540_v59 = vcombine.low %v8880_v14, %v8886_v15 }
  0x3c   :  { %7374 = vmatpush3.bf16.msra.mxu0 %v483_v11  ;;  %7361 = vmatprep.mubr.msk.bf16.mxu0 %vm140_vm1, %v6555_v12  ;;  %v6586_v17 = vld [vmem:[%s10198_s1 + $0x6] sm:$0x3]  ;;  %v6557_v19 = vcombine.low %v8886_v15, %v8891_v16  ;;  %v8916_v22 = vld [vmem:[%s10197_s0 + $0x30] sm:$0xf]  ;;  %v8921_v23 = vld [vmem:[%s10197_s0 + $0x34] sm:$0xf]  ;;  %v6558_v24 = vcombine.low %v8904_v20, %v8910_v21  ;;  %v6541_v62 = vcombine.low %v8891_v16, %v8904_v20 }
  0x3d   :  { %8518 = vmatprep.subr.msk.bf16.mxu0 %vm165_vm0, %v6586_v17  ;;  %v6559_v25 = vcombine.low %v8916_v22, %v8921_v23  ;;  %v8931_v26 = vld [vmem:[%s10197_s0 + $0x38] sm:$0xf]  ;;  %v8937_v27 = vld [vmem:[%s10197_s0 + $0x3c] sm:$0xf]  ;;  %v8541_v30 = vld [vmem:[%s10197_s0 + $0x10] sm:$0xff]   ;;  %v681_v32 = vsel %vm165_vm0, %v6586_v17, 0  ;;  %v6542_v63 = vcombine.low %v8910_v21, %v8916_v22 }
  0x3e   :  { %v6560_v28 = vcombine.low %v8931_v26, %v8937_v27  ;;  %v6603_v33 = vld [vmem:[%s10198_s1 + $0x8] sm:$0x3]  ;;  %v8543_v34 = vld [vmem:[%s10197_s0 + $0x20] sm:$0xff]   ;;  %v8545_v36 = vld [vmem:[%s10197_s0 + $0x30] sm:$0xff]   ;;  %v6543_v2 = vcombine.low %v8921_v23, %v8931_v26  ;;  %vm1825_vm2 = vcmask 130048   ;;  %v8723_v51 = vmov 0  }
  0x3f   :  { %v8544_v35 = vld [vmem:[%s10197_s0 + $0x28] sm:$0xff]   ;;  %v8546_v37 = vld [vmem:[%s10197_s0 + $0x38] sm:$0xff]   ;;  %v8547_v38 = vld [vmem:[%s10197_s0 + $0x40] sm:$0xff]   ;;  %v879_v40 = vsel %vm165_vm0, %v6603_v33, 0  ;;  %1829 = vst.msk [vmem:[#allocation2 + $0x18] sm:$0xff] %vm1825_vm2, %v8723_v51  ;;  %vm1878_vm3 = vcmask 1043456  }
  0x40   :  { %v8548_v39 = vld [vmem:[%s10197_s0 + $0xc] sm:$0xff]   ;;  %v8549_v41 = vld [vmem:[%s10197_s0 + $0x14] sm:$0xff]   ;;  %v8550_v42 = vld [vmem:[%s10197_s0 + $0x1c] sm:$0xff]   ;;  %1826 = vst.msk [vmem:[#allocation2] sm:$0xff] %vm1825_vm2, %v8723_v51  ;;  %vm4771_vm4 = vcmask 261120  }
  0x41   :  { %v6620_v43 = vld [vmem:[%s10198_s1 + $0xa] sm:$0x3]  ;;  %v8552_v45 = vld [vmem:[%s10197_s0 + $0x2c] sm:$0xff]   ;;  %v8553_v46 = vld [vmem:[%s10197_s0 + $0x34] sm:$0xff]   ;;  %1827 = vst.msk [vmem:[#allocation2 + $0x8] sm:$0xff] %vm1825_vm2, %v8723_v51 }
  0x42   :  { %v8551_v44 = vld [vmem:[%s10197_s0 + $0x24] sm:$0xff]   ;;  %v8554_v47 = vld [vmem:[%s10197_s0 + $0x3c] sm:$0xff]   ;;  %v8556_v49 = vld [vmem:[%s10197_s0 + $0x10] sm:$0xff]   ;;  %v1077_v56 = vsel %vm165_vm0, %v6620_v43, 0  ;;  %1828 = vst.msk [vmem:[#allocation2 + $0x10] sm:$0xff] %vm1825_vm2, %v8723_v51 }
  0x43   :  { %7362 = vmatmul.mubr.msk.bf16.gmra.mrb[4].mxu0 %vm140_vm1, %v6556_v18  ;;  %v8555_v48 = vld [vmem:[%s10197_s0 + $0x44] sm:$0xff]   ;;  %v6536_v50 = vld [vmem:[%s10198_s1 + $0x2] sm:$0x3]  ;;  %v8557_v54 = vld [vmem:[%s10197_s0 + $0x18] sm:$0xff]   ;;  %1830 = vst.msk [vmem:[#allocation2 + $0x20] sm:$0xff] %vm1825_vm2, %v8723_v51 }
  0x44   :  { %7365 = vmatprep.mubr.msk.bf16.mxu0 %vm140_vm1, %v6557_v19  ;;  %8515 = vmatprep.subr.msk.bf16.mxu1 %vm165_vm0, %v6536_v50  ;;  %v167_v52 = vsel %vm165_vm0, %v6536_v50, 0  ;;  %v8558_v55 = vld [vmem:[%s10197_s0 + $0x20] sm:$0xff]   ;;  %v6637_v57 = vld [vmem:[%s10198_s1 + $0xc] sm:$0x3]  ;;  %v8560_v61 = vld [vmem:[%s10197_s0 + $0x30] sm:$0xff]   ;;  %1831 = vst.msk [vmem:[#allocation2 + $0x28] sm:$0xff] %vm1825_vm2, %v8723_v51 }
  0x45   :  { %7338 = vmatpush3.bf16.msra.mxu1 %v167_v52  ;;  %v8559_v60 = vld [vmem:[%s10197_s0 + $0x28] sm:$0xff]   ;;  %v8561_v0 = vld [vmem:[%s10197_s0 + $0x38] sm:$0xff]   ;;  %v8562_v1 = vld [vmem:[%s10197_s0 + $0x40] sm:$0xff]   ;;  %v1275_v10 = vsel %vm165_vm0, %v6637_v57, 0  ;;  %1832 = vst.msk [vmem:[#allocation2 + $0x30] sm:$0xff] %vm1825_vm2, %v8723_v51 }
  0x46   :  { %v97_v3 = vld [vmem:[%s10197_s0 + $0x40] sm:$0xf]  ;;  %v8563_v5 = vld [vmem:[%s10197_s0 + $0x48] sm:$0xff]   ;;  %v8564_v6 = vld [vmem:[%s10197_s0 + $0x14] sm:$0xff]   ;;  %1833 = vst.msk [vmem:[#allocation2 + $0x38] sm:$0xff] %vm1825_vm2, %v8723_v51 }
  0x47   :  { %v6544_v4 = vcombine.low %v8937_v27, %v97_v3  ;;  %v8604_v7 = vld [vmem:[#allocation5 + $0x8] sm:$0xff]   ;;  %v8565_v8 = vld [vmem:[%s10197_s0 + $0x1c] sm:$0xff]   ;;  %v8568_v13 = vld [vmem:[%s10197_s0 + $0x34] sm:$0xff]   ;;  %1834 = vst.msk [vmem:[#allocation2 + $0x40] sm:$0xff] %vm1825_vm2, %v8723_v51 }
  0x48   :  { %7340 = vmatmul.mubr.msk.bf16.vlgmr.msra.gmra.mrb[0].mxu1 %vm140_vm1, %v6538_v53  ;;  %7499 = vmatprep.subr.bf16.mxu1 %v8604_v7  ;;  %v8566_v9 = vld [vmem:[%s10197_s0 + $0x24] sm:$0xff]   ;;  %v6654_v11 = vld [vmem:[%s10198_s1 + $0xe] sm:$0x3]  ;;  %v8569_v14 = vld [vmem:[%s10197_s0 + $0x3c] sm:$0xff]   ;;  %1835 = vst.msk [vmem:[#allocation2 + $0x48] sm:$0xff] %vm1825_vm2, %v8723_v51 }
  0x49   :  { %7343 = vmatprep.mubr.msk.bf16.mxu1 %vm140_vm1, %v6539_v58  ;;  %7500 = vmatpush3.bf16.msra.mxu1 %v8604_v7  ;;  %v8567_v12 = vld [vmem:[%s10197_s0 + $0x2c] sm:$0xff]   ;;  %v8570_v15 = vld [vmem:[%s10197_s0 + $0x44] sm:$0xff]   ;;  %v8572_v17 = vld [vmem:[%s10197_s0 + $0x18] sm:$0xff]   ;;  %v1473_v20 = vsel %vm165_vm0, %v6654_v11, 0  ;;  %1836 = vst.msk [vmem:[#allocation2 + $0x50] sm:$0xff] %vm1825_vm2, %v8723_v51 }
  0x4a   :  { %v8571_v16 = vld [vmem:[%s10197_s0 + $0x4c] sm:$0xff]   ;;  %v8573_v18 = vld [vmem:[%s10197_s0 + $0x20] sm:$0xff]   ;;  %v8576_v23 = vld [vmem:[%s10197_s0 + $0x38] sm:$0xff]   ;;  %1837 = vst.msk [vmem:[#allocation2 + $0x58] sm:$0xff] %vm1825_vm2, %v8723_v51 }
  0x4b   :  { %7366 = vmatmul.mubr.msk.bf16.gmra.mrb[8].mxu0 %vm140_vm1, %v6558_v24  ;;  %v8574_v19 = vld [vmem:[%s10197_s0 + $0x28] sm:$0xff]   ;;  %v6671_v21 = vld [vmem:[%s10198_s1 + $0x10] sm:$0x3]  ;;  %v8577_v24 = vld [vmem:[%s10197_s0 + $0x40] sm:$0xff]   ;;  %3299 = vst.msk [vmem:[#allocation3] sm:$0xff] %vm1825_vm2, %v8723_v51 }
  0x4c   :  { %7369 = vmatprep.mubr.msk.bf16.mxu0 %vm140_vm1, %v6559_v25  ;;  %v8575_v22 = vld [vmem:[%s10197_s0 + $0x30] sm:$0xff]   ;;  %v8578_v25 = vld [vmem:[%s10197_s0 + $0x48] sm:$0xff]   ;;  %v8580_v27 = vld [vmem:[%s10197_s0 + $0x1c] sm:$0xff]   ;;  %3300 = vst.msk [vmem:[#allocation3 + $0x8] sm:$0xff] %vm1825_vm2, %v8723_v51 }
  0x4d   :  { %v8579_v26 = vld [vmem:[%s10197_s0 + $0x50] sm:$0xff]   ;;  %3301 = vst.msk [vmem:[#allocation3 + $0x10] sm:$0xff] %vm1825_vm2, %v8723_v51  ;;  %3302 = vst.msk [vmem:[#allocation3 + $0x18] sm:$0xff] %vm1825_vm2, %v8723_v51  ;;  %v1864_v58 = vld [vmem:[#allocation2] sm:$0xf0] }
  0x4e   :  { %3303 = vst.msk [vmem:[#allocation3 + $0x20] sm:$0xff] %vm1825_vm2, %v8723_v51  ;;  %3304 = vst.msk [vmem:[#allocation3 + $0x28] sm:$0xff] %vm1825_vm2, %v8723_v51 }
  0x4f   :  { %3305 = vst.msk [vmem:[#allocation3 + $0x30] sm:$0xff] %vm1825_vm2, %v8723_v51  ;;  %3306 = vst.msk [vmem:[#allocation3 + $0x38] sm:$0xff] %vm1825_vm2, %v8723_v51 }
  0x50   :  { %7344 = vmatmul.mubr.msk.bf16.gmra.mrb[4].mxu1 %vm140_vm1, %v6540_v59  ;;  %3307 = vst.msk [vmem:[#allocation3 + $0x40] sm:$0xff] %vm1825_vm2, %v8723_v51  ;;  %3308 = vst.msk [vmem:[#allocation3 + $0x48] sm:$0xff] %vm1825_vm2, %v8723_v51  ;;  %v1879_v59 = vrot.slane %v1864_v58, 4 }
  0x51   :  { %7347 = vmatprep.mubr.msk.bf16.mxu1 %vm140_vm1, %v6541_v62  ;;  %3309 = vst.msk [vmem:[#allocation3 + $0x50] sm:$0xff] %vm1825_vm2, %v8723_v51  ;;  %3310 = vst.msk [vmem:[#allocation3 + $0x58] sm:$0xff] %vm1825_vm2, %v8723_v51 }
  0x52   :  { %4775 = vst.msk [vmem:[#allocation4 + $0x18] sm:$0xff] %vm4771_vm4, %v8723_v51  ;;  %4772 = vst.msk [vmem:[#allocation4] sm:$0xff] %vm4771_vm4, %v8723_v51 }
  0x53   :  { %7370 = vmatmul.mubr.msk.bf16.gmra.mrb[12].mxu0 %vm140_vm1, %v6560_v28  ;;  %v8581_v28 = vld [vmem:[%s10197_s0 + $0x24] sm:$0xff]   ;;  %4773 = vst.msk [vmem:[#allocation4 + $0x8] sm:$0xff] %vm4771_vm4, %v8723_v51  ;;  %4774 = vst.msk [vmem:[#allocation4 + $0x10] sm:$0xff] %vm4771_vm4, %v8723_v51 }
  0x54   :  { %7375 = vmatprep.mubr.msk.bf16.mxu0 %vm140_vm1, %v8540_v29  ;;  %v8582_v29 = vld [vmem:[%s10197_s0 + $0x2c] sm:$0xff]   ;;  %4776 = vst.msk [vmem:[#allocation4 + $0x20] sm:$0xff] %vm4771_vm4, %v8723_v51  ;;  %4777 = vst.msk [vmem:[#allocation4 + $0x28] sm:$0xff] %vm4771_vm4, %v8723_v51 }
  0x55   :  { %4778 = vst.msk [vmem:[#allocation4 + $0x30] sm:$0xff] %vm4771_vm4, %v8723_v51  ;;  %4779 = vst.msk [vmem:[#allocation4 + $0x38] sm:$0xff] %vm4771_vm4, %v8723_v51 }
  0x56   :  { %4780 = vst.msk [vmem:[#allocation4 + $0x40] sm:$0xff] %vm4771_vm4, %v8723_v51  ;;  %4781 = vst.msk [vmem:[#allocation4 + $0x48] sm:$0xff] %vm4771_vm4, %v8723_v51 }
  0x57   :  { %4782 = vst.msk [vmem:[#allocation4 + $0x50] sm:$0xff] %vm4771_vm4, %v8723_v51  ;;  %4783 = vst.msk [vmem:[#allocation4 + $0x58] sm:$0xff] %vm4771_vm4, %v8723_v51 }
  0x58   :  { %7348 = vmatmul.mubr.msk.bf16.gmra.mrb[8].mxu1 %vm140_vm1, %v6542_v63 }
  0x59   :  { %7351 = vmatprep.mubr.msk.bf16.mxu1 %vm140_vm1, %v6543_v2  ;;  %v9294_v2 = vld [vmem:[#allocation5] sm:$0xff]  }
  0x5a   :  { %7517 = vmatprep.subr.bf16.mxu1 %v9294_v2 }
  0x5b   :  { %7376 = vmatmul.mubr.msk.bf16.vlgmr.msra.gmra.mrb[0].mxu0 %vm140_vm1, %v8541_v30  ;;  %v1671_v30 = vsel %vm165_vm0, %v6671_v21, 0 }
  0x5c   :  { %7392 = vmatpush3.bf16.msra.mxu0 %v681_v32  ;;  %7379 = vmatprep.mubr.msk.bf16.mxu0 %vm140_vm1, %v8542_v31  ;;  %v8583_v31 = vld [vmem:[%s10197_s0 + $0x34] sm:$0xff]   ;;  %v8584_v32 = vld [vmem:[%s10197_s0 + $0x3c] sm:$0xff]  }
  0x5d   :  { %8519 = vmatprep.subr.msk.bf16.mxu0 %vm165_vm0, %v6603_v33  ;;  %v8585_v33 = vld [vmem:[%s10197_s0 + $0x44] sm:$0xff]  }
  0x60   :  { %7352 = vmatmul.mubr.msk.bf16.gmra.mrb[12].mxu1 %vm140_vm1, %v6544_v4  ;;  %v9300_v4 = vld [vmem:[%s10199_s2] ss:$0 sm:$0xff] }
  0x63   :  { %7380 = vmatmul.mubr.msk.bf16.gmra.mrb[4].mxu0 %vm140_vm1, %v8543_v34  ;;  %v8586_v34 = vld [vmem:[%s10197_s0 + $0x4c] sm:$0xff]  }
  0x64   :  { %7383 = vmatprep.mubr.msk.bf16.mxu0 %vm140_vm1, %v8544_v35  ;;  %v8587_v35 = vld [vmem:[%s10197_s0 + $0x54] sm:$0xff]  }
  0x6b   :  { %7384 = vmatmul.mubr.msk.bf16.gmra.mrb[8].mxu0 %vm140_vm1, %v8545_v36  ;;  %v8590_v36 = vld [vmem:[%s10197_s0 + $0x20] sm:$0xff]  }
  0x6c   :  { %7387 = vmatprep.mubr.msk.bf16.mxu0 %vm140_vm1, %v8546_v37  ;;  %v8591_v37 = vld [vmem:[%s10197_s0 + $0x28] sm:$0xff]  }
  0x73   :  { %7388 = vmatmul.mubr.msk.bf16.gmra.mrb[12].mxu0 %vm140_vm1, %v8547_v38  ;;  %v8594_v38 = vld [vmem:[%s10197_s0 + $0x30] sm:$0xff]  }
  0x74   :  { %7393 = vmatprep.mubr.msk.bf16.mxu0 %vm140_vm1, %v8548_v39  ;;  %v8595_v39 = vld [vmem:[%s10197_s0 + $0x38] sm:$0xff]  }
  0x7b   :  { %7394 = vmatmul.mubr.msk.bf16.vlgmr.msra.gmra.mrb[0].mxu0 %vm140_vm1, %v8549_v41  ;;  %v8599_v41 = vld [vmem:[%s10197_s0 + $0x48] sm:$0xff]  }
  0x7c   :  { %7410 = vmatpush3.bf16.msra.mxu0 %v879_v40  ;;  %7397 = vmatprep.mubr.msk.bf16.mxu0 %vm140_vm1, %v8550_v42  ;;  %v8598_v40 = vld [vmem:[%s10197_s0 + $0x40] sm:$0xff]   ;;  %v8602_v42 = vld [vmem:[%s10197_s0 + $0x50] sm:$0xff]  }
  0x7d   :  { %8520 = vmatprep.subr.msk.bf16.mxu0 %vm165_vm0, %v6620_v43  ;;  %v8603_v43 = vld [vmem:[%s10197_s0 + $0x58] sm:$0xff]  }
  0x83   :  { %7398 = vmatmul.mubr.msk.bf16.gmra.mrb[4].mxu0 %vm140_vm1, %v8551_v44 }
  0x84   :  { %7401 = vmatprep.mubr.msk.bf16.mxu0 %vm140_vm1, %v8552_v45 }
  0x8b   :  { %7402 = vmatmul.mubr.msk.bf16.gmra.mrb[8].mxu0 %vm140_vm1, %v8553_v46 }
  0x8c   :  { %7405 = vmatprep.mubr.msk.bf16.mxu0 %vm140_vm1, %v8554_v47 }
  0x93   :  { %7406 = vmatmul.mubr.msk.bf16.gmra.mrb[12].mxu0 %vm140_vm1, %v8555_v48 }
  0x94   :  { %7411 = vmatprep.mubr.msk.bf16.mxu0 %vm140_vm1, %v8556_v49 }
  0x9b   :  { %7412 = vmatmul.mubr.msk.bf16.vlgmr.msra.gmra.mrb[0].mxu0 %vm140_vm1, %v8557_v54 }
  0x9c   :  { %7428 = vmatpush3.bf16.msra.mxu0 %v1077_v56  ;;  %7415 = vmatprep.mubr.msk.bf16.mxu0 %vm140_vm1, %v8558_v55 }
  0x9d   :  { %8521 = vmatprep.subr.msk.bf16.mxu0 %vm165_vm0, %v6637_v57  ;;  %v9279_v57 = vld [vmem:[#allocation2 + $0x8] sm:$0xff] }
  0xa3   :  { %7416 = vmatmul.mubr.msk.bf16.gmra.mrb[4].mxu0 %vm140_vm1, %v8559_v60  ;;  %v1880_v60 = vrot.slane %v9279_v57, 4 }
  0xa4   :  { %7419 = vmatprep.mubr.msk.bf16.mxu0 %vm140_vm1, %v8560_v61 }
  0xa5   :  { %v1881_v62 = vsel %vm1878_vm3, %v1879_v59, %v1880_v60  ;;  %v8606_v59 = vld [vmem:[#allocation5 + $0x10] sm:$0xff]  }
  0xa6   :  { %7501 = vmatprep.mubr.msk.bf16.mxu1 %vm1825_vm2, %v1881_v62 }
  0xab   :  { %7420 = vmatmul.mubr.msk.bf16.gmra.mrb[8].mxu0 %vm140_vm1, %v8561_v0 }
  0xac   :  { %7423 = vmatprep.mubr.msk.bf16.mxu0 %vm140_vm1, %v8562_v1 }
  0xb3   :  { %7424 = vmatmul.mubr.msk.bf16.gmra.mrb[12].mxu0 %vm140_vm1, %v8563_v5 }
  0xb4   :  { %7429 = vmatprep.mubr.msk.bf16.mxu0 %vm140_vm1, %v8564_v6 }
  0xbb   :  { %7430 = vmatmul.mubr.msk.bf16.vlgmr.msra.gmra.mrb[0].mxu0 %vm140_vm1, %v8565_v8 }
  0xbc   :  { %7446 = vmatpush3.bf16.msra.mxu0 %v1275_v10  ;;  %7433 = vmatprep.mubr.msk.bf16.mxu0 %vm140_vm1, %v8566_v9 }
  0xbd   :  { %8522 = vmatprep.subr.msk.bf16.mxu0 %vm165_vm0, %v6654_v11 }
  0xc3   :  { %7434 = vmatmul.mubr.msk.bf16.gmra.mrb[4].mxu0 %vm140_vm1, %v8567_v12 }
  0xc4   :  { %7437 = vmatprep.mubr.msk.bf16.mxu0 %vm140_vm1, %v8568_v13 }
  0xcb   :  { %7438 = vmatmul.mubr.msk.bf16.gmra.mrb[8].mxu0 %vm140_vm1, %v8569_v14 }
  0xcc   :  { %7441 = vmatprep.mubr.msk.bf16.mxu0 %vm140_vm1, %v8570_v15 }
  0xd3   :  { %7442 = vmatmul.mubr.msk.bf16.gmra.mrb[12].mxu0 %vm140_vm1, %v8571_v16 }
  0xd4   :  { %7447 = vmatprep.mubr.msk.bf16.mxu0 %vm140_vm1, %v8572_v17 }
  0xdb   :  { %7448 = vmatmul.mubr.msk.bf16.vlgmr.msra.gmra.mrb[0].mxu0 %vm140_vm1, %v8573_v18 }
  0xdc   :  { %7464 = vmatpush3.bf16.msra.mxu0 %v1473_v20  ;;  %7451 = vmatprep.mubr.msk.bf16.mxu0 %vm140_vm1, %v8574_v19 }
  0xdd   :  { %8523 = vmatprep.subr.msk.bf16.mxu0 %vm165_vm0, %v6671_v21 }
  0xe3   :  { %7452 = vmatmul.mubr.msk.bf16.gmra.mrb[4].mxu0 %vm140_vm1, %v8575_v22 }
  0xe4   :  { %7455 = vmatprep.mubr.msk.bf16.mxu0 %vm140_vm1, %v8576_v23 }
  0xeb   :  { %7456 = vmatmul.mubr.msk.bf16.gmra.mrb[8].mxu0 %vm140_vm1, %v8577_v24 }
  0xec   :  { %7459 = vmatprep.mubr.msk.bf16.mxu0 %vm140_vm1, %v8578_v25 }
  0xf3   :  { %7460 = vmatmul.mubr.msk.bf16.gmra.mrb[12].mxu0 %vm140_vm1, %v8579_v26 }
  0xf4   :  { %7465 = vmatprep.mubr.msk.bf16.mxu0 %vm140_vm1, %v8580_v27 }
  0xfb   :  { %7466 = vmatmul.mubr.msk.bf16.vlgmr.msra.gmra.mrb[0].mxu0 %vm140_vm1, %v8581_v28 }
  0xfc   :  { %7482 = vmatpush3.bf16.msra.mxu0 %v1671_v30  ;;  %7469 = vmatprep.mubr.msk.bf16.mxu0 %vm140_vm1, %v8582_v29 }
 0x103   :  { %7470 = vmatmul.mubr.msk.bf16.gmra.mrb[4].mxu0 %vm140_vm1, %v8583_v31 }
 0x104   :  { %7473 = vmatprep.mubr.msk.bf16.mxu0 %vm140_vm1, %v8584_v32 }
 0x10b   :  { %7474 = vmatmul.mubr.msk.bf16.gmra.mrb[8].mxu0 %vm140_vm1, %v8585_v33 }
 0x10c   :  { %7477 = vmatprep.mubr.msk.bf16.mxu0 %vm140_vm1, %v8586_v34 }
 0x113   :  { %7478 = vmatmul.mubr.msk.bf16.gmra.mrb[12].mxu0 %vm140_vm1, %v8587_v35 }
 0x114   :  { %7483 = vmatprep.mubr.msk.bf16.mxu0 %vm140_vm1, %v8590_v36 }
 0x11b   :  { %7484 = vmatmul.mubr.msk.bf16.vlgmr.msra.gmra.mrb[0].mxu0 %vm140_vm1, %v8591_v37  ;;  %v7341_v44 = vpop.f32.mrb[0].mxu1 }
 0x11c   :  { %7487 = vmatprep.mubr.msk.bf16.mxu0 %vm140_vm1, %v8594_v38  ;;  %v203_v45 = vpop.f32.mrb[1].mxu1 }
 0x11d   :  { %v7342_v46 = vpop.f32.mrb[2].mxu1 }
 0x11e   :  { %v206_v47 = vpop.f32.mrb[3].mxu1 }
 0x123   :  { %7488 = vmatmul.mubr.msk.bf16.gmra.mrb[4].mxu0 %vm140_vm1, %v8595_v39  ;;  %v9223_v48 = vpop.f32.mrb[4].mxu1 }
 0x124   :  { %7491 = vmatprep.mubr.msk.bf16.mxu0 %vm140_vm1, %v8598_v40  ;;  %v9225_v49 = vpop.f32.mrb[5].mxu1 }
 0x125   :  { %v9227_v50 = vpop.f32.mrb[6].mxu1 }
 0x126   :  { %v222_v52 = vpop.f32.mrb[7].mxu1 }
 0x12b   :  { %7492 = vmatmul.mubr.msk.bf16.gmra.mrb[8].mxu0 %vm140_vm1, %v8599_v41  ;;  %v7349_v53 = vpop.f32.mrb[8].mxu1 }
 0x12c   :  { %7495 = vmatprep.mubr.msk.bf16.mxu0 %vm140_vm1, %v8602_v42  ;;  %v235_v54 = vpop.f32.mrb[9].mxu1 }
 0x12d   :  { %v7350_v55 = vpop.f32.mrb[10].mxu1 }
 0x12e   :  { %v9277_v56 = vpop.f32.mrb[11].mxu1 }
 0x133   :  { %7496 = vmatmul.mubr.msk.bf16.gmra.mrb[12].mxu0 %vm140_vm1, %v8603_v43  ;;  %v9282_v61 = vpop.f32.mrb[12].mxu1 }
 0x134   :  { %v9288_v63 = vpop.f32.mrb[13].mxu1 }
 0x135   :  { %v9290_v0 = vpop.f32.mrb[14].mxu1 }
 0x136   :  { %v9292_v1 = vpop.f32.mrb[15].mxu1 }
 0x1ee   :  { %v7485_v3 = vpop.f32.mrb[0].mxu0 }
 0x1ef   :  { %v8003_v5 = vadd.f32 %v7485_v3, %v7341_v44  ;;  %v1707_v6 = vpop.f32.mrb[1].mxu0 }
 0x1f0   :  { %v8004_v7 = vadd.f32 %v1707_v6, %v203_v45  ;;  %v7486_v8 = vpop.f32.mrb[2].mxu0 }
 0x1f1   :  { %v1795_v9 = vadd.f32 %v8003_v5, %v9300_v4  ;;  %v8005_v10 = vadd.f32 %v7486_v8, %v7342_v46  ;;  %v1710_v11 = vpop.f32.mrb[3].mxu0 }
 0x1f2   :  { %v1793_v12 = vadd.f32 %v8004_v7, %v9300_v4  ;;  %v8006_v13 = vadd.f32 %v1710_v11, %v206_v47 }
 0x1f3   :  { %v1796_v14 = vadd.f32 %v8005_v10, %v9300_v4  ;;  %v1811_v16 = vmax.f32 %v1795_v9, 0.0 }
 0x1f4   :  { %v1794_v15 = vadd.f32 %v8006_v13, %v9300_v4  ;;  %v1809_v18 = vmax.f32 %v1793_v12, 0.0 }
 0x1f5   :  { %v1812_v17 = vmax.f32 %v1796_v14, 0.0 }
 0x1f6   :  { %v1810_v19 = vmax.f32 %v1794_v15, 0.0  ;;  %v7489_v20 = vpop.f32.mrb[4].mxu0 }
 0x1f7   :  { %v1839_v21 = vpack.c.bf16 %v1812_v17, %v1811_v16  ;;  %v8007_v22 = vadd.f32 %v7489_v20, %v9223_v48  ;;  %v1723_v23 = vpop.f32.mrb[5].mxu0 }
 0x1f8   :  { %v1838_v24 = vpack.c.bf16 %v1810_v19, %v1809_v18  ;;  %v8008_v25 = vadd.f32 %v1723_v23, %v9225_v49  ;;  %v7490_v26 = vpop.f32.mrb[6].mxu0 }
 0x1f9   :  { %1847 = vst.msk [vmem:[#allocation2 + $0x18] sm:$0xff] %vm1825_vm2, %v1839_v21  ;;  %v1799_v27 = vadd.f32 %v8007_v22, %v9300_v4  ;;  %v8009_v28 = vadd.f32 %v7490_v26, %v9227_v50  ;;  %v1726_v29 = vpop.f32.mrb[7].mxu0 }
 0x1fa   :  { %1846 = vst.msk [vmem:[#allocation2 + $0x10] sm:$0xff] %vm1825_vm2, %v1838_v24  ;;  %v1797_v30 = vadd.f32 %v8008_v25, %v9300_v4  ;;  %v8010_v31 = vadd.f32 %v1726_v29, %v222_v52 }
 0x1fb   :  { %v1800_v32 = vadd.f32 %v8009_v28, %v9300_v4  ;;  %v1815_v34 = vmax.f32 %v1799_v27, 0.0 }
 0x1fc   :  { %v1798_v33 = vadd.f32 %v8010_v31, %v9300_v4  ;;  %v1813_v36 = vmax.f32 %v1797_v30, 0.0 }
 0x1fd   :  { %v1816_v35 = vmax.f32 %v1800_v32, 0.0 }
 0x1fe   :  { %v1814_v37 = vmax.f32 %v1798_v33, 0.0  ;;  %v7493_v38 = vpop.f32.mrb[8].mxu0 }
 0x1ff   :  { %v1841_v39 = vpack.c.bf16 %v1816_v35, %v1815_v34  ;;  %v8011_v40 = vadd.f32 %v7493_v38, %v7349_v53  ;;  %v1739_v41 = vpop.f32.mrb[9].mxu0  ;;  %v1854_v35 = vld [vmem:[#allocation2] sm:$0xff] }
 0x200   :  { %v1840_v42 = vpack.c.bf16 %v1814_v37, %v1813_v36  ;;  %v8012_v43 = vadd.f32 %v1739_v41, %v235_v54  ;;  %v7494_v44 = vpop.f32.mrb[10].mxu0  ;;  %v9315_v45 = vld [vmem:[#allocation2 + $0x18] sm:$0xff]  ;;  %v8608_v38 = vld [vmem:[#allocation5 + $0x20] sm:$0xff]  }
 0x201   :  { %1849 = vst.msk [vmem:[#allocation2 + $0x28] sm:$0xff] %vm1825_vm2, %v1841_v39  ;;  %v1803_v46 = vadd.f32 %v8011_v40, %v9300_v4  ;;  %v8013_v47 = vadd.f32 %v7494_v44, %v7350_v55  ;;  %v1742_v48 = vpop.f32.mrb[11].mxu0  ;;  %v9319_v49 = vld [vmem:[#allocation2 + $0x10] sm:$0xff]  ;;  %v9322_v50 = vrot.slane %v9315_v45, 4  ;;  %v8607_v37 = vld [vmem:[#allocation5 + $0x18] sm:$0xff]  }
 0x202   :  { %1848 = vst.msk [vmem:[#allocation2 + $0x20] sm:$0xff] %vm1825_vm2, %v1840_v42  ;;  %v1801_v52 = vadd.f32 %v8012_v43, %v9300_v4  ;;  %v8014_v53 = vadd.f32 %v1742_v48, %v9277_v56  ;;  %v9328_v54 = vrot.slane %v9319_v49, 4  ;;  %v8609_v42 = vld [vmem:[#allocation5 + $0x28] sm:$0xff]  }
 0x203   :  { %v1804_v58 = vadd.f32 %v8013_v47, %v9300_v4  ;;  %v1819_v5 = vmax.f32 %v1803_v46, 0.0 }
 0x204   :  { %v1802_v55 = vadd.f32 %v8014_v53, %v9300_v4  ;;  %v1883_v62 = vsel %vm1878_vm3, %v1880_v60, %v9328_v54  ;;  %v9339_v3 = vsel %vm1878_vm3, %v9328_v54, %v9322_v50  ;;  %v1817_v6 = vmax.f32 %v1801_v52, 0.0  ;;  %v8610_v52 = vld [vmem:[#allocation5 + $0x30] sm:$0xff]  }
 0x205   :  { %v1820_v56 = vmax.f32 %v1804_v58, 0.0  ;;  %7502 = vmatmul.mubr.msk.bf16.vlgmr.msra.gmra.mrb[16].mxu1 %vm1825_vm2, %v1883_v62 }
 0x206   :  { %v1818_v7 = vmax.f32 %v1802_v55, 0.0  ;;  %v7497_v8 = vpop.f32.mrb[12].mxu0  ;;  %7505 = vmatprep.mubr.msk.bf16.mxu1 %vm1825_vm2, %v9339_v3  ;;  %7518 = vmatpush3.bf16.msra.mxu1 %v9294_v2  ;;  %v8611_v55 = vld [vmem:[#allocation5 + $0x38] sm:$0xff]  }
 0x207   :  { %v1843_v9 = vpack.c.bf16 %v1820_v56, %v1819_v5  ;;  %v8015_v60 = vadd.f32 %v7497_v8, %v9282_v61  ;;  %v1755_v10 = vpop.f32.mrb[13].mxu0  ;;  %7535 = vmatprep.subr.bf16.mxu1 %v8606_v59  ;;  %v2785_v8 = vld [vmem:[#allocation2 + $0x50] sm:$0xff] }
 0x208   :  { %v1842_v11 = vpack.c.bf16 %v1818_v7, %v1817_v6  ;;  %v8016_v12 = vadd.f32 %v1755_v10, %v9288_v63  ;;  %v7498_v13 = vpop.f32.mrb[14].mxu0  ;;  %v9347_v14 = vld [vmem:[#allocation2 + $0x28] sm:$0xff]  ;;  %v8612_v6 = vld [vmem:[#allocation5 + $0x40] sm:$0xff]   ;;  %v2940_v10 = vld [vmem:[#allocation2 + $0x58] sm:$0xf] }
 0x209   :  { %1851 = vst.msk [vmem:[#allocation2 + $0x38] sm:$0xff] %vm1825_vm2, %v1843_v9  ;;  %v1807_v15 = vadd.f32 %v8015_v60, %v9300_v4  ;;  %v8017_v16 = vadd.f32 %v7498_v13, %v9290_v0  ;;  %v1758_v17 = vpop.f32.mrb[15].mxu0  ;;  %v9352_v18 = vld [vmem:[#allocation2 + $0x20] sm:$0xff]  ;;  %v1888_v2 = vrot.slane %v9347_v14, 4  ;;  %v2966_v60 = vrot.slane %v2785_v8, 4 }
 0x20a   :  { %1850 = vst.msk [vmem:[#allocation2 + $0x30] sm:$0xff] %vm1825_vm2, %v1842_v11  ;;  %v1805_v61 = vadd.f32 %v8016_v12, %v9300_v4  ;;  %v8018_v63 = vadd.f32 %v1758_v17, %v9292_v1  ;;  %v9359_v19 = vrot.slane %v9352_v18, 4  ;;  %v2968_v12 = vrot.slane %v2940_v10, 4  ;;  %v3337_v17 = vld [vmem:[#allocation3] sm:$0xf0] }
 0x20b   :  { %v1808_v20 = vadd.f32 %v8017_v16, %v9300_v4  ;;  %v1823_v23 = vmax.f32 %v1807_v15, 0.0  ;;  %v3113_v15 = vld [vmem:[#allocation2 + $0x58] sm:$0xff]  ;;  %v9520_v16 = vld [vmem:[#allocation3 + $0x8] sm:$0xff] }
 0x20c   :  { %v1806_v21 = vadd.f32 %v8018_v63, %v9300_v4  ;;  %v9366_v0 = vsel %vm1878_vm3, %v9322_v50, %v9359_v19  ;;  %v9370_v22 = vsel %vm1878_vm3, %v9359_v19, %v1888_v2  ;;  %v1821_v1 = vmax.f32 %v1805_v61, 0.0  ;;  %v8614_v61 = vld [vmem:[#allocation7] sm:$0xff]   ;;  %v9528_v63 = vld [vmem:[%s10201_s4] ss:$0 sm:$0xff] }
 0x20d   :  { %v1824_v24 = vmax.f32 %v1808_v20, 0.0  ;;  %7506 = vmatmul.mubr.msk.bf16.gmra.mrb[20].mxu1 %vm1825_vm2, %v9366_v0  ;;  %v2969_v13 = vsel %vm1878_vm3, %v2966_v60, %v2968_v12 }
 0x20e   :  { %v1822_v25 = vmax.f32 %v1806_v21, 0.0  ;;  %7509 = vmatprep.mubr.msk.bf16.mxu1 %vm1825_vm2, %v9370_v22 }
 0x20f   :  { %v1845_v4 = vpack.c.bf16 %v1824_v24, %v1823_v23 }
 0x210   :  { %v1844_v26 = vpack.c.bf16 %v1822_v25, %v1821_v1  ;;  %v9376_v27 = vld [vmem:[#allocation2 + $0x38] sm:$0xff] }
 0x211   :  { %1853 = vst.msk [vmem:[#allocation2 + $0x48] sm:$0xff] %vm1825_vm2, %v1845_v4  ;;  %v9379_v28 = vld [vmem:[#allocation2 + $0x30] sm:$0xff]  ;;  %v1892_v29 = vrot.slane %v9376_v27, 4 }
 0x212   :  { %1852 = vst.msk [vmem:[#allocation2 + $0x40] sm:$0xff] %vm1825_vm2, %v1844_v26  ;;  %v1890_v30 = vrot.slane %v9379_v28, 4 }
 0x214   :  { %v9385_v31 = vsel %vm1878_vm3, %v1888_v2, %v1890_v30  ;;  %v9388_v32 = vsel %vm1878_vm3, %v1890_v30, %v1892_v29 }
 0x215   :  { %7510 = vmatmul.mubr.msk.bf16.gmra.mrb[24].mxu1 %vm1825_vm2, %v9385_v31 }
 0x216   :  { %7513 = vmatprep.mubr.msk.bf16.mxu1 %vm1825_vm2, %v9388_v32 }
 0x218   :  { %v2284_v46 = vld [vmem:[#allocation2 + $0x48] sm:$0xf] }
 0x219   :  { %v1865_v33 = vld [vmem:[#allocation2 + $0x40] sm:$0xf]  ;;  %v2312_v47 = vrot.slane %v2284_v46, 4 }
 0x21a   :  { %v1894_v34 = vrot.slane %v1865_v33, 4  ;;  %v9425_v40 = vld [vmem:[#allocation2 + $0x40] sm:$0xff] }
 0x21b   :  { %v2310_v43 = vrot.slane %v9425_v40, 4 }
 0x21c   :  { %v1895_v36 = vsel %vm1878_vm3, %v1892_v29, %v1894_v34 }
 0x21d   :  { %7514 = vmatmul.mubr.msk.bf16.gmra.mrb[28].mxu1 %vm1825_vm2, %v1895_v36  ;;  %v2311_v44 = vsel %vm1878_vm3, %v1892_v29, %v2310_v43  ;;  %v2313_v48 = vsel %vm1878_vm3, %v2310_v43, %v2312_v47 }
 0x21e   :  { %7519 = vmatprep.mubr.msk.bf16.mxu1 %vm1825_vm2, %v1854_v35 }
 0x225   :  { %7520 = vmatmul.mubr.msk.bf16.vlgmr.msra.gmra.mrb[16].mxu1 %vm1825_vm2, %v9279_v57 }
 0x226   :  { %7523 = vmatprep.mubr.msk.bf16.mxu1 %vm1825_vm2, %v9319_v49  ;;  %7536 = vmatpush3.bf16.msra.mxu1 %v8606_v59  ;;  %v8613_v59 = vld [vmem:[#allocation7 + $0x8] sm:$0xff]  }
 0x227   :  { %7553 = vmatprep.subr.bf16.mxu1 %v8607_v37  ;;  %7661 = vmatprep.subr.bf16.mxu0 %v8613_v59 }
 0x228   :  { %7662 = vmatpush3.bf16.msra.mxu0 %v8613_v59 }
 0x229   :  { %7679 = vmatprep.subr.bf16.mxu0 %v8614_v61 }
 0x22d   :  { %7524 = vmatmul.mubr.msk.bf16.gmra.mrb[20].mxu1 %vm1825_vm2, %v9315_v45 }
 0x22e   :  { %7527 = vmatprep.mubr.msk.bf16.mxu1 %vm1825_vm2, %v9352_v18 }
 0x235   :  { %7528 = vmatmul.mubr.msk.bf16.gmra.mrb[24].mxu1 %vm1825_vm2, %v9347_v14 }
 0x236   :  { %7531 = vmatprep.mubr.msk.bf16.mxu1 %vm1825_vm2, %v9379_v28 }
 0x23d   :  { %7532 = vmatmul.mubr.msk.bf16.gmra.mrb[28].mxu1 %vm1825_vm2, %v9376_v27 }
 0x23e   :  { %7537 = vmatprep.mubr.msk.bf16.mxu1 %vm1825_vm2, %v9279_v57  ;;  %v2276_v57 = vld [vmem:[#allocation2 + $0x8] sm:$0xf0] }
 0x23f   :  { %v2297_v39 = vrot.slane %v2276_v57, 4 }
 0x241   :  { %v2299_v41 = vsel %vm1878_vm3, %v2297_v39, %v9328_v54  ;;  %v2457_v54 = vld [vmem:[#allocation2 + $0x48] sm:$0xff] }
 0x245   :  { %7538 = vmatmul.mubr.msk.bf16.vlgmr.msra.gmra.mrb[16].mxu1 %vm1825_vm2, %v9319_v49 }
 0x246   :  { %7541 = vmatprep.mubr.msk.bf16.mxu1 %vm1825_vm2, %v9315_v45  ;;  %7554 = vmatpush3.bf16.msra.mxu1 %v8607_v37 }
 0x247   :  { %7571 = vmatprep.subr.bf16.mxu1 %v8608_v38 }
 0x24d   :  { %7542 = vmatmul.mubr.msk.bf16.gmra.mrb[20].mxu1 %vm1825_vm2, %v9352_v18 }
 0x24e   :  { %7545 = vmatprep.mubr.msk.bf16.mxu1 %vm1825_vm2, %v9347_v14 }
 0x255   :  { %7546 = vmatmul.mubr.msk.bf16.gmra.mrb[24].mxu1 %vm1825_vm2, %v9379_v28 }
 0x256   :  { %7549 = vmatprep.mubr.msk.bf16.mxu1 %vm1825_vm2, %v9376_v27 }
 0x25d   :  { %7550 = vmatmul.mubr.msk.bf16.gmra.mrb[28].mxu1 %vm1825_vm2, %v9425_v40 }
 0x25e   :  { %7555 = vmatprep.mubr.msk.bf16.mxu1 %vm1825_vm2, %v2299_v41 }
 0x265   :  { %7556 = vmatmul.mubr.msk.bf16.vlgmr.msra.gmra.mrb[16].mxu1 %vm1825_vm2, %v9339_v3  ;;  %v2612_v3 = vld [vmem:[#allocation2 + $0x50] sm:$0xf] }
 0x266   :  { %7559 = vmatprep.mubr.msk.bf16.mxu1 %vm1825_vm2, %v9366_v0  ;;  %7572 = vmatpush3.bf16.msra.mxu1 %v8608_v38  ;;  %v2640_v5 = vrot.slane %v2612_v3, 4 }
 0x267   :  { %7589 = vmatprep.subr.bf16.mxu1 %v8609_v42 }
 0x26d   :  { %7560 = vmatmul.mubr.msk.bf16.gmra.mrb[20].mxu1 %vm1825_vm2, %v9370_v22 }
 0x26e   :  { %7563 = vmatprep.mubr.msk.bf16.mxu1 %vm1825_vm2, %v9385_v31 }
 0x275   :  { %7564 = vmatmul.mubr.msk.bf16.gmra.mrb[24].mxu1 %vm1825_vm2, %v9388_v32 }
 0x276   :  { %7567 = vmatprep.mubr.msk.bf16.mxu1 %vm1825_vm2, %v2311_v44 }
 0x27d   :  { %7568 = vmatmul.mubr.msk.bf16.gmra.mrb[28].mxu1 %vm1825_vm2, %v2313_v48 }
 0x27e   :  { %7573 = vmatprep.mubr.msk.bf16.mxu1 %vm1825_vm2, %v9319_v49  ;;  %v2604_v49 = vld [vmem:[#allocation2 + $0x10] sm:$0xf0] }
 0x27f   :  { %v2625_v53 = vrot.slane %v2604_v49, 4 }
 0x281   :  { %v2627_v58 = vsel %vm1878_vm3, %v2625_v53, %v9322_v50  ;;  %v2638_v50 = vrot.slane %v2457_v54, 4 }
 0x283   :  { %v2639_v62 = vsel %vm1878_vm3, %v2310_v43, %v2638_v50  ;;  %v2641_v56 = vsel %vm1878_vm3, %v2638_v50, %v2640_v5  ;;  %v2967_v11 = vsel %vm1878_vm3, %v2638_v50, %v2966_v60 }
 0x285   :  { %7574 = vmatmul.mubr.msk.bf16.vlgmr.msra.gmra.mrb[16].mxu1 %vm1825_vm2, %v9315_v45 }
 0x286   :  { %7577 = vmatprep.mubr.msk.bf16.mxu1 %vm1825_vm2, %v9352_v18  ;;  %7590 = vmatpush3.bf16.msra.mxu1 %v8609_v42 }
 0x287   :  { %7607 = vmatprep.subr.bf16.mxu1 %v8610_v52 }
 0x28d   :  { %7578 = vmatmul.mubr.msk.bf16.gmra.mrb[20].mxu1 %vm1825_vm2, %v9347_v14 }
 0x28e   :  { %7581 = vmatprep.mubr.msk.bf16.mxu1 %vm1825_vm2, %v9379_v28 }
 0x295   :  { %7582 = vmatmul.mubr.msk.bf16.gmra.mrb[24].mxu1 %vm1825_vm2, %v9376_v27 }
 0x296   :  { %7585 = vmatprep.mubr.msk.bf16.mxu1 %vm1825_vm2, %v9425_v40 }
 0x29d   :  { %7586 = vmatmul.mubr.msk.bf16.gmra.mrb[28].mxu1 %vm1825_vm2, %v2457_v54 }
 0x29e   :  { %7591 = vmatprep.mubr.msk.bf16.mxu1 %vm1825_vm2, %v2627_v58 }
 0x2a5   :  { %7592 = vmatmul.mubr.msk.bf16.vlgmr.msra.gmra.mrb[16].mxu1 %vm1825_vm2, %v9366_v0 }
 0x2a6   :  { %7595 = vmatprep.mubr.msk.bf16.mxu1 %vm1825_vm2, %v9370_v22  ;;  %7608 = vmatpush3.bf16.msra.mxu1 %v8610_v52 }
 0x2a7   :  { %7625 = vmatprep.subr.bf16.mxu1 %v8611_v55 }
 0x2ad   :  { %7596 = vmatmul.mubr.msk.bf16.gmra.mrb[20].mxu1 %vm1825_vm2, %v9385_v31 }
 0x2ae   :  { %7599 = vmatprep.mubr.msk.bf16.mxu1 %vm1825_vm2, %v9388_v32 }
 0x2b5   :  { %7600 = vmatmul.mubr.msk.bf16.gmra.mrb[24].mxu1 %vm1825_vm2, %v2311_v44 }
 0x2b6   :  { %7603 = vmatprep.mubr.msk.bf16.mxu1 %vm1825_vm2, %v2639_v62 }
 0x2bd   :  { %7604 = vmatmul.mubr.msk.bf16.gmra.mrb[28].mxu1 %vm1825_vm2, %v2641_v56 }
 0x2be   :  { %7609 = vmatprep.mubr.msk.bf16.mxu1 %vm1825_vm2, %v9315_v45  ;;  %v2932_v45 = vld [vmem:[#allocation2 + $0x18] sm:$0xf0] }
 0x2bf   :  { %v2953_v7 = vrot.slane %v2932_v45, 4 }
 0x2c1   :  { %v2955_v9 = vsel %vm1878_vm3, %v2953_v7, %v9359_v19 }
 0x2c5   :  { %7610 = vmatmul.mubr.msk.bf16.vlgmr.msra.gmra.mrb[16].mxu1 %vm1825_vm2, %v9352_v18 }
 0x2c6   :  { %7613 = vmatprep.mubr.msk.bf16.mxu1 %vm1825_vm2, %v9347_v14  ;;  %7626 = vmatpush3.bf16.msra.mxu1 %v8611_v55  ;;  %v8615_v55 = vld [vmem:[#allocation7 + $0x10] sm:$0xff]  }
 0x2c7   :  { %7643 = vmatprep.subr.bf16.mxu1 %v8612_v6 }
 0x2cd   :  { %7614 = vmatmul.mubr.msk.bf16.gmra.mrb[20].mxu1 %vm1825_vm2, %v9379_v28 }
 0x2ce   :  { %7617 = vmatprep.mubr.msk.bf16.mxu1 %vm1825_vm2, %v9376_v27 }
 0x2d5   :  { %7618 = vmatmul.mubr.msk.bf16.gmra.mrb[24].mxu1 %vm1825_vm2, %v9425_v40 }
 0x2d6   :  { %7621 = vmatprep.mubr.msk.bf16.mxu1 %vm1825_vm2, %v2457_v54 }
 0x2dd   :  { %7622 = vmatmul.mubr.msk.bf16.gmra.mrb[28].mxu1 %vm1825_vm2, %v2785_v8 }
 0x2de   :  { %7627 = vmatprep.mubr.msk.bf16.mxu1 %vm1825_vm2, %v2955_v9 }
 0x2e5   :  { %7628 = vmatmul.mubr.msk.bf16.vlgmr.msra.gmra.mrb[16].mxu1 %vm1825_vm2, %v9370_v22 }
 0x2e6   :  { %7631 = vmatprep.mubr.msk.bf16.mxu1 %vm1825_vm2, %v9385_v31  ;;  %7644 = vmatpush3.bf16.msra.mxu1 %v8612_v6 }
 0x2ed   :  { %7632 = vmatmul.mubr.msk.bf16.gmra.mrb[20].mxu1 %vm1825_vm2, %v9388_v32 }
 0x2ee   :  { %7635 = vmatprep.mubr.msk.bf16.mxu1 %vm1825_vm2, %v2311_v44 }
 0x2f5   :  { %7636 = vmatmul.mubr.msk.bf16.gmra.mrb[24].mxu1 %vm1825_vm2, %v2639_v62 }
 0x2f6   :  { %7639 = vmatprep.mubr.msk.bf16.mxu1 %vm1825_vm2, %v2967_v11 }
 0x2fd   :  { %7640 = vmatmul.mubr.msk.bf16.gmra.mrb[28].mxu1 %vm1825_vm2, %v2969_v13 }
 0x2fe   :  { %7645 = vmatprep.mubr.msk.bf16.mxu1 %vm1825_vm2, %v9352_v18  ;;  %v3352_v18 = vrot.slane %v9520_v16, 4 }
 0x305   :  { %7646 = vmatmul.mubr.msk.bf16.vlgmr.msra.gmra.mrb[16].mxu1 %vm1825_vm2, %v9347_v14  ;;  %v3351_v14 = vrot.slane %v3337_v17, 4 }
 0x306   :  { %7649 = vmatprep.mubr.msk.bf16.mxu1 %vm1825_vm2, %v9379_v28 }
 0x307   :  { %v3353_v2 = vsel %vm1878_vm3, %v3351_v14, %v3352_v18 }
 0x308   :  { %7663 = vmatprep.mubr.msk.bf16.mxu0 %vm1825_vm2, %v3353_v2 }
 0x30d   :  { %7650 = vmatmul.mubr.msk.bf16.gmra.mrb[20].mxu1 %vm1825_vm2, %v9376_v27 }
 0x30e   :  { %7653 = vmatprep.mubr.msk.bf16.mxu1 %vm1825_vm2, %v9425_v40 }
 0x315   :  { %7654 = vmatmul.mubr.msk.bf16.gmra.mrb[24].mxu1 %vm1825_vm2, %v2457_v54 }
 0x316   :  { %7657 = vmatprep.mubr.msk.bf16.mxu1 %vm1825_vm2, %v2785_v8 }
 0x31d   :  { %7658 = vmatmul.mubr.msk.bf16.gmra.mrb[28].mxu1 %vm1825_vm2, %v3113_v15 }
 0x3d8   :  { %v7647_v19 = vpop.f32.mrb[16].mxu1 }
 0x3d9   :  { %v3269_v20 = vadd.f32 %v7647_v19, %v9528_v63  ;;  %v3181_v21 = vpop.f32.mrb[17].mxu1 }
 0x3da   :  { %v3267_v0 = vadd.f32 %v9528_v63, %v3181_v21  ;;  %v7648_v22 = vpop.f32.mrb[18].mxu1 }
 0x3db   :  { %v3270_v23 = vadd.f32 %v7648_v22, %v9528_v63  ;;  %v3184_v24 = vpop.f32.mrb[19].mxu1  ;;  %v3285_v25 = vmax.f32 %v3269_v20, 0.0 }
 0x3dc   :  { %v3268_v1 = vadd.f32 %v9528_v63, %v3184_v24  ;;  %v3283_v26 = vmax.f32 %v3267_v0, 0.0 }
 0x3dd   :  { %v3286_v4 = vmax.f32 %v3270_v23, 0.0 }
 0x3de   :  { %v3284_v27 = vmax.f32 %v3268_v1, 0.0 }
 0x3df   :  { %v3312_v28 = vpack.c.bf16 %v3286_v4, %v3285_v25 }
 0x3e0   :  { %v3311_v29 = vpack.c.bf16 %v3284_v27, %v3283_v26  ;;  %v7651_v30 = vpop.f32.mrb[20].mxu1 }
 0x3e1   :  { %3320 = vst.msk [vmem:[#allocation3 + $0x18] sm:$0xff] %vm1825_vm2, %v3312_v28  ;;  %v3273_v31 = vadd.f32 %v7651_v30, %v9528_v63  ;;  %v3197_v32 = vpop.f32.mrb[21].mxu1 }
 0x3e2   :  { %3319 = vst.msk [vmem:[#allocation3 + $0x10] sm:$0xff] %vm1825_vm2, %v3311_v29  ;;  %v3271_v33 = vadd.f32 %v9528_v63, %v3197_v32  ;;  %v7652_v34 = vpop.f32.mrb[22].mxu1 }
 0x3e3   :  { %v3274_v35 = vadd.f32 %v7652_v34, %v9528_v63  ;;  %v3200_v36 = vpop.f32.mrb[23].mxu1  ;;  %v3289_v38 = vmax.f32 %v3273_v31, 0.0  ;;  %v3327_v31 = vld [vmem:[#allocation3] sm:$0xff]  ;;  %v8617_v34 = vld [vmem:[#allocation7 + $0x20] sm:$0xff]  }
 0x3e4   :  { %v3272_v37 = vadd.f32 %v9528_v63, %v3200_v36  ;;  %v3287_v39 = vmax.f32 %v3271_v33, 0.0  ;;  %v8616_v33 = vld [vmem:[#allocation7 + $0x18] sm:$0xff]  }
 0x3e5   :  { %v3290_v57 = vmax.f32 %v3274_v35, 0.0 }
 0x3e6   :  { %v3288_v40 = vmax.f32 %v3272_v37, 0.0 }
 0x3e7   :  { %v3314_v41 = vpack.c.bf16 %v3290_v57, %v3289_v38  ;;  %v8618_v38 = vld [vmem:[#allocation7 + $0x28] sm:$0xff]  }
 0x3e8   :  { %v3313_v42 = vpack.c.bf16 %v3288_v40, %v3287_v39  ;;  %v7655_v43 = vpop.f32.mrb[24].mxu1  ;;  %v9540_v44 = vld [vmem:[#allocation3 + $0x18] sm:$0xff] }
 0x3e9   :  { %3322 = vst.msk [vmem:[#allocation3 + $0x28] sm:$0xff] %vm1825_vm2, %v3314_v41  ;;  %v3277_v46 = vadd.f32 %v7655_v43, %v9528_v63  ;;  %v3213_v47 = vpop.f32.mrb[25].mxu1  ;;  %v9544_v48 = vld [vmem:[#allocation3 + $0x10] sm:$0xff]  ;;  %v9547_v52 = vrot.slane %v9540_v44, 4  ;;  %v8619_v43 = vld [vmem:[#allocation7 + $0x30] sm:$0xff]  }
 0x3ea   :  { %3321 = vst.msk [vmem:[#allocation3 + $0x20] sm:$0xff] %vm1825_vm2, %v3313_v42  ;;  %v3275_v49 = vadd.f32 %v9528_v63, %v3213_v47  ;;  %v7656_v53 = vpop.f32.mrb[26].mxu1  ;;  %v9552_v54 = vrot.slane %v9544_v48, 4 }
 0x3eb   :  { %v3278_v58 = vadd.f32 %v7656_v53, %v9528_v63  ;;  %v3216_v59 = vpop.f32.mrb[27].mxu1  ;;  %v3293_v5 = vmax.f32 %v3277_v46, 0.0  ;;  %v4076_v46 = vld [vmem:[#allocation3 + $0x10] sm:$0xf0] }
 0x3ec   :  { %v3276_v50 = vadd.f32 %v9528_v63, %v3216_v59  ;;  %v3355_v62 = vsel %vm1878_vm3, %v3352_v18, %v9552_v54  ;;  %v9561_v3 = vsel %vm1878_vm3, %v9552_v54, %v9547_v52  ;;  %v3291_v6 = vmax.f32 %v3275_v49, 0.0  ;;  %v8622_v53 = vld [vmem:[%s10204_s7 + $0x10] sm:$0xff]  }
 0x3ed   :  { %v3294_v56 = vmax.f32 %v3278_v58, 0.0  ;;  %7664 = vmatmul.mubr.msk.bf16.vlgmr.msra.gmra.mrb[16].mxu0 %vm1825_vm2, %v3355_v62  ;;  %v4097_v47 = vrot.slane %v4076_v46, 4  ;;  %7823 = vmatprep.subr.bf16.mxu1 %v8622_v53  ;;  %v4084_v59 = vld [vmem:[#allocation3 + $0x50] sm:$0xf]  ;;  %v8621_v62 = vld [vmem:[#allocation7 + $0x40] sm:$0xff]  }
 0x3ee   :  { %v3292_v45 = vmax.f32 %v3276_v50, 0.0  ;;  %7667 = vmatprep.mubr.msk.bf16.mxu0 %vm1825_vm2, %v9561_v3  ;;  %7680 = vmatpush3.bf16.msra.mxu0 %v8614_v61 }
 0x3ef   :  { %v3316_v7 = vpack.c.bf16 %v3294_v56, %v3293_v5  ;;  %7697 = vmatprep.subr.bf16.mxu0 %v8615_v55  ;;  %v4099_v49 = vsel %vm1878_vm3, %v4097_v47, %v9547_v52  ;;  %7824 = vmatpush3.bf16.msra.mxu1 %v8622_v53  ;;  %v4257_v5 = vld [vmem:[#allocation3 + $0x50] sm:$0xff] }
 0x3f0   :  { %v3315_v8 = vpack.c.bf16 %v3292_v45, %v3291_v6  ;;  %v7659_v9 = vpop.f32.mrb[28].mxu1  ;;  %v9566_v60 = vld [vmem:[#allocation3 + $0x28] sm:$0xff]  ;;  %v4438_v6 = vrot.slane %v4257_v5, 4  ;;  %v4412_v45 = vld [vmem:[#allocation3 + $0x58] sm:$0xf] }
 0x3f1   :  { %3324 = vst.msk [vmem:[#allocation3 + $0x38] sm:$0xff] %vm1825_vm2, %v3316_v7  ;;  %v3281_v10 = vadd.f32 %v7659_v9, %v9528_v63  ;;  %v3229_v11 = vpop.f32.mrb[29].mxu1  ;;  %v9570_v12 = vld [vmem:[#allocation3 + $0x20] sm:$0xff]  ;;  %v3360_v13 = vrot.slane %v9566_v60, 4 }
 0x3f2   :  { %3323 = vst.msk [vmem:[#allocation3 + $0x30] sm:$0xff] %vm1825_vm2, %v3315_v8  ;;  %v3279_v15 = vadd.f32 %v9528_v63, %v3229_v11  ;;  %v7660_v17 = vpop.f32.mrb[30].mxu1  ;;  %v9576_v14 = vrot.slane %v9570_v12, 4  ;;  %v4440_v8 = vrot.slane %v4412_v45, 4  ;;  %v9768_v11 = vld [vmem:[#allocation4 + $0x8] sm:$0xff] }
 0x3f3   :  { %v3282_v18 = vadd.f32 %v7660_v17, %v9528_v63  ;;  %v3232_v2 = vpop.f32.mrb[31].mxu1  ;;  %v3297_v21 = vmax.f32 %v3281_v10, 0.0  ;;  %v4585_v10 = vld [vmem:[#allocation3 + $0x58] sm:$0xff] }
 0x3f4   :  { %v3280_v61 = vadd.f32 %v9528_v63, %v3232_v2  ;;  %v9583_v19 = vsel %vm1878_vm3, %v9547_v52, %v9576_v14  ;;  %v9587_v20 = vsel %vm1878_vm3, %v9576_v14, %v3360_v13  ;;  %v3295_v22 = vmax.f32 %v3279_v15, 0.0 }
 0x3f5   :  { %v3298_v0 = vmax.f32 %v3282_v18, 0.0  ;;  %7668 = vmatmul.mubr.msk.bf16.gmra.mrb[20].mxu0 %vm1825_vm2, %v9583_v19  ;;  %v4441_v9 = vsel %vm1878_vm3, %v4438_v6, %v4440_v8  ;;  %v4829_v15 = vrot.slane %v9768_v11, 4  ;;  %v9779_v18 = vld [vmem:[%s10203_s6] ss:$0 sm:$0xff] }
 0x3f6   :  { %v3296_v23 = vmax.f32 %v3280_v61, 0.0  ;;  %7671 = vmatprep.mubr.msk.bf16.mxu0 %vm1825_vm2, %v9587_v20 }
 0x3f7   :  { %v3318_v63 = vpack.c.bf16 %v3298_v0, %v3297_v21 }
 0x3f8   :  { %v3317_v24 = vpack.c.bf16 %v3296_v23, %v3295_v22  ;;  %v9593_v1 = vld [vmem:[#allocation3 + $0x38] sm:$0xff] }
 0x3f9   :  { %3326 = vst.msk [vmem:[#allocation3 + $0x48] sm:$0xff] %vm1825_vm2, %v3318_v63  ;;  %v9596_v25 = vld [vmem:[#allocation3 + $0x30] sm:$0xff]  ;;  %v3364_v4 = vrot.slane %v9593_v1, 4 }
 0x3fa   :  { %3325 = vst.msk [vmem:[#allocation3 + $0x40] sm:$0xff] %vm1825_vm2, %v3317_v24  ;;  %v3362_v26 = vrot.slane %v9596_v25, 4 }
 0x3fc   :  { %v9602_v27 = vsel %vm1878_vm3, %v3360_v13, %v3362_v26  ;;  %v9605_v28 = vsel %vm1878_vm3, %v3362_v26, %v3364_v4 }
 0x3fd   :  { %7672 = vmatmul.mubr.msk.bf16.gmra.mrb[24].mxu0 %vm1825_vm2, %v9602_v27 }
 0x3fe   :  { %7675 = vmatprep.mubr.msk.bf16.mxu0 %vm1825_vm2, %v9605_v28 }
 0x400   :  { %v3756_v40 = vld [vmem:[#allocation3 + $0x48] sm:$0xf] }
 0x401   :  { %v3338_v29 = vld [vmem:[#allocation3 + $0x40] sm:$0xf]  ;;  %v3784_v41 = vrot.slane %v3756_v40, 4 }
 0x402   :  { %v3366_v30 = vrot.slane %v3338_v29, 4  ;;  %v9642_v36 = vld [vmem:[#allocation3 + $0x40] sm:$0xff] }
 0x403   :  { %v3782_v57 = vrot.slane %v9642_v36, 4 }
 0x404   :  { %v3367_v32 = vsel %vm1878_vm3, %v3364_v4, %v3366_v30 }
 0x405   :  { %7676 = vmatmul.mubr.msk.bf16.gmra.mrb[28].mxu0 %vm1825_vm2, %v3367_v32  ;;  %v3783_v39 = vsel %vm1878_vm3, %v3364_v4, %v3782_v57  ;;  %v3785_v42 = vsel %vm1878_vm3, %v3782_v57, %v3784_v41 }
 0x406   :  { %7681 = vmatprep.mubr.msk.bf16.mxu0 %vm1825_vm2, %v3327_v31 }
 0x40d   :  { %7682 = vmatmul.mubr.msk.bf16.vlgmr.msra.gmra.mrb[16].mxu0 %vm1825_vm2, %v9520_v16 }
 0x40e   :  { %7685 = vmatprep.mubr.msk.bf16.mxu0 %vm1825_vm2, %v9544_v48  ;;  %7698 = vmatpush3.bf16.msra.mxu0 %v8615_v55  ;;  %v4112_v55 = vrot.slane %v4084_v59, 4 }
 0x40f   :  { %7715 = vmatprep.subr.bf16.mxu0 %v8616_v33 }
 0x415   :  { %7686 = vmatmul.mubr.msk.bf16.gmra.mrb[20].mxu0 %vm1825_vm2, %v9540_v44 }
 0x416   :  { %7689 = vmatprep.mubr.msk.bf16.mxu0 %vm1825_vm2, %v9570_v12 }
 0x41d   :  { %7690 = vmatmul.mubr.msk.bf16.gmra.mrb[24].mxu0 %vm1825_vm2, %v9566_v60 }
 0x41e   :  { %7693 = vmatprep.mubr.msk.bf16.mxu0 %vm1825_vm2, %v9596_v25 }
 0x425   :  { %7694 = vmatmul.mubr.msk.bf16.gmra.mrb[28].mxu0 %vm1825_vm2, %v9593_v1 }
 0x426   :  { %7699 = vmatprep.mubr.msk.bf16.mxu0 %vm1825_vm2, %v9520_v16  ;;  %v3748_v16 = vld [vmem:[#allocation3 + $0x8] sm:$0xf0] }
 0x427   :  { %v3769_v35 = vrot.slane %v3748_v16, 4 }
 0x429   :  { %v3771_v37 = vsel %vm1878_vm3, %v3769_v35, %v9552_v54  ;;  %v8620_v54 = vld [vmem:[#allocation7 + $0x38] sm:$0xff]  }
 0x42d   :  { %7700 = vmatmul.mubr.msk.bf16.vlgmr.msra.gmra.mrb[16].mxu0 %vm1825_vm2, %v9544_v48 }
 0x42e   :  { %7703 = vmatprep.mubr.msk.bf16.mxu0 %vm1825_vm2, %v9540_v44  ;;  %7716 = vmatpush3.bf16.msra.mxu0 %v8616_v33 }
 0x42f   :  { %7733 = vmatprep.subr.bf16.mxu0 %v8617_v34 }
 0x435   :  { %7704 = vmatmul.mubr.msk.bf16.gmra.mrb[20].mxu0 %vm1825_vm2, %v9570_v12 }
 0x436   :  { %7707 = vmatprep.mubr.msk.bf16.mxu0 %vm1825_vm2, %v9566_v60 }
 0x43d   :  { %7708 = vmatmul.mubr.msk.bf16.gmra.mrb[24].mxu0 %vm1825_vm2, %v9596_v25 }
 0x43e   :  { %7711 = vmatprep.mubr.msk.bf16.mxu0 %vm1825_vm2, %v9593_v1 }
 0x445   :  { %7712 = vmatmul.mubr.msk.bf16.gmra.mrb[28].mxu0 %vm1825_vm2, %v9642_v36 }
 0x446   :  { %7717 = vmatprep.mubr.msk.bf16.mxu0 %vm1825_vm2, %v3771_v37 }
 0x44d   :  { %7718 = vmatmul.mubr.msk.bf16.vlgmr.msra.gmra.mrb[16].mxu0 %vm1825_vm2, %v9561_v3 }
 0x44e   :  { %7721 = vmatprep.mubr.msk.bf16.mxu0 %vm1825_vm2, %v9583_v19  ;;  %7734 = vmatpush3.bf16.msra.mxu0 %v8617_v34 }
 0x44f   :  { %7751 = vmatprep.subr.bf16.mxu0 %v8618_v38 }
 0x455   :  { %7722 = vmatmul.mubr.msk.bf16.gmra.mrb[20].mxu0 %vm1825_vm2, %v9587_v20 }
 0x456   :  { %7725 = vmatprep.mubr.msk.bf16.mxu0 %vm1825_vm2, %v9602_v27 }
 0x45d   :  { %7726 = vmatmul.mubr.msk.bf16.gmra.mrb[24].mxu0 %vm1825_vm2, %v9605_v28 }
 0x45e   :  { %7729 = vmatprep.mubr.msk.bf16.mxu0 %vm1825_vm2, %v3783_v39 }
 0x465   :  { %7730 = vmatmul.mubr.msk.bf16.gmra.mrb[28].mxu0 %vm1825_vm2, %v3785_v42 }
 0x466   :  { %7735 = vmatprep.mubr.msk.bf16.mxu0 %vm1825_vm2, %v9544_v48  ;;  %v3929_v48 = vld [vmem:[#allocation3 + $0x48] sm:$0xff] }
 0x467   :  { %v4110_v52 = vrot.slane %v3929_v48, 4 }
 0x469   :  { %v4111_v58 = vsel %vm1878_vm3, %v3782_v57, %v4110_v52  ;;  %v4113_v50 = vsel %vm1878_vm3, %v4110_v52, %v4112_v55  ;;  %v4439_v7 = vsel %vm1878_vm3, %v4110_v52, %v4438_v6  ;;  %v8625_v52 = vld [vmem:[%s10204_s7 + $0x8] sm:$0xff]  }
 0x46d   :  { %7736 = vmatmul.mubr.msk.bf16.vlgmr.msra.gmra.mrb[16].mxu0 %vm1825_vm2, %v9540_v44 }
 0x46e   :  { %7739 = vmatprep.mubr.msk.bf16.mxu0 %vm1825_vm2, %v9570_v12  ;;  %7752 = vmatpush3.bf16.msra.mxu0 %v8618_v38 }
 0x46f   :  { %7769 = vmatprep.subr.bf16.mxu0 %v8619_v43 }
 0x475   :  { %7740 = vmatmul.mubr.msk.bf16.gmra.mrb[20].mxu0 %vm1825_vm2, %v9566_v60 }
 0x476   :  { %7743 = vmatprep.mubr.msk.bf16.mxu0 %vm1825_vm2, %v9596_v25 }
 0x47d   :  { %7744 = vmatmul.mubr.msk.bf16.gmra.mrb[24].mxu0 %vm1825_vm2, %v9593_v1 }
 0x47e   :  { %7747 = vmatprep.mubr.msk.bf16.mxu0 %vm1825_vm2, %v9642_v36 }
 0x485   :  { %7748 = vmatmul.mubr.msk.bf16.gmra.mrb[28].mxu0 %vm1825_vm2, %v3929_v48 }
 0x486   :  { %7753 = vmatprep.mubr.msk.bf16.mxu0 %vm1825_vm2, %v4099_v49 }
 0x48d   :  { %7754 = vmatmul.mubr.msk.bf16.vlgmr.msra.gmra.mrb[16].mxu0 %vm1825_vm2, %v9583_v19 }
 0x48e   :  { %7757 = vmatprep.mubr.msk.bf16.mxu0 %vm1825_vm2, %v9587_v20  ;;  %7770 = vmatpush3.bf16.msra.mxu0 %v8619_v43 }
 0x48f   :  { %7787 = vmatprep.subr.bf16.mxu0 %v8620_v54 }
 0x495   :  { %7758 = vmatmul.mubr.msk.bf16.gmra.mrb[20].mxu0 %vm1825_vm2, %v9602_v27 }
 0x496   :  { %7761 = vmatprep.mubr.msk.bf16.mxu0 %vm1825_vm2, %v9605_v28 }
 0x49d   :  { %7762 = vmatmul.mubr.msk.bf16.gmra.mrb[24].mxu0 %vm1825_vm2, %v3783_v39 }
 0x49e   :  { %7765 = vmatprep.mubr.msk.bf16.mxu0 %vm1825_vm2, %v4111_v58 }
 0x4a5   :  { %7766 = vmatmul.mubr.msk.bf16.gmra.mrb[28].mxu0 %vm1825_vm2, %v4113_v50 }
 0x4a6   :  { %7771 = vmatprep.mubr.msk.bf16.mxu0 %vm1825_vm2, %v9540_v44  ;;  %v4404_v44 = vld [vmem:[#allocation3 + $0x18] sm:$0xf0] }
 0x4a7   :  { %v4425_v3 = vrot.slane %v4404_v44, 4 }
 0x4a9   :  { %v4427_v56 = vsel %vm1878_vm3, %v4425_v3, %v9576_v14  ;;  %v8624_v14 = vld [vmem:[%s10204_s7] sm:$0xff]  }
 0x4ad   :  { %7772 = vmatmul.mubr.msk.bf16.vlgmr.msra.gmra.mrb[16].mxu0 %vm1825_vm2, %v9570_v12 }
 0x4ae   :  { %7775 = vmatprep.mubr.msk.bf16.mxu0 %vm1825_vm2, %v9566_v60  ;;  %7788 = vmatpush3.bf16.msra.mxu0 %v8620_v54 }
 0x4af   :  { %7805 = vmatprep.subr.bf16.mxu0 %v8621_v62 }
 0x4b5   :  { %7776 = vmatmul.mubr.msk.bf16.gmra.mrb[20].mxu0 %vm1825_vm2, %v9596_v25 }
 0x4b6   :  { %7779 = vmatprep.mubr.msk.bf16.mxu0 %vm1825_vm2, %v9593_v1 }
 0x4bd   :  { %7780 = vmatmul.mubr.msk.bf16.gmra.mrb[24].mxu0 %vm1825_vm2, %v9642_v36 }
 0x4be   :  { %7783 = vmatprep.mubr.msk.bf16.mxu0 %vm1825_vm2, %v3929_v48 }
 0x4c5   :  { %7784 = vmatmul.mubr.msk.bf16.gmra.mrb[28].mxu0 %vm1825_vm2, %v4257_v5 }
 0x4c6   :  { %7789 = vmatprep.mubr.msk.bf16.mxu0 %vm1825_vm2, %v4427_v56  ;;  %v8626_v56 = vld [vmem:[%s10204_s7 + $0x20] sm:$0xff]  }
 0x4cd   :  { %7790 = vmatmul.mubr.msk.bf16.vlgmr.msra.gmra.mrb[16].mxu0 %vm1825_vm2, %v9587_v20 }
 0x4ce   :  { %7793 = vmatprep.mubr.msk.bf16.mxu0 %vm1825_vm2, %v9602_v27  ;;  %7806 = vmatpush3.bf16.msra.mxu0 %v8621_v62 }
 0x4d5   :  { %7794 = vmatmul.mubr.msk.bf16.gmra.mrb[20].mxu0 %vm1825_vm2, %v9605_v28 }
 0x4d6   :  { %7797 = vmatprep.mubr.msk.bf16.mxu0 %vm1825_vm2, %v3783_v39 }
 0x4dd   :  { %7798 = vmatmul.mubr.msk.bf16.gmra.mrb[24].mxu0 %vm1825_vm2, %v4111_v58 }
 0x4de   :  { %7801 = vmatprep.mubr.msk.bf16.mxu0 %vm1825_vm2, %v4439_v7 }
 0x4e5   :  { %7802 = vmatmul.mubr.msk.bf16.gmra.mrb[28].mxu0 %vm1825_vm2, %v4441_v9 }
 0x4e6   :  { %7807 = vmatprep.mubr.msk.bf16.mxu0 %vm1825_vm2, %v9570_v12  ;;  %v4812_v12 = vld [vmem:[#allocation4] sm:$0xf0] }
 0x4e7   :  { %v4828_v13 = vrot.slane %v4812_v12, 4 }
 0x4e9   :  { %v4830_v17 = vsel %vm1878_vm3, %v4828_v13, %v4829_v15 }
 0x4ea   :  { %7827 = vmatprep.mubr.msk.bf16.mxu1 %vm4771_vm4, %v4830_v17 }
 0x4ed   :  { %7808 = vmatmul.mubr.msk.bf16.vlgmr.msra.gmra.mrb[16].mxu0 %vm1825_vm2, %v9566_v60  ;;  %v8623_v60 = vld [vmem:[%s10204_s7 + $0x18] sm:$0xff]  }
 0x4ee   :  { %7811 = vmatprep.mubr.msk.bf16.mxu0 %vm1825_vm2, %v9596_v25  ;;  %7825 = vmatprep.subr.bf16.mxu1 %v8623_v60 }
 0x4ef   :  { %7826 = vmatpush3.bf16.msra.mxu1 %v8623_v60 }
 0x4f0   :  { %7843 = vmatprep.subr.bf16.mxu1 %v8624_v14 }
 0x4f5   :  { %7812 = vmatmul.mubr.msk.bf16.gmra.mrb[20].mxu0 %vm1825_vm2, %v9593_v1 }
 0x4f6   :  { %7815 = vmatprep.mubr.msk.bf16.mxu0 %vm1825_vm2, %v9642_v36 }
 0x4fd   :  { %7816 = vmatmul.mubr.msk.bf16.gmra.mrb[24].mxu0 %vm1825_vm2, %v3929_v48 }
 0x4fe   :  { %7819 = vmatprep.mubr.msk.bf16.mxu0 %vm1825_vm2, %v4257_v5 }
 0x505   :  { %7820 = vmatmul.mubr.msk.bf16.gmra.mrb[28].mxu0 %vm1825_vm2, %v4585_v10 }
 0x506   :  { %6416 = vmatprep.mubr.bf16.mxu0 %v8723_v51 }
 0x5c0   :  { %v7809_v2 = vpop.f32.mrb[16].mxu0 }
 0x5c1   :  { %v4741_v61 = vadd.f32 %v7809_v2, %v9779_v18  ;;  %v4653_v19 = vpop.f32.mrb[17].mxu0 }
 0x5c2   :  { %v4739_v20 = vadd.f32 %v9779_v18, %v4653_v19  ;;  %v7810_v21 = vpop.f32.mrb[18].mxu0 }
 0x5c3   :  { %v4742_v0 = vadd.f32 %v7810_v21, %v9779_v18  ;;  %v4656_v22 = vpop.f32.mrb[19].mxu0  ;;  %v4757_v63 = vmax.f32 %v4741_v61, 0.0 }
 0x5c4   :  { %v4740_v23 = vadd.f32 %v9779_v18, %v4656_v22  ;;  %v4755_v1 = vmax.f32 %v4739_v20, 0.0 }
 0x5c5   :  { %v4758_v24 = vmax.f32 %v4742_v0, 0.0 }
 0x5c6   :  { %v4756_v25 = vmax.f32 %v4740_v23, 0.0 }
 0x5c7   :  { %v4785_v4 = vpack.c.bf16 %v4758_v24, %v4757_v63 }
 0x5c8   :  { %v4784_v26 = vpack.c.bf16 %v4756_v25, %v4755_v1  ;;  %v7813_v27 = vpop.f32.mrb[20].mxu0 }
 0x5c9   :  { %4793 = vst.msk [vmem:[#allocation4 + $0x18] sm:$0xff] %vm4771_vm4, %v4785_v4  ;;  %v4745_v28 = vadd.f32 %v7813_v27, %v9779_v18  ;;  %v4669_v29 = vpop.f32.mrb[21].mxu0 }
 0x5ca   :  { %4792 = vst.msk [vmem:[#allocation4 + $0x10] sm:$0xff] %vm4771_vm4, %v4784_v26  ;;  %v4743_v30 = vadd.f32 %v9779_v18, %v4669_v29  ;;  %v7814_v31 = vpop.f32.mrb[22].mxu0  ;;  %v4800_v29 = vld [vmem:[#allocation4] sm:$0xff] }
 0x5cb   :  { %v4746_v32 = vadd.f32 %v7814_v31, %v9779_v18  ;;  %v4672_v33 = vpop.f32.mrb[23].mxu0  ;;  %v4761_v16 = vmax.f32 %v4745_v28, 0.0  ;;  %v8627_v31 = vld [vmem:[%s10204_s7 + $0x28] sm:$0xff]  }
 0x5cc   :  { %v4744_v34 = vadd.f32 %v9779_v18, %v4672_v33  ;;  %v4759_v36 = vmax.f32 %v4743_v30, 0.0  ;;  %v8629_v33 = vld [vmem:[%s10204_s7 + $0x38] sm:$0xff]  }
 0x5cd   :  { %v4762_v35 = vmax.f32 %v4746_v32, 0.0  ;;  %v8628_v32 = vld [vmem:[%s10204_s7 + $0x30] sm:$0xff]  }
 0x5ce   :  { %v4760_v37 = vmax.f32 %v4744_v34, 0.0  ;;  %v8630_v34 = vld [vmem:[%s10204_s7 + $0x40] sm:$0xff]  }
 0x5cf   :  { %v4787_v38 = vpack.c.bf16 %v4762_v35, %v4761_v16 }
 0x5d0   :  { %v4786_v57 = vpack.c.bf16 %v4760_v37, %v4759_v36  ;;  %v7817_v39 = vpop.f32.mrb[24].mxu0  ;;  %v9791_v40 = vld [vmem:[#allocation4 + $0x18] sm:$0xff]  ;;  %v8631_v37 = vld [vmem:[%s10204_s7 + $0x48] sm:$0xff]  }
 0x5d1   :  { %4795 = vst.msk [vmem:[#allocation4 + $0x28] sm:$0xff] %vm4771_vm4, %v4787_v38  ;;  %v4749_v41 = vadd.f32 %v7817_v39, %v9779_v18  ;;  %v4685_v42 = vpop.f32.mrb[25].mxu0  ;;  %v9795_v43 = vld [vmem:[#allocation4 + $0x10] sm:$0xff]  ;;  %v9798_v46 = vrot.slane %v9791_v40, 4 }
 0x5d2   :  { %4794 = vst.msk [vmem:[#allocation4 + $0x20] sm:$0xff] %vm4771_vm4, %v4786_v57  ;;  %v4747_v47 = vadd.f32 %v9779_v18, %v4685_v42  ;;  %v7818_v48 = vpop.f32.mrb[26].mxu0  ;;  %v9803_v49 = vrot.slane %v9795_v43, 4  ;;  %v8632_v38 = vld [vmem:[%s10204_s7 + $0x50] sm:$0xff]  }
 0x5d3   :  { %v4750_v53 = vadd.f32 %v7818_v48, %v9779_v18  ;;  %v4688_v54 = vpop.f32.mrb[27].mxu0  ;;  %v4765_v50 = vmax.f32 %v4749_v41, 0.0  ;;  %v8633_v48 = vld [vmem:[%s10204_s7 + $0x58] sm:$0xff]  }
 0x5d4   :  { %v4748_v58 = vadd.f32 %v9779_v18, %v4688_v54  ;;  %v4832_v59 = vsel %vm1878_vm3, %v4829_v15, %v9803_v49  ;;  %v9815_v55 = vsel %vm1878_vm3, %v9803_v49, %v9798_v46  ;;  %v4763_v44 = vmax.f32 %v4747_v47, 0.0 }
 0x5d5   :  { %v4766_v62 = vmax.f32 %v4750_v53, 0.0  ;;  %7828 = vmatmul.mubr.msk.bf16.vlgmr.msra.gmra.mrb[32].mxu1 %vm4771_vm4, %v4832_v59  ;;  %v8642_v59 = vld [vmem:[#allocation9 + $0x4] ss:$8 sps:$4 sm:$0xff]  }
 0x5d6   :  { %v4764_v3 = vmax.f32 %v4748_v58, 0.0  ;;  %7831 = vmatprep.mubr.msk.bf16.mxu1 %vm4771_vm4, %v9815_v55  ;;  %7844 = vmatpush3.bf16.msra.mxu1 %v8624_v14  ;;  %v8640_v58 = vld [vmem:[#allocation9] ss:$8 sps:$4 sm:$0xff]  }
 0x5d7   :  { %v4789_v5 = vpack.c.bf16 %v4766_v62, %v4765_v50  ;;  %7845 = vmatprep.subr.bf16.mxu1 %v8625_v52  ;;  %6384 = vmatprep.subr.bf16.mxu0 %v8642_v59  ;;  %v8643_v50 = vld [vmem:[#allocation9 + $0x10] ss:$8 sps:$4 sm:$0xff]  }
 0x5d8   :  { %v4788_v6 = vpack.c.bf16 %v4764_v3, %v4763_v44  ;;  %v7821_v45 = vpop.f32.mrb[28].mxu0  ;;  %v9823_v7 = vld [vmem:[#allocation4 + $0x28] sm:$0xff]  ;;  %6385 = vmatpush1.bf16.msra.mxu0 %v8640_v58 }
 0x5d9   :  { %4797 = vst.msk [vmem:[#allocation4 + $0x38] sm:$0xff] %vm4771_vm4, %v4789_v5  ;;  %v4753_v8 = vadd.f32 %v7821_v45, %v9779_v18  ;;  %v4701_v9 = vpop.f32.mrb[29].mxu0  ;;  %v9827_v10 = vld [vmem:[#allocation4 + $0x20] sm:$0xff]  ;;  %v4837_v60 = vrot.slane %v9823_v7, 4  ;;  %v8635_v62 = vld [vmem:[%s10204_s7 + $0x68] sm:$0xff]   ;;  %v8637_v45 = vld [vmem:[%s10204_s7 + $0x78] sm:$0xff]  }
 0x5da   :  { %4796 = vst.msk [vmem:[#allocation4 + $0x30] sm:$0xff] %vm4771_vm4, %v4788_v6  ;;  %v4751_v12 = vadd.f32 %v9779_v18, %v4701_v9  ;;  %v7822_v13 = vpop.f32.mrb[30].mxu0  ;;  %v9833_v15 = vrot.slane %v9827_v10, 4  ;;  %7846 = vmatpush3.bf16.msra.mxu1 %v8625_v52  ;;  %v5597_v5 = vld [vmem:[#allocation4 + $0x50] sm:$0xf] }
 0x5db   :  { %v4754_v17 = vadd.f32 %v7822_v13, %v9779_v18  ;;  %v4704_v14 = vpop.f32.mrb[31].mxu0  ;;  %7863 = vmatprep.subr.bf16.mxu1 %v8626_v56  ;;  %v4769_v20 = vmax.f32 %v4753_v8, 0.0  ;;  %v8638_v8 = vld [vmem:[%s10204_s7 + $0x80] sm:$0xff]   ;;  %v8639_v13 = vld [vmem:[%s10204_s7 + $0x88] sm:$0xff]  }
 0x5dc   :  { %v4752_v2 = vadd.f32 %v9779_v18, %v4704_v14  ;;  %v9840_v61 = vsel %vm1878_vm3, %v9798_v46, %v9833_v15  ;;  %v9844_v19 = vsel %vm1878_vm3, %v9833_v15, %v4837_v60  ;;  %v4767_v0 = vmax.f32 %v4751_v12, 0.0 }
 0x5dd   :  { %v4770_v21 = vmax.f32 %v4754_v17, 0.0  ;;  %7832 = vmatmul.mubr.msk.bf16.gmra.mrb[36].mxu1 %vm4771_vm4, %v9840_v61  ;;  %v5941_v17 = vld [vmem:[#allocation4 + $0x58] sm:$0xf] }
 0x5de   :  { %v4768_v22 = vmax.f32 %v4752_v2, 0.0  ;;  %7835 = vmatprep.mubr.msk.bf16.mxu1 %vm4771_vm4, %v9844_v19  ;;  %v5971_v2 = vrot.slane %v5941_v17, 4 }
 0x5df   :  { %v4791_v18 = vpack.c.bf16 %v4770_v21, %v4769_v20 }
 0x5e0   :  { %v4790_v23 = vpack.c.bf16 %v4768_v22, %v4767_v0  ;;  %v9850_v63 = vld [vmem:[#allocation4 + $0x38] sm:$0xff] }
 0x5e1   :  { %4799 = vst.msk [vmem:[#allocation4 + $0x48] sm:$0xff] %vm4771_vm4, %v4791_v18  ;;  %v9853_v24 = vld [vmem:[#allocation4 + $0x30] sm:$0xff]  ;;  %v4841_v1 = vrot.slane %v9850_v63, 4 }
 0x5e2   :  { %4798 = vst.msk [vmem:[#allocation4 + $0x40] sm:$0xff] %vm4771_vm4, %v4790_v23  ;;  %v4839_v25 = vrot.slane %v9853_v24, 4 }
 0x5e4   :  { %v9859_v4 = vsel %vm1878_vm3, %v4837_v60, %v4839_v25  ;;  %v9862_v26 = vsel %vm1878_vm3, %v4839_v25, %v4841_v1  ;;  %v5778_v60 = vld [vmem:[#allocation4 + $0x50] sm:$0xff] }
 0x5e5   :  { %7836 = vmatmul.mubr.msk.bf16.gmra.mrb[40].mxu1 %vm4771_vm4, %v9859_v4 }
 0x5e6   :  { %7839 = vmatprep.mubr.msk.bf16.mxu1 %vm4771_vm4, %v9862_v26 }
 0x5e8   :  { %v5253_v41 = vld [vmem:[#allocation4 + $0x48] sm:$0xf] }
 0x5e9   :  { %v4813_v27 = vld [vmem:[#allocation4 + $0x40] sm:$0xf]  ;;  %v5283_v42 = vrot.slane %v5253_v41, 4  ;;  %v9962_v54 = vld [vmem:[#allocation4 + $0x48] sm:$0xff] }
 0x5ea   :  { %v4843_v28 = vrot.slane %v4813_v27, 4  ;;  %v9911_v35 = vld [vmem:[#allocation4 + $0x40] sm:$0xff]  ;;  %v5625_v44 = vrot.slane %v9962_v54, 4 }
 0x5eb   :  { %v5281_v57 = vrot.slane %v9911_v35, 4 }
 0x5ec   :  { %v4844_v30 = vsel %vm1878_vm3, %v4841_v1, %v4843_v28 }
 0x5ed   :  { %7840 = vmatmul.mubr.msk.bf16.gmra.mrb[44].mxu1 %vm4771_vm4, %v4844_v30  ;;  %v9936_v39 = vsel %vm1878_vm3, %v4841_v1, %v5281_v57  ;;  %v5284_v47 = vsel %vm1878_vm3, %v5281_v57, %v5283_v42  ;;  %v5626_v3 = vsel %vm1878_vm3, %v5281_v57, %v5625_v44 }
 0x5ee   :  { %7847 = vmatprep.mubr.msk.bf16.mxu1 %vm4771_vm4, %v4800_v29 }
 0x5f5   :  { %7848 = vmatmul.mubr.msk.bf16.vlgmr.msra.gmra.mrb[32].mxu1 %vm4771_vm4, %v9768_v11 }
 0x5f6   :  { %7851 = vmatprep.mubr.msk.bf16.mxu1 %vm4771_vm4, %v9795_v43  ;;  %7864 = vmatpush3.bf16.msra.mxu1 %v8626_v56  ;;  %v5627_v56 = vrot.slane %v5597_v5, 4 }
 0x5f7   :  { %7865 = vmatprep.subr.bf16.mxu1 %v8627_v31 }
 0x5f8   :  { %v5628_v6 = vsel %vm1878_vm3, %v5625_v44, %v5627_v56 }
 0x5fa   :  { %7866 = vmatpush3.bf16.msra.mxu1 %v8627_v31 }
 0x5fb   :  { %7883 = vmatprep.subr.bf16.mxu1 %v8628_v32 }
 0x5fd   :  { %7852 = vmatmul.mubr.msk.bf16.gmra.mrb[36].mxu1 %vm4771_vm4, %v9791_v40 }
 0x5fe   :  { %7855 = vmatprep.mubr.msk.bf16.mxu1 %vm4771_vm4, %v9827_v10 }
 0x605   :  { %7856 = vmatmul.mubr.msk.bf16.gmra.mrb[40].mxu1 %vm4771_vm4, %v9823_v7 }
 0x606   :  { %7859 = vmatprep.mubr.msk.bf16.mxu1 %vm4771_vm4, %v9853_v24 }
 0x60d   :  { %7860 = vmatmul.mubr.msk.bf16.gmra.mrb[44].mxu1 %vm4771_vm4, %v9850_v63 }
 0x60e   :  { %7867 = vmatprep.mubr.msk.bf16.mxu1 %vm4771_vm4, %v9768_v11  ;;  %v5245_v11 = vld [vmem:[#allocation4 + $0x8] sm:$0xf0] }
 0x60f   :  { %v5268_v16 = vrot.slane %v5245_v11, 4 }
 0x611   :  { %v5270_v36 = vsel %vm1878_vm3, %v5268_v16, %v9803_v49  ;;  %v8634_v49 = vld [vmem:[%s10204_s7 + $0x60] sm:$0xff]  }
 0x615   :  { %7868 = vmatmul.mubr.msk.bf16.vlgmr.msra.gmra.mrb[32].mxu1 %vm4771_vm4, %v9795_v43 }
 0x616   :  { %7871 = vmatprep.mubr.msk.bf16.mxu1 %vm4771_vm4, %v9791_v40  ;;  %7884 = vmatpush3.bf16.msra.mxu1 %v8628_v32 }
 0x617   :  { %7885 = vmatprep.subr.bf16.mxu1 %v8629_v33 }
 0x61a   :  { %7886 = vmatpush3.bf16.msra.mxu1 %v8629_v33 }
 0x61b   :  { %7903 = vmatprep.subr.bf16.mxu1 %v8630_v34 }
 0x61d   :  { %7872 = vmatmul.mubr.msk.bf16.gmra.mrb[36].mxu1 %vm4771_vm4, %v9827_v10 }
 0x61e   :  { %7875 = vmatprep.mubr.msk.bf16.mxu1 %vm4771_vm4, %v9823_v7 }
 0x625   :  { %7876 = vmatmul.mubr.msk.bf16.gmra.mrb[40].mxu1 %vm4771_vm4, %v9853_v24 }
 0x626   :  { %7879 = vmatprep.mubr.msk.bf16.mxu1 %vm4771_vm4, %v9850_v63 }
 0x62d   :  { %7880 = vmatmul.mubr.msk.bf16.gmra.mrb[44].mxu1 %vm4771_vm4, %v9911_v35 }
 0x62e   :  { %7887 = vmatprep.mubr.msk.bf16.mxu1 %vm4771_vm4, %v5270_v36 }
 0x635   :  { %7888 = vmatmul.mubr.msk.bf16.vlgmr.msra.gmra.mrb[32].mxu1 %vm4771_vm4, %v9815_v55  ;;  %v8645_v55 = vld [vmem:[#allocation9 + $0x14] ss:$8 sps:$4 sm:$0xff]  }
 0x636   :  { %7891 = vmatprep.mubr.msk.bf16.mxu1 %vm4771_vm4, %v9840_v61  ;;  %7904 = vmatpush3.bf16.msra.mxu1 %v8630_v34 }
 0x637   :  { %7905 = vmatprep.subr.bf16.mxu1 %v8631_v37  ;;  %6386 = vmatprep.subr.bf16.mxu0 %v8645_v55 }
 0x638   :  { %6387 = vmatpush1.bf16.msra.mxu0 %v8643_v50 }
 0x63a   :  { %7906 = vmatpush3.bf16.msra.mxu1 %v8631_v37 }
 0x63b   :  { %7923 = vmatprep.subr.bf16.mxu1 %v8632_v38 }
 0x63d   :  { %7892 = vmatmul.mubr.msk.bf16.gmra.mrb[36].mxu1 %vm4771_vm4, %v9844_v19 }
 0x63e   :  { %7895 = vmatprep.mubr.msk.bf16.mxu1 %vm4771_vm4, %v9859_v4 }
 0x645   :  { %7896 = vmatmul.mubr.msk.bf16.gmra.mrb[40].mxu1 %vm4771_vm4, %v9862_v26 }
 0x646   :  { %7899 = vmatprep.mubr.msk.bf16.mxu1 %vm4771_vm4, %v9936_v39 }
 0x64d   :  { %7900 = vmatmul.mubr.msk.bf16.gmra.mrb[44].mxu1 %vm4771_vm4, %v5284_v47 }
 0x64e   :  { %7907 = vmatprep.mubr.msk.bf16.mxu1 %vm4771_vm4, %v9795_v43  ;;  %v5589_v43 = vld [vmem:[#allocation4 + $0x10] sm:$0xf0] }
 0x64f   :  { %v5612_v53 = vrot.slane %v5589_v43, 4 }
 0x651   :  { %v5614_v52 = vsel %vm1878_vm3, %v5612_v53, %v9798_v46  ;;  %v8636_v46 = vld [vmem:[%s10204_s7 + $0x70] sm:$0xff]  }
 0x655   :  { %7908 = vmatmul.mubr.msk.bf16.vlgmr.msra.gmra.mrb[32].mxu1 %vm4771_vm4, %v9791_v40 }
 0x656   :  { %7911 = vmatprep.mubr.msk.bf16.mxu1 %vm4771_vm4, %v9827_v10  ;;  %7924 = vmatpush3.bf16.msra.mxu1 %v8632_v38 }
 0x657   :  { %7925 = vmatprep.subr.bf16.mxu1 %v8633_v48 }
 0x65a   :  { %7926 = vmatpush3.bf16.msra.mxu1 %v8633_v48 }
 0x65b   :  { %7943 = vmatprep.subr.bf16.mxu1 %v8634_v49 }
 0x65d   :  { %7912 = vmatmul.mubr.msk.bf16.gmra.mrb[36].mxu1 %vm4771_vm4, %v9823_v7 }
 0x65e   :  { %7915 = vmatprep.mubr.msk.bf16.mxu1 %vm4771_vm4, %v9853_v24 }
 0x665   :  { %7916 = vmatmul.mubr.msk.bf16.gmra.mrb[40].mxu1 %vm4771_vm4, %v9850_v63 }
 0x666   :  { %7919 = vmatprep.mubr.msk.bf16.mxu1 %vm4771_vm4, %v9911_v35 }
 0x66d   :  { %7920 = vmatmul.mubr.msk.bf16.gmra.mrb[44].mxu1 %vm4771_vm4, %v9962_v54 }
 0x66e   :  { %7927 = vmatprep.mubr.msk.bf16.mxu1 %vm4771_vm4, %v5614_v52 }
 0x675   :  { %7928 = vmatmul.mubr.msk.bf16.vlgmr.msra.gmra.mrb[32].mxu1 %vm4771_vm4, %v9840_v61 }
 0x676   :  { %7931 = vmatprep.mubr.msk.bf16.mxu1 %vm4771_vm4, %v9844_v19  ;;  %7944 = vmatpush3.bf16.msra.mxu1 %v8634_v49 }
 0x677   :  { %7945 = vmatprep.subr.bf16.mxu1 %v8635_v62 }
 0x67a   :  { %7946 = vmatpush3.bf16.msra.mxu1 %v8635_v62 }
 0x67b   :  { %7963 = vmatprep.subr.bf16.mxu1 %v8636_v46 }
 0x67d   :  { %7932 = vmatmul.mubr.msk.bf16.gmra.mrb[36].mxu1 %vm4771_vm4, %v9859_v4 }
 0x67e   :  { %7935 = vmatprep.mubr.msk.bf16.mxu1 %vm4771_vm4, %v9862_v26 }
 0x685   :  { %7936 = vmatmul.mubr.msk.bf16.gmra.mrb[40].mxu1 %vm4771_vm4, %v9936_v39 }
 0x686   :  { %7939 = vmatprep.mubr.msk.bf16.mxu1 %vm4771_vm4, %v5626_v3 }
 0x68d   :  { %7940 = vmatmul.mubr.msk.bf16.gmra.mrb[44].mxu1 %vm4771_vm4, %v5628_v6 }
 0x68e   :  { %7947 = vmatprep.mubr.msk.bf16.mxu1 %vm4771_vm4, %v9791_v40  ;;  %v5933_v40 = vld [vmem:[#allocation4 + $0x18] sm:$0xf0] }
 0x68f   :  { %v5956_v9 = vrot.slane %v5933_v40, 4 }
 0x691   :  { %v5958_v12 = vsel %vm1878_vm3, %v5956_v9, %v9833_v15  ;;  %v5969_v15 = vrot.slane %v5778_v60, 4 }
 0x693   :  { %v5970_v14 = vsel %vm1878_vm3, %v5625_v44, %v5969_v15  ;;  %v5972_v61 = vsel %vm1878_vm3, %v5969_v15, %v5971_v2  ;;  %v6330_v15 = vlaneseq  ;;  %v6328_v2 = vld [vmem:[%s10207_s10] sm:$0x3] }
 0x695   :  { %7948 = vmatmul.mubr.msk.bf16.vlgmr.msra.gmra.mrb[32].mxu1 %vm4771_vm4, %v9827_v10  ;;  %v6331_v17 = vshrl.u32 %v6330_v15, 7 }
 0x696   :  { %7951 = vmatprep.mubr.msk.bf16.mxu1 %vm4771_vm4, %v9823_v7  ;;  %7964 = vmatpush3.bf16.msra.mxu1 %v8636_v46 }
 0x697   :  { %7965 = vmatprep.subr.bf16.mxu1 %v8637_v45 }
 0x69a   :  { %7966 = vmatpush3.bf16.msra.mxu1 %v8637_v45 }
 0x69b   :  { %7983 = vmatprep.subr.bf16.mxu1 %v8638_v8 }
 0x69d   :  { %7952 = vmatmul.mubr.msk.bf16.gmra.mrb[36].mxu1 %vm4771_vm4, %v9853_v24 }
 0x69e   :  { %7955 = vmatprep.mubr.msk.bf16.mxu1 %vm4771_vm4, %v9850_v63 }
 0x6a5   :  { %7956 = vmatmul.mubr.msk.bf16.gmra.mrb[40].mxu1 %vm4771_vm4, %v9911_v35 }
 0x6a6   :  { %7959 = vmatprep.mubr.msk.bf16.mxu1 %vm4771_vm4, %v9962_v54 }
 0x6ad   :  { %7960 = vmatmul.mubr.msk.bf16.gmra.mrb[44].mxu1 %vm4771_vm4, %v5778_v60 }
 0x6ae   :  { %7967 = vmatprep.mubr.msk.bf16.mxu1 %vm4771_vm4, %v5958_v12 }
 0x6b5   :  { %7968 = vmatmul.mubr.msk.bf16.vlgmr.msra.gmra.mrb[32].mxu1 %vm4771_vm4, %v9844_v19  ;;  %v6122_v19 = vld [vmem:[#allocation4 + $0x58] sm:$0xff] }
 0x6b6   :  { %7971 = vmatprep.mubr.msk.bf16.mxu1 %vm4771_vm4, %v9859_v4  ;;  %7984 = vmatpush3.bf16.msra.mxu1 %v8638_v8 }
 0x6b7   :  { %7985 = vmatprep.subr.bf16.mxu1 %v8639_v13 }
 0x6ba   :  { %7986 = vmatpush3.bf16.msra.mxu1 %v8639_v13 }
 0x6bd   :  { %7972 = vmatmul.mubr.msk.bf16.gmra.mrb[36].mxu1 %vm4771_vm4, %v9862_v26 }
 0x6be   :  { %7975 = vmatprep.mubr.msk.bf16.mxu1 %vm4771_vm4, %v9936_v39 }
 0x6c5   :  { %7976 = vmatmul.mubr.msk.bf16.gmra.mrb[40].mxu1 %vm4771_vm4, %v5626_v3 }
 0x6c6   :  { %7979 = vmatprep.mubr.msk.bf16.mxu1 %vm4771_vm4, %v5970_v14  ;;  %v6332_v14 = vsub.s32 0, %v6331_v17 }
 0x6cd   :  { %7980 = vmatmul.mubr.msk.bf16.gmra.mrb[44].mxu1 %vm4771_vm4, %v5972_v61  ;;  %v6336_v61 = vsub.s32 1, %v6331_v17 }
 0x6ce   :  { %7987 = vmatprep.mubr.msk.bf16.mxu1 %vm4771_vm4, %v9827_v10 }
 0x6d5   :  { %7988 = vmatmul.mubr.msk.bf16.vlgmr.msra.gmra.mrb[32].mxu1 %vm4771_vm4, %v9823_v7  ;;  %v6975_v7 = vld [vmem:[%s10205_s8] ss:$0 sm:$0xff] }
 0x6d6   :  { %7991 = vmatprep.mubr.msk.bf16.mxu1 %vm4771_vm4, %v9853_v24 }
 0x6dd   :  { %7992 = vmatmul.mubr.msk.bf16.gmra.mrb[36].mxu1 %vm4771_vm4, %v9850_v63 }
 0x6de   :  { %7995 = vmatprep.mubr.msk.bf16.mxu1 %vm4771_vm4, %v9911_v35 }
 0x6e5   :  { %7996 = vmatmul.mubr.msk.bf16.gmra.mrb[40].mxu1 %vm4771_vm4, %v9962_v54 }
 0x6e6   :  { %7999 = vmatprep.mubr.msk.bf16.mxu1 %vm4771_vm4, %v5778_v60 }
 0x6ed   :  { %8000 = vmatmul.mubr.msk.bf16.gmra.mrb[44].mxu1 %vm4771_vm4, %v6122_v19  ;;  %v10065_v19 = vrot.slane %v6328_v2, %v6332_v14 }
 0x7a8   :  { %v7989_v10 = vpop.f32.mrb[32].mxu1 }
 0x7a9   :  { %v6286_v20 = vadd.f32 %v7989_v10, %v6975_v7  ;;  %v6198_v21 = vpop.f32.mrb[33].mxu1 }
 0x7aa   :  { %v6284_v0 = vadd.f32 %v6975_v7, %v6198_v21  ;;  %v7990_v22 = vpop.f32.mrb[34].mxu1 }
 0x7ab   :  { %v6287_v18 = vadd.f32 %v7990_v22, %v6975_v7  ;;  %v6201_v23 = vpop.f32.mrb[35].mxu1  ;;  %v6302_v24 = vmax.f32 %v6286_v20, 0.0 }
 0x7ac   :  { %v6285_v63 = vadd.f32 %v6975_v7, %v6201_v23  ;;  %v6300_v25 = vmax.f32 %v6284_v0, 0.0 }
 0x7ad   :  { %v6303_v1 = vmax.f32 %v6287_v18, 0.0 }
 0x7ae   :  { %v6301_v4 = vmax.f32 %v6285_v63, 0.0 }
 0x7af   :  { %v6317_v26 = vpack.c.bf16 %v6303_v1, %v6302_v24 }
 0x7b0   :  { %v6316_v27 = vpack.c.bf16 %v6301_v4, %v6300_v25  ;;  %v7993_v28 = vpop.f32.mrb[36].mxu1 }
 0x7b1   :  { %v6290_v29 = vadd.f32 %v7993_v28, %v6975_v7  ;;  %v6214_v30 = vpop.f32.mrb[37].mxu1 }
 0x7b2   :  { %v6288_v31 = vadd.f32 %v6975_v7, %v6214_v30  ;;  %v7994_v32 = vpop.f32.mrb[38].mxu1  ;;  %6980 = vmatmul.mubr.msk.bf16.vlgmr.msra.gmra.mrb[32].mxu0 %vm4771_vm4, %v6316_v27 }
 0x7b3   :  { %v6291_v33 = vadd.f32 %v7994_v32, %v6975_v7  ;;  %v6217_v34 = vpop.f32.mrb[39].mxu1  ;;  %6426 = vmatprep.mubr.bf16.mxu0 %v8723_v51  ;;  %v6306_v16 = vmax.f32 %v6290_v29, 0.0 }
 0x7b4   :  { %v6289_v11 = vadd.f32 %v6975_v7, %v6217_v34  ;;  %v6304_v36 = vmax.f32 %v6288_v31, 0.0 }
 0x7b5   :  { %v6307_v35 = vmax.f32 %v6291_v33, 0.0 }
 0x7b6   :  { %v6305_v37 = vmax.f32 %v6289_v11, 0.0 }
 0x7b7   :  { %v6319_v38 = vpack.c.bf16 %v6307_v35, %v6306_v16 }
 0x7b8   :  { %v6318_v57 = vpack.c.bf16 %v6305_v37, %v6304_v36  ;;  %v7997_v39 = vpop.f32.mrb[40].mxu1 }
 0x7b9   :  { %v6294_v41 = vadd.f32 %v7997_v39, %v6975_v7  ;;  %v6230_v42 = vpop.f32.mrb[41].mxu1 }
 0x7ba   :  { %v6292_v47 = vadd.f32 %v6975_v7, %v6230_v42  ;;  %v7998_v48 = vpop.f32.mrb[42].mxu1  ;;  %6981 = vmatmul.mubr.msk.bf16.gmra.mrb[36].mxu0 %vm4771_vm4, %v6317_v26 }
 0x7bb   :  { %v6295_v49 = vadd.f32 %v7998_v48, %v6975_v7  ;;  %v6233_v43 = vpop.f32.mrb[43].mxu1  ;;  %6436 = vmatprep.mubr.bf16.mxu0 %v8723_v51  ;;  %v6310_v54 = vmax.f32 %v6294_v41, 0.0 }
 0x7bc   :  { %v6293_v53 = vadd.f32 %v6975_v7, %v6233_v43  ;;  %v6308_v58 = vmax.f32 %v6292_v47, 0.0 }
 0x7bd   :  { %v6311_v52 = vmax.f32 %v6295_v49, 0.0 }
 0x7be   :  { %v6309_v59 = vmax.f32 %v6293_v53, 0.0 }
 0x7bf   :  { %v6321_v55 = vpack.c.bf16 %v6311_v52, %v6310_v54 }
 0x7c0   :  { %v6320_v50 = vpack.c.bf16 %v6309_v59, %v6308_v58  ;;  %v8001_v62 = vpop.f32.mrb[44].mxu1 }
 0x7c1   :  { %v6298_v46 = vadd.f32 %v8001_v62, %v6975_v7  ;;  %v6246_v44 = vpop.f32.mrb[45].mxu1 }
 0x7c2   :  { %v6296_v3 = vadd.f32 %v6975_v7, %v6246_v44  ;;  %v8002_v5 = vpop.f32.mrb[46].mxu1  ;;  %6982 = vmatmul.mubr.msk.bf16.gmra.mrb[40].mxu0 %vm4771_vm4, %v6318_v57 }
 0x7c3   :  { %v6299_v56 = vadd.f32 %v8002_v5, %v6975_v7  ;;  %v6249_v6 = vpop.f32.mrb[47].mxu1  ;;  %6446 = vmatprep.mubr.bf16.mxu0 %v8723_v51  ;;  %v6314_v8 = vmax.f32 %v6298_v46, 0.0 }
 0x7c4   :  { %v6297_v45 = vadd.f32 %v6975_v7, %v6249_v6  ;;  %v6312_v9 = vmax.f32 %v6296_v3, 0.0  ;;  %v10067_v7 = vrot.slane %v6328_v2, %v6336_v61 }
 0x7c5   :  { %v6315_v40 = vmax.f32 %v6299_v56, 0.0 }
 0x7c6   :  { %v6313_v60 = vmax.f32 %v6297_v45, 0.0 }
 0x7c7   :  { %v6323_v12 = vpack.c.bf16 %v6315_v40, %v6314_v8 }
 0x7c8   :  { %v6322_v13 = vpack.c.bf16 %v6313_v60, %v6312_v9 }
 0x7ca   :  { %6983 = vmatmul.mubr.msk.bf16.gmra.mrb[44].mxu0 %vm4771_vm4, %v6319_v38 }
 0x7cb   :  { %6456 = vmatprep.mubr.bf16.mxu0 %v8723_v51 }
 0x7d2   :  { %6984 = vmatmul.mubr.msk.bf16.gmra.mrb[48].mxu0 %vm4771_vm4, %v6320_v50 }
 0x7d3   :  { %6466 = vmatprep.mubr.bf16.mxu0 %v8723_v51 }
 0x7da   :  { %6985 = vmatmul.mubr.msk.bf16.gmra.mrb[52].mxu0 %vm4771_vm4, %v6321_v55 }
 0x7db   :  { %6476 = vmatprep.mubr.bf16.mxu0 %v8723_v51 }
 0x7e2   :  { %6986 = vmatmul.mubr.msk.bf16.gmra.mrb[56].mxu0 %vm4771_vm4, %v6322_v13 }
 0x7e3   :  { %6486 = vmatprep.mubr.bf16.mxu0 %v8723_v51 }
 0x7ea   :  { %6987 = vmatmul.mubr.msk.bf16.gmra.mrb[60].mxu0 %vm4771_vm4, %v6323_v12 }
 0x885   :  { %v6418_v10 = vpop.f32.mrb[32].mxu0 }
 0x886   :  { %v6419_v20 = vadd.f32 %v6418_v10, %v10065_v19  ;;  %v6420_v21 = vpop.f32.mrb[33].mxu0 }
 0x887   :  { %v6421_v51 = vadd.f32 %v6420_v21, %v10067_v7  ;;  %v6422_v0 = vpop.f32.mrb[34].mxu0 }
 0x888   :  { %6497 = vst [vmem:[%s10208_s11] sm:$0xff] %v6419_v20  ;;  %v6423_v22 = vadd.f32 %v6422_v0, %v10065_v19  ;;  %v6424_v18 = vpop.f32.mrb[35].mxu0 }
 0x889   :  { %6988 = vst [vmem:[%s10208_s11 + $0x80] sm:$0xff] %v6421_v51  ;;  %v6425_v23 = vadd.f32 %v6424_v18, %v10067_v7 }
 0x88a   :  { %6498 = vst [vmem:[%s10208_s11 + $0x8] sm:$0xff] %v6423_v22 }
 0x88b   :  { %6989 = vst [vmem:[%s10208_s11 + $0x88] sm:$0xff] %v6425_v23 }
 0x88d   :  { %v6428_v63 = vpop.f32.mrb[36].mxu0 }
 0x88e   :  { %v6429_v24 = vadd.f32 %v6428_v63, %v10065_v19  ;;  %v6430_v1 = vpop.f32.mrb[37].mxu0 }
 0x88f   :  { %v6431_v25 = vadd.f32 %v6430_v1, %v10067_v7  ;;  %v6432_v4 = vpop.f32.mrb[38].mxu0 }
 0x890   :  { %6499 = vst [vmem:[%s10208_s11 + $0x10] sm:$0xff] %v6429_v24  ;;  %v6433_v26 = vadd.f32 %v6432_v4, %v10065_v19  ;;  %v6434_v27 = vpop.f32.mrb[39].mxu0 }
 0x891   :  { %6990 = vst [vmem:[%s10208_s11 + $0x90] sm:$0xff] %v6431_v25  ;;  %v6435_v28 = vadd.f32 %v6434_v27, %v10067_v7 }
 0x892   :  { %6500 = vst [vmem:[%s10208_s11 + $0x18] sm:$0xff] %v6433_v26 }
 0x893   :  { %6991 = vst [vmem:[%s10208_s11 + $0x98] sm:$0xff] %v6435_v28 }
 0x895   :  { %v6438_v29 = vpop.f32.mrb[40].mxu0 }
 0x896   :  { %v6439_v30 = vadd.f32 %v6438_v29, %v10065_v19  ;;  %v6440_v31 = vpop.f32.mrb[41].mxu0 }
 0x897   :  { %v6441_v32 = vadd.f32 %v6440_v31, %v10067_v7  ;;  %v6442_v33 = vpop.f32.mrb[42].mxu0 }
 0x898   :  { %6501 = vst [vmem:[%s10208_s11 + $0x20] sm:$0xff] %v6439_v30  ;;  %v6443_v34 = vadd.f32 %v6442_v33, %v10065_v19  ;;  %v6444_v11 = vpop.f32.mrb[43].mxu0 }
 0x899   :  { %6992 = vst [vmem:[%s10208_s11 + $0xa0] sm:$0xff] %v6441_v32  ;;  %v6445_v16 = vadd.f32 %v6444_v11, %v10067_v7 }
 0x89a   :  { %6502 = vst [vmem:[%s10208_s11 + $0x28] sm:$0xff] %v6443_v34 }
 0x89b   :  { %6993 = vst [vmem:[%s10208_s11 + $0xa8] sm:$0xff] %v6445_v16 }
 0x89d   :  { %v6448_v35 = vpop.f32.mrb[44].mxu0 }
 0x89e   :  { %v6449_v36 = vadd.f32 %v6448_v35, %v10065_v19  ;;  %v6450_v37 = vpop.f32.mrb[45].mxu0 }
 0x89f   :  { %v6451_v38 = vadd.f32 %v6450_v37, %v10067_v7  ;;  %v6452_v57 = vpop.f32.mrb[46].mxu0 }
 0x8a0   :  { %6503 = vst [vmem:[%s10208_s11 + $0x30] sm:$0xff] %v6449_v36  ;;  %v6453_v39 = vadd.f32 %v6452_v57, %v10065_v19  ;;  %v6454_v41 = vpop.f32.mrb[47].mxu0 }
 0x8a1   :  { %6994 = vst [vmem:[%s10208_s11 + $0xb0] sm:$0xff] %v6451_v38  ;;  %v6455_v42 = vadd.f32 %v6454_v41, %v10067_v7 }
 0x8a2   :  { %6504 = vst [vmem:[%s10208_s11 + $0x38] sm:$0xff] %v6453_v39 }
 0x8a3   :  { %6995 = vst [vmem:[%s10208_s11 + $0xb8] sm:$0xff] %v6455_v42 }
 0x8a5   :  { %v6458_v47 = vpop.f32.mrb[48].mxu0 }
 0x8a6   :  { %v6459_v48 = vadd.f32 %v6458_v47, %v10065_v19  ;;  %v6460_v49 = vpop.f32.mrb[49].mxu0 }
 0x8a7   :  { %v6461_v43 = vadd.f32 %v6460_v49, %v10067_v7  ;;  %v6462_v53 = vpop.f32.mrb[50].mxu0 }
 0x8a8   :  { %6505 = vst [vmem:[%s10208_s11 + $0x40] sm:$0xff] %v6459_v48  ;;  %v6463_v54 = vadd.f32 %v6462_v53, %v10065_v19  ;;  %v6464_v52 = vpop.f32.mrb[51].mxu0 }
 0x8a9   :  { %6996 = vst [vmem:[%s10208_s11 + $0xc0] sm:$0xff] %v6461_v43  ;;  %v6465_v58 = vadd.f32 %v6464_v52, %v10067_v7 }
 0x8aa   :  { %6506 = vst [vmem:[%s10208_s11 + $0x48] sm:$0xff] %v6463_v54 }
 0x8ab   :  { %6997 = vst [vmem:[%s10208_s11 + $0xc8] sm:$0xff] %v6465_v58 }
 0x8ad   :  { %v6468_v59 = vpop.f32.mrb[52].mxu0 }
 0x8ae   :  { %v6469_v55 = vadd.f32 %v6468_v59, %v10065_v19  ;;  %v6470_v50 = vpop.f32.mrb[53].mxu0 }
 0x8af   :  { %v6471_v62 = vadd.f32 %v6470_v50, %v10067_v7  ;;  %v6472_v46 = vpop.f32.mrb[54].mxu0 }
 0x8b0   :  { %6507 = vst [vmem:[%s10208_s11 + $0x50] sm:$0xff] %v6469_v55  ;;  %v6473_v44 = vadd.f32 %v6472_v46, %v10065_v19  ;;  %v6474_v3 = vpop.f32.mrb[55].mxu0 }
 0x8b1   :  { %6998 = vst [vmem:[%s10208_s11 + $0xd0] sm:$0xff] %v6471_v62  ;;  %v6475_v5 = vadd.f32 %v6474_v3, %v10067_v7 }
 0x8b2   :  { %6508 = vst [vmem:[%s10208_s11 + $0x58] sm:$0xff] %v6473_v44 }
 0x8b3   :  { %6999 = vst [vmem:[%s10208_s11 + $0xd8] sm:$0xff] %v6475_v5 }
 0x8b5   :  { %v6478_v56 = vpop.f32.mrb[56].mxu0 }
 0x8b6   :  { %v6479_v6 = vadd.f32 %v6478_v56, %v10065_v19  ;;  %v6480_v45 = vpop.f32.mrb[57].mxu0 }
 0x8b7   :  { %v6481_v8 = vadd.f32 %v6480_v45, %v10067_v7  ;;  %v6482_v40 = vpop.f32.mrb[58].mxu0 }
 0x8b8   :  { %6509 = vst [vmem:[%s10208_s11 + $0x60] sm:$0xff] %v6479_v6  ;;  %v6483_v9 = vadd.f32 %v6482_v40, %v10065_v19  ;;  %v6484_v60 = vpop.f32.mrb[59].mxu0 }
 0x8b9   :  { %7000 = vst [vmem:[%s10208_s11 + $0xe0] sm:$0xff] %v6481_v8  ;;  %v6485_v12 = vadd.f32 %v6484_v60, %v10067_v7 }
 0x8ba   :  { %6510 = vst [vmem:[%s10208_s11 + $0x68] sm:$0xff] %v6483_v9 }
 0x8bb   :  { %7001 = vst [vmem:[%s10208_s11 + $0xe8] sm:$0xff] %v6485_v12 }
 0x8bd   :  { %v6488_v13 = vpop.f32.mrb[60].mxu0 }
 0x8be   :  { %v6489_v15 = vadd.f32 %v6488_v13, %v10065_v19  ;;  %v6490_v17 = vpop.f32.mrb[61].mxu0 }
 0x8bf   :  { %v6491_v14 = vadd.f32 %v6490_v17, %v10067_v7  ;;  %v6492_v2 = vpop.f32.mrb[62].mxu0 }
 0x8c0   :  { %6511 = vst [vmem:[%s10208_s11 + $0x70] sm:$0xff] %v6489_v15  ;;  %v6493_v61 = vadd.f32 %v6492_v2, %v10065_v19  ;;  %v6494_v10 = vpop.f32.mrb[63].mxu0 }
 0x8c1   :  { %7002 = vst [vmem:[%s10208_s11 + $0xf0] sm:$0xff] %v6491_v14  ;;  %v6495_v20 = vadd.f32 %v6494_v10, %v10067_v7 }
 0x8c2   :  { %6512 = vst [vmem:[%s10208_s11 + $0x78] sm:$0xff] %v6493_v61 }
 0x8c3   :  { %7003 = vst [vmem:[%s10208_s11 + $0xf8] sm:$0xff] %v6495_v20 }
 0x8c4   :  { %6534 = vsyncpa [#allocation6], 1 }
 0x8c5   :  { %6535 = vsyncpa [#allocation8], 1 }

</bundles_post_ra>
